<compile_context>
chip_gen: v7x
topology: tpu7x:2x2x1
jax: 0.10.0
libtpu: 0.0.40
codegen_flags: <defaults>
</compile_context>

<pallas_src>
import functools

import jax
import jax.numpy as jnp
from jax import lax
from jax.experimental import pallas as pl
from jax.experimental.pallas import tpu as pltpu


_COMPILER_PARAMS = pltpu.CompilerParams(
    dimension_semantics=("parallel",),          # batch axis -> both TCs on v7x
    vmem_limit_bytes=48 * 1024 * 1024,          # safe on v5e/v6e (128 MiB) and v7x (64 MiB)
)


# ----------------------------------------------------------------------------
# Pallas kernels
# ----------------------------------------------------------------------------
def _max4_kernel(a_ref, b_ref, c_ref, d_ref, o_ref):
    o_ref[...] = jnp.maximum(jnp.maximum(a_ref[...], b_ref[...]),
                             jnp.maximum(c_ref[...], d_ref[...]))


def _gn_silu_kernel(x_ref, m_ref, p_ref, g_ref, b_ref, o_ref, *, count, eps):
    # x_ref block: (1, P, C) flat-padded sample; m_ref: (P, 1) validity mask.
    x = x_ref[0]                                           # (P, C) f32
    valid = m_ref[...] > 0.5                               # (P, 1) bool
    xm = jnp.where(valid, x, 0.0)
    s = jnp.sum(xm, axis=0, keepdims=True)                 # (1, C) per-channel sums
    mean = jnp.dot(s, p_ref[...], preferred_element_type=jnp.float32) / count
    xc = jnp.where(valid, x - mean, 0.0)                   # centered pass (stable variance)
    sq = jnp.sum(xc * xc, axis=0, keepdims=True)
    var = jnp.dot(sq, p_ref[...], preferred_element_type=jnp.float32) / count
    inv = lax.rsqrt(var + eps)
    y = (x - mean) * inv * g_ref[...] + b_ref[...]
    y = y * jax.nn.sigmoid(y)                              # SiLU
    o_ref[0] = jnp.where(valid, y, 0.0)                    # keep padded border exactly 0


# ----------------------------------------------------------------------------
# 3x3 conv on the flat-padded layout: 9 shifted bf16 matmuls, f32 accumulation.
# Optionally fuses: 1x1 nin_shortcut, identity residual add, time-MLP add.
# ----------------------------------------------------------------------------
def conv3x3_flat(h_flat, w9, bias, Hv, Wv, *,
                 shortcut=None, residual=None, time_proj=None):
    N, P, Cin = h_flat.shape
    Cout = w9.shape[-1]
    Wp = Wv + 2
    off = Wp + 1                       # flat index of the first valid pixel
    M = Hv * Wp - 2                    # rows from first to last valid pixel
    assert P == (Hv + 2) * Wp

    has_short = shortcut is not None
    has_res = residual is not None
    has_time = time_proj is not None

    inputs = [h_flat, w9, bias.reshape(1, Cout).astype(jnp.float32)]
    in_specs = [
        pl.BlockSpec((1, P, Cin), lambda n: (n, 0, 0)),
        pl.BlockSpec((9, Cin, Cout), lambda n: (0, 0, 0)),   # weights resident
        pl.BlockSpec((1, Cout), lambda n: (0, 0)),
    ]
    if has_short:
        xs, ws = shortcut
        Cs = xs.shape[-1]
        inputs += [xs, ws]
        in_specs += [pl.BlockSpec((1, P, Cs), lambda n: (n, 0, 0)),
                     pl.BlockSpec((Cs, Cout), lambda n: (0, 0))]
    if has_res:
        inputs += [residual]
        in_specs += [pl.BlockSpec((1, P, Cout), lambda n: (n, 0, 0))]
    if has_time:
        t3, wt = time_proj
        T = t3.shape[-1]
        inputs += [t3, wt]
        in_specs += [pl.BlockSpec((1, 1, T), lambda n: (n, 0, 0)),
                     pl.BlockSpec((T, Cout), lambda n: (0, 0))]

    def kernel(*refs):
        x_ref, w_ref, b_ref = refs[0], refs[1], refs[2]
        o_ref = refs[-1]
        k = 3
        acc = jnp.zeros((M, Cout), jnp.float32)
        # 9 shifted taps; each LHS is a contiguous row window -> no im2col.
        for tap in range(9):
            di, dj = tap // 3, tap % 3
            s = (di - 1) * Wp + (dj - 1)
            lhs = x_ref[0, off + s: off + s + M, :].astype(jnp.bfloat16)
            acc = acc + jnp.dot(lhs, w_ref[tap],
                                preferred_element_type=jnp.float32)
        if has_short:                               # fused 1x1 nin_shortcut
            xs_ref, ws_ref = refs[k], refs[k + 1]
            k += 2
            lhs = xs_ref[0, off: off + M, :].astype(jnp.bfloat16)
            acc = acc + jnp.dot(lhs, ws_ref[...],
                                preferred_element_type=jnp.float32)
        if has_res:                                 # fused identity shortcut
            r_ref = refs[k]
            k += 1
            acc = acc + r_ref[0, off: off + M, :]
        if has_time:                                # fused time_mlp projection
            t_ref, wt_ref = refs[k], refs[k + 1]
            k += 2
            tv = t_ref[0]                           # (1, T)
            tv = (tv * jax.nn.sigmoid(tv)).astype(jnp.bfloat16)
            acc = acc + jnp.dot(tv, wt_ref[...],
                                preferred_element_type=jnp.float32)
        acc = acc + b_ref[...]
        edge = jnp.zeros((off, Cout), o_ref.dtype)
        o_ref[0, :off, :] = edge
        o_ref[0, off: off + M, :] = acc.astype(o_ref.dtype)
        o_ref[0, off + M:, :] = edge

    return pl.pallas_call(
        kernel,
        out_shape=jax.ShapeDtypeStruct((N, P, Cout), jnp.float32),
        grid=(N,),
        in_specs=in_specs,
        out_specs=pl.BlockSpec((1, P, Cout), lambda n: (n, 0, 0)),
        compiler_params=_COMPILER_PARAMS,
    )(*inputs)


# ----------------------------------------------------------------------------
# Wrappers (layout plumbing)
# ----------------------------------------------------------------------------
def maxpool2x2(x_nhwc):
    N, H, W, C = x_nhwc.shape
    h, w = H // 2, W // 2
    x_nhwc = x_nhwc[:, :2 * h, :2 * w, :]          # floor behaviour of MaxPool2d(2)
    a = x_nhwc[:, 0::2, 0::2, :]
    b = x_nhwc[:, 0::2, 1::2, :]
    c = x_nhwc[:, 1::2, 0::2, :]
    d = x_nhwc[:, 1::2, 1::2, :]
    spec = pl.BlockSpec((1, h, w, C), lambda n: (n, 0, 0, 0))
    return pl.pallas_call(
        _max4_kernel,
        out_shape=jax.ShapeDtypeStruct((N, h, w, C), x_nhwc.dtype),
        grid=(N,),
        in_specs=[spec, spec, spec, spec],
        out_specs=spec,
        compiler_params=_COMPILER_PARAMS,
    )(a, b, c, d)


def group_norm_silu_flat(x_flat, mask, gamma, beta, n_valid,
                         num_groups=32, eps=1e-6):
    N, P, C = x_flat.shape
    Cg = C // num_groups
    groups = jnp.arange(C) // Cg
    grp_mat = (groups[:, None] == groups[None, :]).astype(jnp.float32)   # (C, C)
    g2 = gamma.reshape(1, C).astype(jnp.float32)
    b2 = beta.reshape(1, C).astype(jnp.float32)
    kernel = functools.partial(_gn_silu_kernel,
                               count=float(n_valid * Cg), eps=eps)
    return pl.pallas_call(
        kernel,
        out_shape=jax.ShapeDtypeStruct((N, P, C), jnp.float32),
        grid=(N,),
        in_specs=[
            pl.BlockSpec((1, P, C), lambda n: (n, 0, 0)),
            pl.BlockSpec((P, 1), lambda n: (0, 0)),
            pl.BlockSpec((C, C), lambda n: (0, 0)),
            pl.BlockSpec((1, C), lambda n: (0, 0)),
            pl.BlockSpec((1, C), lambda n: (0, 0)),
        ],
        out_specs=pl.BlockSpec((1, P, C), lambda n: (n, 0, 0)),
        compiler_params=_COMPILER_PARAMS,
    )(x_flat, mask, grp_mat, g2, b2)


def _prep_w3x3(w_oihw):
    co, ci = w_oihw.shape[0], w_oihw.shape[1]
    return jnp.transpose(w_oihw, (2, 3, 1, 0)).reshape(9, ci, co).astype(jnp.bfloat16)


def _prep_w1x1(w_oihw):
    co, ci = w_oihw.shape[0], w_oihw.shape[1]
    return w_oihw.reshape(co, ci).T.astype(jnp.bfloat16)


def _to_flat_padded(x_nhwc):
    N, H, W, C = x_nhwc.shape
    xp = jnp.pad(x_nhwc, ((0, 0), (1, 1), (1, 1), (0, 0)))
    return xp.reshape(N, (H + 2) * (W + 2), C)


def _valid_mask(Hv, Wv):
    Wp = Wv + 2
    P = (Hv + 2) * Wp
    idx = jnp.arange(P)
    hh, ww = idx // Wp, idx % Wp
    valid = (hh >= 1) & (hh <= Hv) & (ww >= 1) & (ww <= Wv)
    return valid.astype(jnp.float32).reshape(P, 1)


def residual_block_flat(x_flat, mask, Hv, Wv, p, *, time_fuse=None):
    cin = x_flat.shape[-1]
    cout = p["conv1_w"].shape[0]
    n_valid = Hv * Wv

    h = group_norm_silu_flat(x_flat, mask, p["norm1_w"], p["norm1_b"], n_valid)
    h = conv3x3_flat(h, _prep_w3x3(p["conv1_w"]), p["conv1_b"], Hv, Wv)
    h = group_norm_silu_flat(h, mask, p["norm2_w"], p["norm2_b"], n_valid)
    # TODO(synk): dropout treated as identity (inference / eval mode).

    bias = p["conv2_b"]
    shortcut = residual = None
    if cin != cout:
        shortcut = (x_flat, _prep_w1x1(p["nin_w"]))      # fused 1x1 nin_shortcut
        bias = bias + p["nin_b"]
    else:
        residual = x_flat                                # fused identity shortcut
    time_proj = None
    if time_fuse is not None:
        t3, wt, tb = time_fuse
        time_proj = (t3, wt)
        bias = bias + tb                                 # fused time bias
    return conv3x3_flat(h, _prep_w3x3(p["conv2_w"]), bias, Hv, Wv,
                        shortcut=shortcut, residual=residual,
                        time_proj=time_proj)


def down_block_forward(x_nchw, time_emb, params):
    x = jnp.transpose(x_nchw, (0, 2, 3, 1)).astype(jnp.float32)   # NCHW -> NHWC
    N, H, W, _ = x.shape
    if H > 1 and W > 1:                     # mirror the PyTorch forward's gate
        x = maxpool2x2(x)
    N, Hv, Wv, _ = x.shape

    x_flat = _to_flat_padded(x)             # (N, (Hv+2)*(Wv+2), Cin), zero borders
    mask = _valid_mask(Hv, Wv)

    time_fuse = None
    if time_emb is not None:
        cout = params["time_w"].shape[0]
        t3 = time_emb.reshape(N, 1, -1).astype(jnp.float32)
        wt = params["time_w"].reshape(cout, -1).T.astype(jnp.bfloat16)
        time_fuse = (t3, wt, params["time_b"])

    x_flat = residual_block_flat(x_flat, mask, Hv, Wv, params["res1"],
                                 time_fuse=time_fuse)
    x_flat = residual_block_flat(x_flat, mask, Hv, Wv, params["res2"])
    # attn: nn.Identity (use_attention=False path) -> no-op

    cout = x_flat.shape[-1]
    out = x_flat.reshape(N, Hv + 2, Wv + 2, cout)[:, 1:Hv + 1, 1:Wv + 1, :]
    return jnp.transpose(out, (0, 3, 1, 2))              # back to NCHW


# ----------------------------------------------------------------------------
# Deterministic parameter init (shapes from the PyTorch __init__)
# ----------------------------------------------------------------------------
def init_params(key, cin, cout, tdim):
    keys = jax.random.split(key, 12)

    def conv_w(k, co, ci, kh, kw):
        fan_in = ci * kh * kw
        return jax.random.normal(k, (co, ci, kh, kw), jnp.float32) / jnp.sqrt(fan_in)

    def conv_b(k, co):
        return 0.01 * jax.random.normal(k, (co,), jnp.float32)

    res1 = dict(
        norm1_w=jnp.ones((cin,), jnp.float32), norm1_b=jnp.zeros((cin,), jnp.float32),
        conv1_w=conv_w(keys[0], cout, cin, 3, 3), conv1_b=conv_b(keys[1], cout),
        norm2_w=jnp.ones((cout,), jnp.float32), norm2_b=jnp.zeros((cout,), jnp.float32),
        conv2_w=conv_w(keys[2], cout, cout, 3, 3), conv2_b=conv_b(keys[3], cout),
        nin_w=conv_w(keys[4], cout, cin, 1, 1), nin_b=conv_b(keys[5], cout),
    )
    res2 = dict(
        norm1_w=jnp.ones((cout,), jnp.float32), norm1_b=jnp.zeros((cout,), jnp.float32),
        conv1_w=conv_w(keys[6], cout, cout, 3, 3), conv1_b=conv_b(keys[7], cout),
        norm2_w=jnp.ones((cout,), jnp.float32), norm2_b=jnp.zeros((cout,), jnp.float32),
        conv2_w=conv_w(keys[8], cout, cout, 3, 3), conv2_b=conv_b(keys[9], cout),
    )
    return dict(res1=res1, res2=res2,
                time_w=conv_w(keys[10], cout, tdim, 1, 1),
                time_b=conv_b(keys[11], cout))


def quantize_like_kernel(params):
    """bf16-round the matmul weights exactly as the Pallas kernels do."""
    q = lambda w: w.astype(jnp.bfloat16).astype(jnp.float32)
    out = {}
    for blk in ("res1", "res2"):
        d = dict(params[blk])
        for k in ("conv1_w", "conv2_w", "nin_w"):
            if k in d:
                d[k] = q(d[k])
        out[blk] = d
    out["time_w"] = q(params["time_w"])
    out["time_b"] = params["time_b"]
    return out


# ----------------------------------------------------------------------------
# Pure-JAX reference (numerical sanity check)
# ----------------------------------------------------------------------------
def _ref_gn_silu(x, gamma, beta, G=32, eps=1e-6):
    N, H, W, C = x.shape
    xg = x.reshape(N, H * W, G, C // G)
    mean = xg.mean(axis=(1, 3), keepdims=True)
    var = xg.var(axis=(1, 3), keepdims=True)
    y = (xg - mean) / jnp.sqrt(var + eps)
    y = y.reshape(N, H, W, C) * gamma + beta
    return y * jax.nn.sigmoid(y)


def _ref_conv(x, w_oihw, b):
    y = lax.conv_general_dilated(
        x, w_oihw, window_strides=(1, 1), padding="SAME",
        dimension_numbers=("NHWC", "OIHW", "NHWC"),
        precision=lax.Precision.HIGHEST)
    return y + b


def _ref_resblock(x, p):
    cin, cout = x.shape[-1], p["conv1_w"].shape[0]
    h = _ref_gn_silu(x, p["norm1_w"], p["norm1_b"])
    h = _ref_conv(h, p["conv1_w"], p["conv1_b"])
    h = _ref_gn_silu(h, p["norm2_w"], p["norm2_b"])
    h = _ref_conv(h, p["conv2_w"], p["conv2_b"])
    if cin != cout:
        x = _ref_conv(x, p["nin_w"], p["nin_b"])
    return x + h


def ref_down_block(x_nchw, time_emb, params):
    x = jnp.transpose(x_nchw, (0, 2, 3, 1)).astype(jnp.float32)
    x = lax.reduce_window(x, -jnp.inf, lax.max, (1, 2, 2, 1), (1, 2, 2, 1), "VALID")
    x = _ref_resblock(x, params["res1"])
    t = time_emb[:, :, 0, 0]
    t = t * jax.nn.sigmoid(t)
    cout = params["time_w"].shape[0]
    proj = t @ params["time_w"].reshape(cout, -1).T + params["time_b"]
    x = x + proj[:, None, None, :]
    x = _ref_resblock(x, params["res2"])
    return jnp.transpose(x, (0, 3, 1, 2))


# ----------------------------------------------------------------------------
if __name__ == "__main__":
    key = jax.random.PRNGKey(0)
    k_x, k_t, k_p = jax.random.split(key, 3)

    N, Cin, H, W = 2, 32, 16, 16          # GroupNorm(32) => channels multiple of 32
    Cout, Tdim = 64, 16

    x = jax.random.normal(k_x, (N, Cin, H, W), jnp.float32)        # NCHW input
    time_emb = jax.random.normal(k_t, (N, Tdim, 1, 1), jnp.float32)
    params = init_params(k_p, Cin, Cout, Tdim)

    fwd = jax.jit(down_block_forward)
    out = jax.block_until_ready(fwd(x, time_emb, params))

    assert out.shape == (N, Cout, H // 2, W // 2), out.shape
    assert bool(jnp.all(jnp.isfinite(out)))

    # Reference uses the same bf16-rounded weights, so the comparison isolates
    # activation rounding / layout differences only.
    ref = ref_down_block(x, time_emb, quantize_like_kernel(params))
    err = float(jnp.max(jnp.abs(out - ref)))
    assert bool(jnp.allclose(out, ref, atol=5e-2, rtol=5e-2)), err

    print("KERNEL_OK")
</pallas_src>

<mosaic_0001>
module attributes {stable_mosaic.version = 11 : i64} {
  func.func @_max4_kernel(%arg0: i32, %arg1: memref<1x8x8x32xf32, #tpu.memory_space<vmem>>, %arg2: memref<1x8x8x32xf32, #tpu.memory_space<vmem>>, %arg3: memref<1x8x8x32xf32, #tpu.memory_space<vmem>>, %arg4: memref<1x8x8x32xf32, #tpu.memory_space<vmem>>, %arg5: memref<1x8x8x32xf32, #tpu.memory_space<vmem>>) attributes {dimension_semantics = [#tpu.dimension_semantics<parallel>], iteration_bounds = array<i64: 2>, scalar_prefetch = 0 : i64, scratch_operands = 0 : i64, tpu.core_type = #tpu.core_type<tc>, window_params = [{transform_indices = @transform_0, window_bounds = array<i64: 1, 8, 8, 32>}, {transform_indices = @transform_1, window_bounds = array<i64: 1, 8, 8, 32>}, {transform_indices = @transform_2, window_bounds = array<i64: 1, 8, 8, 32>}, {transform_indices = @transform_3, window_bounds = array<i64: 1, 8, 8, 32>}, {transform_indices = @transform_4, window_bounds = array<i64: 1, 8, 8, 32>}]} {
    %c0 = arith.constant 0 : index
    %c0_0 = arith.constant 0 : index
    %c0_1 = arith.constant 0 : index
    %c0_2 = arith.constant 0 : index
    %0 = vector.load %arg1[%c0, %c0_0, %c0_1, %c0_2] : memref<1x8x8x32xf32, #tpu.memory_space<vmem>>, vector<1x8x8x32xf32>
    %c0_3 = arith.constant 0 : index
    %c0_4 = arith.constant 0 : index
    %c0_5 = arith.constant 0 : index
    %c0_6 = arith.constant 0 : index
    %1 = vector.load %arg2[%c0_3, %c0_4, %c0_5, %c0_6] : memref<1x8x8x32xf32, #tpu.memory_space<vmem>>, vector<1x8x8x32xf32>
    %2 = arith.maximumf %0, %1 : vector<1x8x8x32xf32>
    %c0_7 = arith.constant 0 : index
    %c0_8 = arith.constant 0 : index
    %c0_9 = arith.constant 0 : index
    %c0_10 = arith.constant 0 : index
    %3 = vector.load %arg3[%c0_7, %c0_8, %c0_9, %c0_10] : memref<1x8x8x32xf32, #tpu.memory_space<vmem>>, vector<1x8x8x32xf32>
    %c0_11 = arith.constant 0 : index
    %c0_12 = arith.constant 0 : index
    %c0_13 = arith.constant 0 : index
    %c0_14 = arith.constant 0 : index
    %4 = vector.load %arg4[%c0_11, %c0_12, %c0_13, %c0_14] : memref<1x8x8x32xf32, #tpu.memory_space<vmem>>, vector<1x8x8x32xf32>
    %5 = arith.maximumf %3, %4 : vector<1x8x8x32xf32>
    %6 = arith.maximumf %2, %5 : vector<1x8x8x32xf32>
    %c0_15 = arith.constant 0 : index
    %c0_16 = arith.constant 0 : index
    %c0_17 = arith.constant 0 : index
    %c0_18 = arith.constant 0 : index
    %7 = vector.load %arg5[%c0_15, %c0_16, %c0_17, %c0_18] : memref<1x8x8x32xf32, #tpu.memory_space<vmem>>, vector<1x8x8x32xf32>
    tpu.vector_store %arg5[%c0_15, %c0_16, %c0_17, %c0_18], %6 {strides = array<i32>} : memref<1x8x8x32xf32, #tpu.memory_space<vmem>>, vector<1x8x8x32xf32>,
    return
  }
  func.func @transform_0(%arg0: i32) -> (i32, i32, i32, i32) {
    %c0_i32 = arith.constant 0 : i32
    %c0_i32_0 = arith.constant 0 : i32
    %c0_i32_1 = arith.constant 0 : i32
    %c0_i32_2 = arith.constant 0 : i32
    return %arg0, %c0_i32, %c0_i32_0, %c0_i32_1 : i32, i32, i32, i32
  }
  func.func @transform_1(%arg0: i32) -> (i32, i32, i32, i32) {
    %c0_i32 = arith.constant 0 : i32
    %c0_i32_0 = arith.constant 0 : i32
    %c0_i32_1 = arith.constant 0 : i32
    %c0_i32_2 = arith.constant 0 : i32
    return %arg0, %c0_i32, %c0_i32_0, %c0_i32_1 : i32, i32, i32, i32
  }
  func.func @transform_2(%arg0: i32) -> (i32, i32, i32, i32) {
    %c0_i32 = arith.constant 0 : i32
    %c0_i32_0 = arith.constant 0 : i32
    %c0_i32_1 = arith.constant 0 : i32
    %c0_i32_2 = arith.constant 0 : i32
    return %arg0, %c0_i32, %c0_i32_0, %c0_i32_1 : i32, i32, i32, i32
  }
  func.func @transform_3(%arg0: i32) -> (i32, i32, i32, i32) {
    %c0_i32 = arith.constant 0 : i32
    %c0_i32_0 = arith.constant 0 : i32
    %c0_i32_1 = arith.constant 0 : i32
    %c0_i32_2 = arith.constant 0 : i32
    return %arg0, %c0_i32, %c0_i32_0, %c0_i32_1 : i32, i32, i32, i32
  }
  func.func @transform_4(%arg0: i32) -> (i32, i32, i32, i32) {
    %c0_i32 = arith.constant 0 : i32
    %c0_i32_0 = arith.constant 0 : i32
    %c0_i32_1 = arith.constant 0 : i32
    %c0_i32_2 = arith.constant 0 : i32
    return %arg0, %c0_i32, %c0_i32_0, %c0_i32_1 : i32, i32, i32, i32
  }
}

module attributes {stable_mosaic.version = 11 : i64} {
  func.func @_gn_silu_kernel(%arg0: i32, %arg1: memref<1x100x32xf32, #tpu.memory_space<vmem>>, %arg2: memref<100x1xf32, #tpu.memory_space<vmem>>, %arg3: memref<32x32xf32, #tpu.memory_space<vmem>>, %arg4: memref<1x32xf32, #tpu.memory_space<vmem>>, %arg5: memref<1x32xf32, #tpu.memory_space<vmem>>, %arg6: memref<1x100x32xf32, #tpu.memory_space<vmem>>) attributes {dimension_semantics = [#tpu.dimension_semantics<parallel>], iteration_bounds = array<i64: 2>, scalar_prefetch = 0 : i64, scratch_operands = 0 : i64, tpu.core_type = #tpu.core_type<tc>, window_params = [{transform_indices = @transform_0, window_bounds = array<i64: 1, 100, 32>}, {pipeline_mode = #tpu.pipeline_mode<synchronous>, transform_indices = @transform_1, window_bounds = array<i64: 100, 1>}, {pipeline_mode = #tpu.pipeline_mode<synchronous>, transform_indices = @transform_2, window_bounds = array<i64: 32, 32>}, {pipeline_mode = #tpu.pipeline_mode<synchronous>, transform_indices = @transform_3, window_bounds = array<i64: 1, 32>}, {pipeline_mode = #tpu.pipeline_mode<synchronous>, transform_indices = @transform_4, window_bounds = array<i64: 1, 32>}, {transform_indices = @transform_5, window_bounds = array<i64: 1, 100, 32>}]} {
    %c0 = arith.constant 0 : index
    %c0_0 = arith.constant 0 : index
    %c0_1 = arith.constant 0 : index
    %0 = vector.load %arg1[%c0, %c0_0, %c0_1] : memref<1x100x32xf32, #tpu.memory_space<vmem>>, vector<1x100x32xf32>
    %1 = vector.shape_cast %0 : vector<1x100x32xf32> to vector<100x32xf32>
    %c0_2 = arith.constant 0 : index
    %c0_3 = arith.constant 0 : index
    %2 = vector.load %arg2[%c0_2, %c0_3] : memref<100x1xf32, #tpu.memory_space<vmem>>, vector<100x1xf32>
    %cst = arith.constant 5.000000e-01 : f32
    %3 = vector.broadcast %cst : f32 to vector<100x1xf32>
    %4 = arith.cmpf ogt, %2, %3 : vector<100x1xf32>
    %cst_4 = arith.constant 0.000000e+00 : f32
    %5 = vector.shape_cast %4 : vector<100x1xi1> to vector<100x1xi1>
    %6 = vector.broadcast %5 : vector<100x1xi1> to vector<100x32xi1>
    %7 = vector.broadcast %cst_4 : f32 to vector<100x32xf32>
    %8 = arith.select %6, %1, %7 : vector<100x32xi1>, vector<100x32xf32>
    %cst_5 = arith.constant dense<0.000000e+00> : vector<32xf32>
    %9 = vector.multi_reduction <add>, %8, %cst_5 [0] : vector<100x32xf32> to vector<32xf32>
    %10 = vector.shape_cast %9 : vector<32xf32> to vector<1x32xf32>
    %c0_6 = arith.constant 0 : index
    %c0_7 = arith.constant 0 : index
    %11 = vector.load %arg3[%c0_6, %c0_7] : memref<32x32xf32, #tpu.memory_space<vmem>>, vector<32x32xf32>
    %cst_8 = arith.constant dense<0.000000e+00> : vector<1x32xf32>
    %12 = tpu.matmul %10, %11, %cst_8 {dimension_numbers = #tpu.dot_dimension_numbers<[1], [0], [0], [1], [0, 0, 1, 1], [], []>} : vector<1x32xf32>, vector<32x32xf32>, vector<1x32xf32> -> vector<1x32xf32>
    %cst_9 = arith.constant 6.400000e+01 : f32
    %13 = vector.broadcast %cst_9 : f32 to vector<1x32xf32>
    %14 = arith.divf %12, %13 : vector<1x32xf32>
    %15 = vector.broadcast %14 : vector<1x32xf32> to vector<100x32xf32>
    %16 = arith.subf %1, %15 : vector<100x32xf32>
    %cst_10 = arith.constant 0.000000e+00 : f32
    %17 = vector.shape_cast %4 : vector<100x1xi1> to vector<100x1xi1>
    %18 = vector.broadcast %17 : vector<100x1xi1> to vector<100x32xi1>
    %19 = vector.broadcast %cst_10 : f32 to vector<100x32xf32>
    %20 = arith.select %18, %16, %19 : vector<100x32xi1>, vector<100x32xf32>
    %21 = arith.mulf %20, %20 : vector<100x32xf32>
    %cst_11 = arith.constant dense<0.000000e+00> : vector<32xf32>
    %22 = vector.multi_reduction <add>, %21, %cst_11 [0] : vector<100x32xf32> to vector<32xf32>
    %23 = vector.shape_cast %22 : vector<32xf32> to vector<1x32xf32>
    %c0_12 = arith.constant 0 : index
    %c0_13 = arith.constant 0 : index
    %24 = vector.load %arg3[%c0_12, %c0_13] : memref<32x32xf32, #tpu.memory_space<vmem>>, vector<32x32xf32>
    %cst_14 = arith.constant dense<0.000000e+00> : vector<1x32xf32>
    %25 = tpu.matmul %23, %24, %cst_14 {dimension_numbers = #tpu.dot_dimension_numbers<[1], [0], [0], [1], [0, 0, 1, 1], [], []>} : vector<1x32xf32>, vector<32x32xf32>, vector<1x32xf32> -> vector<1x32xf32>
    %cst_15 = arith.constant 6.400000e+01 : f32
    %26 = vector.broadcast %cst_15 : f32 to vector<1x32xf32>
    %27 = arith.divf %25, %26 : vector<1x32xf32>
    %cst_16 = arith.constant 9.99999997E-7 : f32
    %28 = vector.broadcast %cst_16 : f32 to vector<1x32xf32>
    %29 = arith.addf %27, %28 : vector<1x32xf32>
    %30 = math.rsqrt %29 : vector<1x32xf32>
    %31 = vector.broadcast %14 : vector<1x32xf32> to vector<100x32xf32>
    %32 = arith.subf %1, %31 : vector<100x32xf32>
    %33 = vector.broadcast %30 : vector<1x32xf32> to vector<100x32xf32>
    %34 = arith.mulf %32, %33 : vector<100x32xf32>
    %c0_17 = arith.constant 0 : index
    %c0_18 = arith.constant 0 : index
    %35 = vector.load %arg4[%c0_17, %c0_18] : memref<1x32xf32, #tpu.memory_space<vmem>>, vector<1x32xf32>
    %36 = vector.broadcast %35 : vector<1x32xf32> to vector<100x32xf32>
    %37 = arith.mulf %34, %36 : vector<100x32xf32>
    %c0_19 = arith.constant 0 : index
    %c0_20 = arith.constant 0 : index
    %38 = vector.load %arg5[%c0_19, %c0_20] : memref<1x32xf32, #tpu.memory_space<vmem>>, vector<1x32xf32>
    %39 = vector.broadcast %38 : vector<1x32xf32> to vector<100x32xf32>
    %40 = arith.addf %37, %39 : vector<100x32xf32>
    %41 = arith.negf %40 : vector<100x32xf32>
    %42 = math.exp %41 : vector<100x32xf32>
    %cst_21 = arith.constant 1.000000e+00 : f32
    %43 = vector.broadcast %cst_21 : f32 to vector<100x32xf32>
    %44 = arith.addf %43, %42 : vector<100x32xf32>
    %45 = arith.divf %43, %44 : vector<100x32xf32>
    %46 = arith.mulf %40, %45 : vector<100x32xf32>
    %cst_22 = arith.constant 0.000000e+00 : f32
    %47 = vector.shape_cast %4 : vector<100x1xi1> to vector<100x1xi1>
    %48 = vector.broadcast %47 : vector<100x1xi1> to vector<100x32xi1>
    %49 = vector.broadcast %cst_22 : f32 to vector<100x32xf32>
    %50 = arith.select %48, %46, %49 : vector<100x32xi1>, vector<100x32xf32>
    %c0_23 = arith.constant 0 : index
    %c0_24 = arith.constant 0 : index
    %c0_25 = arith.constant 0 : index
    %51 = vector.load %arg6[%c0_23, %c0_24, %c0_25] : memref<1x100x32xf32, #tpu.memory_space<vmem>>, vector<1x100x32xf32>
    %52 = vector.shape_cast %51 : vector<1x100x32xf32> to vector<100x32xf32>
    %53 = vector.shape_cast %50 : vector<100x32xf32> to vector<1x100x32xf32>
    tpu.vector_store %arg6[%c0_23, %c0_24, %c0_25], %53 {strides = array<i32>} : memref<1x100x32xf32, #tpu.memory_space<vmem>>, vector<1x100x32xf32>,
    return
  }
  func.func @transform_0(%arg0: i32) -> (i32, i32, i32) {
    %c0_i32 = arith.constant 0 : i32
    %c0_i32_0 = arith.constant 0 : i32
    %c0_i32_1 = arith.constant 0 : i32
    return %arg0, %c0_i32, %c0_i32_0 : i32, i32, i32
  }
  func.func @transform_1(%arg0: i32) -> (i32, i32) {
    %c0_i32 = arith.constant 0 : i32
    %c0_i32_0 = arith.constant 0 : i32
    %c0_i32_1 = arith.constant 0 : i32
    return %c0_i32, %c0_i32_0 : i32, i32
  }
  func.func @transform_2(%arg0: i32) -> (i32, i32) {
    %c0_i32 = arith.constant 0 : i32
    %c0_i32_0 = arith.constant 0 : i32
    %c0_i32_1 = arith.constant 0 : i32
    return %c0_i32, %c0_i32_0 : i32, i32
  }
  func.func @transform_3(%arg0: i32) -> (i32, i32) {
    %c0_i32 = arith.constant 0 : i32
    %c0_i32_0 = arith.constant 0 : i32
    %c0_i32_1 = arith.constant 0 : i32
    return %c0_i32, %c0_i32_0 : i32, i32
  }
  func.func @transform_4(%arg0: i32) -> (i32, i32) {
    %c0_i32 = arith.constant 0 : i32
    %c0_i32_0 = arith.constant 0 : i32
    %c0_i32_1 = arith.constant 0 : i32
    return %c0_i32, %c0_i32_0 : i32, i32
  }
  func.func @transform_5(%arg0: i32) -> (i32, i32, i32) {
    %c0_i32 = arith.constant 0 : i32
    %c0_i32_0 = arith.constant 0 : i32
    %c0_i32_1 = arith.constant 0 : i32
    return %arg0, %c0_i32, %c0_i32_0 : i32, i32, i32
  }
}

module attributes {stable_mosaic.version = 11 : i64} {
  func.func @kernel(%arg0: i32, %arg1: memref<1x100x32xf32, #tpu.memory_space<vmem>>, %arg2: memref<9x32x64xbf16, #tpu.memory_space<vmem>>, %arg3: memref<1x64xf32, #tpu.memory_space<vmem>>, %arg4: memref<1x100x64xf32, #tpu.memory_space<vmem>>) attributes {dimension_semantics = [#tpu.dimension_semantics<parallel>], iteration_bounds = array<i64: 2>, scalar_prefetch = 0 : i64, scratch_operands = 0 : i64, tpu.core_type = #tpu.core_type<tc>, window_params = [{transform_indices = @transform_0, window_bounds = array<i64: 1, 100, 32>}, {pipeline_mode = #tpu.pipeline_mode<synchronous>, transform_indices = @transform_1, window_bounds = array<i64: 9, 32, 64>}, {pipeline_mode = #tpu.pipeline_mode<synchronous>, transform_indices = @transform_2, window_bounds = array<i64: 1, 64>}, {transform_indices = @transform_3, window_bounds = array<i64: 1, 100, 64>}]} {
    %cst = arith.constant 0.000000e+00 : f32
    %0 = vector.broadcast %cst : f32 to vector<78x64xf32>
    %c0 = arith.constant 0 : index
    %c0_0 = arith.constant 0 : index
    %c0_1 = arith.constant 0 : index
    %1 = vector.load %arg1[%c0, %c0_0, %c0_1] : memref<1x100x32xf32, #tpu.memory_space<vmem>>, vector<1x78x32xf32>
    %2 = vector.shape_cast %1 : vector<1x78x32xf32> to vector<78x32xf32>
    %3 = arith.truncf %2 : vector<78x32xf32> to vector<78x32xbf16>
    %c0_2 = arith.constant 0 : index
    %c0_3 = arith.constant 0 : index
    %c0_4 = arith.constant 0 : index
    %4 = vector.load %arg2[%c0_2, %c0_3, %c0_4] : memref<9x32x64xbf16, #tpu.memory_space<vmem>>, vector<1x32x64xbf16>
    %5 = vector.shape_cast %4 : vector<1x32x64xbf16> to vector<32x64xbf16>
    %cst_5 = arith.constant dense<0.000000e+00> : vector<78x64xf32>
    %6 = tpu.matmul %3, %5, %cst_5 {dimension_numbers = #tpu.dot_dimension_numbers<[1], [0], [0], [1], [0, 0, 1, 1], [], []>} : vector<78x32xbf16>, vector<32x64xbf16>, vector<78x64xf32> -> vector<78x64xf32>
    %7 = arith.addf %0, %6 : vector<78x64xf32>
    %c0_6 = arith.constant 0 : index
    %c1 = arith.constant 1 : index
    %c0_7 = arith.constant 0 : index
    %8 = vector.load %arg1[%c0_6, %c1, %c0_7] : memref<1x100x32xf32, #tpu.memory_space<vmem>>, vector<1x78x32xf32>
    %9 = vector.shape_cast %8 : vector<1x78x32xf32> to vector<78x32xf32>
    %10 = arith.truncf %9 : vector<78x32xf32> to vector<78x32xbf16>
    %c1_8 = arith.constant 1 : index
    %c0_9 = arith.constant 0 : index
    %c0_10 = arith.constant 0 : index
    %11 = vector.load %arg2[%c1_8, %c0_9, %c0_10] : memref<9x32x64xbf16, #tpu.memory_space<vmem>>, vector<1x32x64xbf16>
    %12 = vector.shape_cast %11 : vector<1x32x64xbf16> to vector<32x64xbf16>
    %cst_11 = arith.constant dense<0.000000e+00> : vector<78x64xf32>
    %13 = tpu.matmul %10, %12, %cst_11 {dimension_numbers = #tpu.dot_dimension_numbers<[1], [0], [0], [1], [0, 0, 1, 1], [], []>} : vector<78x32xbf16>, vector<32x64xbf16>, vector<78x64xf32> -> vector<78x64xf32>
    %14 = arith.addf %7, %13 : vector<78x64xf32>
    %c0_12 = arith.constant 0 : index
    %c2 = arith.constant 2 : index
    %c0_13 = arith.constant 0 : index
    %15 = vector.load %arg1[%c0_12, %c2, %c0_13] : memref<1x100x32xf32, #tpu.memory_space<vmem>>, vector<1x78x32xf32>
    %16 = vector.shape_cast %15 : vector<1x78x32xf32> to vector<78x32xf32>
    %17 = arith.truncf %16 : vector<78x32xf32> to vector<78x32xbf16>
    %c2_14 = arith.constant 2 : index
    %c0_15 = arith.constant 0 : index
    %c0_16 = arith.constant 0 : index
    %18 = vector.load %arg2[%c2_14, %c0_15, %c0_16] : memref<9x32x64xbf16, #tpu.memory_space<vmem>>, vector<1x32x64xbf16>
    %19 = vector.shape_cast %18 : vector<1x32x64xbf16> to vector<32x64xbf16>
    %cst_17 = arith.constant dense<0.000000e+00> : vector<78x64xf32>
    %20 = tpu.matmul %17, %19, %cst_17 {dimension_numbers = #tpu.dot_dimension_numbers<[1], [0], [0], [1], [0, 0, 1, 1], [], []>} : vector<78x32xbf16>, vector<32x64xbf16>, vector<78x64xf32> -> vector<78x64xf32>
    %21 = arith.addf %14, %20 : vector<78x64xf32>
    %c0_18 = arith.constant 0 : index
    %c10 = arith.constant 10 : index
    %c0_19 = arith.constant 0 : index
    %22 = vector.load %arg1[%c0_18, %c10, %c0_19] : memref<1x100x32xf32, #tpu.memory_space<vmem>>, vector<1x78x32xf32>
    %23 = vector.shape_cast %22 : vector<1x78x32xf32> to vector<78x32xf32>
    %24 = arith.truncf %23 : vector<78x32xf32> to vector<78x32xbf16>
    %c3 = arith.constant 3 : index
    %c0_20 = arith.constant 0 : index
    %c0_21 = arith.constant 0 : index
    %25 = vector.load %arg2[%c3, %c0_20, %c0_21] : memref<9x32x64xbf16, #tpu.memory_space<vmem>>, vector<1x32x64xbf16>
    %26 = vector.shape_cast %25 : vector<1x32x64xbf16> to vector<32x64xbf16>
    %cst_22 = arith.constant dense<0.000000e+00> : vector<78x64xf32>
    %27 = tpu.matmul %24, %26, %cst_22 {dimension_numbers = #tpu.dot_dimension_numbers<[1], [0], [0], [1], [0, 0, 1, 1], [], []>} : vector<78x32xbf16>, vector<32x64xbf16>, vector<78x64xf32> -> vector<78x64xf32>
    %28 = arith.addf %21, %27 : vector<78x64xf32>
    %c0_23 = arith.constant 0 : index
    %c11 = arith.constant 11 : index
    %c0_24 = arith.constant 0 : index
    %29 = vector.load %arg1[%c0_23, %c11, %c0_24] : memref<1x100x32xf32, #tpu.memory_space<vmem>>, vector<1x78x32xf32>
    %30 = vector.shape_cast %29 : vector<1x78x32xf32> to vector<78x32xf32>
    %31 = arith.truncf %30 : vector<78x32xf32> to vector<78x32xbf16>
    %c4 = arith.constant 4 : index
    %c0_25 = arith.constant 0 : index
    %c0_26 = arith.constant 0 : index
    %32 = vector.load %arg2[%c4, %c0_25, %c0_26] : memref<9x32x64xbf16, #tpu.memory_space<vmem>>, vector<1x32x64xbf16>
    %33 = vector.shape_cast %32 : vector<1x32x64xbf16> to vector<32x64xbf16>
    %cst_27 = arith.constant dense<0.000000e+00> : vector<78x64xf32>
    %34 = tpu.matmul %31, %33, %cst_27 {dimension_numbers = #tpu.dot_dimension_numbers<[1], [0], [0], [1], [0, 0, 1, 1], [], []>} : vector<78x32xbf16>, vector<32x64xbf16>, vector<78x64xf32> -> vector<78x64xf32>
    %35 = arith.addf %28, %34 : vector<78x64xf32>
    %c0_28 = arith.constant 0 : index
    %c12 = arith.constant 12 : index
    %c0_29 = arith.constant 0 : index
    %36 = vector.load %arg1[%c0_28, %c12, %c0_29] : memref<1x100x32xf32, #tpu.memory_space<vmem>>, vector<1x78x32xf32>
    %37 = vector.shape_cast %36 : vector<1x78x32xf32> to vector<78x32xf32>
    %38 = arith.truncf %37 : vector<78x32xf32> to vector<78x32xbf16>
    %c5 = arith.constant 5 : index
    %c0_30 = arith.constant 0 : index
    %c0_31 = arith.constant 0 : index
    %39 = vector.load %arg2[%c5, %c0_30, %c0_31] : memref<9x32x64xbf16, #tpu.memory_space<vmem>>, vector<1x32x64xbf16>
    %40 = vector.shape_cast %39 : vector<1x32x64xbf16> to vector<32x64xbf16>
    %cst_32 = arith.constant dense<0.000000e+00> : vector<78x64xf32>
    %41 = tpu.matmul %38, %40, %cst_32 {dimension_numbers = #tpu.dot_dimension_numbers<[1], [0], [0], [1], [0, 0, 1, 1], [], []>} : vector<78x32xbf16>, vector<32x64xbf16>, vector<78x64xf32> -> vector<78x64xf32>
    %42 = arith.addf %35, %41 : vector<78x64xf32>
    %c0_33 = arith.constant 0 : index
    %c20 = arith.constant 20 : index
    %c0_34 = arith.constant 0 : index
    %43 = vector.load %arg1[%c0_33, %c20, %c0_34] : memref<1x100x32xf32, #tpu.memory_space<vmem>>, vector<1x78x32xf32>
    %44 = vector.shape_cast %43 : vector<1x78x32xf32> to vector<78x32xf32>
    %45 = arith.truncf %44 : vector<78x32xf32> to vector<78x32xbf16>
    %c6 = arith.constant 6 : index
    %c0_35 = arith.constant 0 : index
    %c0_36 = arith.constant 0 : index
    %46 = vector.load %arg2[%c6, %c0_35, %c0_36] : memref<9x32x64xbf16, #tpu.memory_space<vmem>>, vector<1x32x64xbf16>
    %47 = vector.shape_cast %46 : vector<1x32x64xbf16> to vector<32x64xbf16>
    %cst_37 = arith.constant dense<0.000000e+00> : vector<78x64xf32>
    %48 = tpu.matmul %45, %47, %cst_37 {dimension_numbers = #tpu.dot_dimension_numbers<[1], [0], [0], [1], [0, 0, 1, 1], [], []>} : vector<78x32xbf16>, vector<32x64xbf16>, vector<78x64xf32> -> vector<78x64xf32>
    %49 = arith.addf %42, %48 : vector<78x64xf32>
    %c0_38 = arith.constant 0 : index
    %c21 = arith.constant 21 : index
    %c0_39 = arith.constant 0 : index
    %50 = vector.load %arg1[%c0_38, %c21, %c0_39] : memref<1x100x32xf32, #tpu.memory_space<vmem>>, vector<1x78x32xf32>
    %51 = vector.shape_cast %50 : vector<1x78x32xf32> to vector<78x32xf32>
    %52 = arith.truncf %51 : vector<78x32xf32> to vector<78x32xbf16>
    %c7 = arith.constant 7 : index
    %c0_40 = arith.constant 0 : index
    %c0_41 = arith.constant 0 : index
    %53 = vector.load %arg2[%c7, %c0_40, %c0_41] : memref<9x32x64xbf16, #tpu.memory_space<vmem>>, vector<1x32x64xbf16>
    %54 = vector.shape_cast %53 : vector<1x32x64xbf16> to vector<32x64xbf16>
    %cst_42 = arith.constant dense<0.000000e+00> : vector<78x64xf32>
    %55 = tpu.matmul %52, %54, %cst_42 {dimension_numbers = #tpu.dot_dimension_numbers<[1], [0], [0], [1], [0, 0, 1, 1], [], []>} : vector<78x32xbf16>, vector<32x64xbf16>, vector<78x64xf32> -> vector<78x64xf32>
    %56 = arith.addf %49, %55 : vector<78x64xf32>
    %c0_43 = arith.constant 0 : index
    %c22 = arith.constant 22 : index
    %c0_44 = arith.constant 0 : index
    %57 = vector.load %arg1[%c0_43, %c22, %c0_44] : memref<1x100x32xf32, #tpu.memory_space<vmem>>, vector<1x78x32xf32>
    %58 = vector.shape_cast %57 : vector<1x78x32xf32> to vector<78x32xf32>
    %59 = arith.truncf %58 : vector<78x32xf32> to vector<78x32xbf16>
    %c8 = arith.constant 8 : index
    %c0_45 = arith.constant 0 : index
    %c0_46 = arith.constant 0 : index
    %60 = vector.load %arg2[%c8, %c0_45, %c0_46] : memref<9x32x64xbf16, #tpu.memory_space<vmem>>, vector<1x32x64xbf16>
    %61 = vector.shape_cast %60 : vector<1x32x64xbf16> to vector<32x64xbf16>
    %cst_47 = arith.constant dense<0.000000e+00> : vector<78x64xf32>
    %62 = tpu.matmul %59, %61, %cst_47 {dimension_numbers = #tpu.dot_dimension_numbers<[1], [0], [0], [1], [0, 0, 1, 1], [], []>} : vector<78x32xbf16>, vector<32x64xbf16>, vector<78x64xf32> -> vector<78x64xf32>
    %63 = arith.addf %56, %62 : vector<78x64xf32>
    %c0_48 = arith.constant 0 : index
    %c0_49 = arith.constant 0 : index
    %64 = vector.load %arg3[%c0_48, %c0_49] : memref<1x64xf32, #tpu.memory_space<vmem>>, vector<1x64xf32>
    %65 = vector.broadcast %64 : vector<1x64xf32> to vector<78x64xf32>
    %66 = arith.addf %63, %65 : vector<78x64xf32>
    %cst_50 = arith.constant 0.000000e+00 : f32
    %67 = vector.broadcast %cst_50 : f32 to vector<11x64xf32>
    %c0_51 = arith.constant 0 : index
    %c0_52 = arith.constant 0 : index
    %c0_53 = arith.constant 0 : index
    %68 = vector.load %arg4[%c0_51, %c0_52, %c0_53] : memref<1x100x64xf32, #tpu.memory_space<vmem>>, vector<1x11x64xf32>
    %69 = vector.shape_cast %68 : vector<1x11x64xf32> to vector<11x64xf32>
    %70 = vector.shape_cast %67 : vector<11x64xf32> to vector<1x11x64xf32>
    tpu.vector_store %arg4[%c0_51, %c0_52, %c0_53], %70 {strides = array<i32>} : memref<1x100x64xf32, #tpu.memory_space<vmem>>, vector<1x11x64xf32>,
    %c0_54 = arith.constant 0 : index
    %c11_55 = arith.constant 11 : index
    %c0_56 = arith.constant 0 : index
    %71 = vector.load %arg4[%c0_54, %c11_55, %c0_56] : memref<1x100x64xf32, #tpu.memory_space<vmem>>, vector<1x78x64xf32>
    %72 = vector.shape_cast %71 : vector<1x78x64xf32> to vector<78x64xf32>
    %73 = vector.shape_cast %66 : vector<78x64xf32> to vector<1x78x64xf32>
    tpu.vector_store %arg4[%c0_54, %c11_55, %c0_56], %73 {strides = array<i32>} : memref<1x100x64xf32, #tpu.memory_space<vmem>>, vector<1x78x64xf32>,
    %c0_57 = arith.constant 0 : index
    %c89 = arith.constant 89 : index
    %c0_58 = arith.constant 0 : index
    %74 = vector.load %arg4[%c0_57, %c89, %c0_58] : memref<1x100x64xf32, #tpu.memory_space<vmem>>, vector<1x11x64xf32>
    %75 = vector.shape_cast %74 : vector<1x11x64xf32> to vector<11x64xf32>
    %76 = vector.shape_cast %67 : vector<11x64xf32> to vector<1x11x64xf32>
    tpu.vector_store %arg4[%c0_57, %c89, %c0_58], %76 {strides = array<i32>} : memref<1x100x64xf32, #tpu.memory_space<vmem>>, vector<1x11x64xf32>,
    return
  }
  func.func @transform_0(%arg0: i32) -> (i32, i32, i32) {
    %c0_i32 = arith.constant 0 : i32
    %c0_i32_0 = arith.constant 0 : i32
    %c0_i32_1 = arith.constant 0 : i32
    return %arg0, %c0_i32, %c0_i32_0 : i32, i32, i32
  }
  func.func @transform_1(%arg0: i32) -> (i32, i32, i32) {
    %c0_i32 = arith.constant 0 : i32
    %c0_i32_0 = arith.constant 0 : i32
    %c0_i32_1 = arith.constant 0 : i32
    %c0_i32_2 = arith.constant 0 : i32
    return %c0_i32, %c0_i32_0, %c0_i32_1 : i32, i32, i32
  }
  func.func @transform_2(%arg0: i32) -> (i32, i32) {
    %c0_i32 = arith.constant 0 : i32
    %c0_i32_0 = arith.constant 0 : i32
    %c0_i32_1 = arith.constant 0 : i32
    return %c0_i32, %c0_i32_0 : i32, i32
  }
  func.func @transform_3(%arg0: i32) -> (i32, i32, i32) {
    %c0_i32 = arith.constant 0 : i32
    %c0_i32_0 = arith.constant 0 : i32
    %c0_i32_1 = arith.constant 0 : i32
    return %arg0, %c0_i32, %c0_i32_0 : i32, i32, i32
  }
}

module attributes {stable_mosaic.version = 11 : i64} {
  func.func @_gn_silu_kernel(%arg0: i32, %arg1: memref<1x100x64xf32, #tpu.memory_space<vmem>>, %arg2: memref<100x1xf32, #tpu.memory_space<vmem>>, %arg3: memref<64x64xf32, #tpu.memory_space<vmem>>, %arg4: memref<1x64xf32, #tpu.memory_space<vmem>>, %arg5: memref<1x64xf32, #tpu.memory_space<vmem>>, %arg6: memref<1x100x64xf32, #tpu.memory_space<vmem>>) attributes {dimension_semantics = [#tpu.dimension_semantics<parallel>], iteration_bounds = array<i64: 2>, scalar_prefetch = 0 : i64, scratch_operands = 0 : i64, tpu.core_type = #tpu.core_type<tc>, window_params = [{transform_indices = @transform_0, window_bounds = array<i64: 1, 100, 64>}, {pipeline_mode = #tpu.pipeline_mode<synchronous>, transform_indices = @transform_1, window_bounds = array<i64: 100, 1>}, {pipeline_mode = #tpu.pipeline_mode<synchronous>, transform_indices = @transform_2, window_bounds = array<i64: 64, 64>}, {pipeline_mode = #tpu.pipeline_mode<synchronous>, transform_indices = @transform_3, window_bounds = array<i64: 1, 64>}, {pipeline_mode = #tpu.pipeline_mode<synchronous>, transform_indices = @transform_4, window_bounds = array<i64: 1, 64>}, {transform_indices = @transform_5, window_bounds = array<i64: 1, 100, 64>}]} {
    %c0 = arith.constant 0 : index
    %c0_0 = arith.constant 0 : index
    %c0_1 = arith.constant 0 : index
    %0 = vector.load %arg1[%c0, %c0_0, %c0_1] : memref<1x100x64xf32, #tpu.memory_space<vmem>>, vector<1x100x64xf32>
    %1 = vector.shape_cast %0 : vector<1x100x64xf32> to vector<100x64xf32>
    %c0_2 = arith.constant 0 : index
    %c0_3 = arith.constant 0 : index
    %2 = vector.load %arg2[%c0_2, %c0_3] : memref<100x1xf32, #tpu.memory_space<vmem>>, vector<100x1xf32>
    %cst = arith.constant 5.000000e-01 : f32
    %3 = vector.broadcast %cst : f32 to vector<100x1xf32>
    %4 = arith.cmpf ogt, %2, %3 : vector<100x1xf32>
    %cst_4 = arith.constant 0.000000e+00 : f32
    %5 = vector.shape_cast %4 : vector<100x1xi1> to vector<100x1xi1>
    %6 = vector.broadcast %5 : vector<100x1xi1> to vector<100x64xi1>
    %7 = vector.broadcast %cst_4 : f32 to vector<100x64xf32>
    %8 = arith.select %6, %1, %7 : vector<100x64xi1>, vector<100x64xf32>
    %cst_5 = arith.constant dense<0.000000e+00> : vector<64xf32>
    %9 = vector.multi_reduction <add>, %8, %cst_5 [0] : vector<100x64xf32> to vector<64xf32>
    %10 = vector.shape_cast %9 : vector<64xf32> to vector<1x64xf32>
    %c0_6 = arith.constant 0 : index
    %c0_7 = arith.constant 0 : index
    %11 = vector.load %arg3[%c0_6, %c0_7] : memref<64x64xf32, #tpu.memory_space<vmem>>, vector<64x64xf32>
    %cst_8 = arith.constant dense<0.000000e+00> : vector<1x64xf32>
    %12 = tpu.matmul %10, %11, %cst_8 {dimension_numbers = #tpu.dot_dimension_numbers<[1], [0], [0], [1], [0, 0, 1, 1], [], []>} : vector<1x64xf32>, vector<64x64xf32>, vector<1x64xf32> -> vector<1x64xf32>
    %cst_9 = arith.constant 1.280000e+02 : f32
    %13 = vector.broadcast %cst_9 : f32 to vector<1x64xf32>
    %14 = arith.divf %12, %13 : vector<1x64xf32>
    %15 = vector.broadcast %14 : vector<1x64xf32> to vector<100x64xf32>
    %16 = arith.subf %1, %15 : vector<100x64xf32>
    %cst_10 = arith.constant 0.000000e+00 : f32
    %17 = vector.shape_cast %4 : vector<100x1xi1> to vector<100x1xi1>
    %18 = vector.broadcast %17 : vector<100x1xi1> to vector<100x64xi1>
    %19 = vector.broadcast %cst_10 : f32 to vector<100x64xf32>
    %20 = arith.select %18, %16, %19 : vector<100x64xi1>, vector<100x64xf32>
    %21 = arith.mulf %20, %20 : vector<100x64xf32>
    %cst_11 = arith.constant dense<0.000000e+00> : vector<64xf32>
    %22 = vector.multi_reduction <add>, %21, %cst_11 [0] : vector<100x64xf32> to vector<64xf32>
    %23 = vector.shape_cast %22 : vector<64xf32> to vector<1x64xf32>
    %c0_12 = arith.constant 0 : index
    %c0_13 = arith.constant 0 : index
    %24 = vector.load %arg3[%c0_12, %c0_13] : memref<64x64xf32, #tpu.memory_space<vmem>>, vector<64x64xf32>
    %cst_14 = arith.constant dense<0.000000e+00> : vector<1x64xf32>
    %25 = tpu.matmul %23, %24, %cst_14 {dimension_numbers = #tpu.dot_dimension_numbers<[1], [0], [0], [1], [0, 0, 1, 1], [], []>} : vector<1x64xf32>, vector<64x64xf32>, vector<1x64xf32> -> vector<1x64xf32>
    %cst_15 = arith.constant 1.280000e+02 : f32
    %26 = vector.broadcast %cst_15 : f32 to vector<1x64xf32>
    %27 = arith.divf %25, %26 : vector<1x64xf32>
    %cst_16 = arith.constant 9.99999997E-7 : f32
    %28 = vector.broadcast %cst_16 : f32 to vector<1x64xf32>
    %29 = arith.addf %27, %28 : vector<1x64xf32>
    %30 = math.rsqrt %29 : vector<1x64xf32>
    %31 = vector.broadcast %14 : vector<1x64xf32> to vector<100x64xf32>
    %32 = arith.subf %1, %31 : vector<100x64xf32>
    %33 = vector.broadcast %30 : vector<1x64xf32> to vector<100x64xf32>
    %34 = arith.mulf %32, %33 : vector<100x64xf32>
    %c0_17 = arith.constant 0 : index
    %c0_18 = arith.constant 0 : index
    %35 = vector.load %arg4[%c0_17, %c0_18] : memref<1x64xf32, #tpu.memory_space<vmem>>, vector<1x64xf32>
    %36 = vector.broadcast %35 : vector<1x64xf32> to vector<100x64xf32>
    %37 = arith.mulf %34, %36 : vector<100x64xf32>
    %c0_19 = arith.constant 0 : index
    %c0_20 = arith.constant 0 : index
    %38 = vector.load %arg5[%c0_19, %c0_20] : memref<1x64xf32, #tpu.memory_space<vmem>>, vector<1x64xf32>
    %39 = vector.broadcast %38 : vector<1x64xf32> to vector<100x64xf32>
    %40 = arith.addf %37, %39 : vector<100x64xf32>
    %41 = arith.negf %40 : vector<100x64xf32>
    %42 = math.exp %41 : vector<100x64xf32>
    %cst_21 = arith.constant 1.000000e+00 : f32
    %43 = vector.broadcast %cst_21 : f32 to vector<100x64xf32>
    %44 = arith.addf %43, %42 : vector<100x64xf32>
    %45 = arith.divf %43, %44 : vector<100x64xf32>
    %46 = arith.mulf %40, %45 : vector<100x64xf32>
    %cst_22 = arith.constant 0.000000e+00 : f32
    %47 = vector.shape_cast %4 : vector<100x1xi1> to vector<100x1xi1>
    %48 = vector.broadcast %47 : vector<100x1xi1> to vector<100x64xi1>
    %49 = vector.broadcast %cst_22 : f32 to vector<100x64xf32>
    %50 = arith.select %48, %46, %49 : vector<100x64xi1>, vector<100x64xf32>
    %c0_23 = arith.constant 0 : index
    %c0_24 = arith.constant 0 : index
    %c0_25 = arith.constant 0 : index
    %51 = vector.load %arg6[%c0_23, %c0_24, %c0_25] : memref<1x100x64xf32, #tpu.memory_space<vmem>>, vector<1x100x64xf32>
    %52 = vector.shape_cast %51 : vector<1x100x64xf32> to vector<100x64xf32>
    %53 = vector.shape_cast %50 : vector<100x64xf32> to vector<1x100x64xf32>
    tpu.vector_store %arg6[%c0_23, %c0_24, %c0_25], %53 {strides = array<i32>} : memref<1x100x64xf32, #tpu.memory_space<vmem>>, vector<1x100x64xf32>,
    return
  }
  func.func @transform_0(%arg0: i32) -> (i32, i32, i32) {
    %c0_i32 = arith.constant 0 : i32
    %c0_i32_0 = arith.constant 0 : i32
    %c0_i32_1 = arith.constant 0 : i32
    return %arg0, %c0_i32, %c0_i32_0 : i32, i32, i32
  }
  func.func @transform_1(%arg0: i32) -> (i32, i32) {
    %c0_i32 = arith.constant 0 : i32
    %c0_i32_0 = arith.constant 0 : i32
    %c0_i32_1 = arith.constant 0 : i32
    return %c0_i32, %c0_i32_0 : i32, i32
  }
  func.func @transform_2(%arg0: i32) -> (i32, i32) {
    %c0_i32 = arith.constant 0 : i32
    %c0_i32_0 = arith.constant 0 : i32
    %c0_i32_1 = arith.constant 0 : i32
    return %c0_i32, %c0_i32_0 : i32, i32
  }
  func.func @transform_3(%arg0: i32) -> (i32, i32) {
    %c0_i32 = arith.constant 0 : i32
    %c0_i32_0 = arith.constant 0 : i32
    %c0_i32_1 = arith.constant 0 : i32
    return %c0_i32, %c0_i32_0 : i32, i32
  }
  func.func @transform_4(%arg0: i32) -> (i32, i32) {
    %c0_i32 = arith.constant 0 : i32
    %c0_i32_0 = arith.constant 0 : i32
    %c0_i32_1 = arith.constant 0 : i32
    return %c0_i32, %c0_i32_0 : i32, i32
  }
  func.func @transform_5(%arg0: i32) -> (i32, i32, i32) {
    %c0_i32 = arith.constant 0 : i32
    %c0_i32_0 = arith.constant 0 : i32
    %c0_i32_1 = arith.constant 0 : i32
    return %arg0, %c0_i32, %c0_i32_0 : i32, i32, i32
  }
}

module attributes {stable_mosaic.version = 11 : i64} {
  func.func @kernel(%arg0: i32, %arg1: memref<1x100x64xf32, #tpu.memory_space<vmem>>, %arg2: memref<9x64x64xbf16, #tpu.memory_space<vmem>>, %arg3: memref<1x64xf32, #tpu.memory_space<vmem>>, %arg4: memref<1x100x32xf32, #tpu.memory_space<vmem>>, %arg5: memref<32x64xbf16, #tpu.memory_space<vmem>>, %arg6: memref<1x1x16xf32, #tpu.memory_space<vmem>>, %arg7: memref<16x64xbf16, #tpu.memory_space<vmem>>, %arg8: memref<1x100x64xf32, #tpu.memory_space<vmem>>) attributes {dimension_semantics = [#tpu.dimension_semantics<parallel>], iteration_bounds = array<i64: 2>, scalar_prefetch = 0 : i64, scratch_operands = 0 : i64, tpu.core_type = #tpu.core_type<tc>, window_params = [{transform_indices = @transform_0, window_bounds = array<i64: 1, 100, 64>}, {pipeline_mode = #tpu.pipeline_mode<synchronous>, transform_indices = @transform_1, window_bounds = array<i64: 9, 64, 64>}, {pipeline_mode = #tpu.pipeline_mode<synchronous>, transform_indices = @transform_2, window_bounds = array<i64: 1, 64>}, {transform_indices = @transform_3, window_bounds = array<i64: 1, 100, 32>}, {pipeline_mode = #tpu.pipeline_mode<synchronous>, transform_indices = @transform_4, window_bounds = array<i64: 32, 64>}, {transform_indices = @transform_5, window_bounds = array<i64: 1, 1, 16>}, {pipeline_mode = #tpu.pipeline_mode<synchronous>, transform_indices = @transform_6, window_bounds = array<i64: 16, 64>}, {transform_indices = @transform_7, window_bounds = array<i64: 1, 100, 64>}]} {
    %cst = arith.constant 0.000000e+00 : f32
    %0 = vector.broadcast %cst : f32 to vector<78x64xf32>
    %c0 = arith.constant 0 : index
    %c0_0 = arith.constant 0 : index
    %c0_1 = arith.constant 0 : index
    %1 = vector.load %arg1[%c0, %c0_0, %c0_1] : memref<1x100x64xf32, #tpu.memory_space<vmem>>, vector<1x78x64xf32>
    %2 = vector.shape_cast %1 : vector<1x78x64xf32> to vector<78x64xf32>
    %3 = arith.truncf %2 : vector<78x64xf32> to vector<78x64xbf16>
    %c0_2 = arith.constant 0 : index
    %c0_3 = arith.constant 0 : index
    %c0_4 = arith.constant 0 : index
    %4 = vector.load %arg2[%c0_2, %c0_3, %c0_4] : memref<9x64x64xbf16, #tpu.memory_space<vmem>>, vector<1x64x64xbf16>
    %5 = vector.shape_cast %4 : vector<1x64x64xbf16> to vector<64x64xbf16>
    %cst_5 = arith.constant dense<0.000000e+00> : vector<78x64xf32>
    %6 = tpu.matmul %3, %5, %cst_5 {dimension_numbers = #tpu.dot_dimension_numbers<[1], [0], [0], [1], [0, 0, 1, 1], [], []>} : vector<78x64xbf16>, vector<64x64xbf16>, vector<78x64xf32> -> vector<78x64xf32>
    %7 = arith.addf %0, %6 : vector<78x64xf32>
    %c0_6 = arith.constant 0 : index
    %c1 = arith.constant 1 : index
    %c0_7 = arith.constant 0 : index
    %8 = vector.load %arg1[%c0_6, %c1, %c0_7] : memref<1x100x64xf32, #tpu.memory_space<vmem>>, vector<1x78x64xf32>
    %9 = vector.shape_cast %8 : vector<1x78x64xf32> to vector<78x64xf32>
    %10 = arith.truncf %9 : vector<78x64xf32> to vector<78x64xbf16>
    %c1_8 = arith.constant 1 : index
    %c0_9 = arith.constant 0 : index
    %c0_10 = arith.constant 0 : index
    %11 = vector.load %arg2[%c1_8, %c0_9, %c0_10] : memref<9x64x64xbf16, #tpu.memory_space<vmem>>, vector<1x64x64xbf16>
    %12 = vector.shape_cast %11 : vector<1x64x64xbf16> to vector<64x64xbf16>
    %cst_11 = arith.constant dense<0.000000e+00> : vector<78x64xf32>
    %13 = tpu.matmul %10, %12, %cst_11 {dimension_numbers = #tpu.dot_dimension_numbers<[1], [0], [0], [1], [0, 0, 1, 1], [], []>} : vector<78x64xbf16>, vector<64x64xbf16>, vector<78x64xf32> -> vector<78x64xf32>
    %14 = arith.addf %7, %13 : vector<78x64xf32>
    %c0_12 = arith.constant 0 : index
    %c2 = arith.constant 2 : index
    %c0_13 = arith.constant 0 : index
    %15 = vector.load %arg1[%c0_12, %c2, %c0_13] : memref<1x100x64xf32, #tpu.memory_space<vmem>>, vector<1x78x64xf32>
    %16 = vector.shape_cast %15 : vector<1x78x64xf32> to vector<78x64xf32>
    %17 = arith.truncf %16 : vector<78x64xf32> to vector<78x64xbf16>
    %c2_14 = arith.constant 2 : index
    %c0_15 = arith.constant 0 : index
    %c0_16 = arith.constant 0 : index
    %18 = vector.load %arg2[%c2_14, %c0_15, %c0_16] : memref<9x64x64xbf16, #tpu.memory_space<vmem>>, vector<1x64x64xbf16>
    %19 = vector.shape_cast %18 : vector<1x64x64xbf16> to vector<64x64xbf16>
    %cst_17 = arith.constant dense<0.000000e+00> : vector<78x64xf32>
    %20 = tpu.matmul %17, %19, %cst_17 {dimension_numbers = #tpu.dot_dimension_numbers<[1], [0], [0], [1], [0, 0, 1, 1], [], []>} : vector<78x64xbf16>, vector<64x64xbf16>, vector<78x64xf32> -> vector<78x64xf32>
    %21 = arith.addf %14, %20 : vector<78x64xf32>
    %c0_18 = arith.constant 0 : index
    %c10 = arith.constant 10 : index
    %c0_19 = arith.constant 0 : index
    %22 = vector.load %arg1[%c0_18, %c10, %c0_19] : memref<1x100x64xf32, #tpu.memory_space<vmem>>, vector<1x78x64xf32>
    %23 = vector.shape_cast %22 : vector<1x78x64xf32> to vector<78x64xf32>
    %24 = arith.truncf %23 : vector<78x64xf32> to vector<78x64xbf16>
    %c3 = arith.constant 3 : index
    %c0_20 = arith.constant 0 : index
    %c0_21 = arith.constant 0 : index
    %25 = vector.load %arg2[%c3, %c0_20, %c0_21] : memref<9x64x64xbf16, #tpu.memory_space<vmem>>, vector<1x64x64xbf16>
    %26 = vector.shape_cast %25 : vector<1x64x64xbf16> to vector<64x64xbf16>
    %cst_22 = arith.constant dense<0.000000e+00> : vector<78x64xf32>
    %27 = tpu.matmul %24, %26, %cst_22 {dimension_numbers = #tpu.dot_dimension_numbers<[1], [0], [0], [1], [0, 0, 1, 1], [], []>} : vector<78x64xbf16>, vector<64x64xbf16>, vector<78x64xf32> -> vector<78x64xf32>
    %28 = arith.addf %21, %27 : vector<78x64xf32>
    %c0_23 = arith.constant 0 : index
    %c11 = arith.constant 11 : index
    %c0_24 = arith.constant 0 : index
    %29 = vector.load %arg1[%c0_23, %c11, %c0_24] : memref<1x100x64xf32, #tpu.memory_space<vmem>>, vector<1x78x64xf32>
    %30 = vector.shape_cast %29 : vector<1x78x64xf32> to vector<78x64xf32>
    %31 = arith.truncf %30 : vector<78x64xf32> to vector<78x64xbf16>
    %c4 = arith.constant 4 : index
    %c0_25 = arith.constant 0 : index
    %c0_26 = arith.constant 0 : index
    %32 = vector.load %arg2[%c4, %c0_25, %c0_26] : memref<9x64x64xbf16, #tpu.memory_space<vmem>>, vector<1x64x64xbf16>
    %33 = vector.shape_cast %32 : vector<1x64x64xbf16> to vector<64x64xbf16>
    %cst_27 = arith.constant dense<0.000000e+00> : vector<78x64xf32>
    %34 = tpu.matmul %31, %33, %cst_27 {dimension_numbers = #tpu.dot_dimension_numbers<[1], [0], [0], [1], [0, 0, 1, 1], [], []>} : vector<78x64xbf16>, vector<64x64xbf16>, vector<78x64xf32> -> vector<78x64xf32>
    %35 = arith.addf %28, %34 : vector<78x64xf32>
    %c0_28 = arith.constant 0 : index
    %c12 = arith.constant 12 : index
    %c0_29 = arith.constant 0 : index
    %36 = vector.load %arg1[%c0_28, %c12, %c0_29] : memref<1x100x64xf32, #tpu.memory_space<vmem>>, vector<1x78x64xf32>
    %37 = vector.shape_cast %36 : vector<1x78x64xf32> to vector<78x64xf32>
    %38 = arith.truncf %37 : vector<78x64xf32> to vector<78x64xbf16>
    %c5 = arith.constant 5 : index
    %c0_30 = arith.constant 0 : index
    %c0_31 = arith.constant 0 : index
    %39 = vector.load %arg2[%c5, %c0_30, %c0_31] : memref<9x64x64xbf16, #tpu.memory_space<vmem>>, vector<1x64x64xbf16>
    %40 = vector.shape_cast %39 : vector<1x64x64xbf16> to vector<64x64xbf16>
    %cst_32 = arith.constant dense<0.000000e+00> : vector<78x64xf32>
    %41 = tpu.matmul %38, %40, %cst_32 {dimension_numbers = #tpu.dot_dimension_numbers<[1], [0], [0], [1], [0, 0, 1, 1], [], []>} : vector<78x64xbf16>, vector<64x64xbf16>, vector<78x64xf32> -> vector<78x64xf32>
    %42 = arith.addf %35, %41 : vector<78x64xf32>
    %c0_33 = arith.constant 0 : index
    %c20 = arith.constant 20 : index
    %c0_34 = arith.constant 0 : index
    %43 = vector.load %arg1[%c0_33, %c20, %c0_34] : memref<1x100x64xf32, #tpu.memory_space<vmem>>, vector<1x78x64xf32>
    %44 = vector.shape_cast %43 : vector<1x78x64xf32> to vector<78x64xf32>
    %45 = arith.truncf %44 : vector<78x64xf32> to vector<78x64xbf16>
    %c6 = arith.constant 6 : index
    %c0_35 = arith.constant 0 : index
    %c0_36 = arith.constant 0 : index
    %46 = vector.load %arg2[%c6, %c0_35, %c0_36] : memref<9x64x64xbf16, #tpu.memory_space<vmem>>, vector<1x64x64xbf16>
    %47 = vector.shape_cast %46 : vector<1x64x64xbf16> to vector<64x64xbf16>
    %cst_37 = arith.constant dense<0.000000e+00> : vector<78x64xf32>
    %48 = tpu.matmul %45, %47, %cst_37 {dimension_numbers = #tpu.dot_dimension_numbers<[1], [0], [0], [1], [0, 0, 1, 1], [], []>} : vector<78x64xbf16>, vector<64x64xbf16>, vector<78x64xf32> -> vector<78x64xf32>
    %49 = arith.addf %42, %48 : vector<78x64xf32>
    %c0_38 = arith.constant 0 : index
    %c21 = arith.constant 21 : index
    %c0_39 = arith.constant 0 : index
    %50 = vector.load %arg1[%c0_38, %c21, %c0_39] : memref<1x100x64xf32, #tpu.memory_space<vmem>>, vector<1x78x64xf32>
    %51 = vector.shape_cast %50 : vector<1x78x64xf32> to vector<78x64xf32>
    %52 = arith.truncf %51 : vector<78x64xf32> to vector<78x64xbf16>
    %c7 = arith.constant 7 : index
    %c0_40 = arith.constant 0 : index
    %c0_41 = arith.constant 0 : index
    %53 = vector.load %arg2[%c7, %c0_40, %c0_41] : memref<9x64x64xbf16, #tpu.memory_space<vmem>>, vector<1x64x64xbf16>
    %54 = vector.shape_cast %53 : vector<1x64x64xbf16> to vector<64x64xbf16>
    %cst_42 = arith.constant dense<0.000000e+00> : vector<78x64xf32>
    %55 = tpu.matmul %52, %54, %cst_42 {dimension_numbers = #tpu.dot_dimension_numbers<[1], [0], [0], [1], [0, 0, 1, 1], [], []>} : vector<78x64xbf16>, vector<64x64xbf16>, vector<78x64xf32> -> vector<78x64xf32>
    %56 = arith.addf %49, %55 : vector<78x64xf32>
    %c0_43 = arith.constant 0 : index
    %c22 = arith.constant 22 : index
    %c0_44 = arith.constant 0 : index
    %57 = vector.load %arg1[%c0_43, %c22, %c0_44] : memref<1x100x64xf32, #tpu.memory_space<vmem>>, vector<1x78x64xf32>
    %58 = vector.shape_cast %57 : vector<1x78x64xf32> to vector<78x64xf32>
    %59 = arith.truncf %58 : vector<78x64xf32> to vector<78x64xbf16>
    %c8 = arith.constant 8 : index
    %c0_45 = arith.constant 0 : index
    %c0_46 = arith.constant 0 : index
    %60 = vector.load %arg2[%c8, %c0_45, %c0_46] : memref<9x64x64xbf16, #tpu.memory_space<vmem>>, vector<1x64x64xbf16>
    %61 = vector.shape_cast %60 : vector<1x64x64xbf16> to vector<64x64xbf16>
    %cst_47 = arith.constant dense<0.000000e+00> : vector<78x64xf32>
    %62 = tpu.matmul %59, %61, %cst_47 {dimension_numbers = #tpu.dot_dimension_numbers<[1], [0], [0], [1], [0, 0, 1, 1], [], []>} : vector<78x64xbf16>, vector<64x64xbf16>, vector<78x64xf32> -> vector<78x64xf32>
    %63 = arith.addf %56, %62 : vector<78x64xf32>
    %c0_48 = arith.constant 0 : index
    %c11_49 = arith.constant 11 : index
    %c0_50 = arith.constant 0 : index
    %64 = vector.load %arg4[%c0_48, %c11_49, %c0_50] : memref<1x100x32xf32, #tpu.memory_space<vmem>>, vector<1x78x32xf32>
    %65 = vector.shape_cast %64 : vector<1x78x32xf32> to vector<78x32xf32>
    %66 = arith.truncf %65 : vector<78x32xf32> to vector<78x32xbf16>
    %c0_51 = arith.constant 0 : index
    %c0_52 = arith.constant 0 : index
    %67 = vector.load %arg5[%c0_51, %c0_52] : memref<32x64xbf16, #tpu.memory_space<vmem>>, vector<32x64xbf16>
    %cst_53 = arith.constant dense<0.000000e+00> : vector<78x64xf32>
    %68 = tpu.matmul %66, %67, %cst_53 {dimension_numbers = #tpu.dot_dimension_numbers<[1], [0], [0], [1], [0, 0, 1, 1], [], []>} : vector<78x32xbf16>, vector<32x64xbf16>, vector<78x64xf32> -> vector<78x64xf32>
    %69 = arith.addf %63, %68 : vector<78x64xf32>
    %c0_54 = arith.constant 0 : index
    %c0_55 = arith.constant 0 : index
    %c0_56 = arith.constant 0 : index
    %70 = vector.load %arg6[%c0_54, %c0_55, %c0_56] : memref<1x1x16xf32, #tpu.memory_space<vmem>>, vector<1x1x16xf32>
    %71 = vector.shape_cast %70 : vector<1x1x16xf32> to vector<1x16xf32>
    %72 = arith.negf %71 : vector<1x16xf32>
    %73 = math.exp %72 : vector<1x16xf32>
    %cst_57 = arith.constant 1.000000e+00 : f32
    %74 = vector.broadcast %cst_57 : f32 to vector<1x16xf32>
    %75 = arith.addf %74, %73 : vector<1x16xf32>
    %76 = arith.divf %74, %75 : vector<1x16xf32>
    %77 = arith.mulf %71, %76 : vector<1x16xf32>
    %78 = arith.truncf %77 : vector<1x16xf32> to vector<1x16xbf16>
    %c0_58 = arith.constant 0 : index
    %c0_59 = arith.constant 0 : index
    %79 = vector.load %arg7[%c0_58, %c0_59] : memref<16x64xbf16, #tpu.memory_space<vmem>>, vector<16x64xbf16>
    %cst_60 = arith.constant dense<0.000000e+00> : vector<1x64xf32>
    %80 = tpu.matmul %78, %79, %cst_60 {dimension_numbers = #tpu.dot_dimension_numbers<[1], [0], [0], [1], [0, 0, 1, 1], [], []>} : vector<1x16xbf16>, vector<16x64xbf16>, vector<1x64xf32> -> vector<1x64xf32>
    %81 = vector.broadcast %80 : vector<1x64xf32> to vector<78x64xf32>
    %82 = arith.addf %69, %81 : vector<78x64xf32>
    %c0_61 = arith.constant 0 : index
    %c0_62 = arith.constant 0 : index
    %83 = vector.load %arg3[%c0_61, %c0_62] : memref<1x64xf32, #tpu.memory_space<vmem>>, vector<1x64xf32>
    %84 = vector.broadcast %83 : vector<1x64xf32> to vector<78x64xf32>
    %85 = arith.addf %82, %84 : vector<78x64xf32>
    %cst_63 = arith.constant 0.000000e+00 : f32
    %86 = vector.broadcast %cst_63 : f32 to vector<11x64xf32>
    %c0_64 = arith.constant 0 : index
    %c0_65 = arith.constant 0 : index
    %c0_66 = arith.constant 0 : index
    %87 = vector.load %arg8[%c0_64, %c0_65, %c0_66] : memref<1x100x64xf32, #tpu.memory_space<vmem>>, vector<1x11x64xf32>
    %88 = vector.shape_cast %87 : vector<1x11x64xf32> to vector<11x64xf32>
    %89 = vector.shape_cast %86 : vector<11x64xf32> to vector<1x11x64xf32>
    tpu.vector_store %arg8[%c0_64, %c0_65, %c0_66], %89 {strides = array<i32>} : memref<1x100x64xf32, #tpu.memory_space<vmem>>, vector<1x11x64xf32>,
    %c0_67 = arith.constant 0 : index
    %c11_68 = arith.constant 11 : index
    %c0_69 = arith.constant 0 : index
    %90 = vector.load %arg8[%c0_67, %c11_68, %c0_69] : memref<1x100x64xf32, #tpu.memory_space<vmem>>, vector<1x78x64xf32>
    %91 = vector.shape_cast %90 : vector<1x78x64xf32> to vector<78x64xf32>
    %92 = vector.shape_cast %85 : vector<78x64xf32> to vector<1x78x64xf32>
    tpu.vector_store %arg8[%c0_67, %c11_68, %c0_69], %92 {strides = array<i32>} : memref<1x100x64xf32, #tpu.memory_space<vmem>>, vector<1x78x64xf32>,
    %c0_70 = arith.constant 0 : index
    %c89 = arith.constant 89 : index
    %c0_71 = arith.constant 0 : index
    %93 = vector.load %arg8[%c0_70, %c89, %c0_71] : memref<1x100x64xf32, #tpu.memory_space<vmem>>, vector<1x11x64xf32>
    %94 = vector.shape_cast %93 : vector<1x11x64xf32> to vector<11x64xf32>
    %95 = vector.shape_cast %86 : vector<11x64xf32> to vector<1x11x64xf32>
    tpu.vector_store %arg8[%c0_70, %c89, %c0_71], %95 {strides = array<i32>} : memref<1x100x64xf32, #tpu.memory_space<vmem>>, vector<1x11x64xf32>,
    return
  }
  func.func @transform_0(%arg0: i32) -> (i32, i32, i32) {
    %c0_i32 = arith.constant 0 : i32
    %c0_i32_0 = arith.constant 0 : i32
    %c0_i32_1 = arith.constant 0 : i32
    return %arg0, %c0_i32, %c0_i32_0 : i32, i32, i32
  }
  func.func @transform_1(%arg0: i32) -> (i32, i32, i32) {
    %c0_i32 = arith.constant 0 : i32
    %c0_i32_0 = arith.constant 0 : i32
    %c0_i32_1 = arith.constant 0 : i32
    %c0_i32_2 = arith.constant 0 : i32
    return %c0_i32, %c0_i32_0, %c0_i32_1 : i32, i32, i32
  }
  func.func @transform_2(%arg0: i32) -> (i32, i32) {
    %c0_i32 = arith.constant 0 : i32
    %c0_i32_0 = arith.constant 0 : i32
    %c0_i32_1 = arith.constant 0 : i32
    return %c0_i32, %c0_i32_0 : i32, i32
  }
  func.func @transform_3(%arg0: i32) -> (i32, i32, i32) {
    %c0_i32 = arith.constant 0 : i32
    %c0_i32_0 = arith.constant 0 : i32
    %c0_i32_1 = arith.constant 0 : i32
    return %arg0, %c0_i32, %c0_i32_0 : i32, i32, i32
  }
  func.func @transform_4(%arg0: i32) -> (i32, i32) {
    %c0_i32 = arith.constant 0 : i32
    %c0_i32_0 = arith.constant 0 : i32
    %c0_i32_1 = arith.constant 0 : i32
    return %c0_i32, %c0_i32_0 : i32, i32
  }
  func.func @transform_5(%arg0: i32) -> (i32, i32, i32) {
    %c0_i32 = arith.constant 0 : i32
    %c0_i32_0 = arith.constant 0 : i32
    %c0_i32_1 = arith.constant 0 : i32
    return %arg0, %c0_i32, %c0_i32_0 : i32, i32, i32
  }
  func.func @transform_6(%arg0: i32) -> (i32, i32) {
    %c0_i32 = arith.constant 0 : i32
    %c0_i32_0 = arith.constant 0 : i32
    %c0_i32_1 = arith.constant 0 : i32
    return %c0_i32, %c0_i32_0 : i32, i32
  }
  func.func @transform_7(%arg0: i32) -> (i32, i32, i32) {
    %c0_i32 = arith.constant 0 : i32
    %c0_i32_0 = arith.constant 0 : i32
    %c0_i32_1 = arith.constant 0 : i32
    return %arg0, %c0_i32, %c0_i32_0 : i32, i32, i32
  }
}

module attributes {stable_mosaic.version = 11 : i64} {
  func.func @kernel(%arg0: i32, %arg1: memref<1x100x64xf32, #tpu.memory_space<vmem>>, %arg2: memref<9x64x64xbf16, #tpu.memory_space<vmem>>, %arg3: memref<1x64xf32, #tpu.memory_space<vmem>>, %arg4: memref<1x100x64xf32, #tpu.memory_space<vmem>>) attributes {dimension_semantics = [#tpu.dimension_semantics<parallel>], iteration_bounds = array<i64: 2>, scalar_prefetch = 0 : i64, scratch_operands = 0 : i64, tpu.core_type = #tpu.core_type<tc>, window_params = [{transform_indices = @transform_0, window_bounds = array<i64: 1, 100, 64>}, {pipeline_mode = #tpu.pipeline_mode<synchronous>, transform_indices = @transform_1, window_bounds = array<i64: 9, 64, 64>}, {pipeline_mode = #tpu.pipeline_mode<synchronous>, transform_indices = @transform_2, window_bounds = array<i64: 1, 64>}, {transform_indices = @transform_3, window_bounds = array<i64: 1, 100, 64>}]} {
    %cst = arith.constant 0.000000e+00 : f32
    %0 = vector.broadcast %cst : f32 to vector<78x64xf32>
    %c0 = arith.constant 0 : index
    %c0_0 = arith.constant 0 : index
    %c0_1 = arith.constant 0 : index
    %1 = vector.load %arg1[%c0, %c0_0, %c0_1] : memref<1x100x64xf32, #tpu.memory_space<vmem>>, vector<1x78x64xf32>
    %2 = vector.shape_cast %1 : vector<1x78x64xf32> to vector<78x64xf32>
    %3 = arith.truncf %2 : vector<78x64xf32> to vector<78x64xbf16>
    %c0_2 = arith.constant 0 : index
    %c0_3 = arith.constant 0 : index
    %c0_4 = arith.constant 0 : index
    %4 = vector.load %arg2[%c0_2, %c0_3, %c0_4] : memref<9x64x64xbf16, #tpu.memory_space<vmem>>, vector<1x64x64xbf16>
    %5 = vector.shape_cast %4 : vector<1x64x64xbf16> to vector<64x64xbf16>
    %cst_5 = arith.constant dense<0.000000e+00> : vector<78x64xf32>
    %6 = tpu.matmul %3, %5, %cst_5 {dimension_numbers = #tpu.dot_dimension_numbers<[1], [0], [0], [1], [0, 0, 1, 1], [], []>} : vector<78x64xbf16>, vector<64x64xbf16>, vector<78x64xf32> -> vector<78x64xf32>
    %7 = arith.addf %0, %6 : vector<78x64xf32>
    %c0_6 = arith.constant 0 : index
    %c1 = arith.constant 1 : index
    %c0_7 = arith.constant 0 : index
    %8 = vector.load %arg1[%c0_6, %c1, %c0_7] : memref<1x100x64xf32, #tpu.memory_space<vmem>>, vector<1x78x64xf32>
    %9 = vector.shape_cast %8 : vector<1x78x64xf32> to vector<78x64xf32>
    %10 = arith.truncf %9 : vector<78x64xf32> to vector<78x64xbf16>
    %c1_8 = arith.constant 1 : index
    %c0_9 = arith.constant 0 : index
    %c0_10 = arith.constant 0 : index
    %11 = vector.load %arg2[%c1_8, %c0_9, %c0_10] : memref<9x64x64xbf16, #tpu.memory_space<vmem>>, vector<1x64x64xbf16>
    %12 = vector.shape_cast %11 : vector<1x64x64xbf16> to vector<64x64xbf16>
    %cst_11 = arith.constant dense<0.000000e+00> : vector<78x64xf32>
    %13 = tpu.matmul %10, %12, %cst_11 {dimension_numbers = #tpu.dot_dimension_numbers<[1], [0], [0], [1], [0, 0, 1, 1], [], []>} : vector<78x64xbf16>, vector<64x64xbf16>, vector<78x64xf32> -> vector<78x64xf32>
    %14 = arith.addf %7, %13 : vector<78x64xf32>
    %c0_12 = arith.constant 0 : index
    %c2 = arith.constant 2 : index
    %c0_13 = arith.constant 0 : index
    %15 = vector.load %arg1[%c0_12, %c2, %c0_13] : memref<1x100x64xf32, #tpu.memory_space<vmem>>, vector<1x78x64xf32>
    %16 = vector.shape_cast %15 : vector<1x78x64xf32> to vector<78x64xf32>
    %17 = arith.truncf %16 : vector<78x64xf32> to vector<78x64xbf16>
    %c2_14 = arith.constant 2 : index
    %c0_15 = arith.constant 0 : index
    %c0_16 = arith.constant 0 : index
    %18 = vector.load %arg2[%c2_14, %c0_15, %c0_16] : memref<9x64x64xbf16, #tpu.memory_space<vmem>>, vector<1x64x64xbf16>
    %19 = vector.shape_cast %18 : vector<1x64x64xbf16> to vector<64x64xbf16>
    %cst_17 = arith.constant dense<0.000000e+00> : vector<78x64xf32>
    %20 = tpu.matmul %17, %19, %cst_17 {dimension_numbers = #tpu.dot_dimension_numbers<[1], [0], [0], [1], [0, 0, 1, 1], [], []>} : vector<78x64xbf16>, vector<64x64xbf16>, vector<78x64xf32> -> vector<78x64xf32>
    %21 = arith.addf %14, %20 : vector<78x64xf32>
    %c0_18 = arith.constant 0 : index
    %c10 = arith.constant 10 : index
    %c0_19 = arith.constant 0 : index
    %22 = vector.load %arg1[%c0_18, %c10, %c0_19] : memref<1x100x64xf32, #tpu.memory_space<vmem>>, vector<1x78x64xf32>
    %23 = vector.shape_cast %22 : vector<1x78x64xf32> to vector<78x64xf32>
    %24 = arith.truncf %23 : vector<78x64xf32> to vector<78x64xbf16>
    %c3 = arith.constant 3 : index
    %c0_20 = arith.constant 0 : index
    %c0_21 = arith.constant 0 : index
    %25 = vector.load %arg2[%c3, %c0_20, %c0_21] : memref<9x64x64xbf16, #tpu.memory_space<vmem>>, vector<1x64x64xbf16>
    %26 = vector.shape_cast %25 : vector<1x64x64xbf16> to vector<64x64xbf16>
    %cst_22 = arith.constant dense<0.000000e+00> : vector<78x64xf32>
    %27 = tpu.matmul %24, %26, %cst_22 {dimension_numbers = #tpu.dot_dimension_numbers<[1], [0], [0], [1], [0, 0, 1, 1], [], []>} : vector<78x64xbf16>, vector<64x64xbf16>, vector<78x64xf32> -> vector<78x64xf32>
    %28 = arith.addf %21, %27 : vector<78x64xf32>
    %c0_23 = arith.constant 0 : index
    %c11 = arith.constant 11 : index
    %c0_24 = arith.constant 0 : index
    %29 = vector.load %arg1[%c0_23, %c11, %c0_24] : memref<1x100x64xf32, #tpu.memory_space<vmem>>, vector<1x78x64xf32>
    %30 = vector.shape_cast %29 : vector<1x78x64xf32> to vector<78x64xf32>
    %31 = arith.truncf %30 : vector<78x64xf32> to vector<78x64xbf16>
    %c4 = arith.constant 4 : index
    %c0_25 = arith.constant 0 : index
    %c0_26 = arith.constant 0 : index
    %32 = vector.load %arg2[%c4, %c0_25, %c0_26] : memref<9x64x64xbf16, #tpu.memory_space<vmem>>, vector<1x64x64xbf16>
    %33 = vector.shape_cast %32 : vector<1x64x64xbf16> to vector<64x64xbf16>
    %cst_27 = arith.constant dense<0.000000e+00> : vector<78x64xf32>
    %34 = tpu.matmul %31, %33, %cst_27 {dimension_numbers = #tpu.dot_dimension_numbers<[1], [0], [0], [1], [0, 0, 1, 1], [], []>} : vector<78x64xbf16>, vector<64x64xbf16>, vector<78x64xf32> -> vector<78x64xf32>
    %35 = arith.addf %28, %34 : vector<78x64xf32>
    %c0_28 = arith.constant 0 : index
    %c12 = arith.constant 12 : index
    %c0_29 = arith.constant 0 : index
    %36 = vector.load %arg1[%c0_28, %c12, %c0_29] : memref<1x100x64xf32, #tpu.memory_space<vmem>>, vector<1x78x64xf32>
    %37 = vector.shape_cast %36 : vector<1x78x64xf32> to vector<78x64xf32>
    %38 = arith.truncf %37 : vector<78x64xf32> to vector<78x64xbf16>
    %c5 = arith.constant 5 : index
    %c0_30 = arith.constant 0 : index
    %c0_31 = arith.constant 0 : index
    %39 = vector.load %arg2[%c5, %c0_30, %c0_31] : memref<9x64x64xbf16, #tpu.memory_space<vmem>>, vector<1x64x64xbf16>
    %40 = vector.shape_cast %39 : vector<1x64x64xbf16> to vector<64x64xbf16>
    %cst_32 = arith.constant dense<0.000000e+00> : vector<78x64xf32>
    %41 = tpu.matmul %38, %40, %cst_32 {dimension_numbers = #tpu.dot_dimension_numbers<[1], [0], [0], [1], [0, 0, 1, 1], [], []>} : vector<78x64xbf16>, vector<64x64xbf16>, vector<78x64xf32> -> vector<78x64xf32>
    %42 = arith.addf %35, %41 : vector<78x64xf32>
    %c0_33 = arith.constant 0 : index
    %c20 = arith.constant 20 : index
    %c0_34 = arith.constant 0 : index
    %43 = vector.load %arg1[%c0_33, %c20, %c0_34] : memref<1x100x64xf32, #tpu.memory_space<vmem>>, vector<1x78x64xf32>
    %44 = vector.shape_cast %43 : vector<1x78x64xf32> to vector<78x64xf32>
    %45 = arith.truncf %44 : vector<78x64xf32> to vector<78x64xbf16>
    %c6 = arith.constant 6 : index
    %c0_35 = arith.constant 0 : index
    %c0_36 = arith.constant 0 : index
    %46 = vector.load %arg2[%c6, %c0_35, %c0_36] : memref<9x64x64xbf16, #tpu.memory_space<vmem>>, vector<1x64x64xbf16>
    %47 = vector.shape_cast %46 : vector<1x64x64xbf16> to vector<64x64xbf16>
    %cst_37 = arith.constant dense<0.000000e+00> : vector<78x64xf32>
    %48 = tpu.matmul %45, %47, %cst_37 {dimension_numbers = #tpu.dot_dimension_numbers<[1], [0], [0], [1], [0, 0, 1, 1], [], []>} : vector<78x64xbf16>, vector<64x64xbf16>, vector<78x64xf32> -> vector<78x64xf32>
    %49 = arith.addf %42, %48 : vector<78x64xf32>
    %c0_38 = arith.constant 0 : index
    %c21 = arith.constant 21 : index
    %c0_39 = arith.constant 0 : index
    %50 = vector.load %arg1[%c0_38, %c21, %c0_39] : memref<1x100x64xf32, #tpu.memory_space<vmem>>, vector<1x78x64xf32>
    %51 = vector.shape_cast %50 : vector<1x78x64xf32> to vector<78x64xf32>
    %52 = arith.truncf %51 : vector<78x64xf32> to vector<78x64xbf16>
    %c7 = arith.constant 7 : index
    %c0_40 = arith.constant 0 : index
    %c0_41 = arith.constant 0 : index
    %53 = vector.load %arg2[%c7, %c0_40, %c0_41] : memref<9x64x64xbf16, #tpu.memory_space<vmem>>, vector<1x64x64xbf16>
    %54 = vector.shape_cast %53 : vector<1x64x64xbf16> to vector<64x64xbf16>
    %cst_42 = arith.constant dense<0.000000e+00> : vector<78x64xf32>
    %55 = tpu.matmul %52, %54, %cst_42 {dimension_numbers = #tpu.dot_dimension_numbers<[1], [0], [0], [1], [0, 0, 1, 1], [], []>} : vector<78x64xbf16>, vector<64x64xbf16>, vector<78x64xf32> -> vector<78x64xf32>
    %56 = arith.addf %49, %55 : vector<78x64xf32>
    %c0_43 = arith.constant 0 : index
    %c22 = arith.constant 22 : index
    %c0_44 = arith.constant 0 : index
    %57 = vector.load %arg1[%c0_43, %c22, %c0_44] : memref<1x100x64xf32, #tpu.memory_space<vmem>>, vector<1x78x64xf32>
    %58 = vector.shape_cast %57 : vector<1x78x64xf32> to vector<78x64xf32>
    %59 = arith.truncf %58 : vector<78x64xf32> to vector<78x64xbf16>
    %c8 = arith.constant 8 : index
    %c0_45 = arith.constant 0 : index
    %c0_46 = arith.constant 0 : index
    %60 = vector.load %arg2[%c8, %c0_45, %c0_46] : memref<9x64x64xbf16, #tpu.memory_space<vmem>>, vector<1x64x64xbf16>
    %61 = vector.shape_cast %60 : vector<1x64x64xbf16> to vector<64x64xbf16>
    %cst_47 = arith.constant dense<0.000000e+00> : vector<78x64xf32>
    %62 = tpu.matmul %59, %61, %cst_47 {dimension_numbers = #tpu.dot_dimension_numbers<[1], [0], [0], [1], [0, 0, 1, 1], [], []>} : vector<78x64xbf16>, vector<64x64xbf16>, vector<78x64xf32> -> vector<78x64xf32>
    %63 = arith.addf %56, %62 : vector<78x64xf32>
    %c0_48 = arith.constant 0 : index
    %c0_49 = arith.constant 0 : index
    %64 = vector.load %arg3[%c0_48, %c0_49] : memref<1x64xf32, #tpu.memory_space<vmem>>, vector<1x64xf32>
    %65 = vector.broadcast %64 : vector<1x64xf32> to vector<78x64xf32>
    %66 = arith.addf %63, %65 : vector<78x64xf32>
    %cst_50 = arith.constant 0.000000e+00 : f32
    %67 = vector.broadcast %cst_50 : f32 to vector<11x64xf32>
    %c0_51 = arith.constant 0 : index
    %c0_52 = arith.constant 0 : index
    %c0_53 = arith.constant 0 : index
    %68 = vector.load %arg4[%c0_51, %c0_52, %c0_53] : memref<1x100x64xf32, #tpu.memory_space<vmem>>, vector<1x11x64xf32>
    %69 = vector.shape_cast %68 : vector<1x11x64xf32> to vector<11x64xf32>
    %70 = vector.shape_cast %67 : vector<11x64xf32> to vector<1x11x64xf32>
    tpu.vector_store %arg4[%c0_51, %c0_52, %c0_53], %70 {strides = array<i32>} : memref<1x100x64xf32, #tpu.memory_space<vmem>>, vector<1x11x64xf32>,
    %c0_54 = arith.constant 0 : index
    %c11_55 = arith.constant 11 : index
    %c0_56 = arith.constant 0 : index
    %71 = vector.load %arg4[%c0_54, %c11_55, %c0_56] : memref<1x100x64xf32, #tpu.memory_space<vmem>>, vector<1x78x64xf32>
    %72 = vector.shape_cast %71 : vector<1x78x64xf32> to vector<78x64xf32>
    %73 = vector.shape_cast %66 : vector<78x64xf32> to vector<1x78x64xf32>
    tpu.vector_store %arg4[%c0_54, %c11_55, %c0_56], %73 {strides = array<i32>} : memref<1x100x64xf32, #tpu.memory_space<vmem>>, vector<1x78x64xf32>,
    %c0_57 = arith.constant 0 : index
    %c89 = arith.constant 89 : index
    %c0_58 = arith.constant 0 : index
    %74 = vector.load %arg4[%c0_57, %c89, %c0_58] : memref<1x100x64xf32, #tpu.memory_space<vmem>>, vector<1x11x64xf32>
    %75 = vector.shape_cast %74 : vector<1x11x64xf32> to vector<11x64xf32>
    %76 = vector.shape_cast %67 : vector<11x64xf32> to vector<1x11x64xf32>
    tpu.vector_store %arg4[%c0_57, %c89, %c0_58], %76 {strides = array<i32>} : memref<1x100x64xf32, #tpu.memory_space<vmem>>, vector<1x11x64xf32>,
    return
  }
  func.func @transform_0(%arg0: i32) -> (i32, i32, i32) {
    %c0_i32 = arith.constant 0 : i32
    %c0_i32_0 = arith.constant 0 : i32
    %c0_i32_1 = arith.constant 0 : i32
    return %arg0, %c0_i32, %c0_i32_0 : i32, i32, i32
  }
  func.func @transform_1(%arg0: i32) -> (i32, i32, i32) {
    %c0_i32 = arith.constant 0 : i32
    %c0_i32_0 = arith.constant 0 : i32
    %c0_i32_1 = arith.constant 0 : i32
    %c0_i32_2 = arith.constant 0 : i32
    return %c0_i32, %c0_i32_0, %c0_i32_1 : i32, i32, i32
  }
  func.func @transform_2(%arg0: i32) -> (i32, i32) {
    %c0_i32 = arith.constant 0 : i32
    %c0_i32_0 = arith.constant 0 : i32
    %c0_i32_1 = arith.constant 0 : i32
    return %c0_i32, %c0_i32_0 : i32, i32
  }
  func.func @transform_3(%arg0: i32) -> (i32, i32, i32) {
    %c0_i32 = arith.constant 0 : i32
    %c0_i32_0 = arith.constant 0 : i32
    %c0_i32_1 = arith.constant 0 : i32
    return %arg0, %c0_i32, %c0_i32_0 : i32, i32, i32
  }
}

module attributes {stable_mosaic.version = 11 : i64} {
  func.func @kernel(%arg0: i32, %arg1: memref<1x100x64xf32, #tpu.memory_space<vmem>>, %arg2: memref<9x64x64xbf16, #tpu.memory_space<vmem>>, %arg3: memref<1x64xf32, #tpu.memory_space<vmem>>, %arg4: memref<1x100x64xf32, #tpu.memory_space<vmem>>, %arg5: memref<1x100x64xf32, #tpu.memory_space<vmem>>) attributes {dimension_semantics = [#tpu.dimension_semantics<parallel>], iteration_bounds = array<i64: 2>, scalar_prefetch = 0 : i64, scratch_operands = 0 : i64, tpu.core_type = #tpu.core_type<tc>, window_params = [{transform_indices = @transform_0, window_bounds = array<i64: 1, 100, 64>}, {pipeline_mode = #tpu.pipeline_mode<synchronous>, transform_indices = @transform_1, window_bounds = array<i64: 9, 64, 64>}, {pipeline_mode = #tpu.pipeline_mode<synchronous>, transform_indices = @transform_2, window_bounds = array<i64: 1, 64>}, {transform_indices = @transform_3, window_bounds = array<i64: 1, 100, 64>}, {transform_indices = @transform_4, window_bounds = array<i64: 1, 100, 64>}]} {
    %cst = arith.constant 0.000000e+00 : f32
    %0 = vector.broadcast %cst : f32 to vector<78x64xf32>
    %c0 = arith.constant 0 : index
    %c0_0 = arith.constant 0 : index
    %c0_1 = arith.constant 0 : index
    %1 = vector.load %arg1[%c0, %c0_0, %c0_1] : memref<1x100x64xf32, #tpu.memory_space<vmem>>, vector<1x78x64xf32>
    %2 = vector.shape_cast %1 : vector<1x78x64xf32> to vector<78x64xf32>
    %3 = arith.truncf %2 : vector<78x64xf32> to vector<78x64xbf16>
    %c0_2 = arith.constant 0 : index
    %c0_3 = arith.constant 0 : index
    %c0_4 = arith.constant 0 : index
    %4 = vector.load %arg2[%c0_2, %c0_3, %c0_4] : memref<9x64x64xbf16, #tpu.memory_space<vmem>>, vector<1x64x64xbf16>
    %5 = vector.shape_cast %4 : vector<1x64x64xbf16> to vector<64x64xbf16>
    %cst_5 = arith.constant dense<0.000000e+00> : vector<78x64xf32>
    %6 = tpu.matmul %3, %5, %cst_5 {dimension_numbers = #tpu.dot_dimension_numbers<[1], [0], [0], [1], [0, 0, 1, 1], [], []>} : vector<78x64xbf16>, vector<64x64xbf16>, vector<78x64xf32> -> vector<78x64xf32>
    %7 = arith.addf %0, %6 : vector<78x64xf32>
    %c0_6 = arith.constant 0 : index
    %c1 = arith.constant 1 : index
    %c0_7 = arith.constant 0 : index
    %8 = vector.load %arg1[%c0_6, %c1, %c0_7] : memref<1x100x64xf32, #tpu.memory_space<vmem>>, vector<1x78x64xf32>
    %9 = vector.shape_cast %8 : vector<1x78x64xf32> to vector<78x64xf32>
    %10 = arith.truncf %9 : vector<78x64xf32> to vector<78x64xbf16>
    %c1_8 = arith.constant 1 : index
    %c0_9 = arith.constant 0 : index
    %c0_10 = arith.constant 0 : index
    %11 = vector.load %arg2[%c1_8, %c0_9, %c0_10] : memref<9x64x64xbf16, #tpu.memory_space<vmem>>, vector<1x64x64xbf16>
    %12 = vector.shape_cast %11 : vector<1x64x64xbf16> to vector<64x64xbf16>
    %cst_11 = arith.constant dense<0.000000e+00> : vector<78x64xf32>
    %13 = tpu.matmul %10, %12, %cst_11 {dimension_numbers = #tpu.dot_dimension_numbers<[1], [0], [0], [1], [0, 0, 1, 1], [], []>} : vector<78x64xbf16>, vector<64x64xbf16>, vector<78x64xf32> -> vector<78x64xf32>
    %14 = arith.addf %7, %13 : vector<78x64xf32>
    %c0_12 = arith.constant 0 : index
    %c2 = arith.constant 2 : index
    %c0_13 = arith.constant 0 : index
    %15 = vector.load %arg1[%c0_12, %c2, %c0_13] : memref<1x100x64xf32, #tpu.memory_space<vmem>>, vector<1x78x64xf32>
    %16 = vector.shape_cast %15 : vector<1x78x64xf32> to vector<78x64xf32>
    %17 = arith.truncf %16 : vector<78x64xf32> to vector<78x64xbf16>
    %c2_14 = arith.constant 2 : index
    %c0_15 = arith.constant 0 : index
    %c0_16 = arith.constant 0 : index
    %18 = vector.load %arg2[%c2_14, %c0_15, %c0_16] : memref<9x64x64xbf16, #tpu.memory_space<vmem>>, vector<1x64x64xbf16>
    %19 = vector.shape_cast %18 : vector<1x64x64xbf16> to vector<64x64xbf16>
    %cst_17 = arith.constant dense<0.000000e+00> : vector<78x64xf32>
    %20 = tpu.matmul %17, %19, %cst_17 {dimension_numbers = #tpu.dot_dimension_numbers<[1], [0], [0], [1], [0, 0, 1, 1], [], []>} : vector<78x64xbf16>, vector<64x64xbf16>, vector<78x64xf32> -> vector<78x64xf32>
    %21 = arith.addf %14, %20 : vector<78x64xf32>
    %c0_18 = arith.constant 0 : index
    %c10 = arith.constant 10 : index
    %c0_19 = arith.constant 0 : index
    %22 = vector.load %arg1[%c0_18, %c10, %c0_19] : memref<1x100x64xf32, #tpu.memory_space<vmem>>, vector<1x78x64xf32>
    %23 = vector.shape_cast %22 : vector<1x78x64xf32> to vector<78x64xf32>
    %24 = arith.truncf %23 : vector<78x64xf32> to vector<78x64xbf16>
    %c3 = arith.constant 3 : index
    %c0_20 = arith.constant 0 : index
    %c0_21 = arith.constant 0 : index
    %25 = vector.load %arg2[%c3, %c0_20, %c0_21] : memref<9x64x64xbf16, #tpu.memory_space<vmem>>, vector<1x64x64xbf16>
    %26 = vector.shape_cast %25 : vector<1x64x64xbf16> to vector<64x64xbf16>
    %cst_22 = arith.constant dense<0.000000e+00> : vector<78x64xf32>
    %27 = tpu.matmul %24, %26, %cst_22 {dimension_numbers = #tpu.dot_dimension_numbers<[1], [0], [0], [1], [0, 0, 1, 1], [], []>} : vector<78x64xbf16>, vector<64x64xbf16>, vector<78x64xf32> -> vector<78x64xf32>
    %28 = arith.addf %21, %27 : vector<78x64xf32>
    %c0_23 = arith.constant 0 : index
    %c11 = arith.constant 11 : index
    %c0_24 = arith.constant 0 : index
    %29 = vector.load %arg1[%c0_23, %c11, %c0_24] : memref<1x100x64xf32, #tpu.memory_space<vmem>>, vector<1x78x64xf32>
    %30 = vector.shape_cast %29 : vector<1x78x64xf32> to vector<78x64xf32>
    %31 = arith.truncf %30 : vector<78x64xf32> to vector<78x64xbf16>
    %c4 = arith.constant 4 : index
    %c0_25 = arith.constant 0 : index
    %c0_26 = arith.constant 0 : index
    %32 = vector.load %arg2[%c4, %c0_25, %c0_26] : memref<9x64x64xbf16, #tpu.memory_space<vmem>>, vector<1x64x64xbf16>
    %33 = vector.shape_cast %32 : vector<1x64x64xbf16> to vector<64x64xbf16>
    %cst_27 = arith.constant dense<0.000000e+00> : vector<78x64xf32>
    %34 = tpu.matmul %31, %33, %cst_27 {dimension_numbers = #tpu.dot_dimension_numbers<[1], [0], [0], [1], [0, 0, 1, 1], [], []>} : vector<78x64xbf16>, vector<64x64xbf16>, vector<78x64xf32> -> vector<78x64xf32>
    %35 = arith.addf %28, %34 : vector<78x64xf32>
    %c0_28 = arith.constant 0 : index
    %c12 = arith.constant 12 : index
    %c0_29 = arith.constant 0 : index
    %36 = vector.load %arg1[%c0_28, %c12, %c0_29] : memref<1x100x64xf32, #tpu.memory_space<vmem>>, vector<1x78x64xf32>
    %37 = vector.shape_cast %36 : vector<1x78x64xf32> to vector<78x64xf32>
    %38 = arith.truncf %37 : vector<78x64xf32> to vector<78x64xbf16>
    %c5 = arith.constant 5 : index
    %c0_30 = arith.constant 0 : index
    %c0_31 = arith.constant 0 : index
    %39 = vector.load %arg2[%c5, %c0_30, %c0_31] : memref<9x64x64xbf16, #tpu.memory_space<vmem>>, vector<1x64x64xbf16>
    %40 = vector.shape_cast %39 : vector<1x64x64xbf16> to vector<64x64xbf16>
    %cst_32 = arith.constant dense<0.000000e+00> : vector<78x64xf32>
    %41 = tpu.matmul %38, %40, %cst_32 {dimension_numbers = #tpu.dot_dimension_numbers<[1], [0], [0], [1], [0, 0, 1, 1], [], []>} : vector<78x64xbf16>, vector<64x64xbf16>, vector<78x64xf32> -> vector<78x64xf32>
    %42 = arith.addf %35, %41 : vector<78x64xf32>
    %c0_33 = arith.constant 0 : index
    %c20 = arith.constant 20 : index
    %c0_34 = arith.constant 0 : index
    %43 = vector.load %arg1[%c0_33, %c20, %c0_34] : memref<1x100x64xf32, #tpu.memory_space<vmem>>, vector<1x78x64xf32>
    %44 = vector.shape_cast %43 : vector<1x78x64xf32> to vector<78x64xf32>
    %45 = arith.truncf %44 : vector<78x64xf32> to vector<78x64xbf16>
    %c6 = arith.constant 6 : index
    %c0_35 = arith.constant 0 : index
    %c0_36 = arith.constant 0 : index
    %46 = vector.load %arg2[%c6, %c0_35, %c0_36] : memref<9x64x64xbf16, #tpu.memory_space<vmem>>, vector<1x64x64xbf16>
    %47 = vector.shape_cast %46 : vector<1x64x64xbf16> to vector<64x64xbf16>
    %cst_37 = arith.constant dense<0.000000e+00> : vector<78x64xf32>
    %48 = tpu.matmul %45, %47, %cst_37 {dimension_numbers = #tpu.dot_dimension_numbers<[1], [0], [0], [1], [0, 0, 1, 1], [], []>} : vector<78x64xbf16>, vector<64x64xbf16>, vector<78x64xf32> -> vector<78x64xf32>
    %49 = arith.addf %42, %48 : vector<78x64xf32>
    %c0_38 = arith.constant 0 : index
    %c21 = arith.constant 21 : index
    %c0_39 = arith.constant 0 : index
    %50 = vector.load %arg1[%c0_38, %c21, %c0_39] : memref<1x100x64xf32, #tpu.memory_space<vmem>>, vector<1x78x64xf32>
    %51 = vector.shape_cast %50 : vector<1x78x64xf32> to vector<78x64xf32>
    %52 = arith.truncf %51 : vector<78x64xf32> to vector<78x64xbf16>
    %c7 = arith.constant 7 : index
    %c0_40 = arith.constant 0 : index
    %c0_41 = arith.constant 0 : index
    %53 = vector.load %arg2[%c7, %c0_40, %c0_41] : memref<9x64x64xbf16, #tpu.memory_space<vmem>>, vector<1x64x64xbf16>
    %54 = vector.shape_cast %53 : vector<1x64x64xbf16> to vector<64x64xbf16>
    %cst_42 = arith.constant dense<0.000000e+00> : vector<78x64xf32>
    %55 = tpu.matmul %52, %54, %cst_42 {dimension_numbers = #tpu.dot_dimension_numbers<[1], [0], [0], [1], [0, 0, 1, 1], [], []>} : vector<78x64xbf16>, vector<64x64xbf16>, vector<78x64xf32> -> vector<78x64xf32>
    %56 = arith.addf %49, %55 : vector<78x64xf32>
    %c0_43 = arith.constant 0 : index
    %c22 = arith.constant 22 : index
    %c0_44 = arith.constant 0 : index
    %57 = vector.load %arg1[%c0_43, %c22, %c0_44] : memref<1x100x64xf32, #tpu.memory_space<vmem>>, vector<1x78x64xf32>
    %58 = vector.shape_cast %57 : vector<1x78x64xf32> to vector<78x64xf32>
    %59 = arith.truncf %58 : vector<78x64xf32> to vector<78x64xbf16>
    %c8 = arith.constant 8 : index
    %c0_45 = arith.constant 0 : index
    %c0_46 = arith.constant 0 : index
    %60 = vector.load %arg2[%c8, %c0_45, %c0_46] : memref<9x64x64xbf16, #tpu.memory_space<vmem>>, vector<1x64x64xbf16>
    %61 = vector.shape_cast %60 : vector<1x64x64xbf16> to vector<64x64xbf16>
    %cst_47 = arith.constant dense<0.000000e+00> : vector<78x64xf32>
    %62 = tpu.matmul %59, %61, %cst_47 {dimension_numbers = #tpu.dot_dimension_numbers<[1], [0], [0], [1], [0, 0, 1, 1], [], []>} : vector<78x64xbf16>, vector<64x64xbf16>, vector<78x64xf32> -> vector<78x64xf32>
    %63 = arith.addf %56, %62 : vector<78x64xf32>
    %c0_48 = arith.constant 0 : index
    %c11_49 = arith.constant 11 : index
    %c0_50 = arith.constant 0 : index
    %64 = vector.load %arg4[%c0_48, %c11_49, %c0_50] : memref<1x100x64xf32, #tpu.memory_space<vmem>>, vector<1x78x64xf32>
    %65 = vector.shape_cast %64 : vector<1x78x64xf32> to vector<78x64xf32>
    %66 = arith.addf %63, %65 : vector<78x64xf32>
    %c0_51 = arith.constant 0 : index
    %c0_52 = arith.constant 0 : index
    %67 = vector.load %arg3[%c0_51, %c0_52] : memref<1x64xf32, #tpu.memory_space<vmem>>, vector<1x64xf32>
    %68 = vector.broadcast %67 : vector<1x64xf32> to vector<78x64xf32>
    %69 = arith.addf %66, %68 : vector<78x64xf32>
    %cst_53 = arith.constant 0.000000e+00 : f32
    %70 = vector.broadcast %cst_53 : f32 to vector<11x64xf32>
    %c0_54 = arith.constant 0 : index
    %c0_55 = arith.constant 0 : index
    %c0_56 = arith.constant 0 : index
    %71 = vector.load %arg5[%c0_54, %c0_55, %c0_56] : memref<1x100x64xf32, #tpu.memory_space<vmem>>, vector<1x11x64xf32>
    %72 = vector.shape_cast %71 : vector<1x11x64xf32> to vector<11x64xf32>
    %73 = vector.shape_cast %70 : vector<11x64xf32> to vector<1x11x64xf32>
    tpu.vector_store %arg5[%c0_54, %c0_55, %c0_56], %73 {strides = array<i32>} : memref<1x100x64xf32, #tpu.memory_space<vmem>>, vector<1x11x64xf32>,
    %c0_57 = arith.constant 0 : index
    %c11_58 = arith.constant 11 : index
    %c0_59 = arith.constant 0 : index
    %74 = vector.load %arg5[%c0_57, %c11_58, %c0_59] : memref<1x100x64xf32, #tpu.memory_space<vmem>>, vector<1x78x64xf32>
    %75 = vector.shape_cast %74 : vector<1x78x64xf32> to vector<78x64xf32>
    %76 = vector.shape_cast %69 : vector<78x64xf32> to vector<1x78x64xf32>
    tpu.vector_store %arg5[%c0_57, %c11_58, %c0_59], %76 {strides = array<i32>} : memref<1x100x64xf32, #tpu.memory_space<vmem>>, vector<1x78x64xf32>,
    %c0_60 = arith.constant 0 : index
    %c89 = arith.constant 89 : index
    %c0_61 = arith.constant 0 : index
    %77 = vector.load %arg5[%c0_60, %c89, %c0_61] : memref<1x100x64xf32, #tpu.memory_space<vmem>>, vector<1x11x64xf32>
    %78 = vector.shape_cast %77 : vector<1x11x64xf32> to vector<11x64xf32>
    %79 = vector.shape_cast %70 : vector<11x64xf32> to vector<1x11x64xf32>
    tpu.vector_store %arg5[%c0_60, %c89, %c0_61], %79 {strides = array<i32>} : memref<1x100x64xf32, #tpu.memory_space<vmem>>, vector<1x11x64xf32>,
    return
  }
  func.func @transform_0(%arg0: i32) -> (i32, i32, i32) {
    %c0_i32 = arith.constant 0 : i32
    %c0_i32_0 = arith.constant 0 : i32
    %c0_i32_1 = arith.constant 0 : i32
    return %arg0, %c0_i32, %c0_i32_0 : i32, i32, i32
  }
  func.func @transform_1(%arg0: i32) -> (i32, i32, i32) {
    %c0_i32 = arith.constant 0 : i32
    %c0_i32_0 = arith.constant 0 : i32
    %c0_i32_1 = arith.constant 0 : i32
    %c0_i32_2 = arith.constant 0 : i32
    return %c0_i32, %c0_i32_0, %c0_i32_1 : i32, i32, i32
  }
  func.func @transform_2(%arg0: i32) -> (i32, i32) {
    %c0_i32 = arith.constant 0 : i32
    %c0_i32_0 = arith.constant 0 : i32
    %c0_i32_1 = arith.constant 0 : i32
    return %c0_i32, %c0_i32_0 : i32, i32
  }
  func.func @transform_3(%arg0: i32) -> (i32, i32, i32) {
    %c0_i32 = arith.constant 0 : i32
    %c0_i32_0 = arith.constant 0 : i32
    %c0_i32_1 = arith.constant 0 : i32
    return %arg0, %c0_i32, %c0_i32_0 : i32, i32, i32
  }
  func.func @transform_4(%arg0: i32) -> (i32, i32, i32) {
    %c0_i32 = arith.constant 0 : i32
    %c0_i32_0 = arith.constant 0 : i32
    %c0_i32_1 = arith.constant 0 : i32
    return %arg0, %c0_i32, %c0_i32_0 : i32, i32, i32
  }
}

</mosaic_0001>

<bundles_post_ra>
// kernel: down_block_forward.9
= control target key start
LH: loop header
LB: loop body
LE: loop exit
PB: predicated region body
PF: predicated region fallthrough
CT: control target
= control target key end

     0   :  { %s477_s15 = smov 0   ;;  %s561_s0 = inlined_call_operand.vmem [shape: f32[2,8,8,32], index: 0, kind: input, shape index: {}]   ;;  %s562_s1 = inlined_call_operand.vmem [shape: f32[2,8,8,32], index: 1, kind: input, shape index: {}]   ;;  %s563_s2 = inlined_call_operand.vmem [shape: f32[2,8,8,32], index: 2, kind: input, shape index: {}]   ;;  %s564_s3 = inlined_call_operand.vmem [shape: f32[2,8,8,32], index: 3, kind: input, shape index: {}]   ;;  %s565_s4 = inlined_call_operand.vmem [shape: f32[2,8,8,32], index: 4, kind: output, shape index: {}]  }
   0x1 LB: > { %s414_s16 = sadd.s32 4294967295, %s450_s15   ;;  %p418_p0 = scmp.ge.s32.totalorder %s450_s15, 1  ;;  %s450_s15 = sphi %s477_s15, %s14_s15  }
   0x2   : > { %p192_p1 = scmp.lt.s32.totalorder %s450_s15, 3 }
   0x4   : > { %p193_p2 = pnand %p418_p0, %p192_p1 }
   0x5   : > { %p233_p3 = scmp.lt.s32.totalorder (!%p193_p2), %s414_s16, 1  ;;  %vm314_vm0 = vcmask (!%p193_p2), 261120  }
   0x6   : > { %196 = sbr.rel (%p193_p2) target bundleno = 33 (0x21), region = 36 }
   0xd   : > { %s567_s16 = smov (!%p233_p3, %s414_s16), 1 }
   0xe   : > { %s431_s17 = sshll.u32 %s567_s16, 6 }
   0xf   : > { %s488_s20 = scalar_lea.vmem %s561_s0, %s431_s17  ;;  %s493_s23 = scalar_lea.vmem %s562_s1, %s431_s17 }
  0x10   : > { %s498_s26 = scalar_lea.vmem %s563_s2, %s431_s17  ;;  %s503_s29 = scalar_lea.vmem %s564_s3, %s431_s17  ;;  %v258_v0 = vld [vmem:[%s488_s20] sm:$0xff]  ;;  %v259_v2 = vld [vmem:[%s488_s20 + $0x8] sm:$0xff]  ;;  %v260_v11 = vld [vmem:[%s488_s20 + $0x10] sm:$0xff] }
  0x11   : > { %v266_v1 = vld [vmem:[%s493_s23] sm:$0xff]  ;;  %v267_v6 = vld [vmem:[%s493_s23 + $0x8] sm:$0xff]  ;;  %s517_s6 = scalar_lea.vmem %s565_s4, %s431_s17  ;;  %v268_v13 = vld [vmem:[%s493_s23 + $0x10] sm:$0xff] }
  0x12   : > { %v274_v3 = vmax.f32 %v258_v0, %v266_v1  ;;  %v282_v4 = vld [vmem:[%s498_s26] sm:$0xff]  ;;  %v275_v8 = vmax.f32 %v259_v2, %v267_v6  ;;  %v283_v9 = vld [vmem:[%s498_s26 + $0x8] sm:$0xff]  ;;  %v284_v14 = vld [vmem:[%s498_s26 + $0x10] sm:$0xff]  ;;  %v276_v17 = vmax.f32 %v260_v11, %v268_v13 }
  0x13   : > { %v290_v5 = vld [vmem:[%s503_s29] sm:$0xff]  ;;  %v291_v10 = vld [vmem:[%s503_s29 + $0x8] sm:$0xff]  ;;  %v292_v15 = vld [vmem:[%s503_s29 + $0x10] sm:$0xff] }
  0x14   : > { %v298_v7 = vmax.f32 %v282_v4, %v290_v5  ;;  %v299_v12 = vmax.f32 %v283_v9, %v291_v10  ;;  %v300_v18 = vmax.f32 %v284_v14, %v292_v15  ;;  %v261_v19 = vld [vmem:[%s488_s20 + $0x18] sm:$0xff]  ;;  %v262_v25 = vld [vmem:[%s488_s20 + $0x20] sm:$0xff]  ;;  %v263_v32 = vld [vmem:[%s488_s20 + $0x28] sm:$0xff] }
  0x15   : > { %v269_v20 = vld [vmem:[%s493_s23 + $0x18] sm:$0xff]  ;;  %v270_v26 = vld [vmem:[%s493_s23 + $0x20] sm:$0xff]  ;;  %v271_v34 = vld [vmem:[%s493_s23 + $0x28] sm:$0xff] }
  0x16   : > { %v306_v16 = vmax.f32 %v274_v3, %v298_v7  ;;  %v285_v21 = vld [vmem:[%s498_s26 + $0x18] sm:$0xff]  ;;  %v307_v22 = vmax.f32 %v275_v8, %v299_v12  ;;  %v277_v23 = vmax.f32 %v261_v19, %v269_v20  ;;  %v308_v27 = vmax.f32 %v276_v17, %v300_v18  ;;  %v286_v30 = vld [vmem:[%s498_s26 + $0x20] sm:$0xff]  ;;  %v287_v35 = vld [vmem:[%s498_s26 + $0x28] sm:$0xff] }
  0x17   : > { %v293_v24 = vld [vmem:[%s503_s29 + $0x18] sm:$0xff]  ;;  %v278_v29 = vmax.f32 %v262_v25, %v270_v26  ;;  %v294_v31 = vld [vmem:[%s503_s29 + $0x20] sm:$0xff]  ;;  %v295_v36 = vld [vmem:[%s503_s29 + $0x28] sm:$0xff]  ;;  %v279_v38 = vmax.f32 %v263_v32, %v271_v34 }
  0x18   : > { %315 = vst.msk [vmem:[%s517_s6] sm:$0xff] %vm314_vm0, %v306_v16  ;;  %v301_v28 = vmax.f32 %v285_v21, %v293_v24  ;;  %316 = vst.msk [vmem:[%s517_s6 + $0x8] sm:$0xff] %vm314_vm0, %v307_v22  ;;  %v302_v33 = vmax.f32 %v286_v30, %v294_v31  ;;  %v303_v39 = vmax.f32 %v287_v35, %v295_v36  ;;  %v264_v40 = vld [vmem:[%s488_s20 + $0x30] sm:$0xff]  ;;  %v265_v46 = vld [vmem:[%s488_s20 + $0x38] sm:$0xff] }
  0x19   : > { %317 = vst.msk [vmem:[%s517_s6 + $0x10] sm:$0xff] %vm314_vm0, %v308_v27  ;;  %v272_v41 = vld [vmem:[%s493_s23 + $0x30] sm:$0xff]  ;;  %v273_v47 = vld [vmem:[%s493_s23 + $0x38] sm:$0xff] }
  0x1a   : > { %v309_v37 = vmax.f32 %v277_v23, %v301_v28  ;;  %v288_v42 = vld [vmem:[%s498_s26 + $0x30] sm:$0xff]  ;;  %v310_v43 = vmax.f32 %v278_v29, %v302_v33  ;;  %v280_v44 = vmax.f32 %v264_v40, %v272_v41  ;;  %v311_v48 = vmax.f32 %v279_v38, %v303_v39  ;;  %v289_v51 = vld [vmem:[%s498_s26 + $0x38] sm:$0xff] }
  0x1b   : > { %v296_v45 = vld [vmem:[%s503_s29 + $0x30] sm:$0xff]  ;;  %v281_v50 = vmax.f32 %v265_v46, %v273_v47  ;;  %v297_v52 = vld [vmem:[%s503_s29 + $0x38] sm:$0xff] }
  0x1c   : > { %318 = vst.msk [vmem:[%s517_s6 + $0x18] sm:$0xff] %vm314_vm0, %v309_v37  ;;  %v304_v49 = vmax.f32 %v288_v42, %v296_v45  ;;  %319 = vst.msk [vmem:[%s517_s6 + $0x20] sm:$0xff] %vm314_vm0, %v310_v43  ;;  %v305_v53 = vmax.f32 %v289_v51, %v297_v52 }
  0x1d   : > { %320 = vst.msk [vmem:[%s517_s6 + $0x28] sm:$0xff] %vm314_vm0, %v311_v48 }
  0x1e   : > { %v312_v54 = vmax.f32 %v280_v44, %v304_v49  ;;  %v313_v55 = vmax.f32 %v281_v50, %v305_v53 }
  0x20   : > { %321 = vst.msk [vmem:[%s517_s6 + $0x30] sm:$0xff] %vm314_vm0, %v312_v54  ;;  %322 = vst.msk [vmem:[%s517_s6 + $0x38] sm:$0xff] %vm314_vm0, %v313_v55 }
  0x21 PF: > { %s14_s15 = sadd.s32 1, %s450_s15  }
  0x22   : > { %p11_p4 = scmp.ge.s32.totalorder %s14_s15, 4  }
  0x24   :  { %13 = sbr.rel (!%p11_p4) target bundleno = 1 (0x1), region = 75 }

// kernel: down_block_forward.10
= control target key start
LH: loop header
LB: loop body
LE: loop exit
PB: predicated region body
PF: predicated region fallthrough
CT: control target
= control target key end

     0   :  { %s1014_s18 = smov 0   ;;  %s1442_s0 = inlined_call_operand.vmem [shape: f32[2,100,32], index: 0, kind: input, shape index: {}]   ;;  %s1443_s1 = inlined_call_operand.vmem [shape: f32[100,1], index: 1, kind: input, shape index: {}]   ;;  %s1444_s2 = inlined_call_operand.vmem [shape: f32[32,32], index: 2, kind: input, shape index: {}]   ;;  %s1445_s3 = inlined_call_operand.vmem [shape: f32[1,32], index: 3, kind: input, shape index: {}]   ;;  %s1446_s4 = inlined_call_operand.vmem [shape: f32[1,32], index: 4, kind: input, shape index: {}]   ;;  %s1447_s5 = inlined_call_operand.vmem [shape: f32[2,100,32], index: 5, kind: output, shape index: {}]  }
   0x1 LB: > { %s833_s19 = sadd.s32 4294967295, %s978_s18   ;;  %p837_p0 = scmp.ge.s32.totalorder %s978_s18, 1  ;;  %s978_s18 = sphi %s1014_s18, %s15_s18  }
   0x2   : > { %p187_p1 = scmp.lt.s32.totalorder %s978_s18, 3 }
   0x4   : > { %p188_p2 = pnand %p837_p0, %p187_p1 }
   0x5   : > { %v240_v0 = vld [vmem:[%s1443_s1 + $0x10] sm:$0xff] (!%p188_p2)  ;;  %v238_v1 = vld [vmem:[%s1443_s1] sm:$0xff] (!%p188_p2)  ;;  %v241_v2 = vld [vmem:[%s1443_s1 + $0x18] sm:$0xff] (!%p188_p2)  ;;  %v980_v3 = vmov (!%p188_p2), 0   ;;  %v981_v30 = vmov (!%p188_p2), 0.0|0.0   ;;  %vm982_vm13 = vmmov (!%p188_p2), 0  }
   0x6   : > { %191 = sbr.rel (%p188_p2) target bundleno = 716 (0x2cc), region = 40  ;;  %917 = vset.pattern.permute.xlu1 (!%p188_p2), %v980_v3  ;;  %916 = vset.pattern.permute.xlu0 (!%p188_p2), %v980_v3  ;;  %vm253_vm0 = vcmp.gt.f32.partialorder (!%p188_p2), %v240_v0, 0.5  ;;  %vm251_vm1 = vcmp.gt.f32.partialorder (!%p188_p2), %v238_v1, 0.5  ;;  %vm254_vm2 = vcmp.gt.f32.partialorder (!%p188_p2), %v241_v2, 0.5  ;;  %v239_v4 = vld [vmem:[%s1443_s1 + $0x8] sm:$0xff] (!%p188_p2)  ;;  %v242_v8 = vld [vmem:[%s1443_s1 + $0x20] sm:$0xff] (!%p188_p2) }
   0x7   : > { %v266_v5 = vsel (!%p188_p2), %vm253_vm0, 1, %v980_v3  ;;  %v264_v6 = vsel (!%p188_p2), %vm251_vm1, 1, %v980_v3  ;;  %vm252_vm3 = vcmp.gt.f32.partialorder (!%p188_p2), %v239_v4, 0.5  ;;  %v243_v7 = vld [vmem:[%s1443_s1 + $0x28] sm:$0xff] (!%p188_p2)  ;;  %v267_v9 = vsel (!%p188_p2), %vm254_vm2, 1, %v980_v3  ;;  %v245_v11 = vld [vmem:[%s1443_s1 + $0x38] sm:$0xff] (!%p188_p2)  ;;  %891 = vmatprep.subr.bf16.mxu0 (!%p188_p2), %v981_v30  ;;  %897 = vmatprep.subr.bf16.mxu1 (!%p188_p2), %v981_v30 }
   0x8   : > { %284 = vperm.xlu1 (!%p188_p2), %917, %v266_v5   ;;  %278 = vperm.xlu0 (!%p188_p2), %916, %v264_v6   ;;  %v265_v10 = vsel (!%p188_p2), %vm252_vm3, 1, %v980_v3  ;;  %vm256_vm4 = vcmp.gt.f32.partialorder (!%p188_p2), %v243_v7, 0.5  ;;  %vm255_vm5 = vcmp.gt.f32.partialorder (!%p188_p2), %v242_v8, 0.5  ;;  %v244_v12 = vld [vmem:[%s1443_s1 + $0x30] sm:$0xff] (!%p188_p2)  ;;  %vm258_vm6 = vcmp.gt.f32.partialorder (!%p188_p2), %v245_v11, 0.5  ;;  %v247_v15 = vld [vmem:[%s1443_s1 + $0x48] sm:$0xff] (!%p188_p2) }
   0x9   : > { %v269_v13 = vsel (!%p188_p2), %vm256_vm4, 1, %v980_v3  ;;  %v268_v14 = vsel (!%p188_p2), %vm255_vm5, 1, %v980_v3  ;;  %vm257_vm7 = vcmp.gt.f32.partialorder (!%p188_p2), %v244_v12, 0.5  ;;  %v246_v16 = vld [vmem:[%s1443_s1 + $0x40] sm:$0xff] (!%p188_p2)  ;;  %v271_v17 = vsel (!%p188_p2), %vm258_vm6, 1, %v980_v3  ;;  %v249_v19 = vld [vmem:[%s1443_s1 + $0x58] sm:$0xff] (!%p188_p2) }
   0xa   : > { %v270_v18 = vsel (!%p188_p2), %vm257_vm7, 1, %v980_v3  ;;  %vm260_vm8 = vcmp.gt.f32.partialorder (!%p188_p2), %v247_v15, 0.5  ;;  %vm259_vm9 = vcmp.gt.f32.partialorder (!%p188_p2), %v246_v16, 0.5  ;;  %v248_v20 = vld [vmem:[%s1443_s1 + $0x50] sm:$0xff] (!%p188_p2)  ;;  %vm262_vm10 = vcmp.gt.f32.partialorder (!%p188_p2), %v249_v19, 0.5  ;;  %v375_v27 = vld [vmem:[%s1444_s2] sm:$0xff] (!%p188_p2) }
   0xb   : > { %v273_v21 = vsel (!%p188_p2), %vm260_vm8, 1, %v980_v3  ;;  %v272_v22 = vsel (!%p188_p2), %vm259_vm9, 1, %v980_v3  ;;  %vm261_vm11 = vcmp.gt.f32.partialorder (!%p188_p2), %v248_v20, 0.5  ;;  %v250_v23 = vld [vmem:[%s1443_s1 + $0x60] sm:$0xf] (!%p188_p2)  ;;  %v275_v24 = vsel (!%p188_p2), %vm262_vm10, 1, %v980_v3 }
   0xc   : > { %287 = vperm.xlu1 (!%p188_p2), %917, %v267_v9   ;;  %281 = vperm.xlu0 (!%p188_p2), %916, %v265_v10   ;;  %v274_v25 = vsel (!%p188_p2), %vm261_vm11, 1, %v980_v3  ;;  %vm263_vm12 = vcmp.gt.f32.partialorder (!%p188_p2), %v250_v23, 0.5  ;;  %v376_v28 = vld [vmem:[%s1444_s2 + $0x8] sm:$0xff] (!%p188_p2)  ;;  %v377_v31 = vld [vmem:[%s1444_s2 + $0x10] sm:$0xff] (!%p188_p2)  ;;  %v378_v32 = vld [vmem:[%s1444_s2 + $0x18] sm:$0xff] (!%p188_p2)  ;;  %v983_v34 = vmov (!%p188_p2), 0.0  }
   0xd   : > { %v276_v26 = vsel %vm263_vm12, 1, %v980_v3  ;;  %v892_v29 = vpack.c.bf16 %v376_v28, %v375_v27  ;;  %v895_v33 = vpack.c.bf16 %v378_v32, %v377_v31  ;;  %877 = vmatprep.mubr.msk.f32.mxu0 %vm982_vm13, %v983_v34  ;;  %888 = vmatprep.mubr.msk.f32.mxu1 %vm982_vm13, %v983_v34  ;;  %p215_p3 = scmp.lt.s32.totalorder %s833_s19, 1  ;;  %vm342_vm0 = vcmask 261120  }
   0xe   : > { %vm366_vm12 = vcmask 257024  }
   0xf   : > { %893 = vmatpush3.bf16.msra.mxu0 %v892_v29  ;;  %899 = vmatpush3.bf16.msra.mxu1 %v892_v29  ;;  %s1449_s19 = smov (!%p215_p3, %s833_s19), 1 }
  0x10   : > { %293 = vperm.xlu1 %917, %v269_v13   ;;  %290 = vperm.xlu0 %916, %v268_v14   ;;  %s903_s6 = smul.u32 104, %s1449_s19 }
  0x11   : > { %894 = vmatprep.subr.bf16.mxu0 %v981_v30  ;;  %900 = vmatprep.subr.bf16.mxu1 %v981_v30 }
  0x12   : > { %s1085_s9 = scalar_lea.vmem %s1442_s0, %s903_s6  ;;  %s1372_s16 = scalar_lea.vmem %s1447_s5, %s903_s6 }
  0x13   : > { %896 = vmatpush3.bf16.msra.mxu0 %v895_v33  ;;  %902 = vmatpush3.bf16.msra.mxu1 %v895_v33  ;;  %v1092_v37 = vld [vmem:[%s1085_s9] sm:$0xff]  ;;  %v1096_v38 = vld [vmem:[%s1085_s9 + $0x10] sm:$0xff]  ;;  %v1100_v39 = vld [vmem:[%s1085_s9 + $0x8] sm:$0xff] }
  0x14   : > { %299 = vperm.xlu1 %917, %v271_v17   ;;  %296 = vperm.xlu0 %916, %v270_v18   ;;  %v1110_v43 = vld [vmem:[%s1085_s9 + $0x18] sm:$0xff]  ;;  %v1123_v48 = vld [vmem:[%s1085_s9 + $0x20] sm:$0xff]  ;;  %v1134_v54 = vld [vmem:[%s1085_s9 + $0x28] sm:$0xff] }
  0x15   : > { %v1143_v58 = vld [vmem:[%s1085_s9 + $0x30] sm:$0xff]  ;;  %v1154_v0 = vld [vmem:[%s1085_s9 + $0x38] sm:$0xff]  ;;  %v1163_v4 = vld [vmem:[%s1085_s9 + $0x40] sm:$0xff] }
  0x16   : > { %v1174_v10 = vld [vmem:[%s1085_s9 + $0x48] sm:$0xff]  ;;  %v1183_v14 = vld [vmem:[%s1085_s9 + $0x50] sm:$0xff]  ;;  %v1194_v20 = vld [vmem:[%s1085_s9 + $0x58] sm:$0xff] }
  0x18   : > { %305 = vperm.xlu1 %917, %v273_v21   ;;  %302 = vperm.xlu0 %916, %v272_v22  }
  0x1c   : > { %311 = vperm.xlu1 %917, %v275_v24   ;;  %308 = vperm.xlu0 %916, %v274_v25   ;;  %v1203_v24 = vld [vmem:[%s1085_s9 + $0x60] sm:$0xf] }
  0x20   : > { %314 = vperm.xlu0 %916, %v276_v26  }
  0x87   : > { %v1087_v35 = vpop.permute.xlu1 %284  ;;  %v1089_v36 = vpop.permute.xlu0 %278 }
  0x88   : > { %vm316_vm14 = vcmp.eq.s32.totalorder %v1089_v36, 1  ;;  %vm318_vm15 = vcmp.eq.s32.totalorder %v1087_v35, 1 }
  0x89   : > { %v329_v40 = vsel %vm316_vm14, %v1092_v37, 0.0  ;;  %v331_v44 = vsel %vm318_vm15, %v1096_v38, 0.0 }
  0x8a   : > { %v343_v46 = vsel %vm342_vm0, %v329_v40, 0.0  ;;  %v346_v53 = vsel %vm342_vm0, %v331_v44, 0.0 }
  0x8b   : > { %v1105_v41 = vpop.permute.xlu1 %287  ;;  %v1107_v42 = vpop.permute.xlu0 %281 }
  0x8c   : > { %vm319_vm1 = vcmp.eq.s32.totalorder %v1105_v41, 1  ;;  %vm317_vm2 = vcmp.eq.s32.totalorder %v1107_v42, 1 }
  0x8d   : > { %v330_v45 = vsel %vm317_vm2, %v1100_v39, 0.0  ;;  %v332_v49 = vsel %vm319_vm1, %v1110_v43, 0.0 }
  0x8e   : > { %v344_v47 = vsel %vm342_vm0, %v330_v45, 0.0  ;;  %v348_v57 = vsel %vm342_vm0, %v332_v49, 0.0 }
  0x8f   : > { %v345_v50 = vadd.f32 %v344_v47, %v343_v46  ;;  %v1128_v51 = vpop.permute.xlu1 %293  ;;  %v1130_v52 = vpop.permute.xlu0 %290 }
  0x90   : > { %vm321_vm3 = vcmp.eq.s32.totalorder %v1128_v51, 1  ;;  %vm320_vm4 = vcmp.eq.s32.totalorder %v1130_v52, 1 }
  0x91   : > { %v347_v55 = vadd.f32 %v346_v53, %v345_v50  ;;  %v333_v56 = vsel %vm320_vm4, %v1123_v48, 0.0  ;;  %v334_v59 = vsel %vm321_vm3, %v1134_v54, 0.0  ;;  %v454_v50 = vlaneseq }
  0x92   : > { %v350_v63 = vsel %vm342_vm0, %v333_v56, 0.0  ;;  %v352_v3 = vsel %vm342_vm0, %v334_v59, 0.0 }
  0x93   : > { %v349_v60 = vadd.f32 %v348_v57, %v347_v55  ;;  %v1148_v61 = vpop.permute.xlu1 %299  ;;  %v1150_v62 = vpop.permute.xlu0 %296  ;;  %v1218_v53 = vshrl.u32 %v454_v50, 7 }
  0x94   : > { %vm323_vm5 = vcmp.eq.s32.totalorder %v1148_v61, 1  ;;  %vm322_vm6 = vcmp.eq.s32.totalorder %v1150_v62, 1 }
  0x95   : > { %v351_v1 = vadd.f32 %v350_v63, %v349_v60  ;;  %v335_v2 = vsel %vm322_vm6, %v1143_v58, 0.0  ;;  %v336_v5 = vsel %vm323_vm5, %v1154_v0, 0.0  ;;  %v456_v55 = vsub.s32 0, %v1218_v53 }
  0x96   : > { %v354_v9 = vsel %vm342_vm0, %v335_v2, 0.0  ;;  %v356_v13 = vsel %vm342_vm0, %v336_v5, 0.0 }
  0x97   : > { %v353_v6 = vadd.f32 %v352_v3, %v351_v1  ;;  %v1168_v7 = vpop.permute.xlu1 %305  ;;  %v1170_v8 = vpop.permute.xlu0 %302 }
  0x98   : > { %vm325_vm7 = vcmp.eq.s32.totalorder %v1168_v7, 1  ;;  %vm324_vm8 = vcmp.eq.s32.totalorder %v1170_v8, 1 }
  0x99   : > { %v355_v11 = vadd.f32 %v354_v9, %v353_v6  ;;  %v337_v12 = vsel %vm324_vm8, %v1163_v4, 0.0  ;;  %v338_v15 = vsel %vm325_vm7, %v1174_v10, 0.0 }
  0x9a   : > { %v358_v19 = vsel %vm342_vm0, %v337_v12, 0.0  ;;  %v360_v23 = vsel %vm342_vm0, %v338_v15, 0.0 }
  0x9b   : > { %v357_v16 = vadd.f32 %v356_v13, %v355_v11  ;;  %v1188_v17 = vpop.permute.xlu1 %311  ;;  %v1190_v18 = vpop.permute.xlu0 %308 }
  0x9c   : > { %vm327_vm9 = vcmp.eq.s32.totalorder %v1188_v17, 1  ;;  %vm326_vm10 = vcmp.eq.s32.totalorder %v1190_v18, 1 }
  0x9d   : > { %v359_v21 = vadd.f32 %v358_v19, %v357_v16  ;;  %v339_v22 = vsel %vm326_vm10, %v1183_v14, 0.0  ;;  %v340_v25 = vsel %vm327_vm9, %v1194_v20, 0.0 }
  0x9e   : > { %v362_v28 = vsel %vm342_vm0, %v339_v22, 0.0  ;;  %v364_v31 = vsel %vm342_vm0, %v340_v25, 0.0 }
  0x9f   : > { %v361_v26 = vadd.f32 %v360_v23, %v359_v21  ;;  %v1208_v27 = vpop.permute.xlu0 %314 }
  0xa0   : > { %vm328_vm11 = vcmp.eq.s32.totalorder %v1208_v27, 1 }
  0xa1   : > { %v363_v29 = vadd.f32 %v362_v28, %v361_v26  ;;  %v341_v30 = vsel %vm328_vm11, %v1203_v24, 0.0 }
  0xa2   : > { %v367_v33 = vsel %vm366_vm12, %v341_v30, 0.0 }
  0xa3   : > { %v365_v32 = vadd.f32 %v364_v31, %v363_v29 }
  0xa5   : > { %v368_v34 = vadd.f32 %v367_v33, %v365_v32 }
  0xa7   : > { %v369_v40 = vrot.slane %v368_v34, 4 }
  0xa9   : > { %v370_v44 = vadd.f32 %v369_v40, %v368_v34 }
  0xab   : > { %v371_v45 = vrot.slane %v370_v44, 2 }
  0xad   : > { %v372_v46 = vadd.f32 %v371_v45, %v370_v44 }
  0xaf   : > { %v373_v47 = vrot.slane %v372_v46, 1 }
  0xb1   : > { %v374_v49 = vadd.f32 %v373_v47, %v372_v46 }
  0xb3   : > { %878 = vmatmul.mubr.msk.f32.vlgmr.msra.gmra.mrb[0].mxu0 %vm342_vm0, %v374_v49 }
 0x186   : > { %v448_v56 = vpop.f32.mrb[0].mxu0 }
 0x187   : > { %v453_v57 = vmul.f32 0.015625, %v448_v56  ;;  %v879_v59 = vpop.f32.mrb[1].mxu0 }
 0x189   : > { %v457_v60 = vrot.slane %v453_v57, %v456_v55 }
 0x18b   : > { %v1224_v63 = vsub.f32 %v1092_v37, %v457_v60  ;;  %v1227_v1 = vsub.f32 %v1100_v39, %v457_v60  ;;  %v1230_v2 = vsub.f32 %v1096_v38, %v457_v60  ;;  %v1233_v3 = vsub.f32 %v1110_v43, %v457_v60 }
 0x18c   : > { %v1242_v37 = vsub.f32 %v1123_v48, %v457_v60  ;;  %v1248_v43 = vsub.f32 %v1134_v54, %v457_v60  ;;  %v1254_v13 = vsub.f32 %v1143_v58, %v457_v60  ;;  %v1262_v54 = vsub.f32 %v1154_v0, %v457_v60 }
 0x18d   : > { %v471_v5 = vsel %vm316_vm14, %v1224_v63, 0.0  ;;  %v472_v6 = vsel %vm317_vm2, %v1227_v1, 0.0  ;;  %v473_v39 = vsel %vm318_vm15, %v1230_v2, 0.0  ;;  %v474_v11 = vsel %vm319_vm1, %v1233_v3, 0.0 }
 0x18e   : > { %v484_v38 = vmul.f32 %v471_v5, %v471_v5  ;;  %v485_v9 = vmul.f32 %v472_v6, %v472_v6  ;;  %v486_v12 = vmul.f32 %v473_v39, %v473_v39  ;;  %v475_v48 = vsel %vm320_vm4, %v1242_v37, 0.0 }
 0x18f   : > { %v487_v16 = vmul.f32 %v474_v11, %v474_v11  ;;  %v476_v21 = vsel %vm321_vm3, %v1248_v43, 0.0  ;;  %v488_v23 = vmul.f32 %v475_v48, %v475_v48  ;;  %v1269_v25 = vsub.f32 %v1163_v4, %v457_v60 }
 0x190   : > { %v497_v15 = vsel %vm342_vm0, %v484_v38, 0.0  ;;  %v498_v19 = vsel %vm342_vm0, %v485_v9, 0.0  ;;  %v500_v58 = vsel %vm342_vm0, %v486_v12, 0.0  ;;  %v477_v26 = vsel %vm322_vm6, %v1254_v13, 0.0 }
 0x191   : > { %v499_v22 = vadd.f32 %v498_v19, %v497_v15  ;;  %v489_v29 = vmul.f32 %v476_v21, %v476_v21  ;;  %v502_v0 = vsel %vm342_vm0, %v487_v16, 0.0  ;;  %v1276_v30 = vsub.f32 %v1174_v10, %v457_v60 }
 0x192   : > { %v478_v31 = vsel %vm323_vm5, %v1262_v54, 0.0  ;;  %v490_v33 = vmul.f32 %v477_v26, %v477_v26  ;;  %v504_v4 = vsel %vm342_vm0, %v488_v23, 0.0  ;;  %v1283_v34 = vsub.f32 %v1183_v14, %v457_v60 }
 0x193   : > { %v501_v28 = vadd.f32 %v500_v58, %v499_v22  ;;  %v479_v40 = vsel %vm324_vm8, %v1269_v25, 0.0  ;;  %v491_v45 = vmul.f32 %v478_v31, %v478_v31  ;;  %v506_v10 = vsel %vm342_vm0, %v489_v29, 0.0 }
 0x194   : > { %v469_v46 = vsub.f32 %v1194_v20, %v457_v60  ;;  %v480_v47 = vsel %vm325_vm7, %v1276_v30, 0.0  ;;  %v492_v50 = vmul.f32 %v479_v40, %v479_v40  ;;  %v508_v56 = vsel %vm342_vm0, %v490_v33, 0.0 }
 0x195   : > { %v503_v32 = vadd.f32 %v502_v0, %v501_v28  ;;  %v470_v14 = vsub.f32 %v1203_v24, %v457_v60  ;;  %v481_v57 = vsel %vm326_vm10, %v1283_v34, 0.0  ;;  %v493_v5 = vmul.f32 %v480_v47, %v480_v47 }
 0x196   : > { %v510_v6 = vsel %vm342_vm0, %v491_v45, 0.0  ;;  %v482_v20 = vsel %vm327_vm9, %v469_v46, 0.0  ;;  %v494_v38 = vmul.f32 %v481_v57, %v481_v57  ;;  %v512_v9 = vsel %vm342_vm0, %v492_v50, 0.0  ;;  %v842_v57 = vld [vmem:[%s1445_s3] ss:$0 sm:$0xff] }
 0x197   : > { %v505_v44 = vadd.f32 %v504_v4, %v503_v32  ;;  %v483_v11 = vsel %vm328_vm11, %v470_v14, 0.0  ;;  %v495_v24 = vmul.f32 %v482_v20, %v482_v20  ;;  %v514_v60 = vsel %vm342_vm0, %v493_v5, 0.0 }
 0x198   : > { %v496_v15 = vmul.f32 %v483_v11, %v483_v11  ;;  %v516_v16 = vsel %vm342_vm0, %v494_v38, 0.0 }
 0x199   : > { %v507_v49 = vadd.f32 %v506_v10, %v505_v44  ;;  %v518_v21 = vsel %vm342_vm0, %v495_v24, 0.0 }
 0x19a   : > { %v520_v23 = vsel %vm366_vm12, %v496_v15, 0.0 }
 0x19b   : > { %v509_v59 = vadd.f32 %v508_v56, %v507_v49 }
 0x19d   : > { %v511_v39 = vadd.f32 %v510_v6, %v509_v59 }
 0x19f   : > { %v513_v12 = vadd.f32 %v512_v9, %v511_v39 }
 0x1a1   : > { %v515_v48 = vadd.f32 %v514_v60, %v513_v12 }
 0x1a3   : > { %v517_v19 = vadd.f32 %v516_v16, %v515_v48 }
 0x1a5   : > { %v519_v22 = vadd.f32 %v518_v21, %v517_v19 }
 0x1a7   : > { %v521_v58 = vadd.f32 %v520_v23, %v519_v22 }
 0x1a9   : > { %v522_v26 = vrot.slane %v521_v58, 4 }
 0x1ab   : > { %v523_v28 = vadd.f32 %v522_v26, %v521_v58 }
 0x1ad   : > { %v524_v29 = vrot.slane %v523_v28, 2 }
 0x1af   : > { %v525_v0 = vadd.f32 %v524_v29, %v523_v28 }
 0x1b1   : > { %v526_v31 = vrot.slane %v525_v0, 1 }
 0x1b3   : > { %v527_v32 = vadd.f32 %v526_v31, %v525_v0 }
 0x1b5   : > { %889 = vmatmul.mubr.msk.f32.vlgmr.msra.gmra.mrb[0].mxu1 %vm342_vm0, %v527_v32 }
 0x288   : > { %v597_v33 = vpop.f32.mrb[0].mxu1 }
 0x289   : > { %v601_v4 = vmul.f32 0.015625, %v597_v33  ;;  %v890_v40 = vpop.f32.mrb[1].mxu1 }
 0x28b   : > { %v602_v44 = vadd.f32 1e-06, %v601_v4 }
 0x28d   : > { %918 = vrsqrt.f32 %v602_v44 }
 0x297   : > { %v919_v45 = vpop.eup %918 }
 0x298   : > { %v607_v10 = vrot.slane %v919_v45, %v456_v55 }
 0x29a   : > { %v608_v47 = vmul.f32 %v607_v10, %v1224_v63  ;;  %v609_v49 = vmul.f32 %v607_v10, %v1227_v1  ;;  %v610_v50 = vmul.f32 %v607_v10, %v1230_v2  ;;  %v611_v56 = vmul.f32 %v607_v10, %v1233_v3  ;;  %v843_v2 = vld [vmem:[%s1446_s4] ss:$0 sm:$0xff] }
 0x29b   : > { %v612_v59 = vmul.f32 %v607_v10, %v1242_v37  ;;  %v613_v5 = vmul.f32 %v607_v10, %v1248_v43  ;;  %v614_v6 = vmul.f32 %v607_v10, %v1254_v13  ;;  %v615_v53 = vmul.f32 %v607_v10, %v1262_v54 }
 0x29c   : > { %v616_v55 = vmul.f32 %v607_v10, %v1269_v25  ;;  %v628_v63 = vmul.f32 %v842_v57, %v608_v47  ;;  %v629_v1 = vmul.f32 %v842_v57, %v609_v49  ;;  %v630_v20 = vmul.f32 %v842_v57, %v610_v50 }
 0x29d   : > { %v617_v3 = vmul.f32 %v607_v10, %v1276_v30  ;;  %v631_v39 = vmul.f32 %v842_v57, %v611_v56  ;;  %v632_v38 = vmul.f32 %v842_v57, %v612_v59  ;;  %v633_v37 = vmul.f32 %v842_v57, %v613_v5 }
 0x29e   : > { %v618_v43 = vmul.f32 %v607_v10, %v1283_v34  ;;  %v619_v9 = vmul.f32 %v607_v10, %v469_v46  ;;  %v634_v13 = vmul.f32 %v842_v57, %v614_v6  ;;  %v620_v11 = vmul.f32 %v607_v10, %v470_v14 }
 0x29f   : > { %v635_v54 = vmul.f32 %v842_v57, %v615_v53  ;;  %v1328_v12 = vadd.f32 %v843_v2, %v628_v63  ;;  %v1330_v25 = vadd.f32 %v843_v2, %v629_v1  ;;  %v636_v24 = vmul.f32 %v842_v57, %v616_v55 }
 0x2a0   : > { %v1332_v60 = vadd.f32 %v843_v2, %v630_v20  ;;  %v1334_v48 = vadd.f32 %v843_v2, %v631_v39  ;;  %v1336_v15 = vadd.f32 %v843_v2, %v632_v38  ;;  %v637_v30 = vmul.f32 %v842_v57, %v617_v3 }
 0x2a1   : > { %v1338_v16 = vadd.f32 %v843_v2, %v633_v37  ;;  %v638_v19 = vmul.f32 %v842_v57, %v618_v43  ;;  %v639_v34 = vmul.f32 %v842_v57, %v619_v9  ;;  %v1340_v46 = vadd.f32 %v843_v2, %v634_v13 }
 0x2a2   : > { %v844_v14 = vmul.f32 -1.442695, %v1328_v12  ;;  %v1343_v21 = vadd.f32 %v843_v2, %v635_v54  ;;  %v845_v22 = vmul.f32 -1.442695, %v1330_v25  ;;  %v846_v23 = vmul.f32 -1.442695, %v1332_v60 }
 0x2a3   : > { %v847_v58 = vmul.f32 -1.442695, %v1334_v48  ;;  %v640_v26 = vmul.f32 %v842_v57, %v620_v11  ;;  %v1348_v28 = vadd.f32 %v843_v2, %v636_v24  ;;  %v848_v29 = vmul.f32 -1.442695, %v1336_v15 }
 0x2a4   : > { %920 = vpow2.f32 %v844_v14  ;;  %v1351_v0 = vadd.f32 %v843_v2, %v637_v30  ;;  %v849_v31 = vmul.f32 -1.442695, %v1338_v16  ;;  %v1354_v32 = vadd.f32 %v843_v2, %v638_v19 }
 0x2a5   : > { %922 = vpow2.f32 %v845_v22  ;;  %v850_v33 = vmul.f32 -1.442695, %v1340_v46  ;;  %v1357_v4 = vadd.f32 %v843_v2, %v639_v34  ;;  %v851_v40 = vmul.f32 -1.442695, %v1343_v21 }
 0x2a6   : > { %924 = vpow2.f32 %v846_v23  ;;  %v1360_v44 = vadd.f32 %v843_v2, %v640_v26  ;;  %v852_v45 = vmul.f32 -1.442695, %v1348_v28  ;;  %v853_v10 = vmul.f32 -1.442695, %v1351_v0 }
 0x2a7   : > { %926 = vpow2.f32 %v847_v58  ;;  %v854_v47 = vmul.f32 -1.442695, %v1354_v32  ;;  %v855_v49 = vmul.f32 -1.442695, %v1357_v4 }
 0x2a8   : > { %928 = vpow2.f32 %v848_v29  ;;  %v856_v50 = vmul.f32 -1.442695, %v1360_v44 }
 0x2a9   : > { %930 = vpow2.f32 %v849_v31 }
 0x2aa   : > { %932 = vpow2.f32 %v850_v33 }
 0x2ab   : > { %934 = vpow2.f32 %v851_v40 }
 0x2ac   : > { %936 = vpow2.f32 %v852_v45 }
 0x2ad   : > { %938 = vpow2.f32 %v853_v10 }
 0x2ae   : > { %v921_v56 = vpop.eup %920  ;;  %940 = vpow2.f32 %v854_v47 }
 0x2af   : > { %v923_v57 = vpop.eup %922  ;;  %942 = vpow2.f32 %v855_v49  ;;  %v700_v59 = vadd.f32 1.0, %v921_v56 }
 0x2b0   : > { %v925_v5 = vpop.eup %924  ;;  %944 = vpow2.f32 %v856_v50  ;;  %v701_v6 = vadd.f32 1.0, %v923_v57 }
 0x2b1   : > { %v927_v53 = vpop.eup %926  ;;  %v702_v55 = vadd.f32 1.0, %v925_v5  ;;  %946 = vrcp.f32 %v700_v59 }
 0x2b2   : > { %v929_v63 = vpop.eup %928  ;;  %v703_v1 = vadd.f32 1.0, %v927_v53  ;;  %948 = vrcp.f32 %v701_v6 }
 0x2b3   : > { %v931_v20 = vpop.eup %930  ;;  %v704_v2 = vadd.f32 1.0, %v929_v63  ;;  %950 = vrcp.f32 %v702_v55 }
 0x2b4   : > { %v933_v3 = vpop.eup %932  ;;  %v705_v39 = vadd.f32 1.0, %v931_v20  ;;  %952 = vrcp.f32 %v703_v1 }
 0x2b5   : > { %v935_v38 = vpop.eup %934  ;;  %v706_v37 = vadd.f32 1.0, %v933_v3  ;;  %954 = vrcp.f32 %v704_v2 }
 0x2b6   : > { %v937_v43 = vpop.eup %936  ;;  %v707_v9 = vadd.f32 1.0, %v935_v38  ;;  %956 = vrcp.f32 %v705_v39 }
 0x2b7   : > { %v939_v13 = vpop.eup %938  ;;  %v708_v11 = vadd.f32 1.0, %v937_v43  ;;  %958 = vrcp.f32 %v706_v37 }
 0x2b8   : > { %v941_v54 = vpop.eup %940  ;;  %v709_v24 = vadd.f32 1.0, %v939_v13  ;;  %960 = vrcp.f32 %v707_v9 }
 0x2b9   : > { %v943_v30 = vpop.eup %942  ;;  %v710_v19 = vadd.f32 1.0, %v941_v54  ;;  %962 = vrcp.f32 %v708_v11 }
 0x2ba   : > { %v945_v34 = vpop.eup %944  ;;  %v711_v14 = vadd.f32 1.0, %v943_v30  ;;  %964 = vrcp.f32 %v709_v24 }
 0x2bb   : > { %v947_v22 = vpop.eup %946  ;;  %v712_v23 = vadd.f32 1.0, %v945_v34  ;;  %966 = vrcp.f32 %v710_v19 }
 0x2bc   : > { %v949_v58 = vpop.eup %948  ;;  %968 = vrcp.f32 %v711_v14  ;;  %v739_v26 = vmul.f32 %v947_v22, %v1328_v12 }
 0x2bd   : > { %v951_v29 = vpop.eup %950  ;;  %970 = vrcp.f32 %v712_v23  ;;  %v740_v31 = vmul.f32 %v949_v58, %v1330_v25 }
 0x2be   : > { %v953_v33 = vpop.eup %952  ;;  %v741_v40 = vmul.f32 %v951_v29, %v1332_v60  ;;  %v752_v45 = vsel %vm316_vm14, %v739_v26, 0.0 }
 0x2bf   : > { %v955_v10 = vpop.eup %954  ;;  %v742_v47 = vmul.f32 %v953_v33, %v1334_v48  ;;  %v753_v49 = vsel %vm317_vm2, %v740_v31, 0.0  ;;  %765 = vst.msk [vmem:[%s1372_s16] sm:$0xff] %vm342_vm0, %v752_v45 }
 0x2c0   : > { %v957_v12 = vpop.eup %956  ;;  %v743_v50 = vmul.f32 %v955_v10, %v1336_v15  ;;  %v754_v25 = vsel %vm318_vm15, %v741_v40, 0.0  ;;  %766 = vst.msk [vmem:[%s1372_s16 + $0x8] sm:$0xff] %vm342_vm0, %v753_v49 }
 0x2c1   : > { %v959_v36 = vpop.eup %958  ;;  %v744_v60 = vmul.f32 %v957_v12, %v1338_v16  ;;  %v755_v48 = vsel %vm319_vm1, %v742_v47, 0.0  ;;  %767 = vst.msk [vmem:[%s1372_s16 + $0x10] sm:$0xff] %vm342_vm0, %v754_v25 }
 0x2c2   : > { %v961_v42 = vpop.eup %960  ;;  %v745_v56 = vmul.f32 %v959_v36, %v1340_v46  ;;  %v756_v15 = vsel %vm320_vm4, %v743_v50, 0.0  ;;  %768 = vst.msk [vmem:[%s1372_s16 + $0x18] sm:$0xff] %vm342_vm0, %v755_v48 }
 0x2c3   : > { %v963_v35 = vpop.eup %962  ;;  %v746_v57 = vmul.f32 %v961_v42, %v1343_v21  ;;  %v757_v16 = vsel %vm321_vm3, %v744_v60, 0.0  ;;  %769 = vst.msk [vmem:[%s1372_s16 + $0x20] sm:$0xff] %vm342_vm0, %v756_v15 }
 0x2c4   : > { %v965_v41 = vpop.eup %964  ;;  %v747_v59 = vmul.f32 %v963_v35, %v1348_v28  ;;  %v758_v46 = vsel %vm322_vm6, %v745_v56, 0.0  ;;  %770 = vst.msk [vmem:[%s1372_s16 + $0x28] sm:$0xff] %vm342_vm0, %v757_v16 }
 0x2c5   : > { %v967_v52 = vpop.eup %966  ;;  %v748_v5 = vmul.f32 %v965_v41, %v1351_v0  ;;  %v759_v51 = vsel %vm323_vm5, %v746_v57, 0.0  ;;  %771 = vst.msk [vmem:[%s1372_s16 + $0x30] sm:$0xff] %vm342_vm0, %v758_v46 }
 0x2c6   : > { %v969_v21 = vpop.eup %968  ;;  %v749_v28 = vmul.f32 %v967_v52, %v1354_v32  ;;  %v760_v62 = vsel %vm324_vm8, %v747_v59, 0.0  ;;  %772 = vst.msk [vmem:[%s1372_s16 + $0x38] sm:$0xff] %vm342_vm0, %v759_v51 }
 0x2c7   : > { %v971_v6 = vpop.eup %970  ;;  %v750_v53 = vmul.f32 %v969_v21, %v1357_v4  ;;  %v761_v0 = vsel %vm325_vm7, %v748_v5, 0.0  ;;  %773 = vst.msk [vmem:[%s1372_s16 + $0x40] sm:$0xff] %vm342_vm0, %v760_v62 }
 0x2c8   : > { %v751_v61 = vmul.f32 %v971_v6, %v1360_v44  ;;  %v762_v55 = vsel %vm326_vm10, %v749_v28, 0.0  ;;  %774 = vst.msk [vmem:[%s1372_s16 + $0x48] sm:$0xff] %vm342_vm0, %v761_v0 }
 0x2c9   : > { %v763_v8 = vsel %vm327_vm9, %v750_v53, 0.0  ;;  %775 = vst.msk [vmem:[%s1372_s16 + $0x50] sm:$0xff] %vm342_vm0, %v762_v55 }
 0x2ca   : > { %v764_v32 = vsel %vm328_vm11, %v751_v61, 0.0  ;;  %776 = vst.msk [vmem:[%s1372_s16 + $0x58] sm:$0xff] %vm342_vm0, %v763_v8 }
 0x2cb   : > { %777 = vst.msk [vmem:[%s1372_s16 + $0x60] sm:$0xf] %vm366_vm12, %v764_v32 }
 0x2cc PF: > { %s15_s18 = sadd.s32 1, %s978_s18  }
 0x2cd   : > { %p12_p4 = scmp.ge.s32.totalorder %s15_s18, 4  }
 0x2cf   :  { %14 = sbr.rel (!%p12_p4) target bundleno = 1 (0x1), region = 70 }

// kernel: down_block_forward.12
= control target key start
LH: loop header
LB: loop body
LE: loop exit
PB: predicated region body
PF: predicated region fallthrough
CT: control target
= control target key end

     0   :  { %s1054_s18 = smov 0   ;;  %s1494_s0 = inlined_call_operand.vmem [shape: f32[2,100,64], index: 0, kind: input, shape index: {}]   ;;  %s1495_s1 = inlined_call_operand.vmem [shape: f32[100,1], index: 1, kind: input, shape index: {}]   ;;  %s1496_s2 = inlined_call_operand.vmem [shape: f32[64,64], index: 2, kind: input, shape index: {}]   ;;  %s1497_s3 = inlined_call_operand.vmem [shape: f32[1,64], index: 3, kind: input, shape index: {}]   ;;  %s1498_s4 = inlined_call_operand.vmem [shape: f32[1,64], index: 4, kind: input, shape index: {}]   ;;  %s1499_s5 = inlined_call_operand.vmem [shape: f32[2,100,64], index: 5, kind: output, shape index: {}]  }
   0x1 LB: > { %s837_s19 = sadd.s32 4294967295, %s1018_s18   ;;  %p841_p0 = scmp.ge.s32.totalorder %s1018_s18, 1  ;;  %s1018_s18 = sphi %s1054_s18, %s15_s18  }
   0x2   : > { %p187_p1 = scmp.lt.s32.totalorder %s1018_s18, 3 }
   0x4   : > { %p188_p2 = pnand %p841_p0, %p187_p1 }
   0x5   : > { %v240_v0 = vld [vmem:[%s1495_s1 + $0x10] sm:$0xff] (!%p188_p2)  ;;  %v238_v1 = vld [vmem:[%s1495_s1] sm:$0xff] (!%p188_p2)  ;;  %v241_v2 = vld [vmem:[%s1495_s1 + $0x18] sm:$0xff] (!%p188_p2)  ;;  %v1020_v3 = vmov (!%p188_p2), 0   ;;  %v1021_v30 = vmov (!%p188_p2), 0.0|0.0   ;;  %vm1022_vm13 = vmmov (!%p188_p2), 0  }
   0x6   : > { %191 = sbr.rel (%p188_p2) target bundleno = 716 (0x2cc), region = 40  ;;  %957 = vset.pattern.permute.xlu1 (!%p188_p2), %v1020_v3  ;;  %956 = vset.pattern.permute.xlu0 (!%p188_p2), %v1020_v3  ;;  %vm253_vm0 = vcmp.gt.f32.partialorder (!%p188_p2), %v240_v0, 0.5  ;;  %vm251_vm1 = vcmp.gt.f32.partialorder (!%p188_p2), %v238_v1, 0.5  ;;  %vm254_vm2 = vcmp.gt.f32.partialorder (!%p188_p2), %v241_v2, 0.5  ;;  %v239_v4 = vld [vmem:[%s1495_s1 + $0x8] sm:$0xff] (!%p188_p2)  ;;  %v242_v8 = vld [vmem:[%s1495_s1 + $0x20] sm:$0xff] (!%p188_p2) }
   0x7   : > { %v266_v5 = vsel (!%p188_p2), %vm253_vm0, 1, %v1020_v3  ;;  %v264_v6 = vsel (!%p188_p2), %vm251_vm1, 1, %v1020_v3  ;;  %vm252_vm3 = vcmp.gt.f32.partialorder (!%p188_p2), %v239_v4, 0.5  ;;  %v243_v7 = vld [vmem:[%s1495_s1 + $0x28] sm:$0xff] (!%p188_p2)  ;;  %v267_v9 = vsel (!%p188_p2), %vm254_vm2, 1, %v1020_v3  ;;  %v245_v11 = vld [vmem:[%s1495_s1 + $0x38] sm:$0xff] (!%p188_p2)  ;;  %919 = vmatprep.subr.bf16.mxu0 (!%p188_p2), %v1021_v30  ;;  %931 = vmatprep.subr.bf16.mxu1 (!%p188_p2), %v1021_v30 }
   0x8   : > { %284 = vperm.xlu1 (!%p188_p2), %957, %v266_v5   ;;  %278 = vperm.xlu0 (!%p188_p2), %956, %v264_v6   ;;  %v265_v10 = vsel (!%p188_p2), %vm252_vm3, 1, %v1020_v3  ;;  %vm256_vm4 = vcmp.gt.f32.partialorder (!%p188_p2), %v243_v7, 0.5  ;;  %vm255_vm5 = vcmp.gt.f32.partialorder (!%p188_p2), %v242_v8, 0.5  ;;  %v244_v12 = vld [vmem:[%s1495_s1 + $0x30] sm:$0xff] (!%p188_p2)  ;;  %vm258_vm6 = vcmp.gt.f32.partialorder (!%p188_p2), %v245_v11, 0.5  ;;  %v247_v15 = vld [vmem:[%s1495_s1 + $0x48] sm:$0xff] (!%p188_p2) }
   0x9   : > { %v269_v13 = vsel (!%p188_p2), %vm256_vm4, 1, %v1020_v3  ;;  %v268_v14 = vsel (!%p188_p2), %vm255_vm5, 1, %v1020_v3  ;;  %vm257_vm7 = vcmp.gt.f32.partialorder (!%p188_p2), %v244_v12, 0.5  ;;  %v246_v16 = vld [vmem:[%s1495_s1 + $0x40] sm:$0xff] (!%p188_p2)  ;;  %v271_v17 = vsel (!%p188_p2), %vm258_vm6, 1, %v1020_v3  ;;  %v249_v19 = vld [vmem:[%s1495_s1 + $0x58] sm:$0xff] (!%p188_p2) }
   0xa   : > { %v270_v18 = vsel (!%p188_p2), %vm257_vm7, 1, %v1020_v3  ;;  %vm260_vm8 = vcmp.gt.f32.partialorder (!%p188_p2), %v247_v15, 0.5  ;;  %vm259_vm9 = vcmp.gt.f32.partialorder (!%p188_p2), %v246_v16, 0.5  ;;  %v248_v20 = vld [vmem:[%s1495_s1 + $0x50] sm:$0xff] (!%p188_p2)  ;;  %vm262_vm10 = vcmp.gt.f32.partialorder (!%p188_p2), %v249_v19, 0.5  ;;  %v375_v27 = vld [vmem:[%s1496_s2] sm:$0xff] (!%p188_p2) }
   0xb   : > { %v273_v21 = vsel (!%p188_p2), %vm260_vm8, 1, %v1020_v3  ;;  %v272_v22 = vsel (!%p188_p2), %vm259_vm9, 1, %v1020_v3  ;;  %vm261_vm11 = vcmp.gt.f32.partialorder (!%p188_p2), %v248_v20, 0.5  ;;  %v250_v23 = vld [vmem:[%s1495_s1 + $0x60] sm:$0xf] (!%p188_p2)  ;;  %v275_v24 = vsel (!%p188_p2), %vm262_vm10, 1, %v1020_v3 }
   0xc   : > { %287 = vperm.xlu1 (!%p188_p2), %957, %v267_v9   ;;  %281 = vperm.xlu0 (!%p188_p2), %956, %v265_v10   ;;  %v274_v25 = vsel (!%p188_p2), %vm261_vm11, 1, %v1020_v3  ;;  %vm263_vm12 = vcmp.gt.f32.partialorder (!%p188_p2), %v250_v23, 0.5  ;;  %v376_v28 = vld [vmem:[%s1496_s2 + $0x8] sm:$0xff] (!%p188_p2)  ;;  %v377_v31 = vld [vmem:[%s1496_s2 + $0x10] sm:$0xff] (!%p188_p2)  ;;  %v378_v32 = vld [vmem:[%s1496_s2 + $0x18] sm:$0xff] (!%p188_p2)  ;;  %v1023_v40 = vmov (!%p188_p2), 0.0  }
   0xd   : > { %v276_v26 = vsel %vm263_vm12, 1, %v1020_v3  ;;  %v920_v29 = vpack.c.bf16 %v376_v28, %v375_v27  ;;  %v923_v33 = vpack.c.bf16 %v378_v32, %v377_v31  ;;  %v379_v34 = vld [vmem:[%s1496_s2 + $0x20] sm:$0xff]  ;;  %v380_v35 = vld [vmem:[%s1496_s2 + $0x28] sm:$0xff]  ;;  %v381_v37 = vld [vmem:[%s1496_s2 + $0x30] sm:$0xff]  ;;  %897 = vmatprep.mubr.msk.f32.mxu0 %vm1022_vm13, %v1023_v40  ;;  %916 = vmatprep.mubr.msk.f32.mxu1 %vm1022_vm13, %v1023_v40  ;;  %p215_p3 = scmp.lt.s32.totalorder %s837_s19, 1  ;;  %vm342_vm0 = vcmask 523264  }
   0xe   : > { %v926_v36 = vpack.c.bf16 %v380_v35, %v379_v34  ;;  %v382_v38 = vld [vmem:[%s1496_s2 + $0x38] sm:$0xff]  ;;  %vm366_vm12 = vcmask 519168  }
   0xf   : > { %921 = vmatpush3.bf16.msra.mxu0 %v920_v29  ;;  %933 = vmatpush3.bf16.msra.mxu1 %v920_v29  ;;  %v929_v39 = vpack.c.bf16 %v382_v38, %v381_v37  ;;  %s1501_s19 = smov (!%p215_p3, %s837_s19), 1 }
  0x10   : > { %293 = vperm.xlu1 %957, %v269_v13   ;;  %290 = vperm.xlu0 %956, %v268_v14   ;;  %s943_s14 = smul.u32 104, %s1501_s19 }
  0x11   : > { %922 = vmatprep.subr.bf16.mxu0 %v1021_v30  ;;  %934 = vmatprep.subr.bf16.mxu1 %v1021_v30 }
  0x12   : > { %s1137_s17 = scalar_lea.vmem %s1494_s0, %s943_s14  ;;  %s1424_s26 = scalar_lea.vmem %s1499_s5, %s943_s14 }
  0x13   : > { %924 = vmatpush3.bf16.msra.mxu0 %v923_v33  ;;  %936 = vmatpush3.bf16.msra.mxu1 %v923_v33  ;;  %v1144_v43 = vld [vmem:[%s1137_s17] sm:$0xff]  ;;  %v1148_v44 = vld [vmem:[%s1137_s17 + $0x10] sm:$0xff]  ;;  %v1152_v45 = vld [vmem:[%s1137_s17 + $0x8] sm:$0xff] }
  0x14   : > { %299 = vperm.xlu1 %957, %v271_v17   ;;  %296 = vperm.xlu0 %956, %v270_v18   ;;  %v1162_v49 = vld [vmem:[%s1137_s17 + $0x18] sm:$0xff]  ;;  %v1175_v54 = vld [vmem:[%s1137_s17 + $0x20] sm:$0xff]  ;;  %v1186_v60 = vld [vmem:[%s1137_s17 + $0x28] sm:$0xff] }
  0x15   : > { %925 = vmatprep.subr.bf16.mxu0 %v1021_v30  ;;  %937 = vmatprep.subr.bf16.mxu1 %v1021_v30  ;;  %v1195_v0 = vld [vmem:[%s1137_s17 + $0x30] sm:$0xff]  ;;  %v1206_v6 = vld [vmem:[%s1137_s17 + $0x38] sm:$0xff]  ;;  %v1215_v10 = vld [vmem:[%s1137_s17 + $0x40] sm:$0xff] }
  0x16   : > { %v1226_v16 = vld [vmem:[%s1137_s17 + $0x48] sm:$0xff]  ;;  %v1235_v20 = vld [vmem:[%s1137_s17 + $0x50] sm:$0xff] }
  0x17   : > { %927 = vmatpush3.bf16.msra.mxu0 %v926_v36  ;;  %939 = vmatpush3.bf16.msra.mxu1 %v926_v36 }
  0x18   : > { %305 = vperm.xlu1 %957, %v273_v21   ;;  %302 = vperm.xlu0 %956, %v272_v22  }
  0x19   : > { %928 = vmatprep.subr.bf16.mxu0 %v1021_v30  ;;  %940 = vmatprep.subr.bf16.mxu1 %v1021_v30  ;;  %v1255_v30 = vld [vmem:[%s1137_s17 + $0x60] sm:$0xf] }
  0x1b   : > { %930 = vmatpush3.bf16.msra.mxu0 %v929_v39  ;;  %942 = vmatpush3.bf16.msra.mxu1 %v929_v39 }
  0x1c   : > { %311 = vperm.xlu1 %957, %v275_v24   ;;  %308 = vperm.xlu0 %956, %v274_v25  }
  0x20   : > { %314 = vperm.xlu0 %956, %v276_v26   ;;  %v1246_v26 = vld [vmem:[%s1137_s17 + $0x58] sm:$0xff] }
  0x87   : > { %v1139_v41 = vpop.permute.xlu1 %284  ;;  %v1141_v42 = vpop.permute.xlu0 %278 }
  0x88   : > { %vm316_vm14 = vcmp.eq.s32.totalorder %v1141_v42, 1  ;;  %vm318_vm15 = vcmp.eq.s32.totalorder %v1139_v41, 1 }
  0x89   : > { %v329_v46 = vsel %vm316_vm14, %v1144_v43, 0.0  ;;  %v331_v50 = vsel %vm318_vm15, %v1148_v44, 0.0 }
  0x8a   : > { %v343_v52 = vsel %vm342_vm0, %v329_v46, 0.0  ;;  %v346_v59 = vsel %vm342_vm0, %v331_v50, 0.0 }
  0x8b   : > { %v1157_v47 = vpop.permute.xlu1 %287  ;;  %v1159_v48 = vpop.permute.xlu0 %281 }
  0x8c   : > { %vm319_vm1 = vcmp.eq.s32.totalorder %v1157_v47, 1  ;;  %vm317_vm2 = vcmp.eq.s32.totalorder %v1159_v48, 1 }
  0x8d   : > { %v330_v51 = vsel %vm317_vm2, %v1152_v45, 0.0  ;;  %v332_v55 = vsel %vm319_vm1, %v1162_v49, 0.0 }
  0x8e   : > { %v344_v53 = vsel %vm342_vm0, %v330_v51, 0.0  ;;  %v348_v63 = vsel %vm342_vm0, %v332_v55, 0.0 }
  0x8f   : > { %v345_v56 = vadd.f32 %v344_v53, %v343_v52  ;;  %v1180_v57 = vpop.permute.xlu1 %293  ;;  %v1182_v58 = vpop.permute.xlu0 %290 }
  0x90   : > { %vm321_vm3 = vcmp.eq.s32.totalorder %v1180_v57, 1  ;;  %vm320_vm4 = vcmp.eq.s32.totalorder %v1182_v58, 1 }
  0x91   : > { %v347_v61 = vadd.f32 %v346_v59, %v345_v56  ;;  %v333_v62 = vsel %vm320_vm4, %v1175_v54, 0.0  ;;  %v334_v1 = vsel %vm321_vm3, %v1186_v60, 0.0  ;;  %v458_v56 = vlaneseq }
  0x92   : > { %v350_v5 = vsel %vm342_vm0, %v333_v62, 0.0  ;;  %v352_v9 = vsel %vm342_vm0, %v334_v1, 0.0 }
  0x93   : > { %v349_v2 = vadd.f32 %v348_v63, %v347_v61  ;;  %v1200_v3 = vpop.permute.xlu1 %299  ;;  %v1202_v4 = vpop.permute.xlu0 %296  ;;  %v1270_v59 = vshrl.u32 %v458_v56, 7 }
  0x94   : > { %vm323_vm5 = vcmp.eq.s32.totalorder %v1200_v3, 1  ;;  %vm322_vm6 = vcmp.eq.s32.totalorder %v1202_v4, 1 }
  0x95   : > { %v351_v7 = vadd.f32 %v350_v5, %v349_v2  ;;  %v335_v8 = vsel %vm322_vm6, %v1195_v0, 0.0  ;;  %v336_v11 = vsel %vm323_vm5, %v1206_v6, 0.0  ;;  %v460_v61 = vsub.s32 0, %v1270_v59 }
  0x96   : > { %v354_v15 = vsel %vm342_vm0, %v335_v8, 0.0  ;;  %v356_v19 = vsel %vm342_vm0, %v336_v11, 0.0 }
  0x97   : > { %v353_v12 = vadd.f32 %v352_v9, %v351_v7  ;;  %v1220_v13 = vpop.permute.xlu1 %305  ;;  %v1222_v14 = vpop.permute.xlu0 %302 }
  0x98   : > { %vm325_vm7 = vcmp.eq.s32.totalorder %v1220_v13, 1  ;;  %vm324_vm8 = vcmp.eq.s32.totalorder %v1222_v14, 1 }
  0x99   : > { %v355_v17 = vadd.f32 %v354_v15, %v353_v12  ;;  %v337_v18 = vsel %vm324_vm8, %v1215_v10, 0.0  ;;  %v338_v21 = vsel %vm325_vm7, %v1226_v16, 0.0 }
  0x9a   : > { %v358_v25 = vsel %vm342_vm0, %v337_v18, 0.0  ;;  %v360_v29 = vsel %vm342_vm0, %v338_v21, 0.0 }
  0x9b   : > { %v357_v22 = vadd.f32 %v356_v19, %v355_v17  ;;  %v1240_v23 = vpop.permute.xlu1 %311  ;;  %v1242_v24 = vpop.permute.xlu0 %308 }
  0x9c   : > { %vm327_vm9 = vcmp.eq.s32.totalorder %v1240_v23, 1  ;;  %vm326_vm10 = vcmp.eq.s32.totalorder %v1242_v24, 1 }
  0x9d   : > { %v359_v27 = vadd.f32 %v358_v25, %v357_v22  ;;  %v339_v28 = vsel %vm326_vm10, %v1235_v20, 0.0  ;;  %v340_v31 = vsel %vm327_vm9, %v1246_v26, 0.0 }
  0x9e   : > { %v362_v34 = vsel %vm342_vm0, %v339_v28, 0.0  ;;  %v364_v37 = vsel %vm342_vm0, %v340_v31, 0.0 }
  0x9f   : > { %v361_v32 = vadd.f32 %v360_v29, %v359_v27  ;;  %v1260_v33 = vpop.permute.xlu0 %314 }
  0xa0   : > { %vm328_vm11 = vcmp.eq.s32.totalorder %v1260_v33, 1 }
  0xa1   : > { %v363_v35 = vadd.f32 %v362_v34, %v361_v32  ;;  %v341_v36 = vsel %vm328_vm11, %v1255_v30, 0.0 }
  0xa2   : > { %v367_v39 = vsel %vm366_vm12, %v341_v36, 0.0 }
  0xa3   : > { %v365_v38 = vadd.f32 %v364_v37, %v363_v35 }
  0xa5   : > { %v368_v40 = vadd.f32 %v367_v39, %v365_v38 }
  0xa7   : > { %v369_v46 = vrot.slane %v368_v40, 4 }
  0xa9   : > { %v370_v50 = vadd.f32 %v369_v46, %v368_v40 }
  0xab   : > { %v371_v51 = vrot.slane %v370_v50, 2 }
  0xad   : > { %v372_v52 = vadd.f32 %v371_v51, %v370_v50 }
  0xaf   : > { %v373_v53 = vrot.slane %v372_v52, 1 }
  0xb1   : > { %v374_v55 = vadd.f32 %v373_v53, %v372_v52 }
  0xb3   : > { %898 = vmatmul.mubr.msk.f32.vlgmr.msra.gmra.mrb[0].mxu0 %vm342_vm0, %v374_v55 }
 0x186   : > { %v452_v62 = vpop.f32.mrb[0].mxu0 }
 0x187   : > { %v457_v63 = vmul.f32 0.0078125, %v452_v62  ;;  %v899_v1 = vpop.f32.mrb[1].mxu0 }
 0x189   : > { %v461_v2 = vrot.slane %v457_v63, %v460_v61 }
 0x18b   : > { %v1276_v5 = vsub.f32 %v1144_v43, %v461_v2  ;;  %v1279_v7 = vsub.f32 %v1152_v45, %v461_v2  ;;  %v1282_v8 = vsub.f32 %v1148_v44, %v461_v2  ;;  %v1285_v9 = vsub.f32 %v1162_v49, %v461_v2 }
 0x18c   : > { %v1294_v43 = vsub.f32 %v1175_v54, %v461_v2  ;;  %v1300_v49 = vsub.f32 %v1186_v60, %v461_v2  ;;  %v1306_v19 = vsub.f32 %v1195_v0, %v461_v2  ;;  %v1314_v60 = vsub.f32 %v1206_v6, %v461_v2 }
 0x18d   : > { %v475_v11 = vsel %vm316_vm14, %v1276_v5, 0.0  ;;  %v476_v12 = vsel %vm317_vm2, %v1279_v7, 0.0  ;;  %v477_v45 = vsel %vm318_vm15, %v1282_v8, 0.0  ;;  %v478_v17 = vsel %vm319_vm1, %v1285_v9, 0.0 }
 0x18e   : > { %v488_v44 = vmul.f32 %v475_v11, %v475_v11  ;;  %v489_v15 = vmul.f32 %v476_v12, %v476_v12  ;;  %v490_v18 = vmul.f32 %v477_v45, %v477_v45  ;;  %v479_v54 = vsel %vm320_vm4, %v1294_v43, 0.0 }
 0x18f   : > { %v491_v22 = vmul.f32 %v478_v17, %v478_v17  ;;  %v480_v27 = vsel %vm321_vm3, %v1300_v49, 0.0  ;;  %v492_v29 = vmul.f32 %v479_v54, %v479_v54  ;;  %v1321_v31 = vsub.f32 %v1215_v10, %v461_v2 }
 0x190   : > { %v501_v21 = vsel %vm342_vm0, %v488_v44, 0.0  ;;  %v502_v25 = vsel %vm342_vm0, %v489_v15, 0.0  ;;  %v504_v0 = vsel %vm342_vm0, %v490_v18, 0.0  ;;  %v481_v32 = vsel %vm322_vm6, %v1306_v19, 0.0 }
 0x191   : > { %v503_v28 = vadd.f32 %v502_v25, %v501_v21  ;;  %v493_v35 = vmul.f32 %v480_v27, %v480_v27  ;;  %v506_v6 = vsel %vm342_vm0, %v491_v22, 0.0  ;;  %v1328_v36 = vsub.f32 %v1226_v16, %v461_v2 }
 0x192   : > { %v482_v37 = vsel %vm323_vm5, %v1314_v60, 0.0  ;;  %v494_v39 = vmul.f32 %v481_v32, %v481_v32  ;;  %v508_v10 = vsel %vm342_vm0, %v492_v29, 0.0  ;;  %v1335_v40 = vsub.f32 %v1235_v20, %v461_v2 }
 0x193   : > { %v505_v34 = vadd.f32 %v504_v0, %v503_v28  ;;  %v483_v46 = vsel %vm324_vm8, %v1321_v31, 0.0  ;;  %v495_v51 = vmul.f32 %v482_v37, %v482_v37  ;;  %v510_v16 = vsel %vm342_vm0, %v493_v35, 0.0 }
 0x194   : > { %v473_v52 = vsub.f32 %v1246_v26, %v461_v2  ;;  %v484_v53 = vsel %vm325_vm7, %v1328_v36, 0.0  ;;  %v496_v56 = vmul.f32 %v483_v46, %v483_v46  ;;  %v512_v62 = vsel %vm342_vm0, %v494_v39, 0.0 }
 0x195   : > { %v507_v38 = vadd.f32 %v506_v6, %v505_v34  ;;  %v474_v20 = vsub.f32 %v1255_v30, %v461_v2  ;;  %v485_v63 = vsel %vm326_vm10, %v1335_v40, 0.0  ;;  %v497_v11 = vmul.f32 %v484_v53, %v484_v53 }
 0x196   : > { %v514_v12 = vsel %vm342_vm0, %v495_v51, 0.0  ;;  %v486_v26 = vsel %vm327_vm9, %v473_v52, 0.0  ;;  %v498_v44 = vmul.f32 %v485_v63, %v485_v63  ;;  %v516_v15 = vsel %vm342_vm0, %v496_v56, 0.0  ;;  %v846_v63 = vld [vmem:[%s1497_s3] ss:$0 sm:$0xff] }
 0x197   : > { %v509_v50 = vadd.f32 %v508_v10, %v507_v38  ;;  %v487_v17 = vsel %vm328_vm11, %v474_v20, 0.0  ;;  %v499_v30 = vmul.f32 %v486_v26, %v486_v26  ;;  %v518_v2 = vsel %vm342_vm0, %v497_v11, 0.0 }
 0x198   : > { %v500_v21 = vmul.f32 %v487_v17, %v487_v17  ;;  %v520_v22 = vsel %vm342_vm0, %v498_v44, 0.0 }
 0x199   : > { %v511_v55 = vadd.f32 %v510_v16, %v509_v50  ;;  %v522_v27 = vsel %vm342_vm0, %v499_v30, 0.0 }
 0x19a   : > { %v524_v29 = vsel %vm366_vm12, %v500_v21, 0.0 }
 0x19b   : > { %v513_v1 = vadd.f32 %v512_v62, %v511_v55 }
 0x19d   : > { %v515_v45 = vadd.f32 %v514_v12, %v513_v1 }
 0x19f   : > { %v517_v18 = vadd.f32 %v516_v15, %v515_v45 }
 0x1a1   : > { %v519_v54 = vadd.f32 %v518_v2, %v517_v18 }
 0x1a3   : > { %v521_v25 = vadd.f32 %v520_v22, %v519_v54 }
 0x1a5   : > { %v523_v28 = vadd.f32 %v522_v27, %v521_v25 }
 0x1a7   : > { %v525_v0 = vadd.f32 %v524_v29, %v523_v28 }
 0x1a9   : > { %v526_v32 = vrot.slane %v525_v0, 4 }
 0x1ab   : > { %v527_v34 = vadd.f32 %v526_v32, %v525_v0 }
 0x1ad   : > { %v528_v35 = vrot.slane %v527_v34, 2 }
 0x1af   : > { %v529_v6 = vadd.f32 %v528_v35, %v527_v34 }
 0x1b1   : > { %v530_v37 = vrot.slane %v529_v6, 1 }
 0x1b3   : > { %v531_v38 = vadd.f32 %v530_v37, %v529_v6 }
 0x1b5   : > { %917 = vmatmul.mubr.msk.f32.vlgmr.msra.gmra.mrb[0].mxu1 %vm342_vm0, %v531_v38 }
 0x288   : > { %v601_v39 = vpop.f32.mrb[0].mxu1 }
 0x289   : > { %v605_v10 = vmul.f32 0.0078125, %v601_v39  ;;  %v918_v46 = vpop.f32.mrb[1].mxu1 }
 0x28b   : > { %v606_v50 = vadd.f32 1e-06, %v605_v10 }
 0x28d   : > { %958 = vrsqrt.f32 %v606_v50 }
 0x297   : > { %v959_v51 = vpop.eup %958 }
 0x298   : > { %v611_v16 = vrot.slane %v959_v51, %v460_v61 }
 0x29a   : > { %v612_v53 = vmul.f32 %v611_v16, %v1276_v5  ;;  %v613_v55 = vmul.f32 %v611_v16, %v1279_v7  ;;  %v614_v56 = vmul.f32 %v611_v16, %v1282_v8  ;;  %v615_v62 = vmul.f32 %v611_v16, %v1285_v9  ;;  %v847_v8 = vld [vmem:[%s1498_s4] ss:$0 sm:$0xff] }
 0x29b   : > { %v616_v1 = vmul.f32 %v611_v16, %v1294_v43  ;;  %v617_v11 = vmul.f32 %v611_v16, %v1300_v49  ;;  %v618_v12 = vmul.f32 %v611_v16, %v1306_v19  ;;  %v619_v59 = vmul.f32 %v611_v16, %v1314_v60 }
 0x29c   : > { %v620_v61 = vmul.f32 %v611_v16, %v1321_v31  ;;  %v632_v5 = vmul.f32 %v846_v63, %v612_v53  ;;  %v633_v7 = vmul.f32 %v846_v63, %v613_v55  ;;  %v634_v26 = vmul.f32 %v846_v63, %v614_v56 }
 0x29d   : > { %v621_v9 = vmul.f32 %v611_v16, %v1328_v36  ;;  %v635_v45 = vmul.f32 %v846_v63, %v615_v62  ;;  %v636_v44 = vmul.f32 %v846_v63, %v616_v1  ;;  %v637_v43 = vmul.f32 %v846_v63, %v617_v11 }
 0x29e   : > { %v622_v49 = vmul.f32 %v611_v16, %v1335_v40  ;;  %v623_v15 = vmul.f32 %v611_v16, %v473_v52  ;;  %v638_v19 = vmul.f32 %v846_v63, %v618_v12  ;;  %v624_v17 = vmul.f32 %v611_v16, %v474_v20 }
 0x29f   : > { %v639_v60 = vmul.f32 %v846_v63, %v619_v59  ;;  %v1380_v18 = vadd.f32 %v847_v8, %v632_v5  ;;  %v1382_v31 = vadd.f32 %v847_v8, %v633_v7  ;;  %v640_v30 = vmul.f32 %v846_v63, %v620_v61 }
 0x2a0   : > { %v1384_v2 = vadd.f32 %v847_v8, %v634_v26  ;;  %v1386_v54 = vadd.f32 %v847_v8, %v635_v45  ;;  %v1388_v21 = vadd.f32 %v847_v8, %v636_v44  ;;  %v641_v36 = vmul.f32 %v846_v63, %v621_v9 }
 0x2a1   : > { %v1390_v22 = vadd.f32 %v847_v8, %v637_v43  ;;  %v642_v25 = vmul.f32 %v846_v63, %v622_v49  ;;  %v643_v40 = vmul.f32 %v846_v63, %v623_v15  ;;  %v1392_v52 = vadd.f32 %v847_v8, %v638_v19 }
 0x2a2   : > { %v848_v20 = vmul.f32 -1.442695, %v1380_v18  ;;  %v1395_v27 = vadd.f32 %v847_v8, %v639_v60  ;;  %v849_v28 = vmul.f32 -1.442695, %v1382_v31  ;;  %v850_v29 = vmul.f32 -1.442695, %v1384_v2 }
 0x2a3   : > { %v851_v0 = vmul.f32 -1.442695, %v1386_v54  ;;  %v644_v32 = vmul.f32 %v846_v63, %v624_v17  ;;  %v1400_v34 = vadd.f32 %v847_v8, %v640_v30  ;;  %v852_v35 = vmul.f32 -1.442695, %v1388_v21 }
 0x2a4   : > { %960 = vpow2.f32 %v848_v20  ;;  %v1403_v6 = vadd.f32 %v847_v8, %v641_v36  ;;  %v853_v37 = vmul.f32 -1.442695, %v1390_v22  ;;  %v1406_v38 = vadd.f32 %v847_v8, %v642_v25 }
 0x2a5   : > { %962 = vpow2.f32 %v849_v28  ;;  %v854_v39 = vmul.f32 -1.442695, %v1392_v52  ;;  %v1409_v10 = vadd.f32 %v847_v8, %v643_v40  ;;  %v855_v46 = vmul.f32 -1.442695, %v1395_v27 }
 0x2a6   : > { %964 = vpow2.f32 %v850_v29  ;;  %v1412_v50 = vadd.f32 %v847_v8, %v644_v32  ;;  %v856_v51 = vmul.f32 -1.442695, %v1400_v34  ;;  %v857_v16 = vmul.f32 -1.442695, %v1403_v6 }
 0x2a7   : > { %966 = vpow2.f32 %v851_v0  ;;  %v858_v53 = vmul.f32 -1.442695, %v1406_v38  ;;  %v859_v55 = vmul.f32 -1.442695, %v1409_v10 }
 0x2a8   : > { %968 = vpow2.f32 %v852_v35  ;;  %v860_v56 = vmul.f32 -1.442695, %v1412_v50 }
 0x2a9   : > { %970 = vpow2.f32 %v853_v37 }
 0x2aa   : > { %972 = vpow2.f32 %v854_v39 }
 0x2ab   : > { %974 = vpow2.f32 %v855_v46 }
 0x2ac   : > { %976 = vpow2.f32 %v856_v51 }
 0x2ad   : > { %978 = vpow2.f32 %v857_v16 }
 0x2ae   : > { %v961_v62 = vpop.eup %960  ;;  %980 = vpow2.f32 %v858_v53 }
 0x2af   : > { %v963_v63 = vpop.eup %962  ;;  %982 = vpow2.f32 %v859_v55  ;;  %v704_v1 = vadd.f32 1.0, %v961_v62 }
 0x2b0   : > { %v965_v11 = vpop.eup %964  ;;  %984 = vpow2.f32 %v860_v56  ;;  %v705_v12 = vadd.f32 1.0, %v963_v63 }
 0x2b1   : > { %v967_v59 = vpop.eup %966  ;;  %v706_v61 = vadd.f32 1.0, %v965_v11  ;;  %986 = vrcp.f32 %v704_v1 }
 0x2b2   : > { %v969_v5 = vpop.eup %968  ;;  %v707_v7 = vadd.f32 1.0, %v967_v59  ;;  %988 = vrcp.f32 %v705_v12 }
 0x2b3   : > { %v971_v26 = vpop.eup %970  ;;  %v708_v8 = vadd.f32 1.0, %v969_v5  ;;  %990 = vrcp.f32 %v706_v61 }
 0x2b4   : > { %v973_v9 = vpop.eup %972  ;;  %v709_v45 = vadd.f32 1.0, %v971_v26  ;;  %992 = vrcp.f32 %v707_v7 }
 0x2b5   : > { %v975_v44 = vpop.eup %974  ;;  %v710_v43 = vadd.f32 1.0, %v973_v9  ;;  %994 = vrcp.f32 %v708_v8 }
 0x2b6   : > { %v977_v49 = vpop.eup %976  ;;  %v711_v15 = vadd.f32 1.0, %v975_v44  ;;  %996 = vrcp.f32 %v709_v45 }
 0x2b7   : > { %v979_v19 = vpop.eup %978  ;;  %v712_v17 = vadd.f32 1.0, %v977_v49  ;;  %998 = vrcp.f32 %v710_v43 }
 0x2b8   : > { %v981_v60 = vpop.eup %980  ;;  %v713_v30 = vadd.f32 1.0, %v979_v19  ;;  %1000 = vrcp.f32 %v711_v15 }
 0x2b9   : > { %v983_v36 = vpop.eup %982  ;;  %v714_v25 = vadd.f32 1.0, %v981_v60  ;;  %1002 = vrcp.f32 %v712_v17 }
 0x2ba   : > { %v985_v40 = vpop.eup %984  ;;  %v715_v20 = vadd.f32 1.0, %v983_v36  ;;  %1004 = vrcp.f32 %v713_v30 }
 0x2bb   : > { %v987_v28 = vpop.eup %986  ;;  %v716_v29 = vadd.f32 1.0, %v985_v40  ;;  %1006 = vrcp.f32 %v714_v25 }
 0x2bc   : > { %v989_v0 = vpop.eup %988  ;;  %1008 = vrcp.f32 %v715_v20  ;;  %v743_v32 = vmul.f32 %v987_v28, %v1380_v18 }
 0x2bd   : > { %v991_v35 = vpop.eup %990  ;;  %1010 = vrcp.f32 %v716_v29  ;;  %v744_v37 = vmul.f32 %v989_v0, %v1382_v31 }
 0x2be   : > { %v993_v39 = vpop.eup %992  ;;  %v745_v46 = vmul.f32 %v991_v35, %v1384_v2  ;;  %v756_v51 = vsel %vm316_vm14, %v743_v32, 0.0 }
 0x2bf   : > { %v995_v16 = vpop.eup %994  ;;  %v746_v53 = vmul.f32 %v993_v39, %v1386_v54  ;;  %v757_v55 = vsel %vm317_vm2, %v744_v37, 0.0  ;;  %769 = vst.msk [vmem:[%s1424_s26] sm:$0xff] %vm342_vm0, %v756_v51 }
 0x2c0   : > { %v997_v18 = vpop.eup %996  ;;  %v747_v56 = vmul.f32 %v995_v16, %v1388_v21  ;;  %v758_v31 = vsel %vm318_vm15, %v745_v46, 0.0  ;;  %770 = vst.msk [vmem:[%s1424_s26 + $0x8] sm:$0xff] %vm342_vm0, %v757_v55 }
 0x2c1   : > { %v999_v42 = vpop.eup %998  ;;  %v748_v2 = vmul.f32 %v997_v18, %v1390_v22  ;;  %v759_v54 = vsel %vm319_vm1, %v746_v53, 0.0  ;;  %771 = vst.msk [vmem:[%s1424_s26 + $0x10] sm:$0xff] %vm342_vm0, %v758_v31 }
 0x2c2   : > { %v1001_v48 = vpop.eup %1000  ;;  %v749_v62 = vmul.f32 %v999_v42, %v1392_v52  ;;  %v760_v21 = vsel %vm320_vm4, %v747_v56, 0.0  ;;  %772 = vst.msk [vmem:[%s1424_s26 + $0x18] sm:$0xff] %vm342_vm0, %v759_v54 }
 0x2c3   : > { %v1003_v41 = vpop.eup %1002  ;;  %v750_v63 = vmul.f32 %v1001_v48, %v1395_v27  ;;  %v761_v22 = vsel %vm321_vm3, %v748_v2, 0.0  ;;  %773 = vst.msk [vmem:[%s1424_s26 + $0x20] sm:$0xff] %vm342_vm0, %v760_v21 }
 0x2c4   : > { %v1005_v47 = vpop.eup %1004  ;;  %v751_v1 = vmul.f32 %v1003_v41, %v1400_v34  ;;  %v762_v52 = vsel %vm322_vm6, %v749_v62, 0.0  ;;  %774 = vst.msk [vmem:[%s1424_s26 + $0x28] sm:$0xff] %vm342_vm0, %v761_v22 }
 0x2c5   : > { %v1007_v58 = vpop.eup %1006  ;;  %v752_v11 = vmul.f32 %v1005_v47, %v1403_v6  ;;  %v763_v57 = vsel %vm323_vm5, %v750_v63, 0.0  ;;  %775 = vst.msk [vmem:[%s1424_s26 + $0x30] sm:$0xff] %vm342_vm0, %v762_v52 }
 0x2c6   : > { %v1009_v27 = vpop.eup %1008  ;;  %v753_v34 = vmul.f32 %v1007_v58, %v1406_v38  ;;  %v764_v4 = vsel %vm324_vm8, %v751_v1, 0.0  ;;  %776 = vst.msk [vmem:[%s1424_s26 + $0x38] sm:$0xff] %vm342_vm0, %v763_v57 }
 0x2c7   : > { %v1011_v12 = vpop.eup %1010  ;;  %v754_v59 = vmul.f32 %v1009_v27, %v1409_v10  ;;  %v765_v6 = vsel %vm325_vm7, %v752_v11, 0.0  ;;  %777 = vst.msk [vmem:[%s1424_s26 + $0x40] sm:$0xff] %vm342_vm0, %v764_v4 }
 0x2c8   : > { %v755_v3 = vmul.f32 %v1011_v12, %v1412_v50  ;;  %v766_v61 = vsel %vm326_vm10, %v753_v34, 0.0  ;;  %778 = vst.msk [vmem:[%s1424_s26 + $0x48] sm:$0xff] %vm342_vm0, %v765_v6 }
 0x2c9   : > { %v767_v14 = vsel %vm327_vm9, %v754_v59, 0.0  ;;  %779 = vst.msk [vmem:[%s1424_s26 + $0x50] sm:$0xff] %vm342_vm0, %v766_v61 }
 0x2ca   : > { %v768_v38 = vsel %vm328_vm11, %v755_v3, 0.0  ;;  %780 = vst.msk [vmem:[%s1424_s26 + $0x58] sm:$0xff] %vm342_vm0, %v767_v14 }
 0x2cb   : > { %781 = vst.msk [vmem:[%s1424_s26 + $0x60] sm:$0xf] %vm366_vm12, %v768_v38 }
 0x2cc PF: > { %s15_s18 = sadd.s32 1, %s1018_s18  }
 0x2cd   : > { %p12_p4 = scmp.ge.s32.totalorder %s15_s18, 4  }
 0x2cf   :  { %14 = sbr.rel (!%p12_p4) target bundleno = 1 (0x1), region = 70 }

// kernel: down_block_forward.11
= control target key start
LH: loop header
LB: loop body
LE: loop exit
PB: predicated region body
PF: predicated region fallthrough
CT: control target
= control target key end

     0   :  { %s1858_s12 = smov 0   ;;  %s2225_s0 = inlined_call_operand.vmem [shape: f32[2,100,32], index: 0, kind: input, shape index: {}]   ;;  %s2226_s1 = inlined_call_operand.vmem [shape: bf16[9,32,64], index: 1, kind: input, shape index: {}]   ;;  %s2227_s2 = inlined_call_operand.vmem [shape: f32[1,64], index: 2, kind: input, shape index: {}]   ;;  %s2228_s3 = inlined_call_operand.vmem [shape: f32[2,100,64], index: 3, kind: output, shape index: {}]  }
   0x1 LB: > { %s1411_s13 = sadd.s32 4294967295, %s1834_s12   ;;  %p1415_p0 = scmp.ge.s32.totalorder %s1834_s12, 1  ;;  %s1834_s12 = sphi %s1858_s12, %s13_s12  }
   0x2   : > { %p137_p1 = scmp.lt.s32.totalorder %s1834_s12, 3 }
   0x4   : > { %p138_p2 = pnand %p1415_p0, %p137_p1 }
   0x5   : > { %v1810_v0 = vld [vmem:[%s2226_s1 + $0x10] sm:$0xff] (!%p138_p2)   ;;  %v1836_v1 = vmov (!%p138_p2), 0.0   ;;  %v1811_v2 = vld [vmem:[%s2226_s1 + $0x18] sm:$0xff] (!%p138_p2)   ;;  %p161_p3 = scmp.lt.s32.totalorder (!%p138_p2), %s1411_s13, 1  ;;  %vm1837_vm0 = vmmov (!%p138_p2), 0   ;;  %v1812_v3 = vld [vmem:[%s2226_s1 + $0x20] sm:$0xff] (!%p138_p2)  }
   0x6   : > { %141 = sbr.rel (%p138_p2) target bundleno = 415 (0x19f), region = 32  ;;  %1579 = vmatprep.subr.bf16.mxu0 (!%p138_p2), %v1836_v1  ;;  %1795 = vmatprep.subr.bf16.mxu1 (!%p138_p2), %v1836_v1  ;;  %vm223_vm1 = vcmask (!%p138_p2), 261120   ;;  %v1813_v10 = vld [vmem:[%s2226_s1] sm:$0xff] (!%p138_p2)   ;;  %v1815_v13 = vld [vmem:[%s2226_s1 + $0x28] sm:$0xff] (!%p138_p2)   ;;  %v1816_v25 = vld [vmem:[%s2226_s1 + $0x30] sm:$0xff] (!%p138_p2)   ;;  %vm1339_vm2 = vcmask (!%p138_p2), 523264  }
   0x7   : > { %1580 = vmatpush3.bf16.msra.mxu0 (!%p138_p2), %v1810_v0  ;;  %1797 = vmatpush3.bf16.msra.mxu1 (!%p138_p2), %v1810_v0  ;;  %v1814_v16 = vld [vmem:[%s2226_s1 + $0x8] sm:$0xff] (!%p138_p2)   ;;  %v1818_v30 = vld [vmem:[%s2226_s1 + $0x38] sm:$0xff] (!%p138_p2)   ;;  %v1817_v33 = vld [vmem:[%s2226_s1 + $0x40] sm:$0xff] (!%p138_p2)   ;;  %vm1341_vm3 = vcmask (!%p138_p2), 518144   ;;  %vm1352_vm4 = vcmask (!%p138_p2), 521216  }
   0x8   : > { %1581 = vmatprep.subr.bf16.mxu0 (!%p138_p2), %v1836_v1  ;;  %1796 = vmatprep.subr.bf16.mxu1 (!%p138_p2), %v1836_v1  ;;  %v1819_v36 = vld [vmem:[%s2226_s1 + $0x48] sm:$0xff] (!%p138_p2)   ;;  %v1820_v57 = vld [vmem:[%s2226_s1 + $0x50] sm:$0xff] (!%p138_p2)   ;;  %v1822_v60 = vld [vmem:[%s2226_s1 + $0x58] sm:$0xff] (!%p138_p2)  }
   0x9   : > { %1583 = vmatprep.mubr.msk.bf16.mxu0 (!%p138_p2), %vm1837_vm0, %v1836_v1  ;;  %1595 = vmatprep.mubr.msk.bf16.mxu1 (!%p138_p2), %vm1837_vm0, %v1836_v1  ;;  %v1821_v63 = vld [vmem:[%s2226_s1 + $0x60] sm:$0xff] (!%p138_p2)  }
   0xb   : > { %1582 = vmatpush3.bf16.msra.mxu0 (!%p138_p2), %v1811_v2  ;;  %1798 = vmatpush3.bf16.msra.mxu1 (!%p138_p2), %v1811_v2 }
   0xc   : > { %1627 = vmatprep.subr.bf16.mxu0 (!%p138_p2), %v1836_v1  ;;  %1603 = vmatprep.subr.bf16.mxu1 (!%p138_p2), %v1836_v1 }
   0xd   : > { %s2230_s13 = smov (!%p161_p3, %s1411_s13), 1 }
   0xe   : > { %s1799_s18 = smul.u32 104, %s2230_s13 }
  0x10   : > { %s1890_s21 = scalar_lea.vmem %s2225_s0, %s1799_s18  ;;  %s2168_s5 = scalar_lea.vmem %s2228_s3, %s1799_s18 }
  0x11   : > { %v191_v4 = vld [vmem:[%s1890_s21 + $0x1] sm:$0xff]  ;;  %v192_v5 = vld [vmem:[%s1890_s21 + $0x9] sm:$0xff]  ;;  %v197_v6 = vld [vmem:[%s1890_s21 + $0x31] sm:$0xff]  ;;  %1340 = vst.msk [vmem:[%s2168_s5] sm:$0xff] %vm1339_vm2, %v1836_v1 }
  0x12   : > { %v201_v7 = vpack.c.bf16 %v192_v5, %v191_v4  ;;  %v198_v8 = vld [vmem:[%s1890_s21 + $0x39] sm:$0xff]  ;;  %v193_v11 = vld [vmem:[%s1890_s21 + $0x11] sm:$0xff]  ;;  %v199_v14 = vld [vmem:[%s1890_s21 + $0x41] sm:$0xff]  ;;  %1342 = vst.msk [vmem:[%s2168_s5 + $0x8] sm:$0x7] %vm1341_vm3, %v1836_v1 }
  0x13   : > { %v204_v9 = vpack.c.bf16 %v198_v8, %v197_v6  ;;  %v194_v12 = vld [vmem:[%s1890_s21 + $0x19] sm:$0xff]  ;;  %v200_v15 = vld [vmem:[%s1890_s21 + $0x49] sm:$0x3f]  ;;  %v195_v19 = vld [vmem:[%s1890_s21 + $0x21] sm:$0xff]  ;;  %1354 = vst.msk [vmem:[%s2168_s5 + $0x59] sm:$0xff] %vm1339_vm2, %v1836_v1 }
  0x14   : > { %1584 = vmatmul.mubr.msk.bf16.vlgmr.msra.gmra.mrb[0].mxu0 %vm223_vm1, %v201_v7  ;;  %v202_v17 = vpack.c.bf16 %v194_v12, %v193_v11  ;;  %v205_v18 = vpack.c.bf16 %v200_v15, %v199_v14  ;;  %v196_v20 = vld [vmem:[%s1890_s21 + $0x29] sm:$0xff]  ;;  %v172_v21 = vld [vmem:[%s1890_s21] sm:$0xff]  ;;  %v175_v29 = vld [vmem:[%s1890_s21 + $0x18] sm:$0xff]  ;;  %1355 = vst.msk [vmem:[%s2168_s5 + $0x61] sm:$0x7] %vm1341_vm3, %v1836_v1 }
  0x15   : > { %1596 = vmatmul.mubr.msk.bf16.vlgmr.msra.gmra.mrb[0].mxu1 %vm223_vm1, %v204_v9  ;;  %1628 = vmatpush3.bf16.msra.mxu0 %v1812_v3  ;;  %v173_v22 = vld [vmem:[%s1890_s21 + $0x8] sm:$0xff]  ;;  %v203_v23 = vpack.c.bf16 %v196_v20, %v195_v19  ;;  %v174_v26 = vld [vmem:[%s1890_s21 + $0x10] sm:$0xff]  ;;  %v415_v35 = vld [vmem:[%s1890_s21 + $0x1a] sm:$0xff] }
  0x16   : > { %1587 = vmatprep.mubr.msk.bf16.mxu0 %vm1837_vm0, %v1836_v1  ;;  %1599 = vmatprep.mubr.msk.bf16.mxu1 %vm1837_vm0, %v1836_v1  ;;  %v182_v24 = vpack.c.bf16 %v173_v22, %v172_v21  ;;  %v412_v27 = vld [vmem:[%s1890_s21 + $0x2] sm:$0xff]  ;;  %v413_v28 = vld [vmem:[%s1890_s21 + $0xa] sm:$0xff]  ;;  %v183_v32 = vpack.c.bf16 %v175_v29, %v174_v26  ;;  %v414_v34 = vld [vmem:[%s1890_s21 + $0x12] sm:$0xff] }
  0x17   : > { %1604 = vmatpush3.bf16.msra.mxu1 %v1813_v10  ;;  %1629 = vmatprep.subr.bf16.mxu0 %v1836_v1  ;;  %v422_v31 = vpack.c.bf16 %v413_v28, %v412_v27  ;;  %v176_v37 = vld [vmem:[%s1890_s21 + $0x20] sm:$0xff]  ;;  %v177_v38 = vld [vmem:[%s1890_s21 + $0x28] sm:$0xff]  ;;  %v423_v39 = vpack.c.bf16 %v415_v35, %v414_v34  ;;  %v178_v43 = vld [vmem:[%s1890_s21 + $0x30] sm:$0xff]  ;;  %v552_v56 = vpack.c.bf16 %v414_v34, %v413_v28 }
  0x18   : > { %1605 = vmatprep.subr.bf16.mxu1 %v1836_v1  ;;  %v184_v40 = vpack.c.bf16 %v177_v38, %v176_v37  ;;  %v416_v41 = vld [vmem:[%s1890_s21 + $0x22] sm:$0xff]  ;;  %v417_v42 = vld [vmem:[%s1890_s21 + $0x2a] sm:$0xff]  ;;  %v179_v44 = vld [vmem:[%s1890_s21 + $0x38] sm:$0xff] }
  0x19   : > { %1630 = vmatpush3.bf16.msra.mxu0 %v1815_v13  ;;  %v424_v45 = vpack.c.bf16 %v417_v42, %v416_v41  ;;  %v185_v46 = vpack.c.bf16 %v179_v44, %v178_v43  ;;  %v418_v47 = vld [vmem:[%s1890_s21 + $0x32] sm:$0xff]  ;;  %v419_v48 = vld [vmem:[%s1890_s21 + $0x3a] sm:$0xff]  ;;  %v181_v50 = vld [vmem:[%s1890_s21 + $0x48] sm:$0x3f]  ;;  %v553_v62 = vpack.c.bf16 %v416_v41, %v415_v35 }
  0x1a   : > { %1675 = vmatprep.subr.bf16.mxu0 %v1836_v1  ;;  %v180_v49 = vld [vmem:[%s1890_s21 + $0x40] sm:$0xff]  ;;  %v425_v51 = vpack.c.bf16 %v419_v48, %v418_v47  ;;  %v421_v54 = vld [vmem:[%s1890_s21 + $0x4a] sm:$0x3f]  ;;  %v673_v59 = vld [vmem:[%s1890_s21 + $0x13] sm:$0xff]  ;;  %v554_v5 = vpack.c.bf16 %v418_v47, %v417_v42 }
  0x1b   : > { %1606 = vmatpush3.bf16.msra.mxu1 %v1814_v16  ;;  %v186_v52 = vpack.c.bf16 %v181_v50, %v180_v49  ;;  %v420_v53 = vld [vmem:[%s1890_s21 + $0x42] sm:$0xff]  ;;  %v672_v58 = vld [vmem:[%s1890_s21 + $0xb] sm:$0xff]  ;;  %v677_v7 = vld [vmem:[%s1890_s21 + $0x33] sm:$0xff] }
  0x1c   : > { %1588 = vmatmul.mubr.msk.bf16.gmra.mrb[4].mxu0 %vm223_vm1, %v202_v17  ;;  %1651 = vmatprep.subr.bf16.mxu1 %v1836_v1  ;;  %v426_v55 = vpack.c.bf16 %v421_v54, %v420_v53  ;;  %v682_v61 = vpack.c.bf16 %v673_v59, %v672_v58  ;;  %v674_v0 = vld [vmem:[%s1890_s21 + $0x1b] sm:$0xff]  ;;  %v675_v2 = vld [vmem:[%s1890_s21 + $0x23] sm:$0xff]  ;;  %v676_v6 = vld [vmem:[%s1890_s21 + $0x2b] sm:$0xff]  ;;  %v555_v9 = vpack.c.bf16 %v420_v53, %v419_v48 }
  0x1d   : > { %1600 = vmatmul.mubr.msk.bf16.gmra.mrb[4].mxu1 %vm223_vm1, %v205_v18  ;;  %1591 = vmatprep.mubr.msk.bf16.mxu0 %vm1837_vm0, %v1836_v1  ;;  %v1823_v3 = vld [vmem:[%s2226_s1 + $0x68] sm:$0xff]   ;;  %v683_v4 = vpack.c.bf16 %v675_v2, %v674_v0  ;;  %v684_v8 = vpack.c.bf16 %v677_v7, %v676_v6  ;;  %v678_v10 = vld [vmem:[%s1890_s21 + $0x3b] sm:$0xff]  ;;  %v551_v13 = vld [vmem:[%s1890_s21 + $0x52] sm:$0x3f] }
  0x1e   : > { %1607 = vmatprep.mubr.msk.bf16.mxu1 %vm1837_vm0, %v1836_v1  ;;  %v679_v11 = vld [vmem:[%s1890_s21 + $0x43] sm:$0xff]  ;;  %v680_v16 = vld [vmem:[%s1890_s21 + $0x4b] sm:$0xff]  ;;  %v681_v17 = vld [vmem:[%s1890_s21 + $0x53] sm:$0x3f] }
  0x1f   : > { %v550_v12 = vld [vmem:[%s1890_s21 + $0x4a] sm:$0xff]  ;;  %v685_v14 = vpack.c.bf16 %v679_v11, %v678_v10  ;;  %v803_v19 = vld [vmem:[%s1890_s21 + $0x14] sm:$0xff]  ;;  %v686_v20 = vpack.c.bf16 %v681_v17, %v680_v16  ;;  %v1825_v28 = vld [vmem:[%s2226_s1 + $0x80] sm:$0xff]  }
  0x20   : > { %v556_v15 = vpack.c.bf16 %v551_v13, %v550_v12  ;;  %v802_v18 = vld [vmem:[%s1890_s21 + $0xc] sm:$0xff]  ;;  %v808_v34 = vld [vmem:[%s1890_s21 + $0x3c] sm:$0xff]  ;;  %v809_v35 = vld [vmem:[%s1890_s21 + $0x44] sm:$0xff] }
  0x21   : > { %v812_v21 = vpack.c.bf16 %v803_v19, %v802_v18  ;;  %v1824_v22 = vld [vmem:[%s2226_s1 + $0x70] sm:$0xff]   ;;  %v815_v37 = vpack.c.bf16 %v809_v35, %v808_v34  ;;  %v941_v43 = vld [vmem:[%s1890_s21 + $0x5c] sm:$0x3f]  ;;  %v1064_v50 = vld [vmem:[%s1890_s21 + $0x25] sm:$0xff] }
  0x22   : > { %v806_v29 = vld [vmem:[%s1890_s21 + $0x2c] sm:$0xff]  ;;  %v940_v42 = vld [vmem:[%s1890_s21 + $0x54] sm:$0xff]  ;;  %v1193_v49 = vld [vmem:[%s1890_s21 + $0x1e] sm:$0xff] }
  0x23   : > { %v810_v38 = vld [vmem:[%s1890_s21 + $0x4c] sm:$0xff]  ;;  %v1062_v44 = vld [vmem:[%s1890_s21 + $0x15] sm:$0xff]  ;;  %v1071_v6 = vld [vmem:[%s1890_s21 + $0x5d] sm:$0x3f] }
  0x24   : > { %1592 = vmatmul.mubr.msk.bf16.gmra.mrb[8].mxu0 %vm223_vm1, %v203_v23  ;;  %v804_v23 = vld [vmem:[%s1890_s21 + $0x1c] sm:$0xff]  ;;  %v1194_v54 = vld [vmem:[%s1890_s21 + $0x26] sm:$0xff] }
  0x25   : > { %1608 = vmatmul.mubr.msk.bf16.vlgmr.msra.gmra.mrb[8].mxu1 %vm223_vm1, %v182_v24  ;;  %1631 = vmatprep.mubr.msk.bf16.mxu0 %vm1837_vm0, %v1836_v1  ;;  %v805_v24 = vld [vmem:[%s1890_s21 + $0x24] sm:$0xff]  ;;  %v942_v26 = vpack.c.bf16 %v804_v23, %v803_v19  ;;  %v1192_v48 = vld [vmem:[%s1890_s21 + $0x16] sm:$0xff]  ;;  %v1201_v10 = vld [vmem:[%s1890_s21 + $0x5e] sm:$0x3f] }
  0x26   : > { %1611 = vmatprep.mubr.msk.bf16.mxu1 %vm1837_vm0, %v1836_v1  ;;  %1652 = vmatpush3.bf16.msra.mxu1 %v1816_v25  ;;  %v1826_v25 = vld [vmem:[%s2226_s1 + $0x78] sm:$0xff]   ;;  %v813_v27 = vpack.c.bf16 %v805_v24, %v804_v23 }
  0x27   : > { %1653 = vmatprep.subr.bf16.mxu1 %v1836_v1 }
  0x2a   : > { %1654 = vmatpush3.bf16.msra.mxu1 %v1818_v30  ;;  %v1827_v30 = vld [vmem:[%s2226_s1 + $0x88] sm:$0xff]  }
  0x2b   : > { %1699 = vmatprep.subr.bf16.mxu1 %v1836_v1 }
  0x2c   : > { %1632 = vmatmul.mubr.msk.bf16.vlgmr.msra.gmra.mrb[12].mxu0 %vm223_vm1, %v422_v31  ;;  %v807_v31 = vld [vmem:[%s1890_s21 + $0x34] sm:$0xff] }
  0x2d   : > { %1612 = vmatmul.mubr.msk.bf16.gmra.mrb[12].mxu1 %vm223_vm1, %v183_v32  ;;  %1676 = vmatpush3.bf16.msra.mxu0 %v1817_v33  ;;  %v943_v32 = vpack.c.bf16 %v806_v29, %v805_v24  ;;  %v814_v33 = vpack.c.bf16 %v807_v31, %v806_v29 }
  0x2e   : > { %1615 = vmatprep.mubr.msk.bf16.mxu1 %vm1837_vm0, %v1836_v1  ;;  %1635 = vmatprep.mubr.msk.bf16.mxu0 %vm1837_vm0, %v1836_v1 }
  0x2f   : > { %1677 = vmatprep.subr.bf16.mxu0 %v1836_v1 }
  0x31   : > { %1678 = vmatpush3.bf16.msra.mxu0 %v1819_v36  ;;  %v944_v36 = vpack.c.bf16 %v808_v34, %v807_v31 }
  0x32   : > { %1723 = vmatprep.subr.bf16.mxu0 %v1836_v1 }
  0x34   : > { %1636 = vmatmul.mubr.msk.bf16.gmra.mrb[16].mxu0 %vm223_vm1, %v423_v39  ;;  %v811_v39 = vld [vmem:[%s1890_s21 + $0x54] sm:$0x3f] }
  0x35   : > { %1616 = vmatmul.mubr.msk.bf16.gmra.mrb[16].mxu1 %vm223_vm1, %v184_v40  ;;  %1639 = vmatprep.mubr.msk.bf16.mxu0 %vm1837_vm0, %v1836_v1  ;;  %v945_v40 = vpack.c.bf16 %v810_v38, %v809_v35  ;;  %v816_v41 = vpack.c.bf16 %v811_v39, %v810_v38 }
  0x36   : > { %1619 = vmatprep.mubr.msk.bf16.mxu1 %vm1837_vm0, %v1836_v1 }
  0x3c   : > { %1640 = vmatmul.mubr.msk.bf16.gmra.mrb[20].mxu0 %vm223_vm1, %v424_v45  ;;  %v1063_v45 = vld [vmem:[%s1890_s21 + $0x1d] sm:$0xff] }
  0x3d   : > { %1620 = vmatmul.mubr.msk.bf16.gmra.mrb[20].mxu1 %vm223_vm1, %v185_v46  ;;  %1643 = vmatprep.mubr.msk.bf16.mxu0 %vm1837_vm0, %v1836_v1  ;;  %v946_v46 = vpack.c.bf16 %v941_v43, %v940_v42  ;;  %v1072_v47 = vpack.c.bf16 %v1063_v45, %v1062_v44 }
  0x3e   : > { %1623 = vmatprep.mubr.msk.bf16.mxu1 %vm1837_vm0, %v1836_v1 }
  0x44   : > { %1644 = vmatmul.mubr.msk.bf16.gmra.mrb[24].mxu0 %vm223_vm1, %v425_v51  ;;  %v1065_v51 = vld [vmem:[%s1890_s21 + $0x2d] sm:$0xff] }
  0x45   : > { %1624 = vmatmul.mubr.msk.bf16.gmra.mrb[24].mxu1 %vm223_vm1, %v186_v52  ;;  %1647 = vmatprep.mubr.msk.bf16.mxu0 %vm1837_vm0, %v1836_v1  ;;  %v1202_v52 = vpack.c.bf16 %v1193_v49, %v1192_v48  ;;  %v1073_v53 = vpack.c.bf16 %v1065_v51, %v1064_v50 }
  0x46   : > { %1655 = vmatprep.mubr.msk.bf16.mxu1 %vm1837_vm0, %v1836_v1 }
  0x4c   : > { %1648 = vmatmul.mubr.msk.bf16.gmra.mrb[28].mxu0 %vm223_vm1, %v426_v55  ;;  %v1195_v55 = vld [vmem:[%s1890_s21 + $0x2e] sm:$0xff] }
  0x4d   : > { %1656 = vmatmul.mubr.msk.bf16.vlgmr.msra.gmra.mrb[28].mxu1 %vm223_vm1, %v552_v56  ;;  %1679 = vmatprep.mubr.msk.bf16.mxu0 %vm1837_vm0, %v1836_v1  ;;  %v1066_v56 = vld [vmem:[%s1890_s21 + $0x35] sm:$0xff]  ;;  %v1203_v58 = vpack.c.bf16 %v1195_v55, %v1194_v54 }
  0x4e   : > { %1659 = vmatprep.mubr.msk.bf16.mxu1 %vm1837_vm0, %v1836_v1  ;;  %1700 = vmatpush3.bf16.msra.mxu1 %v1820_v57  ;;  %v1067_v57 = vld [vmem:[%s1890_s21 + $0x3d] sm:$0xff] }
  0x4f   : > { %1701 = vmatprep.subr.bf16.mxu1 %v1836_v1  ;;  %v1074_v59 = vpack.c.bf16 %v1067_v57, %v1066_v56 }
  0x52   : > { %1702 = vmatpush3.bf16.msra.mxu1 %v1822_v60  ;;  %v1196_v60 = vld [vmem:[%s1890_s21 + $0x36] sm:$0xff] }
  0x53   : > { %1747 = vmatprep.subr.bf16.mxu1 %v1836_v1 }
  0x54   : > { %1680 = vmatmul.mubr.msk.bf16.vlgmr.msra.gmra.mrb[32].mxu0 %vm223_vm1, %v682_v61  ;;  %v1197_v61 = vld [vmem:[%s1890_s21 + $0x3e] sm:$0xff] }
  0x55   : > { %1660 = vmatmul.mubr.msk.bf16.gmra.mrb[32].mxu1 %vm223_vm1, %v553_v62  ;;  %1724 = vmatpush3.bf16.msra.mxu0 %v1821_v63  ;;  %v1068_v62 = vld [vmem:[%s1890_s21 + $0x45] sm:$0xff]  ;;  %v1069_v63 = vld [vmem:[%s1890_s21 + $0x4d] sm:$0xff]  ;;  %v1204_v0 = vpack.c.bf16 %v1197_v61, %v1196_v60 }
  0x56   : > { %1663 = vmatprep.mubr.msk.bf16.mxu1 %vm1837_vm0, %v1836_v1  ;;  %1683 = vmatprep.mubr.msk.bf16.mxu0 %vm1837_vm0, %v1836_v1  ;;  %v1075_v2 = vpack.c.bf16 %v1069_v63, %v1068_v62 }
  0x57   : > { %1725 = vmatprep.subr.bf16.mxu0 %v1836_v1 }
  0x59   : > { %1726 = vmatpush3.bf16.msra.mxu0 %v1823_v3  ;;  %v1198_v3 = vld [vmem:[%s1890_s21 + $0x46] sm:$0xff] }
  0x5a   : > { %1771 = vmatprep.subr.bf16.mxu0 %v1836_v1 }
  0x5c   : > { %1684 = vmatmul.mubr.msk.bf16.gmra.mrb[36].mxu0 %vm223_vm1, %v683_v4  ;;  %v1199_v4 = vld [vmem:[%s1890_s21 + $0x4e] sm:$0xff] }
  0x5d   : > { %1664 = vmatmul.mubr.msk.bf16.gmra.mrb[36].mxu1 %vm223_vm1, %v554_v5  ;;  %1687 = vmatprep.mubr.msk.bf16.mxu0 %vm1837_vm0, %v1836_v1  ;;  %v1070_v5 = vld [vmem:[%s1890_s21 + $0x55] sm:$0xff]  ;;  %v1205_v7 = vpack.c.bf16 %v1199_v4, %v1198_v3 }
  0x5e   : > { %1667 = vmatprep.mubr.msk.bf16.mxu1 %vm1837_vm0, %v1836_v1 }
  0x64   : > { %1688 = vmatmul.mubr.msk.bf16.gmra.mrb[40].mxu0 %vm223_vm1, %v684_v8  ;;  %v1076_v8 = vpack.c.bf16 %v1071_v6, %v1070_v5 }
  0x65   : > { %1668 = vmatmul.mubr.msk.bf16.gmra.mrb[40].mxu1 %vm223_vm1, %v555_v9  ;;  %1691 = vmatprep.mubr.msk.bf16.mxu0 %vm1837_vm0, %v1836_v1  ;;  %v1200_v9 = vld [vmem:[%s1890_s21 + $0x56] sm:$0xff] }
  0x66   : > { %1671 = vmatprep.mubr.msk.bf16.mxu1 %vm1837_vm0, %v1836_v1  ;;  %v1206_v11 = vpack.c.bf16 %v1201_v10, %v1200_v9 }
  0x6c   : > { %1692 = vmatmul.mubr.msk.bf16.gmra.mrb[44].mxu0 %vm223_vm1, %v685_v14 }
  0x6d   : > { %1672 = vmatmul.mubr.msk.bf16.gmra.mrb[44].mxu1 %vm223_vm1, %v556_v15  ;;  %1695 = vmatprep.mubr.msk.bf16.mxu0 %vm1837_vm0, %v1836_v1 }
  0x6e   : > { %1703 = vmatprep.mubr.msk.bf16.mxu1 %vm1837_vm0, %v1836_v1 }
  0x74   : > { %1696 = vmatmul.mubr.msk.bf16.gmra.mrb[48].mxu0 %vm223_vm1, %v686_v20 }
  0x75   : > { %1704 = vmatmul.mubr.msk.bf16.vlgmr.msra.gmra.mrb[48].mxu1 %vm223_vm1, %v812_v21  ;;  %1727 = vmatprep.mubr.msk.bf16.mxu0 %vm1837_vm0, %v1836_v1 }
  0x76   : > { %1707 = vmatprep.mubr.msk.bf16.mxu1 %vm1837_vm0, %v1836_v1  ;;  %1748 = vmatpush3.bf16.msra.mxu1 %v1824_v22 }
  0x77   : > { %1749 = vmatprep.subr.bf16.mxu1 %v1836_v1 }
  0x7a   : > { %1750 = vmatpush3.bf16.msra.mxu1 %v1826_v25 }
  0x7c   : > { %1728 = vmatmul.mubr.msk.bf16.vlgmr.msra.gmra.mrb[52].mxu0 %vm223_vm1, %v942_v26 }
  0x7d   : > { %1708 = vmatmul.mubr.msk.bf16.gmra.mrb[52].mxu1 %vm223_vm1, %v813_v27  ;;  %1772 = vmatpush3.bf16.msra.mxu0 %v1825_v28 }
  0x7e   : > { %1711 = vmatprep.mubr.msk.bf16.mxu1 %vm1837_vm0, %v1836_v1  ;;  %1731 = vmatprep.mubr.msk.bf16.mxu0 %vm1837_vm0, %v1836_v1 }
  0x7f   : > { %1773 = vmatprep.subr.bf16.mxu0 %v1836_v1 }
  0x81   : > { %1774 = vmatpush3.bf16.msra.mxu0 %v1827_v30 }
  0x84   : > { %1732 = vmatmul.mubr.msk.bf16.gmra.mrb[56].mxu0 %vm223_vm1, %v943_v32 }
  0x85   : > { %1712 = vmatmul.mubr.msk.bf16.gmra.mrb[56].mxu1 %vm223_vm1, %v814_v33  ;;  %1735 = vmatprep.mubr.msk.bf16.mxu0 %vm1837_vm0, %v1836_v1 }
  0x86   : > { %1715 = vmatprep.mubr.msk.bf16.mxu1 %vm1837_vm0, %v1836_v1 }
  0x8c   : > { %1736 = vmatmul.mubr.msk.bf16.gmra.mrb[60].mxu0 %vm223_vm1, %v944_v36 }
  0x8d   : > { %1716 = vmatmul.mubr.msk.bf16.gmra.mrb[60].mxu1 %vm223_vm1, %v815_v37  ;;  %1739 = vmatprep.mubr.msk.bf16.mxu0 %vm1837_vm0, %v1836_v1 }
  0x8e   : > { %1719 = vmatprep.mubr.msk.bf16.mxu1 %vm1837_vm0, %v1836_v1 }
  0x94   : > { %1740 = vmatmul.mubr.msk.bf16.gmra.mrb[64].mxu0 %vm223_vm1, %v945_v40 }
  0x95   : > { %1720 = vmatmul.mubr.msk.bf16.gmra.mrb[64].mxu1 %vm223_vm1, %v816_v41  ;;  %1743 = vmatprep.mubr.msk.bf16.mxu0 %vm1837_vm0, %v1836_v1 }
  0x96   : > { %1751 = vmatprep.mubr.msk.bf16.mxu1 %vm1837_vm0, %v1836_v1 }
  0x9c   : > { %1744 = vmatmul.mubr.msk.bf16.gmra.mrb[68].mxu0 %vm223_vm1, %v946_v46 }
  0x9d   : > { %1752 = vmatmul.mubr.msk.bf16.vlgmr.msra.gmra.mrb[68].mxu1 %vm223_vm1, %v1072_v47  ;;  %1775 = vmatprep.mubr.msk.bf16.mxu0 %vm1837_vm0, %v1836_v1 }
  0x9e   : > { %1755 = vmatprep.mubr.msk.bf16.mxu1 %vm1837_vm0, %v1836_v1 }
  0xa4   : > { %1776 = vmatmul.mubr.msk.bf16.vlgmr.msra.gmra.mrb[72].mxu0 %vm223_vm1, %v1202_v52 }
  0xa5   : > { %1756 = vmatmul.mubr.msk.bf16.gmra.mrb[72].mxu1 %vm223_vm1, %v1073_v53  ;;  %1779 = vmatprep.mubr.msk.bf16.mxu0 %vm1837_vm0, %v1836_v1 }
  0xa6   : > { %1759 = vmatprep.mubr.msk.bf16.mxu1 %vm1837_vm0, %v1836_v1 }
  0xac   : > { %1780 = vmatmul.mubr.msk.bf16.gmra.mrb[76].mxu0 %vm223_vm1, %v1203_v58 }
  0xad   : > { %1760 = vmatmul.mubr.msk.bf16.gmra.mrb[76].mxu1 %vm223_vm1, %v1074_v59  ;;  %1783 = vmatprep.mubr.msk.bf16.mxu0 %vm1837_vm0, %v1836_v1 }
  0xae   : > { %1763 = vmatprep.mubr.msk.bf16.mxu1 %vm1837_vm0, %v1836_v1 }
  0xb4   : > { %1784 = vmatmul.mubr.msk.bf16.gmra.mrb[80].mxu0 %vm223_vm1, %v1204_v0 }
  0xb5   : > { %1764 = vmatmul.mubr.msk.bf16.gmra.mrb[80].mxu1 %vm223_vm1, %v1075_v2  ;;  %1787 = vmatprep.mubr.msk.bf16.mxu0 %vm1837_vm0, %v1836_v1 }
  0xb6   : > { %1767 = vmatprep.mubr.msk.bf16.mxu1 %vm1837_vm0, %v1836_v1 }
  0xbc   : > { %1788 = vmatmul.mubr.msk.bf16.gmra.mrb[84].mxu0 %vm223_vm1, %v1205_v7 }
  0xbd   : > { %1768 = vmatmul.mubr.msk.bf16.gmra.mrb[84].mxu1 %vm223_vm1, %v1076_v8  ;;  %1791 = vmatprep.mubr.msk.bf16.mxu0 %vm1837_vm0, %v1836_v1 }
  0xc4   : > { %1792 = vmatmul.mubr.msk.bf16.gmra.mrb[88].mxu0 %vm223_vm1, %v1206_v11 }
  0xe7   : > { %v273_v12 = vpop.f32.mrb[0].mxu0 }
  0xe8   : > { %v1585_v13 = vpop.f32.mrb[1].mxu0  ;;  %v297_v14 = vpop.f32.mrb[0].mxu1 }
  0xe9   : > { %v276_v15 = vpop.f32.mrb[2].mxu0  ;;  %v1597_v16 = vpop.f32.mrb[1].mxu1 }
  0xea   : > { %v1586_v17 = vpop.f32.mrb[3].mxu0  ;;  %v300_v18 = vpop.f32.mrb[2].mxu1 }
  0xeb   : > { %v1598_v19 = vpop.f32.mrb[3].mxu1 }
  0xef   : > { %v281_v20 = vpop.f32.mrb[4].mxu0 }
  0xf0   : > { %v1589_v21 = vpop.f32.mrb[5].mxu0  ;;  %v2159_v22 = vpop.f32.mrb[4].mxu1 }
  0xf1   : > { %v284_v23 = vpop.f32.mrb[6].mxu0  ;;  %v1601_v24 = vpop.f32.mrb[5].mxu1 }
  0xf2   : > { %v1590_v25 = vpop.f32.mrb[7].mxu0  ;;  %v2161_v26 = vpop.f32.mrb[6].mxu1 }
  0xf3   : > { %v1602_v27 = vpop.f32.mrb[7].mxu1 }
  0xf7   : > { %v289_v28 = vpop.f32.mrb[8].mxu0 }
  0xf8   : > { %v373_v29 = vpop.f32.mrb[8].mxu1  ;;  %v1593_v30 = vpop.f32.mrb[9].mxu0 }
  0xf9   : > { %v374_v31 = vadd.f32 %v373_v29, %v273_v12  ;;  %v1609_v32 = vpop.f32.mrb[9].mxu1  ;;  %v292_v33 = vpop.f32.mrb[10].mxu0 }
  0xfa   : > { %v376_v34 = vpop.f32.mrb[10].mxu1  ;;  %v1594_v35 = vpop.f32.mrb[11].mxu0 }
  0xfb   : > { %v377_v36 = vadd.f32 %v376_v34, %v276_v15  ;;  %v1610_v37 = vpop.f32.mrb[11].mxu1 }
  0xff   : > { %v493_v38 = vpop.f32.mrb[12].mxu0 }
 0x100   : > { %v381_v39 = vpop.f32.mrb[12].mxu1  ;;  %v532_v40 = vadd.f32 %v493_v38, %v374_v31  ;;  %v1633_v41 = vpop.f32.mrb[13].mxu0 }
 0x101   : > { %v382_v42 = vadd.f32 %v381_v39, %v281_v20  ;;  %v1613_v43 = vpop.f32.mrb[13].mxu1  ;;  %v496_v44 = vpop.f32.mrb[14].mxu0 }
 0x102   : > { %v384_v45 = vpop.f32.mrb[14].mxu1  ;;  %v533_v46 = vadd.f32 %v496_v44, %v377_v36  ;;  %v1634_v47 = vpop.f32.mrb[15].mxu0 }
 0x103   : > { %v385_v48 = vadd.f32 %v384_v45, %v284_v23  ;;  %v1614_v49 = vpop.f32.mrb[15].mxu1 }
 0x107   : > { %v501_v50 = vpop.f32.mrb[16].mxu0 }
 0x108   : > { %v389_v51 = vpop.f32.mrb[16].mxu1  ;;  %v534_v52 = vadd.f32 %v501_v50, %v382_v42  ;;  %v1637_v53 = vpop.f32.mrb[17].mxu0 }
 0x109   : > { %v390_v54 = vadd.f32 %v389_v51, %v289_v28  ;;  %v1617_v55 = vpop.f32.mrb[17].mxu1  ;;  %v504_v56 = vpop.f32.mrb[18].mxu0 }
 0x10a   : > { %v392_v1 = vpop.f32.mrb[18].mxu1  ;;  %v535_v57 = vadd.f32 %v504_v56, %v385_v48  ;;  %v1638_v58 = vpop.f32.mrb[19].mxu0 }
 0x10b   : > { %v393_v59 = vadd.f32 %v392_v1, %v292_v33  ;;  %v1618_v60 = vpop.f32.mrb[19].mxu1 }
 0x10f   : > { %v509_v61 = vpop.f32.mrb[20].mxu0 }
 0x110   : > { %v397_v62 = vpop.f32.mrb[20].mxu1  ;;  %v536_v63 = vadd.f32 %v509_v61, %v390_v54  ;;  %v1641_v0 = vpop.f32.mrb[21].mxu0 }
 0x111   : > { %v398_v2 = vadd.f32 %v397_v62, %v297_v14  ;;  %v1621_v3 = vpop.f32.mrb[21].mxu1  ;;  %v512_v4 = vpop.f32.mrb[22].mxu0 }
 0x112   : > { %v400_v5 = vpop.f32.mrb[22].mxu1  ;;  %v537_v6 = vadd.f32 %v512_v4, %v393_v59  ;;  %v1642_v7 = vpop.f32.mrb[23].mxu0 }
 0x113   : > { %v401_v8 = vadd.f32 %v400_v5, %v300_v18  ;;  %v1622_v9 = vpop.f32.mrb[23].mxu1 }
 0x117   : > { %v517_v10 = vpop.f32.mrb[24].mxu0 }
 0x118   : > { %v405_v11 = vpop.f32.mrb[24].mxu1  ;;  %v538_v12 = vadd.f32 %v517_v10, %v398_v2  ;;  %v1645_v13 = vpop.f32.mrb[25].mxu0 }
 0x119   : > { %v406_v15 = vadd.f32 %v405_v11, %v2159_v22  ;;  %v1625_v16 = vpop.f32.mrb[25].mxu1  ;;  %v520_v17 = vpop.f32.mrb[26].mxu0 }
 0x11a   : > { %v408_v19 = vpop.f32.mrb[26].mxu1  ;;  %v539_v20 = vadd.f32 %v520_v17, %v401_v8  ;;  %v1646_v21 = vpop.f32.mrb[27].mxu0 }
 0x11b   : > { %v409_v14 = vadd.f32 %v408_v19, %v2161_v26  ;;  %v1626_v23 = vpop.f32.mrb[27].mxu1 }
 0x11f   : > { %v525_v24 = vpop.f32.mrb[28].mxu0 }
 0x120   : > { %v540_v25 = vadd.f32 %v525_v24, %v406_v15  ;;  %v623_v27 = vpop.f32.mrb[28].mxu1  ;;  %v1649_v28 = vpop.f32.mrb[29].mxu0 }
 0x121   : > { %v662_v18 = vadd.f32 %v623_v27, %v532_v40  ;;  %v1657_v29 = vpop.f32.mrb[29].mxu1  ;;  %v528_v30 = vpop.f32.mrb[30].mxu0 }
 0x122   : > { %v541_v31 = vadd.f32 %v528_v30, %v409_v14  ;;  %v626_v32 = vpop.f32.mrb[30].mxu1  ;;  %v1650_v33 = vpop.f32.mrb[31].mxu0 }
 0x123   : > { %v663_v34 = vadd.f32 %v626_v32, %v533_v46  ;;  %v1658_v22 = vpop.f32.mrb[31].mxu1 }
 0x127   : > { %v753_v35 = vpop.f32.mrb[32].mxu0 }
 0x128   : > { %v631_v36 = vpop.f32.mrb[32].mxu1  ;;  %v792_v37 = vadd.f32 %v753_v35, %v662_v18  ;;  %v1681_v38 = vpop.f32.mrb[33].mxu0 }
 0x129   : > { %v664_v39 = vadd.f32 %v631_v36, %v534_v52  ;;  %v1661_v41 = vpop.f32.mrb[33].mxu1  ;;  %v756_v26 = vpop.f32.mrb[34].mxu0 }
 0x12a   : > { %v634_v42 = vpop.f32.mrb[34].mxu1  ;;  %v793_v43 = vadd.f32 %v756_v26, %v663_v34  ;;  %v1682_v44 = vpop.f32.mrb[35].mxu0 }
 0x12b   : > { %v665_v45 = vadd.f32 %v634_v42, %v535_v57  ;;  %v1662_v47 = vpop.f32.mrb[35].mxu1 }
 0x12f   : > { %v761_v40 = vpop.f32.mrb[36].mxu0 }
 0x130   : > { %v639_v48 = vpop.f32.mrb[36].mxu1  ;;  %v794_v49 = vadd.f32 %v761_v40, %v664_v39  ;;  %v1685_v50 = vpop.f32.mrb[37].mxu0 }
 0x131   : > { %v666_v51 = vadd.f32 %v639_v48, %v536_v63  ;;  %v1665_v53 = vpop.f32.mrb[37].mxu1  ;;  %v764_v46 = vpop.f32.mrb[38].mxu0 }
 0x132   : > { %v642_v54 = vpop.f32.mrb[38].mxu1  ;;  %v795_v55 = vadd.f32 %v764_v46, %v665_v45  ;;  %v1686_v56 = vpop.f32.mrb[39].mxu0 }
 0x133   : > { %v667_v1 = vadd.f32 %v642_v54, %v537_v6  ;;  %v1666_v58 = vpop.f32.mrb[39].mxu1 }
 0x137   : > { %v769_v52 = vpop.f32.mrb[40].mxu0 }
 0x138   : > { %v647_v59 = vpop.f32.mrb[40].mxu1  ;;  %v796_v60 = vadd.f32 %v769_v52, %v666_v51  ;;  %v1689_v61 = vpop.f32.mrb[41].mxu0 }
 0x139   : > { %v668_v62 = vadd.f32 %v647_v59, %v538_v12  ;;  %v1669_v0 = vpop.f32.mrb[41].mxu1  ;;  %v772_v57 = vpop.f32.mrb[42].mxu0 }
 0x13a   : > { %v650_v2 = vpop.f32.mrb[42].mxu1  ;;  %v797_v3 = vadd.f32 %v772_v57, %v667_v1  ;;  %v1690_v4 = vpop.f32.mrb[43].mxu0 }
 0x13b   : > { %v669_v5 = vadd.f32 %v650_v2, %v539_v20  ;;  %v1670_v7 = vpop.f32.mrb[43].mxu1 }
 0x13f   : > { %v777_v63 = vpop.f32.mrb[44].mxu0 }
 0x140   : > { %v655_v8 = vpop.f32.mrb[44].mxu1  ;;  %v798_v9 = vadd.f32 %v777_v63, %v668_v62  ;;  %v1693_v10 = vpop.f32.mrb[45].mxu0 }
 0x141   : > { %v670_v11 = vadd.f32 %v655_v8, %v540_v25  ;;  %v1673_v13 = vpop.f32.mrb[45].mxu1  ;;  %v780_v6 = vpop.f32.mrb[46].mxu0 }
 0x142   : > { %v658_v15 = vpop.f32.mrb[46].mxu1  ;;  %v799_v16 = vadd.f32 %v780_v6, %v669_v5  ;;  %v1694_v17 = vpop.f32.mrb[47].mxu0 }
 0x143   : > { %v671_v19 = vadd.f32 %v658_v15, %v541_v31  ;;  %v1674_v21 = vpop.f32.mrb[47].mxu1 }
 0x147   : > { %v785_v12 = vpop.f32.mrb[48].mxu0 }
 0x148   : > { %v800_v14 = vadd.f32 %v785_v12, %v670_v11  ;;  %v883_v23 = vpop.f32.mrb[48].mxu1  ;;  %v1697_v24 = vpop.f32.mrb[49].mxu0 }
 0x149   : > { %v922_v27 = vadd.f32 %v883_v23, %v792_v37  ;;  %v1705_v28 = vpop.f32.mrb[49].mxu1  ;;  %v788_v20 = vpop.f32.mrb[50].mxu0 }
 0x14a   : > { %v801_v18 = vadd.f32 %v788_v20, %v671_v19  ;;  %v886_v29 = vpop.f32.mrb[50].mxu1  ;;  %v1698_v30 = vpop.f32.mrb[51].mxu0 }
 0x14b   : > { %v923_v32 = vadd.f32 %v886_v29, %v793_v43  ;;  %v1706_v33 = vpop.f32.mrb[51].mxu1 }
 0x14f   : > { %v1013_v25 = vpop.f32.mrb[52].mxu0 }
 0x150   : > { %v891_v34 = vpop.f32.mrb[52].mxu1  ;;  %v1052_v22 = vadd.f32 %v1013_v25, %v922_v27  ;;  %v1729_v35 = vpop.f32.mrb[53].mxu0 }
 0x151   : > { %v924_v36 = vadd.f32 %v891_v34, %v794_v49  ;;  %v1709_v38 = vpop.f32.mrb[53].mxu1  ;;  %v1016_v31 = vpop.f32.mrb[54].mxu0 }
 0x152   : > { %v894_v39 = vpop.f32.mrb[54].mxu1  ;;  %v1053_v41 = vadd.f32 %v1016_v31, %v923_v32  ;;  %v1730_v26 = vpop.f32.mrb[55].mxu0 }
 0x153   : > { %v925_v42 = vadd.f32 %v894_v39, %v795_v55  ;;  %v1710_v44 = vpop.f32.mrb[55].mxu1 }
 0x157   : > { %v1021_v37 = vpop.f32.mrb[56].mxu0 }
 0x158   : > { %v899_v45 = vpop.f32.mrb[56].mxu1  ;;  %v1054_v47 = vadd.f32 %v1021_v37, %v924_v36  ;;  %v1733_v40 = vpop.f32.mrb[57].mxu0 }
 0x159   : > { %v926_v48 = vadd.f32 %v899_v45, %v796_v60  ;;  %v1713_v50 = vpop.f32.mrb[57].mxu1  ;;  %v1024_v43 = vpop.f32.mrb[58].mxu0 }
 0x15a   : > { %v902_v51 = vpop.f32.mrb[58].mxu1  ;;  %v1055_v53 = vadd.f32 %v1024_v43, %v925_v42  ;;  %v1734_v46 = vpop.f32.mrb[59].mxu0 }
 0x15b   : > { %v927_v54 = vadd.f32 %v902_v51, %v797_v3  ;;  %v1714_v56 = vpop.f32.mrb[59].mxu1 }
 0x15f   : > { %v1029_v49 = vpop.f32.mrb[60].mxu0 }
 0x160   : > { %v907_v1 = vpop.f32.mrb[60].mxu1  ;;  %v1056_v58 = vadd.f32 %v1029_v49, %v926_v48  ;;  %v1737_v52 = vpop.f32.mrb[61].mxu0 }
 0x161   : > { %v928_v59 = vadd.f32 %v907_v1, %v798_v9  ;;  %v1717_v61 = vpop.f32.mrb[61].mxu1  ;;  %v1032_v55 = vpop.f32.mrb[62].mxu0 }
 0x162   : > { %v910_v62 = vpop.f32.mrb[62].mxu1  ;;  %v1057_v0 = vadd.f32 %v1032_v55, %v927_v54  ;;  %v1738_v57 = vpop.f32.mrb[63].mxu0 }
 0x163   : > { %v929_v2 = vadd.f32 %v910_v62, %v799_v16  ;;  %v1718_v4 = vpop.f32.mrb[63].mxu1 }
 0x167   : > { %v1037_v60 = vpop.f32.mrb[64].mxu0 }
 0x168   : > { %v915_v5 = vpop.f32.mrb[64].mxu1  ;;  %v1058_v7 = vadd.f32 %v1037_v60, %v928_v59  ;;  %v1741_v63 = vpop.f32.mrb[65].mxu0 }
 0x169   : > { %v930_v8 = vadd.f32 %v915_v5, %v800_v14  ;;  %v1721_v10 = vpop.f32.mrb[65].mxu1  ;;  %v1040_v3 = vpop.f32.mrb[66].mxu0 }
 0x16a   : > { %v918_v11 = vpop.f32.mrb[66].mxu1  ;;  %v1059_v13 = vadd.f32 %v1040_v3, %v929_v2  ;;  %v1742_v6 = vpop.f32.mrb[67].mxu0 }
 0x16b   : > { %v931_v15 = vadd.f32 %v918_v11, %v801_v18  ;;  %v1722_v17 = vpop.f32.mrb[67].mxu1  ;;  %v2189_v18 = vld [vmem:[%s2227_s2] ss:$0 sm:$0xff] }
 0x16f   : > { %v1045_v9 = vpop.f32.mrb[68].mxu0 }
 0x170   : > { %v2182_v19 = vadd.f32 %v1045_v9, %v930_v8  ;;  %v1143_v21 = vpop.f32.mrb[68].mxu1  ;;  %v1745_v12 = vpop.f32.mrb[69].mxu0 }
 0x171   : > { %v1182_v23 = vadd.f32 %v1143_v21, %v1052_v22  ;;  %v1753_v16 = vpop.f32.mrb[69].mxu1  ;;  %v1048_v24 = vpop.f32.mrb[70].mxu0 }
 0x172   : > { %v2184_v27 = vadd.f32 %v1048_v24, %v931_v15  ;;  %v1146_v28 = vpop.f32.mrb[70].mxu1  ;;  %v1746_v20 = vpop.f32.mrb[71].mxu0 }
 0x173   : > { %v1183_v14 = vadd.f32 %v1146_v28, %v1053_v41  ;;  %v1754_v29 = vpop.f32.mrb[71].mxu1 }
 0x177   : > { %v1273_v30 = vpop.f32.mrb[72].mxu0 }
 0x178   : > { %v1151_v32 = vpop.f32.mrb[72].mxu1  ;;  %v1312_v33 = vadd.f32 %v1273_v30, %v1182_v23  ;;  %v1777_v25 = vpop.f32.mrb[73].mxu0 }
 0x179   : > { %v1184_v34 = vadd.f32 %v1151_v32, %v1054_v47  ;;  %v1757_v22 = vpop.f32.mrb[73].mxu1  ;;  %v1276_v35 = vpop.f32.mrb[74].mxu0 }
 0x17a   : > { %v1329_v36 = vadd.f32 %v2189_v18, %v1312_v33  ;;  %v1154_v38 = vpop.f32.mrb[74].mxu1  ;;  %v1313_v31 = vadd.f32 %v1276_v35, %v1183_v14  ;;  %v1778_v39 = vpop.f32.mrb[75].mxu0 }
 0x17b   : > { %v1185_v41 = vadd.f32 %v1154_v38, %v1055_v53  ;;  %v1758_v26 = vpop.f32.mrb[75].mxu1 }
 0x17c   : > { %1343 = vst.msk [vmem:[%s2168_s5 + $0xb] sm:$0xff] %vm1339_vm2, %v1329_v36  ;;  %v1330_v42 = vadd.f32 %v2189_v18, %v1313_v31 }
 0x17e   : > { %1344 = vst.msk [vmem:[%s2168_s5 + $0x13] sm:$0xff] %vm1339_vm2, %v1330_v42 }
 0x17f   : > { %v1281_v44 = vpop.f32.mrb[76].mxu0 }
 0x180   : > { %v1159_v37 = vpop.f32.mrb[76].mxu1  ;;  %v1314_v45 = vadd.f32 %v1281_v44, %v1184_v34  ;;  %v1781_v47 = vpop.f32.mrb[77].mxu0 }
 0x181   : > { %v1186_v40 = vadd.f32 %v1159_v37, %v1056_v58  ;;  %v1761_v48 = vpop.f32.mrb[77].mxu1  ;;  %v1284_v50 = vpop.f32.mrb[78].mxu0 }
 0x182   : > { %v1331_v43 = vadd.f32 %v2189_v18, %v1314_v45  ;;  %v1162_v51 = vpop.f32.mrb[78].mxu1  ;;  %v1315_v53 = vadd.f32 %v1284_v50, %v1185_v41  ;;  %v1782_v46 = vpop.f32.mrb[79].mxu0 }
 0x183   : > { %v1187_v54 = vadd.f32 %v1162_v51, %v1057_v0  ;;  %v1762_v56 = vpop.f32.mrb[79].mxu1 }
 0x184   : > { %1345 = vst.msk [vmem:[%s2168_s5 + $0x1b] sm:$0xff] %vm1339_vm2, %v1331_v43  ;;  %v1332_v49 = vadd.f32 %v2189_v18, %v1315_v53 }
 0x186   : > { %1346 = vst.msk [vmem:[%s2168_s5 + $0x23] sm:$0xff] %vm1339_vm2, %v1332_v49 }
 0x187   : > { %v1289_v1 = vpop.f32.mrb[80].mxu0 }
 0x188   : > { %v1167_v52 = vpop.f32.mrb[80].mxu1  ;;  %v1316_v58 = vadd.f32 %v1289_v1, %v1186_v40  ;;  %v1785_v59 = vpop.f32.mrb[81].mxu0 }
 0x189   : > { %v1188_v61 = vadd.f32 %v1167_v52, %v1058_v7  ;;  %v1765_v55 = vpop.f32.mrb[81].mxu1  ;;  %v1292_v62 = vpop.f32.mrb[82].mxu0 }
 0x18a   : > { %v1333_v57 = vadd.f32 %v2189_v18, %v1316_v58  ;;  %v1170_v2 = vpop.f32.mrb[82].mxu1  ;;  %v1317_v0 = vadd.f32 %v1292_v62, %v1187_v54  ;;  %v1786_v4 = vpop.f32.mrb[83].mxu0 }
 0x18b   : > { %v1189_v60 = vadd.f32 %v1170_v2, %v1059_v13  ;;  %v1766_v5 = vpop.f32.mrb[83].mxu1 }
 0x18c   : > { %1347 = vst.msk [vmem:[%s2168_s5 + $0x2b] sm:$0xff] %vm1339_vm2, %v1333_v57  ;;  %v1334_v63 = vadd.f32 %v2189_v18, %v1317_v0 }
 0x18e   : > { %1348 = vst.msk [vmem:[%s2168_s5 + $0x33] sm:$0xff] %vm1339_vm2, %v1334_v63 }
 0x18f   : > { %v1297_v8 = vpop.f32.mrb[84].mxu0 }
 0x190   : > { %v1175_v10 = vpop.f32.mrb[84].mxu1  ;;  %v1318_v7 = vadd.f32 %v1297_v8, %v1188_v61  ;;  %v1789_v3 = vpop.f32.mrb[85].mxu0 }
 0x191   : > { %v1190_v11 = vadd.f32 %v1175_v10, %v2182_v19  ;;  %v1769_v6 = vpop.f32.mrb[85].mxu1  ;;  %v1300_v15 = vpop.f32.mrb[86].mxu0 }
 0x192   : > { %v1335_v17 = vadd.f32 %v2189_v18, %v1318_v7  ;;  %v1178_v13 = vpop.f32.mrb[86].mxu1  ;;  %v1319_v9 = vadd.f32 %v1300_v15, %v1189_v60  ;;  %v1790_v21 = vpop.f32.mrb[87].mxu0 }
 0x193   : > { %v1191_v12 = vadd.f32 %v1178_v13, %v2184_v27  ;;  %v1770_v23 = vpop.f32.mrb[87].mxu1 }
 0x194   : > { %1349 = vst.msk [vmem:[%s2168_s5 + $0x3b] sm:$0xff] %vm1339_vm2, %v1335_v17  ;;  %v1336_v16 = vadd.f32 %v2189_v18, %v1319_v9 }
 0x196   : > { %1350 = vst.msk [vmem:[%s2168_s5 + $0x43] sm:$0xff] %vm1339_vm2, %v1336_v16 }
 0x197   : > { %v1305_v24 = vpop.f32.mrb[88].mxu0 }
 0x198   : > { %v1320_v19 = vadd.f32 %v1305_v24, %v1190_v11  ;;  %v1793_v28 = vpop.f32.mrb[89].mxu0 }
 0x199   : > { %v1308_v20 = vpop.f32.mrb[90].mxu0 }
 0x19a   : > { %v1337_v14 = vadd.f32 %v2189_v18, %v1320_v19  ;;  %v1321_v29 = vadd.f32 %v1308_v20, %v1191_v12  ;;  %v1794_v30 = vpop.f32.mrb[91].mxu0 }
 0x19c   : > { %1351 = vst.msk [vmem:[%s2168_s5 + $0x4b] sm:$0xff] %vm1339_vm2, %v1337_v14  ;;  %v1338_v27 = vadd.f32 %v2189_v18, %v1321_v29 }
 0x19e   : > { %1353 = vst.msk [vmem:[%s2168_s5 + $0x53] sm:$0x3f] %vm1352_vm4, %v1338_v27 }
 0x19f PF: > { %s13_s12 = sadd.s32 1, %s1834_s12  }
 0x1a0   : > { %p10_p4 = scmp.ge.s32.totalorder %s13_s12, 4  }
 0x1a2   :  { %12 = sbr.rel (!%p10_p4) target bundleno = 1 (0x1), region = 70 }

// kernel: down_block_forward.15
= control target key start
LH: loop header
LB: loop body
LE: loop exit
PB: predicated region body
PF: predicated region fallthrough
CT: control target
= control target key end

     0   :  { %s2127_s12 = smov 0   ;;  %s2612_s0 = inlined_call_operand.vmem [shape: f32[2,100,64], index: 0, kind: input, shape index: {}]   ;;  %s2613_s1 = inlined_call_operand.vmem [shape: bf16[9,64,64], index: 1, kind: input, shape index: {}]   ;;  %s2614_s2 = inlined_call_operand.vmem [shape: f32[1,64], index: 2, kind: input, shape index: {}]   ;;  %s2615_s3 = inlined_call_operand.vmem [shape: f32[2,100,64], index: 3, kind: output, shape index: {}]  }
   0x1 LB: > { %s1554_s13 = sadd.s32 4294967295, %s2103_s12   ;;  %p1558_p0 = scmp.ge.s32.totalorder %s2103_s12, 1  ;;  %s2103_s12 = sphi %s2127_s12, %s13_s12  }
   0x2   : > { %p137_p1 = scmp.lt.s32.totalorder %s2103_s12, 3 }
   0x4   : > { %p138_p2 = pnand %p1558_p0, %p137_p1 }
   0x5   : > { %v2061_v0 = vld [vmem:[%s2613_s1 + $0x20] sm:$0xff] (!%p138_p2)   ;;  %v2105_v1 = vmov (!%p138_p2), 0.0   ;;  %v2062_v2 = vld [vmem:[%s2613_s1 + $0x28] sm:$0xff] (!%p138_p2)   ;;  %p161_p3 = scmp.lt.s32.totalorder (!%p138_p2), %s1554_s13, 1  ;;  %vm2106_vm0 = vmmov (!%p138_p2), 0   ;;  %v2063_v3 = vld [vmem:[%s2613_s1 + $0x30] sm:$0xff] (!%p138_p2)  }
   0x6   : > { %141 = sbr.rel (%p138_p2) target bundleno = 419 (0x1a3), region = 32  ;;  %2042 = vmatprep.subr.bf16.mxu1 (!%p138_p2), %v2105_v1  ;;  %1790 = vmatprep.subr.bf16.mxu0 (!%p138_p2), %v2105_v1  ;;  %v2064_v4 = vld [vmem:[%s2613_s1 + $0x38] sm:$0xff] (!%p138_p2)   ;;  %vm243_vm1 = vcmask (!%p138_p2), 523264   ;;  %v2065_v11 = vld [vmem:[%s2613_s1] sm:$0xff] (!%p138_p2)   ;;  %v2066_v13 = vld [vmem:[%s2613_s1 + $0x8] sm:$0xff] (!%p138_p2)   ;;  %vm1484_vm2 = vcmask (!%p138_p2), 518144  }
   0x7   : > { %2046 = vmatpush3.bf16.msra.mxu1 (!%p138_p2), %v2061_v0  ;;  %1791 = vmatpush3.bf16.msra.mxu0 (!%p138_p2), %v2061_v0  ;;  %v2067_v12 = vld [vmem:[%s2613_s1 + $0x40] sm:$0xff] (!%p138_p2)   ;;  %v2069_v18 = vld [vmem:[%s2613_s1 + $0x48] sm:$0xff] (!%p138_p2)   ;;  %v2068_v21 = vld [vmem:[%s2613_s1 + $0x10] sm:$0xff] (!%p138_p2)   ;;  %vm1495_vm3 = vcmask (!%p138_p2), 521216  }
   0x8   : > { %2043 = vmatprep.subr.bf16.mxu1 (!%p138_p2), %v2105_v1  ;;  %1792 = vmatprep.subr.bf16.mxu0 (!%p138_p2), %v2105_v1  ;;  %v2070_v22 = vld [vmem:[%s2613_s1 + $0x50] sm:$0xff] (!%p138_p2)   ;;  %v2071_v25 = vld [vmem:[%s2613_s1 + $0x18] sm:$0xff] (!%p138_p2)   ;;  %v2074_v31 = vld [vmem:[%s2613_s1 + $0x80] sm:$0xff] (!%p138_p2)  }
   0x9   : > { %1806 = vmatprep.mubr.msk.bf16.mxu1 (!%p138_p2), %vm2106_vm0, %v2105_v1  ;;  %1798 = vmatprep.mubr.msk.bf16.mxu0 (!%p138_p2), %vm2106_vm0, %v2105_v1  ;;  %v2072_v26 = vld [vmem:[%s2613_s1 + $0x58] sm:$0xff] (!%p138_p2)   ;;  %v2076_v35 = vld [vmem:[%s2613_s1 + $0x88] sm:$0xff] (!%p138_p2)   ;;  %v2073_v38 = vld [vmem:[%s2613_s1 + $0x60] sm:$0xff] (!%p138_p2)  }
   0xa   : > { %v2078_v40 = vld [vmem:[%s2613_s1 + $0x90] sm:$0xff] (!%p138_p2)   ;;  %v2075_v43 = vld [vmem:[%s2613_s1 + $0x68] sm:$0xff] (!%p138_p2)   ;;  %v2080_v46 = vld [vmem:[%s2613_s1 + $0x98] sm:$0xff] (!%p138_p2)  }
   0xb   : > { %2047 = vmatpush3.bf16.msra.mxu1 (!%p138_p2), %v2062_v2  ;;  %1793 = vmatpush3.bf16.msra.mxu0 (!%p138_p2), %v2062_v2  ;;  %v2077_v48 = vld [vmem:[%s2613_s1 + $0x70] sm:$0xff] (!%p138_p2)   ;;  %v2079_v52 = vld [vmem:[%s2613_s1 + $0x78] sm:$0xff] (!%p138_p2)  }
   0xc   : > { %2044 = vmatprep.subr.bf16.mxu1 (!%p138_p2), %v2105_v1  ;;  %1794 = vmatprep.subr.bf16.mxu0 (!%p138_p2), %v2105_v1 }
   0xd   : > { %s2617_s13 = smov (!%p161_p3, %s1554_s13), 1 }
   0xe   : > { %s2050_s20 = smul.u32 104, %s2617_s13 }
   0xf   : > { %2048 = vmatpush3.bf16.msra.mxu1 %v2063_v3  ;;  %1795 = vmatpush3.bf16.msra.mxu0 %v2063_v3 }
  0x10   : > { %s2162_s23 = scalar_lea.vmem %s2612_s0, %s2050_s20  ;;  %2045 = vmatprep.subr.bf16.mxu1 %v2105_v1  ;;  %1796 = vmatprep.subr.bf16.mxu0 %v2105_v1  ;;  %s2541_s21 = scalar_lea.vmem %s2615_s3, %s2050_s20 }
  0x11   : > { %v199_v5 = vld [vmem:[%s2162_s23 + $0x21] sm:$0xff]  ;;  %v200_v6 = vld [vmem:[%s2162_s23 + $0x29] sm:$0xff]  ;;  %v201_v14 = vld [vmem:[%s2162_s23 + $0x31] sm:$0xff]  ;;  %1483 = vst.msk [vmem:[%s2541_s21] sm:$0xff] %vm243_vm1, %v2105_v1 }
  0x12   : > { %v195_v7 = vld [vmem:[%s2162_s23 + $0x1] sm:$0xff]  ;;  %v196_v8 = vld [vmem:[%s2162_s23 + $0x9] sm:$0xff]  ;;  %v207_v9 = vpack.c.bf16 %v200_v6, %v199_v5  ;;  %v202_v15 = vld [vmem:[%s2162_s23 + $0x39] sm:$0xff]  ;;  %1497 = vst.msk [vmem:[%s2541_s21 + $0x59] sm:$0xff] %vm243_vm1, %v2105_v1 }
  0x13   : > { %v205_v10 = vpack.c.bf16 %v196_v8, %v195_v7  ;;  %2049 = vmatpush3.bf16.msra.mxu1 %v2064_v4  ;;  %1797 = vmatpush3.bf16.msra.mxu0 %v2064_v4  ;;  %v197_v16 = vld [vmem:[%s2162_s23 + $0x11] sm:$0xff]  ;;  %v198_v17 = vld [vmem:[%s2162_s23 + $0x19] sm:$0xff]  ;;  %v208_v19 = vpack.c.bf16 %v202_v15, %v201_v14  ;;  %v203_v23 = vld [vmem:[%s2162_s23 + $0x41] sm:$0xff]  ;;  %1485 = vst.msk [vmem:[%s2541_s21 + $0x8] sm:$0x7] %vm1484_vm2, %v2105_v1 }
  0x14   : > { %1818 = vmatprep.subr.bf16.mxu1 %v2105_v1  ;;  %1846 = vmatprep.subr.bf16.mxu0 %v2105_v1  ;;  %v206_v20 = vpack.c.bf16 %v198_v17, %v197_v16  ;;  %v204_v24 = vld [vmem:[%s2162_s23 + $0x49] sm:$0x3f]  ;;  %v172_v32 = vld [vmem:[%s2162_s23] sm:$0xff]  ;;  %v2242_v34 = vld [vmem:[%s2162_s23 + $0x12] sm:$0xff]  ;;  %1498 = vst.msk [vmem:[%s2541_s21 + $0x61] sm:$0x7] %vm1484_vm2, %v2105_v1 }
  0x15   : > { %v444_v27 = vld [vmem:[%s2162_s23 + $0x2] sm:$0xff]  ;;  %v2222_v28 = vld [vmem:[%s2162_s23 + $0xa] sm:$0xff]  ;;  %v209_v29 = vpack.c.bf16 %v204_v24, %v203_v23  ;;  %v2248_v36 = vld [vmem:[%s2162_s23 + $0x1a] sm:$0xff] }
  0x16   : > { %1807 = vmatmul.mubr.msk.bf16.vlgmr.msra.gmra.mrb[0].mxu1 %vm243_vm1, %v207_v9  ;;  %1799 = vmatmul.mubr.msk.bf16.vlgmr.msra.gmra.mrb[0].mxu0 %vm243_vm1, %v205_v10  ;;  %v454_v30 = vpack.c.bf16 %v2222_v28, %v444_v27  ;;  %v173_v33 = vld [vmem:[%s2162_s23 + $0x8] sm:$0xff]  ;;  %v455_v39 = vpack.c.bf16 %v2248_v36, %v2242_v34  ;;  %v174_v41 = vld [vmem:[%s2162_s23 + $0x10] sm:$0xff]  ;;  %v175_v42 = vld [vmem:[%s2162_s23 + $0x18] sm:$0xff]  ;;  %v600_v10 = vpack.c.bf16 %v2242_v34, %v2222_v28 }
  0x17   : > { %1819 = vmatpush3.bf16.msra.mxu1 %v2065_v11  ;;  %1810 = vmatprep.mubr.msk.bf16.mxu1 %vm2106_vm0, %v2105_v1  ;;  %v182_v37 = vpack.c.bf16 %v173_v33, %v172_v32  ;;  %v2269_v44 = vld [vmem:[%s2162_s23 + $0x22] sm:$0xff]  ;;  %v2274_v45 = vld [vmem:[%s2162_s23 + $0x2a] sm:$0xff]  ;;  %v183_v47 = vpack.c.bf16 %v175_v42, %v174_v41  ;;  %v2302_v53 = vld [vmem:[%s2162_s23 + $0x32] sm:$0xff] }
  0x18   : > { %1820 = vmatprep.subr.bf16.mxu1 %v2105_v1  ;;  %1847 = vmatpush3.bf16.msra.mxu0 %v2067_v12  ;;  %v456_v49 = vpack.c.bf16 %v2274_v45, %v2269_v44  ;;  %v176_v50 = vld [vmem:[%s2162_s23 + $0x20] sm:$0xff]  ;;  %v177_v51 = vld [vmem:[%s2162_s23 + $0x28] sm:$0xff]  ;;  %v178_v57 = vld [vmem:[%s2162_s23 + $0x30] sm:$0xff]  ;;  %v602_v24 = vpack.c.bf16 %v2302_v53, %v2274_v45 }
  0x19   : > { %1848 = vmatprep.subr.bf16.mxu0 %v2105_v1  ;;  %1802 = vmatprep.mubr.msk.bf16.mxu0 %vm2106_vm0, %v2105_v1  ;;  %v2305_v54 = vld [vmem:[%s2162_s23 + $0x3a] sm:$0xff]  ;;  %v184_v55 = vpack.c.bf16 %v177_v51, %v176_v50  ;;  %v2319_v59 = vld [vmem:[%s2162_s23 + $0x42] sm:$0xff]  ;;  %v453_v60 = vld [vmem:[%s2162_s23 + $0x4a] sm:$0x3f] }
  0x1a   : > { %v457_v56 = vpack.c.bf16 %v2305_v54, %v2302_v53  ;;  %v179_v58 = vld [vmem:[%s2162_s23 + $0x38] sm:$0xff]  ;;  %v458_v62 = vpack.c.bf16 %v453_v60, %v2319_v59  ;;  %v180_v63 = vld [vmem:[%s2162_s23 + $0x40] sm:$0xff]  ;;  %v181_v0 = vld [vmem:[%s2162_s23 + $0x48] sm:$0x3f]  ;;  %v603_v28 = vpack.c.bf16 %v2319_v59, %v2305_v54 }
  0x1b   : > { %1821 = vmatpush3.bf16.msra.mxu1 %v2066_v13  ;;  %v185_v61 = vpack.c.bf16 %v179_v58, %v178_v57  ;;  %v736_v2 = vld [vmem:[%s2162_s23 + $0xb] sm:$0xff]  ;;  %v737_v3 = vld [vmem:[%s2162_s23 + $0x13] sm:$0xff]  ;;  %v186_v4 = vpack.c.bf16 %v181_v0, %v180_v63  ;;  %v2082_v6 = vld [vmem:[%s2613_s1 + $0xc0] sm:$0xff]  }
  0x1c   : > { %1822 = vmatprep.subr.bf16.mxu1 %v2105_v1  ;;  %1849 = vmatpush3.bf16.msra.mxu0 %v2069_v18  ;;  %v746_v5 = vpack.c.bf16 %v737_v3, %v736_v2  ;;  %v738_v7 = vld [vmem:[%s2162_s23 + $0x1b] sm:$0xff]  ;;  %v739_v8 = vld [vmem:[%s2162_s23 + $0x23] sm:$0xff]  ;;  %v2086_v13 = vld [vmem:[%s2613_s1 + $0xd0] sm:$0xff]   ;;  %v601_v18 = vpack.c.bf16 %v2269_v44, %v2248_v36 }
  0x1d   : > { %1850 = vmatprep.subr.bf16.mxu0 %v2105_v1  ;;  %v2084_v9 = vld [vmem:[%s2613_s1 + $0xc8] sm:$0xff]   ;;  %v2081_v11 = vld [vmem:[%s2613_s1 + $0xa0] sm:$0xff]   ;;  %v747_v12 = vpack.c.bf16 %v739_v8, %v738_v7  ;;  %v741_v16 = vld [vmem:[%s2162_s23 + $0x33] sm:$0xff] }
  0x1e   : > { %1811 = vmatmul.mubr.msk.bf16.gmra.mrb[4].mxu1 %vm243_vm1, %v208_v19  ;;  %1803 = vmatmul.mubr.msk.bf16.gmra.mrb[4].mxu0 %vm243_vm1, %v206_v20  ;;  %v2083_v14 = vld [vmem:[%s2613_s1 + $0xa8] sm:$0xff]   ;;  %v2088_v17 = vld [vmem:[%s2613_s1 + $0xd8] sm:$0xff]   ;;  %v2085_v19 = vld [vmem:[%s2613_s1 + $0xb0] sm:$0xff]  }
  0x1f   : > { %1823 = vmatpush3.bf16.msra.mxu1 %v2068_v21  ;;  %1814 = vmatprep.mubr.msk.bf16.mxu1 %vm2106_vm0, %v2105_v1  ;;  %v740_v15 = vld [vmem:[%s2162_s23 + $0x2b] sm:$0xff]  ;;  %v2087_v21 = vld [vmem:[%s2613_s1 + $0xb8] sm:$0xff]   ;;  %v743_v23 = vld [vmem:[%s2162_s23 + $0x43] sm:$0xff] }
  0x20   : > { %1851 = vmatpush3.bf16.msra.mxu0 %v2070_v22  ;;  %1824 = vmatprep.subr.bf16.mxu1 %v2105_v1  ;;  %v748_v20 = vpack.c.bf16 %v741_v16, %v740_v15  ;;  %v742_v22 = vld [vmem:[%s2162_s23 + $0x3b] sm:$0xff]  ;;  %v745_v27 = vld [vmem:[%s2162_s23 + $0x53] sm:$0x3f]  ;;  %v2091_v45 = vld [vmem:[%s2613_s1 + $0xe8] sm:$0xff]  }
  0x21   : > { %1852 = vmatprep.subr.bf16.mxu0 %v2105_v1  ;;  %1854 = vmatprep.mubr.msk.bf16.mxu0 %vm2106_vm0, %v2105_v1  ;;  %v883_v32 = vld [vmem:[%s2162_s23 + $0x14] sm:$0xff]  ;;  %v1029_v33 = vld [vmem:[%s2162_s23 + $0x1c] sm:$0xff]  ;;  %v889_v53 = vld [vmem:[%s2162_s23 + $0x44] sm:$0xff] }
  0x22   : > { %v2090_v36 = vld [vmem:[%s2613_s1 + $0x100] sm:$0xff]   ;;  %v2094_v44 = vld [vmem:[%s2613_s1 + $0x110] sm:$0xff]  }
  0x23   : > { %1825 = vmatpush3.bf16.msra.mxu1 %v2071_v25  ;;  %v749_v25 = vpack.c.bf16 %v743_v23, %v742_v22  ;;  %v2089_v42 = vld [vmem:[%s2613_s1 + $0xe0] sm:$0xff]   ;;  %v2093_v50 = vld [vmem:[%s2613_s1 + $0xf0] sm:$0xff]  }
  0x24   : > { %1853 = vmatpush3.bf16.msra.mxu0 %v2072_v26  ;;  %1874 = vmatprep.subr.bf16.mxu1 %v2105_v1  ;;  %v744_v26 = vld [vmem:[%s2162_s23 + $0x4b] sm:$0xff]  ;;  %v1036_v57 = vld [vmem:[%s2162_s23 + $0x54] sm:$0xff]  ;;  %v1037_v58 = vld [vmem:[%s2162_s23 + $0x5c] sm:$0x3f] }
  0x25   : > { %1902 = vmatprep.subr.bf16.mxu0 %v2105_v1  ;;  %v1035_v54 = vld [vmem:[%s2162_s23 + $0x4c] sm:$0xff]  ;;  %v1042_v60 = vpack.c.bf16 %v1037_v58, %v1036_v57  ;;  %v1321_v63 = vld [vmem:[%s2162_s23 + $0x1e] sm:$0xff]  ;;  %v1174_v3 = vld [vmem:[%s2162_s23 + $0x15] sm:$0xff] }
  0x26   : > { %1815 = vmatmul.mubr.msk.bf16.gmra.mrb[8].mxu1 %vm243_vm1, %v209_v29  ;;  %v750_v29 = vpack.c.bf16 %v745_v27, %v744_v26  ;;  %v1178_v15 = vld [vmem:[%s2162_s23 + $0x35] sm:$0xff]  ;;  %v1179_v16 = vld [vmem:[%s2162_s23 + $0x3d] sm:$0xff]  ;;  %v1181_v22 = vld [vmem:[%s2162_s23 + $0x4d] sm:$0xff] }
  0x27   : > { %1826 = vmatprep.mubr.msk.bf16.mxu1 %vm2106_vm0, %v2105_v1  ;;  %1855 = vmatmul.mubr.msk.bf16.vlgmr.msra.gmra.mrb[8].mxu0 %vm243_vm1, %v454_v30  ;;  %v598_v30 = vld [vmem:[%s2162_s23 + $0x4a] sm:$0xff]  ;;  %v1328_v23 = vld [vmem:[%s2162_s23 + $0x56] sm:$0xff] }
  0x28   : > { %1903 = vmatpush3.bf16.msra.mxu0 %v2074_v31  ;;  %1858 = vmatprep.mubr.msk.bf16.mxu0 %vm2106_vm0, %v2105_v1  ;;  %v599_v31 = vld [vmem:[%s2162_s23 + $0x52] sm:$0x3f] }
  0x29   : > { %1904 = vmatprep.subr.bf16.mxu0 %v2105_v1  ;;  %v604_v34 = vpack.c.bf16 %v599_v31, %v598_v30  ;;  %v1182_v27 = vld [vmem:[%s2162_s23 + $0x55] sm:$0xff] }
  0x2c   : > { %1905 = vmatpush3.bf16.msra.mxu0 %v2076_v35  ;;  %v1038_v35 = vpack.c.bf16 %v1029_v33, %v883_v32 }
  0x2d   : > { %1906 = vmatprep.subr.bf16.mxu0 %v2105_v1 }
  0x2e   : > { %1827 = vmatmul.mubr.msk.bf16.vlgmr.msra.gmra.mrb[12].mxu1 %vm243_vm1, %v182_v37  ;;  %v882_v37 = vld [vmem:[%s2162_s23 + $0xc] sm:$0xff] }
  0x2f   : > { %1875 = vmatpush3.bf16.msra.mxu1 %v2073_v38  ;;  %1830 = vmatprep.mubr.msk.bf16.mxu1 %vm2106_vm0, %v2105_v1  ;;  %v885_v38 = vld [vmem:[%s2162_s23 + $0x24] sm:$0xff]  ;;  %v892_v41 = vpack.c.bf16 %v883_v32, %v882_v37 }
  0x30   : > { %1859 = vmatmul.mubr.msk.bf16.gmra.mrb[12].mxu0 %vm243_vm1, %v455_v39  ;;  %1876 = vmatprep.subr.bf16.mxu1 %v2105_v1  ;;  %v1031_v39 = vld [vmem:[%s2162_s23 + $0x2c] sm:$0xff] }
  0x31   : > { %1862 = vmatprep.mubr.msk.bf16.mxu0 %vm2106_vm0, %v2105_v1  ;;  %1907 = vmatpush3.bf16.msra.mxu0 %v2078_v40  ;;  %v2092_v40 = vld [vmem:[%s2613_s1 + $0x108] sm:$0xff]  }
  0x32   : > { %1908 = vmatprep.subr.bf16.mxu0 %v2105_v1 }
  0x33   : > { %1877 = vmatpush3.bf16.msra.mxu1 %v2075_v43  ;;  %v1039_v43 = vpack.c.bf16 %v1031_v39, %v885_v38 }
  0x34   : > { %1878 = vmatprep.subr.bf16.mxu1 %v2105_v1 }
  0x35   : > { %1909 = vmatpush3.bf16.msra.mxu0 %v2080_v46  ;;  %v887_v46 = vld [vmem:[%s2162_s23 + $0x34] sm:$0xff] }
  0x36   : > { %1831 = vmatmul.mubr.msk.bf16.gmra.mrb[16].mxu1 %vm243_vm1, %v183_v47  ;;  %1958 = vmatprep.subr.bf16.mxu0 %v2105_v1  ;;  %v1033_v47 = vld [vmem:[%s2162_s23 + $0x3c] sm:$0xff] }
  0x37   : > { %1834 = vmatprep.mubr.msk.bf16.mxu1 %vm2106_vm0, %v2105_v1  ;;  %1879 = vmatpush3.bf16.msra.mxu1 %v2077_v48  ;;  %v2096_v48 = vld [vmem:[%s2613_s1 + $0x118] sm:$0xff]   ;;  %v1040_v51 = vpack.c.bf16 %v1033_v47, %v887_v46  ;;  %v895_v59 = vpack.c.bf16 %v889_v53, %v1033_v47 }
  0x38   : > { %1863 = vmatmul.mubr.msk.bf16.gmra.mrb[16].mxu0 %vm243_vm1, %v456_v49  ;;  %1880 = vmatprep.subr.bf16.mxu1 %v2105_v1  ;;  %v893_v49 = vpack.c.bf16 %v885_v38, %v1029_v33 }
  0x39   : > { %1866 = vmatprep.mubr.msk.bf16.mxu0 %vm2106_vm0, %v2105_v1 }
  0x3b   : > { %1881 = vmatpush3.bf16.msra.mxu1 %v2079_v52  ;;  %v2095_v52 = vld [vmem:[%s2613_s1 + $0xf8] sm:$0xff]  }
  0x3c   : > { %1930 = vmatprep.subr.bf16.mxu1 %v2105_v1 }
  0x3e   : > { %1835 = vmatmul.mubr.msk.bf16.gmra.mrb[20].mxu1 %vm243_vm1, %v184_v55  ;;  %v894_v55 = vpack.c.bf16 %v887_v46, %v1031_v39 }
  0x3f   : > { %1838 = vmatprep.mubr.msk.bf16.mxu1 %vm2106_vm0, %v2105_v1 }
  0x40   : > { %1867 = vmatmul.mubr.msk.bf16.gmra.mrb[20].mxu0 %vm243_vm1, %v457_v56  ;;  %v1041_v56 = vpack.c.bf16 %v1035_v54, %v889_v53 }
  0x41   : > { %1870 = vmatprep.mubr.msk.bf16.mxu0 %vm2106_vm0, %v2105_v1 }
  0x46   : > { %1839 = vmatmul.mubr.msk.bf16.gmra.mrb[24].mxu1 %vm243_vm1, %v185_v61  ;;  %v891_v61 = vld [vmem:[%s2162_s23 + $0x54] sm:$0x3f] }
  0x47   : > { %1842 = vmatprep.mubr.msk.bf16.mxu1 %vm2106_vm0, %v2105_v1  ;;  %v896_v0 = vpack.c.bf16 %v891_v61, %v1035_v54 }
  0x48   : > { %1871 = vmatmul.mubr.msk.bf16.gmra.mrb[24].mxu0 %vm243_vm1, %v458_v62  ;;  %v1320_v62 = vld [vmem:[%s2162_s23 + $0x16] sm:$0xff] }
  0x49   : > { %1910 = vmatprep.mubr.msk.bf16.mxu0 %vm2106_vm0, %v2105_v1  ;;  %v1330_v2 = vpack.c.bf16 %v1321_v63, %v1320_v62 }
  0x4e   : > { %1843 = vmatmul.mubr.msk.bf16.gmra.mrb[28].mxu1 %vm243_vm1, %v186_v4  ;;  %v1175_v4 = vld [vmem:[%s2162_s23 + $0x1d] sm:$0xff] }
  0x4f   : > { %1882 = vmatprep.mubr.msk.bf16.mxu1 %vm2106_vm0, %v2105_v1  ;;  %v1184_v7 = vpack.c.bf16 %v1175_v4, %v1174_v3 }
  0x50   : > { %1911 = vmatmul.mubr.msk.bf16.vlgmr.msra.gmra.mrb[28].mxu0 %vm243_vm1, %v746_v5  ;;  %v1322_v5 = vld [vmem:[%s2162_s23 + $0x26] sm:$0xff] }
  0x51   : > { %1959 = vmatpush3.bf16.msra.mxu0 %v2082_v6  ;;  %1914 = vmatprep.mubr.msk.bf16.mxu0 %vm2106_vm0, %v2105_v1  ;;  %v1323_v6 = vld [vmem:[%s2162_s23 + $0x2e] sm:$0xff] }
  0x52   : > { %1960 = vmatprep.subr.bf16.mxu0 %v2105_v1  ;;  %v1331_v8 = vpack.c.bf16 %v1323_v6, %v1322_v5 }
  0x55   : > { %1961 = vmatpush3.bf16.msra.mxu0 %v2084_v9  ;;  %v1176_v9 = vld [vmem:[%s2162_s23 + $0x25] sm:$0xff] }
  0x56   : > { %1883 = vmatmul.mubr.msk.bf16.vlgmr.msra.gmra.mrb[32].mxu1 %vm243_vm1, %v600_v10  ;;  %1962 = vmatprep.subr.bf16.mxu0 %v2105_v1  ;;  %v1177_v10 = vld [vmem:[%s2162_s23 + $0x2d] sm:$0xff] }
  0x57   : > { %1931 = vmatpush3.bf16.msra.mxu1 %v2081_v11  ;;  %1886 = vmatprep.mubr.msk.bf16.mxu1 %vm2106_vm0, %v2105_v1  ;;  %v1324_v11 = vld [vmem:[%s2162_s23 + $0x36] sm:$0xff] }
  0x58   : > { %1915 = vmatmul.mubr.msk.bf16.gmra.mrb[32].mxu0 %vm243_vm1, %v747_v12  ;;  %1932 = vmatprep.subr.bf16.mxu1 %v2105_v1  ;;  %v1325_v12 = vld [vmem:[%s2162_s23 + $0x3e] sm:$0xff] }
  0x59   : > { %1918 = vmatprep.mubr.msk.bf16.mxu0 %vm2106_vm0, %v2105_v1  ;;  %1963 = vmatpush3.bf16.msra.mxu0 %v2086_v13  ;;  %v1185_v13 = vpack.c.bf16 %v1177_v10, %v1176_v9 }
  0x5a   : > { %1964 = vmatprep.subr.bf16.mxu0 %v2105_v1 }
  0x5b   : > { %1933 = vmatpush3.bf16.msra.mxu1 %v2083_v14  ;;  %v1332_v14 = vpack.c.bf16 %v1325_v12, %v1324_v11 }
  0x5c   : > { %1934 = vmatprep.subr.bf16.mxu1 %v2105_v1 }
  0x5d   : > { %1965 = vmatpush3.bf16.msra.mxu0 %v2088_v17  ;;  %v1326_v17 = vld [vmem:[%s2162_s23 + $0x46] sm:$0xff] }
  0x5e   : > { %1887 = vmatmul.mubr.msk.bf16.gmra.mrb[36].mxu1 %vm243_vm1, %v601_v18  ;;  %2014 = vmatprep.subr.bf16.mxu0 %v2105_v1  ;;  %v1327_v18 = vld [vmem:[%s2162_s23 + $0x4e] sm:$0xff] }
  0x5f   : > { %1890 = vmatprep.mubr.msk.bf16.mxu1 %vm2106_vm0, %v2105_v1  ;;  %1935 = vmatpush3.bf16.msra.mxu1 %v2085_v19  ;;  %v1186_v19 = vpack.c.bf16 %v1179_v16, %v1178_v15 }
  0x60   : > { %1919 = vmatmul.mubr.msk.bf16.gmra.mrb[36].mxu0 %vm243_vm1, %v748_v20  ;;  %1936 = vmatprep.subr.bf16.mxu1 %v2105_v1  ;;  %v1333_v20 = vpack.c.bf16 %v1327_v18, %v1326_v17 }
  0x61   : > { %1922 = vmatprep.mubr.msk.bf16.mxu0 %vm2106_vm0, %v2105_v1 }
  0x63   : > { %1937 = vmatpush3.bf16.msra.mxu1 %v2087_v21  ;;  %v1180_v21 = vld [vmem:[%s2162_s23 + $0x45] sm:$0xff] }
  0x64   : > { %1986 = vmatprep.subr.bf16.mxu1 %v2105_v1 }
  0x66   : > { %1891 = vmatmul.mubr.msk.bf16.gmra.mrb[40].mxu1 %vm243_vm1, %v602_v24  ;;  %v1329_v24 = vld [vmem:[%s2162_s23 + $0x5e] sm:$0x3f] }
  0x67   : > { %1894 = vmatprep.mubr.msk.bf16.mxu1 %vm2106_vm0, %v2105_v1  ;;  %v1334_v26 = vpack.c.bf16 %v1329_v24, %v1328_v23 }
  0x68   : > { %1923 = vmatmul.mubr.msk.bf16.gmra.mrb[40].mxu0 %vm243_vm1, %v749_v25  ;;  %v1187_v25 = vpack.c.bf16 %v1181_v22, %v1180_v21 }
  0x69   : > { %1926 = vmatprep.mubr.msk.bf16.mxu0 %vm2106_vm0, %v2105_v1 }
  0x6e   : > { %1895 = vmatmul.mubr.msk.bf16.gmra.mrb[44].mxu1 %vm243_vm1, %v603_v28  ;;  %v1183_v28 = vld [vmem:[%s2162_s23 + $0x5d] sm:$0x3f] }
  0x6f   : > { %1898 = vmatprep.mubr.msk.bf16.mxu1 %vm2106_vm0, %v2105_v1 }
  0x70   : > { %1927 = vmatmul.mubr.msk.bf16.gmra.mrb[44].mxu0 %vm243_vm1, %v750_v29  ;;  %v1188_v29 = vpack.c.bf16 %v1183_v28, %v1182_v27 }
  0x71   : > { %1966 = vmatprep.mubr.msk.bf16.mxu0 %vm2106_vm0, %v2105_v1 }
  0x76   : > { %1899 = vmatmul.mubr.msk.bf16.gmra.mrb[48].mxu1 %vm243_vm1, %v604_v34 }
  0x77   : > { %1938 = vmatprep.mubr.msk.bf16.mxu1 %vm2106_vm0, %v2105_v1 }
  0x78   : > { %1967 = vmatmul.mubr.msk.bf16.vlgmr.msra.gmra.mrb[48].mxu0 %vm243_vm1, %v1038_v35 }
  0x79   : > { %2015 = vmatpush3.bf16.msra.mxu0 %v2090_v36  ;;  %1970 = vmatprep.mubr.msk.bf16.mxu0 %vm2106_vm0, %v2105_v1 }
  0x7a   : > { %2016 = vmatprep.subr.bf16.mxu0 %v2105_v1 }
  0x7d   : > { %2017 = vmatpush3.bf16.msra.mxu0 %v2092_v40 }
  0x7e   : > { %1939 = vmatmul.mubr.msk.bf16.vlgmr.msra.gmra.mrb[52].mxu1 %vm243_vm1, %v892_v41  ;;  %2018 = vmatprep.subr.bf16.mxu0 %v2105_v1 }
  0x7f   : > { %1987 = vmatpush3.bf16.msra.mxu1 %v2089_v42  ;;  %1942 = vmatprep.mubr.msk.bf16.mxu1 %vm2106_vm0, %v2105_v1 }
  0x80   : > { %1971 = vmatmul.mubr.msk.bf16.gmra.mrb[52].mxu0 %vm243_vm1, %v1039_v43  ;;  %1988 = vmatprep.subr.bf16.mxu1 %v2105_v1 }
  0x81   : > { %1974 = vmatprep.mubr.msk.bf16.mxu0 %vm2106_vm0, %v2105_v1  ;;  %2019 = vmatpush3.bf16.msra.mxu0 %v2094_v44 }
  0x82   : > { %2020 = vmatprep.subr.bf16.mxu0 %v2105_v1 }
  0x83   : > { %1989 = vmatpush3.bf16.msra.mxu1 %v2091_v45 }
  0x84   : > { %1990 = vmatprep.subr.bf16.mxu1 %v2105_v1 }
  0x85   : > { %2021 = vmatpush3.bf16.msra.mxu0 %v2096_v48 }
  0x86   : > { %1943 = vmatmul.mubr.msk.bf16.gmra.mrb[56].mxu1 %vm243_vm1, %v893_v49 }
  0x87   : > { %1946 = vmatprep.mubr.msk.bf16.mxu1 %vm2106_vm0, %v2105_v1  ;;  %1991 = vmatpush3.bf16.msra.mxu1 %v2093_v50 }
  0x88   : > { %1975 = vmatmul.mubr.msk.bf16.gmra.mrb[56].mxu0 %vm243_vm1, %v1040_v51  ;;  %1992 = vmatprep.subr.bf16.mxu1 %v2105_v1 }
  0x89   : > { %1978 = vmatprep.mubr.msk.bf16.mxu0 %vm2106_vm0, %v2105_v1 }
  0x8b   : > { %1993 = vmatpush3.bf16.msra.mxu1 %v2095_v52 }
  0x8e   : > { %1947 = vmatmul.mubr.msk.bf16.gmra.mrb[60].mxu1 %vm243_vm1, %v894_v55 }
  0x8f   : > { %1950 = vmatprep.mubr.msk.bf16.mxu1 %vm2106_vm0, %v2105_v1 }
  0x90   : > { %1979 = vmatmul.mubr.msk.bf16.gmra.mrb[60].mxu0 %vm243_vm1, %v1041_v56 }
  0x91   : > { %1982 = vmatprep.mubr.msk.bf16.mxu0 %vm2106_vm0, %v2105_v1 }
  0x96   : > { %1951 = vmatmul.mubr.msk.bf16.gmra.mrb[64].mxu1 %vm243_vm1, %v895_v59 }
  0x97   : > { %1954 = vmatprep.mubr.msk.bf16.mxu1 %vm2106_vm0, %v2105_v1 }
  0x98   : > { %1983 = vmatmul.mubr.msk.bf16.gmra.mrb[64].mxu0 %vm243_vm1, %v1042_v60 }
  0x99   : > { %2022 = vmatprep.mubr.msk.bf16.mxu0 %vm2106_vm0, %v2105_v1 }
  0x9e   : > { %1955 = vmatmul.mubr.msk.bf16.gmra.mrb[68].mxu1 %vm243_vm1, %v896_v0 }
  0x9f   : > { %1994 = vmatprep.mubr.msk.bf16.mxu1 %vm2106_vm0, %v2105_v1 }
  0xa0   : > { %2023 = vmatmul.mubr.msk.bf16.vlgmr.msra.gmra.mrb[68].mxu0 %vm243_vm1, %v1330_v2 }
  0xa1   : > { %2026 = vmatprep.mubr.msk.bf16.mxu0 %vm2106_vm0, %v2105_v1 }
  0xa6   : > { %1995 = vmatmul.mubr.msk.bf16.vlgmr.msra.gmra.mrb[72].mxu1 %vm243_vm1, %v1184_v7 }
  0xa7   : > { %1998 = vmatprep.mubr.msk.bf16.mxu1 %vm2106_vm0, %v2105_v1 }
  0xa8   : > { %2027 = vmatmul.mubr.msk.bf16.gmra.mrb[72].mxu0 %vm243_vm1, %v1331_v8 }
  0xa9   : > { %2030 = vmatprep.mubr.msk.bf16.mxu0 %vm2106_vm0, %v2105_v1 }
  0xae   : > { %1999 = vmatmul.mubr.msk.bf16.gmra.mrb[76].mxu1 %vm243_vm1, %v1185_v13 }
  0xaf   : > { %2002 = vmatprep.mubr.msk.bf16.mxu1 %vm2106_vm0, %v2105_v1 }
  0xb0   : > { %2031 = vmatmul.mubr.msk.bf16.gmra.mrb[76].mxu0 %vm243_vm1, %v1332_v14 }
  0xb1   : > { %2034 = vmatprep.mubr.msk.bf16.mxu0 %vm2106_vm0, %v2105_v1 }
  0xb6   : > { %2003 = vmatmul.mubr.msk.bf16.gmra.mrb[80].mxu1 %vm243_vm1, %v1186_v19 }
  0xb7   : > { %2006 = vmatprep.mubr.msk.bf16.mxu1 %vm2106_vm0, %v2105_v1 }
  0xb8   : > { %2035 = vmatmul.mubr.msk.bf16.gmra.mrb[80].mxu0 %vm243_vm1, %v1333_v20 }
  0xb9   : > { %2038 = vmatprep.mubr.msk.bf16.mxu0 %vm2106_vm0, %v2105_v1 }
  0xbe   : > { %2007 = vmatmul.mubr.msk.bf16.gmra.mrb[84].mxu1 %vm243_vm1, %v1187_v25 }
  0xbf   : > { %2010 = vmatprep.mubr.msk.bf16.mxu1 %vm2106_vm0, %v2105_v1 }
  0xc0   : > { %2039 = vmatmul.mubr.msk.bf16.gmra.mrb[84].mxu0 %vm243_vm1, %v1334_v26 }
  0xc6   : > { %2011 = vmatmul.mubr.msk.bf16.gmra.mrb[88].mxu1 %vm243_vm1, %v1188_v29 }
  0xe9   : > { %v309_v30 = vpop.f32.mrb[0].mxu1  ;;  %v293_v31 = vpop.f32.mrb[0].mxu0 }
  0xea   : > { %v1808_v32 = vpop.f32.mrb[1].mxu1  ;;  %v1800_v33 = vpop.f32.mrb[1].mxu0 }
  0xeb   : > { %v312_v34 = vpop.f32.mrb[2].mxu1  ;;  %v296_v35 = vpop.f32.mrb[2].mxu0 }
  0xec   : > { %v1809_v36 = vpop.f32.mrb[3].mxu1  ;;  %v1801_v37 = vpop.f32.mrb[3].mxu0 }
  0xf1   : > { %v317_v38 = vpop.f32.mrb[4].mxu1  ;;  %v301_v39 = vpop.f32.mrb[4].mxu0 }
  0xf2   : > { %v1812_v40 = vpop.f32.mrb[5].mxu1  ;;  %v1804_v41 = vpop.f32.mrb[5].mxu0 }
  0xf3   : > { %v320_v42 = vpop.f32.mrb[6].mxu1  ;;  %v304_v43 = vpop.f32.mrb[6].mxu0 }
  0xf4   : > { %v1813_v44 = vpop.f32.mrb[7].mxu1  ;;  %v1805_v45 = vpop.f32.mrb[7].mxu0 }
  0xf9   : > { %v2534_v46 = vpop.f32.mrb[8].mxu1 }
  0xfa   : > { %v1816_v47 = vpop.f32.mrb[9].mxu1  ;;  %v541_v48 = vpop.f32.mrb[8].mxu0 }
  0xfb   : > { %v2543_v49 = vpop.f32.mrb[10].mxu1  ;;  %v1856_v50 = vpop.f32.mrb[9].mxu0 }
  0xfc   : > { %v1817_v51 = vpop.f32.mrb[11].mxu1  ;;  %v544_v52 = vpop.f32.mrb[10].mxu0 }
  0xfd   : > { %v1857_v53 = vpop.f32.mrb[11].mxu0 }
 0x101   : > { %v405_v54 = vpop.f32.mrb[12].mxu1 }
 0x102   : > { %v406_v55 = vadd.f32 %v405_v54, %v293_v31  ;;  %v1828_v56 = vpop.f32.mrb[13].mxu1 }
 0x103   : > { %v408_v57 = vpop.f32.mrb[14].mxu1  ;;  %v549_v58 = vpop.f32.mrb[12].mxu0 }
 0x104   : > { %v580_v59 = vadd.f32 %v541_v48, %v406_v55  ;;  %v409_v60 = vadd.f32 %v408_v57, %v296_v35  ;;  %v1829_v61 = vpop.f32.mrb[15].mxu1  ;;  %v1860_v62 = vpop.f32.mrb[13].mxu0 }
 0x105   : > { %v552_v63 = vpop.f32.mrb[14].mxu0 }
 0x106   : > { %v581_v0 = vadd.f32 %v544_v52, %v409_v60  ;;  %v1861_v2 = vpop.f32.mrb[15].mxu0 }
 0x109   : > { %v413_v3 = vpop.f32.mrb[16].mxu1 }
 0x10a   : > { %v414_v4 = vadd.f32 %v413_v3, %v301_v39  ;;  %v1832_v5 = vpop.f32.mrb[17].mxu1 }
 0x10b   : > { %v416_v6 = vpop.f32.mrb[18].mxu1  ;;  %v557_v7 = vpop.f32.mrb[16].mxu0 }
 0x10c   : > { %v582_v8 = vadd.f32 %v549_v58, %v414_v4  ;;  %v417_v9 = vadd.f32 %v416_v6, %v304_v43  ;;  %v1833_v1 = vpop.f32.mrb[19].mxu1  ;;  %v1864_v10 = vpop.f32.mrb[17].mxu0 }
 0x10d   : > { %v560_v11 = vpop.f32.mrb[18].mxu0 }
 0x10e   : > { %v583_v12 = vadd.f32 %v552_v63, %v417_v9  ;;  %v1865_v13 = vpop.f32.mrb[19].mxu0 }
 0x111   : > { %v421_v14 = vpop.f32.mrb[20].mxu1 }
 0x112   : > { %v422_v15 = vadd.f32 %v421_v14, %v309_v30  ;;  %v1836_v16 = vpop.f32.mrb[21].mxu1 }
 0x113   : > { %v424_v17 = vpop.f32.mrb[22].mxu1  ;;  %v565_v18 = vpop.f32.mrb[20].mxu0 }
 0x114   : > { %v584_v19 = vadd.f32 %v557_v7, %v422_v15  ;;  %v425_v20 = vadd.f32 %v424_v17, %v312_v34  ;;  %v1837_v21 = vpop.f32.mrb[23].mxu1  ;;  %v1868_v22 = vpop.f32.mrb[21].mxu0 }
 0x115   : > { %v568_v23 = vpop.f32.mrb[22].mxu0 }
 0x116   : > { %v585_v24 = vadd.f32 %v560_v11, %v425_v20  ;;  %v1869_v25 = vpop.f32.mrb[23].mxu0 }
 0x119   : > { %v429_v26 = vpop.f32.mrb[24].mxu1 }
 0x11a   : > { %v430_v27 = vadd.f32 %v429_v26, %v317_v38  ;;  %v1840_v28 = vpop.f32.mrb[25].mxu1 }
 0x11b   : > { %v432_v29 = vpop.f32.mrb[26].mxu1  ;;  %v573_v31 = vpop.f32.mrb[24].mxu0 }
 0x11c   : > { %v586_v32 = vadd.f32 %v565_v18, %v430_v27  ;;  %v433_v33 = vadd.f32 %v432_v29, %v320_v42  ;;  %v1841_v35 = vpop.f32.mrb[27].mxu1  ;;  %v1872_v36 = vpop.f32.mrb[25].mxu0 }
 0x11d   : > { %v576_v30 = vpop.f32.mrb[26].mxu0 }
 0x11e   : > { %v587_v37 = vadd.f32 %v568_v23, %v433_v33  ;;  %v1873_v39 = vpop.f32.mrb[27].mxu0 }
 0x121   : > { %v437_v40 = vpop.f32.mrb[28].mxu1 }
 0x122   : > { %v438_v34 = vadd.f32 %v437_v40, %v2534_v46  ;;  %v1844_v41 = vpop.f32.mrb[29].mxu1 }
 0x123   : > { %v440_v43 = vpop.f32.mrb[30].mxu1  ;;  %v833_v44 = vpop.f32.mrb[28].mxu0 }
 0x124   : > { %v588_v45 = vadd.f32 %v573_v31, %v438_v34  ;;  %v441_v47 = vadd.f32 %v440_v43, %v2543_v49  ;;  %v1845_v38 = vpop.f32.mrb[31].mxu1  ;;  %v1912_v48 = vpop.f32.mrb[29].mxu0 }
 0x125   : > { %v836_v50 = vpop.f32.mrb[30].mxu0 }
 0x126   : > { %v589_v51 = vadd.f32 %v576_v30, %v441_v47  ;;  %v1913_v52 = vpop.f32.mrb[31].mxu0 }
 0x129   : > { %v687_v42 = vpop.f32.mrb[32].mxu1 }
 0x12a   : > { %v726_v53 = vadd.f32 %v687_v42, %v580_v59  ;;  %v1884_v54 = vpop.f32.mrb[33].mxu1 }
 0x12b   : > { %v690_v55 = vpop.f32.mrb[34].mxu1  ;;  %v841_v56 = vpop.f32.mrb[32].mxu0 }
 0x12c   : > { %v872_v57 = vadd.f32 %v833_v44, %v726_v53  ;;  %v727_v58 = vadd.f32 %v690_v55, %v581_v0  ;;  %v1885_v60 = vpop.f32.mrb[35].mxu1  ;;  %v1916_v46 = vpop.f32.mrb[33].mxu0 }
 0x12d   : > { %v844_v61 = vpop.f32.mrb[34].mxu0 }
 0x12e   : > { %v873_v62 = vadd.f32 %v836_v50, %v727_v58  ;;  %v1917_v63 = vpop.f32.mrb[35].mxu0 }
 0x131   : > { %v695_v2 = vpop.f32.mrb[36].mxu1 }
 0x132   : > { %v728_v3 = vadd.f32 %v695_v2, %v582_v8  ;;  %v1888_v49 = vpop.f32.mrb[37].mxu1 }
 0x133   : > { %v698_v4 = vpop.f32.mrb[38].mxu1  ;;  %v849_v5 = vpop.f32.mrb[36].mxu0 }
 0x134   : > { %v874_v6 = vadd.f32 %v841_v56, %v728_v3  ;;  %v729_v7 = vadd.f32 %v698_v4, %v583_v12  ;;  %v1889_v9 = vpop.f32.mrb[39].mxu1  ;;  %v1920_v1 = vpop.f32.mrb[37].mxu0 }
 0x135   : > { %v852_v59 = vpop.f32.mrb[38].mxu0 }
 0x136   : > { %v875_v10 = vadd.f32 %v844_v61, %v729_v7  ;;  %v1921_v11 = vpop.f32.mrb[39].mxu0 }
 0x139   : > { %v703_v13 = vpop.f32.mrb[40].mxu1 }
 0x13a   : > { %v730_v14 = vadd.f32 %v703_v13, %v584_v19  ;;  %v1892_v0 = vpop.f32.mrb[41].mxu1 }
 0x13b   : > { %v706_v15 = vpop.f32.mrb[42].mxu1  ;;  %v857_v16 = vpop.f32.mrb[40].mxu0 }
 0x13c   : > { %v876_v17 = vadd.f32 %v849_v5, %v730_v14  ;;  %v731_v18 = vadd.f32 %v706_v15, %v585_v24  ;;  %v1893_v20 = vpop.f32.mrb[43].mxu1  ;;  %v1924_v21 = vpop.f32.mrb[41].mxu0 }
 0x13d   : > { %v860_v8 = vpop.f32.mrb[42].mxu0 }
 0x13e   : > { %v877_v22 = vadd.f32 %v852_v59, %v731_v18  ;;  %v1925_v23 = vpop.f32.mrb[43].mxu0 }
 0x141   : > { %v711_v25 = vpop.f32.mrb[44].mxu1 }
 0x142   : > { %v732_v26 = vadd.f32 %v711_v25, %v586_v32  ;;  %v1896_v12 = vpop.f32.mrb[45].mxu1 }
 0x143   : > { %v714_v27 = vpop.f32.mrb[46].mxu1  ;;  %v865_v28 = vpop.f32.mrb[44].mxu0 }
 0x144   : > { %v878_v29 = vadd.f32 %v857_v16, %v732_v26  ;;  %v733_v31 = vadd.f32 %v714_v27, %v587_v37  ;;  %v1897_v33 = vpop.f32.mrb[47].mxu1  ;;  %v1928_v35 = vpop.f32.mrb[45].mxu0 }
 0x145   : > { %v868_v19 = vpop.f32.mrb[46].mxu0 }
 0x146   : > { %v879_v36 = vadd.f32 %v860_v8, %v733_v31  ;;  %v1929_v30 = vpop.f32.mrb[47].mxu0 }
 0x149   : > { %v719_v39 = vpop.f32.mrb[48].mxu1 }
 0x14a   : > { %v734_v40 = vadd.f32 %v719_v39, %v588_v45  ;;  %v1900_v24 = vpop.f32.mrb[49].mxu1 }
 0x14b   : > { %v722_v34 = vpop.f32.mrb[50].mxu1  ;;  %v1125_v41 = vpop.f32.mrb[48].mxu0 }
 0x14c   : > { %v880_v43 = vadd.f32 %v865_v28, %v734_v40  ;;  %v735_v44 = vadd.f32 %v722_v34, %v589_v51  ;;  %v1901_v47 = vpop.f32.mrb[51].mxu1  ;;  %v1968_v38 = vpop.f32.mrb[49].mxu0 }
 0x14d   : > { %v1128_v32 = vpop.f32.mrb[50].mxu0 }
 0x14e   : > { %v881_v48 = vadd.f32 %v868_v19, %v735_v44  ;;  %v1969_v50 = vpop.f32.mrb[51].mxu0 }
 0x151   : > { %v979_v52 = vpop.f32.mrb[52].mxu1 }
 0x152   : > { %v1018_v42 = vadd.f32 %v979_v52, %v872_v57  ;;  %v1940_v37 = vpop.f32.mrb[53].mxu1 }
 0x153   : > { %v982_v53 = vpop.f32.mrb[54].mxu1  ;;  %v1133_v54 = vpop.f32.mrb[52].mxu0 }
 0x154   : > { %v1164_v55 = vadd.f32 %v1125_v41, %v1018_v42  ;;  %v1019_v56 = vadd.f32 %v982_v53, %v873_v62  ;;  %v1941_v58 = vpop.f32.mrb[55].mxu1  ;;  %v1972_v60 = vpop.f32.mrb[53].mxu0 }
 0x155   : > { %v1136_v45 = vpop.f32.mrb[54].mxu0 }
 0x156   : > { %v1165_v46 = vadd.f32 %v1128_v32, %v1019_v56  ;;  %v1973_v61 = vpop.f32.mrb[55].mxu0 }
 0x159   : > { %v987_v63 = vpop.f32.mrb[56].mxu1 }
 0x15a   : > { %v1020_v2 = vadd.f32 %v987_v63, %v874_v6  ;;  %v1944_v51 = vpop.f32.mrb[57].mxu1 }
 0x15b   : > { %v990_v3 = vpop.f32.mrb[58].mxu1  ;;  %v1141_v49 = vpop.f32.mrb[56].mxu0 }
 0x15c   : > { %v1166_v4 = vadd.f32 %v1133_v54, %v1020_v2  ;;  %v1021_v5 = vadd.f32 %v990_v3, %v875_v10  ;;  %v1945_v7 = vpop.f32.mrb[59].mxu1  ;;  %v1976_v9 = vpop.f32.mrb[57].mxu0 }
 0x15d   : > { %v1144_v57 = vpop.f32.mrb[58].mxu0 }
 0x15e   : > { %v1167_v1 = vadd.f32 %v1136_v45, %v1021_v5  ;;  %v1977_v59 = vpop.f32.mrb[59].mxu0 }
 0x161   : > { %v995_v11 = vpop.f32.mrb[60].mxu1 }
 0x162   : > { %v1022_v13 = vadd.f32 %v995_v11, %v876_v17  ;;  %v1948_v62 = vpop.f32.mrb[61].mxu1 }
 0x163   : > { %v998_v14 = vpop.f32.mrb[62].mxu1  ;;  %v1149_v0 = vpop.f32.mrb[60].mxu0 }
 0x164   : > { %v2557_v15 = vadd.f32 %v1141_v49, %v1022_v13  ;;  %v1023_v16 = vadd.f32 %v998_v14, %v877_v22  ;;  %v1949_v18 = vpop.f32.mrb[63].mxu1  ;;  %v1980_v6 = vpop.f32.mrb[61].mxu0 }
 0x165   : > { %v1152_v20 = vpop.f32.mrb[62].mxu0 }
 0x166   : > { %v2559_v21 = vadd.f32 %v1144_v57, %v1023_v16  ;;  %v1981_v8 = vpop.f32.mrb[63].mxu0 }
 0x169   : > { %v1003_v10 = vpop.f32.mrb[64].mxu1 }
 0x16a   : > { %v1024_v23 = vadd.f32 %v1003_v10, %v878_v29  ;;  %v1952_v25 = vpop.f32.mrb[65].mxu1 }
 0x16b   : > { %v1006_v26 = vpop.f32.mrb[66].mxu1  ;;  %v1157_v12 = vpop.f32.mrb[64].mxu0 }
 0x16c   : > { %v2561_v27 = vadd.f32 %v1149_v0, %v1024_v23  ;;  %v1025_v17 = vadd.f32 %v1006_v26, %v879_v36  ;;  %v1953_v28 = vpop.f32.mrb[67].mxu1  ;;  %v1984_v31 = vpop.f32.mrb[65].mxu0 }
 0x16d   : > { %v1160_v33 = vpop.f32.mrb[66].mxu0 }
 0x16e   : > { %v2563_v35 = vadd.f32 %v1152_v20, %v1025_v17  ;;  %v1985_v22 = vpop.f32.mrb[67].mxu0 }
 0x171   : > { %v1011_v19 = vpop.f32.mrb[68].mxu1 }
 0x172   : > { %v1026_v30 = vadd.f32 %v1011_v19, %v880_v43  ;;  %v1956_v39 = vpop.f32.mrb[69].mxu1  ;;  %v2572_v43 = vld [vmem:[%s2614_s2] ss:$0 sm:$0xff] }
 0x173   : > { %v1014_v40 = vpop.f32.mrb[70].mxu1  ;;  %v1417_v24 = vpop.f32.mrb[68].mxu0 }
 0x174   : > { %v2565_v34 = vadd.f32 %v1157_v12, %v1026_v30  ;;  %v1027_v29 = vadd.f32 %v1014_v40, %v881_v48  ;;  %v1957_v41 = vpop.f32.mrb[71].mxu1  ;;  %v2024_v44 = vpop.f32.mrb[69].mxu0 }
 0x175   : > { %v1420_v47 = vpop.f32.mrb[70].mxu0 }
 0x176   : > { %v2567_v38 = vadd.f32 %v1160_v33, %v1027_v29  ;;  %v2025_v36 = vpop.f32.mrb[71].mxu0 }
 0x179   : > { %v1271_v32 = vpop.f32.mrb[72].mxu1 }
 0x17a   : > { %v1310_v50 = vadd.f32 %v1271_v32, %v1164_v55  ;;  %v1996_v52 = vpop.f32.mrb[73].mxu1 }
 0x17b   : > { %v1274_v42 = vpop.f32.mrb[74].mxu1  ;;  %v1425_v37 = vpop.f32.mrb[72].mxu0 }
 0x17c   : > { %v1456_v53 = vadd.f32 %v1417_v24, %v1310_v50  ;;  %v1311_v48 = vadd.f32 %v1274_v42, %v1165_v46  ;;  %v1997_v54 = vpop.f32.mrb[75].mxu1  ;;  %v2028_v56 = vpop.f32.mrb[73].mxu0 }
 0x17d   : > { %v1428_v58 = vpop.f32.mrb[74].mxu0 }
 0x17e   : > { %v1473_v60 = vadd.f32 %v2572_v43, %v1456_v53  ;;  %v1457_v45 = vadd.f32 %v1420_v47, %v1311_v48  ;;  %v2029_v61 = vpop.f32.mrb[75].mxu0 }
 0x180   : > { %1486 = vst.msk [vmem:[%s2541_s21 + $0xb] sm:$0xff] %vm243_vm1, %v1473_v60  ;;  %v1474_v55 = vadd.f32 %v2572_v43, %v1457_v45 }
 0x181   : > { %v1279_v63 = vpop.f32.mrb[76].mxu1 }
 0x182   : > { %1487 = vst.msk [vmem:[%s2541_s21 + $0x13] sm:$0xff] %vm243_vm1, %v1474_v55  ;;  %v1312_v2 = vadd.f32 %v1279_v63, %v1166_v4  ;;  %v2000_v51 = vpop.f32.mrb[77].mxu1 }
 0x183   : > { %v1282_v3 = vpop.f32.mrb[78].mxu1  ;;  %v1433_v46 = vpop.f32.mrb[76].mxu0 }
 0x184   : > { %v1458_v49 = vadd.f32 %v1425_v37, %v1312_v2  ;;  %v1313_v5 = vadd.f32 %v1282_v3, %v1167_v1  ;;  %v2001_v7 = vpop.f32.mrb[79].mxu1  ;;  %v2032_v9 = vpop.f32.mrb[77].mxu0 }
 0x185   : > { %v1436_v57 = vpop.f32.mrb[78].mxu0 }
 0x186   : > { %v1475_v59 = vadd.f32 %v2572_v43, %v1458_v49  ;;  %v1459_v11 = vadd.f32 %v1428_v58, %v1313_v5  ;;  %v2033_v13 = vpop.f32.mrb[79].mxu0 }
 0x188   : > { %1488 = vst.msk [vmem:[%s2541_s21 + $0x1b] sm:$0xff] %vm243_vm1, %v1475_v59  ;;  %v1476_v62 = vadd.f32 %v2572_v43, %v1459_v11 }
 0x189   : > { %v1287_v14 = vpop.f32.mrb[80].mxu1 }
 0x18a   : > { %1489 = vst.msk [vmem:[%s2541_s21 + $0x23] sm:$0xff] %vm243_vm1, %v1476_v62  ;;  %v1314_v4 = vadd.f32 %v1287_v14, %v2557_v15  ;;  %v2004_v0 = vpop.f32.mrb[81].mxu1 }
 0x18b   : > { %v1290_v1 = vpop.f32.mrb[82].mxu1  ;;  %v1441_v16 = vpop.f32.mrb[80].mxu0 }
 0x18c   : > { %v1460_v18 = vadd.f32 %v1433_v46, %v1314_v4  ;;  %v1315_v6 = vadd.f32 %v1290_v1, %v2559_v21  ;;  %v2005_v20 = vpop.f32.mrb[83].mxu1  ;;  %v2036_v8 = vpop.f32.mrb[81].mxu0 }
 0x18d   : > { %v1444_v10 = vpop.f32.mrb[82].mxu0 }
 0x18e   : > { %v1477_v23 = vadd.f32 %v2572_v43, %v1460_v18  ;;  %v1461_v25 = vadd.f32 %v1436_v57, %v1315_v6  ;;  %v2037_v26 = vpop.f32.mrb[83].mxu0 }
 0x190   : > { %1490 = vst.msk [vmem:[%s2541_s21 + $0x2b] sm:$0xff] %vm243_vm1, %v1477_v23  ;;  %v1478_v12 = vadd.f32 %v2572_v43, %v1461_v25 }
 0x191   : > { %v1295_v17 = vpop.f32.mrb[84].mxu1 }
 0x192   : > { %1491 = vst.msk [vmem:[%s2541_s21 + $0x33] sm:$0xff] %vm243_vm1, %v1478_v12  ;;  %v1316_v15 = vadd.f32 %v1295_v17, %v2561_v27  ;;  %v2008_v28 = vpop.f32.mrb[85].mxu1 }
 0x193   : > { %v1298_v21 = vpop.f32.mrb[86].mxu1  ;;  %v1449_v31 = vpop.f32.mrb[84].mxu0 }
 0x194   : > { %v1462_v33 = vadd.f32 %v1441_v16, %v1316_v15  ;;  %v1317_v22 = vadd.f32 %v1298_v21, %v2563_v35  ;;  %v2009_v19 = vpop.f32.mrb[87].mxu1  ;;  %v2040_v30 = vpop.f32.mrb[85].mxu0 }
 0x195   : > { %v1452_v39 = vpop.f32.mrb[86].mxu0 }
 0x196   : > { %v1479_v40 = vadd.f32 %v2572_v43, %v1462_v33  ;;  %v1463_v24 = vadd.f32 %v1444_v10, %v1317_v22  ;;  %v2041_v29 = vpop.f32.mrb[87].mxu0 }
 0x198   : > { %1492 = vst.msk [vmem:[%s2541_s21 + $0x3b] sm:$0xff] %vm243_vm1, %v1479_v40  ;;  %v1480_v41 = vadd.f32 %v2572_v43, %v1463_v24 }
 0x199   : > { %v1303_v27 = vpop.f32.mrb[88].mxu1 }
 0x19a   : > { %1493 = vst.msk [vmem:[%s2541_s21 + $0x43] sm:$0xff] %vm243_vm1, %v1480_v41  ;;  %v1318_v44 = vadd.f32 %v1303_v27, %v2565_v34  ;;  %v2012_v47 = vpop.f32.mrb[89].mxu1 }
 0x19b   : > { %v1306_v35 = vpop.f32.mrb[90].mxu1 }
 0x19c   : > { %v1464_v36 = vadd.f32 %v1449_v31, %v1318_v44  ;;  %v1319_v32 = vadd.f32 %v1306_v35, %v2567_v38  ;;  %v2013_v50 = vpop.f32.mrb[91].mxu1 }
 0x19e   : > { %v1481_v52 = vadd.f32 %v2572_v43, %v1464_v36  ;;  %v1465_v42 = vadd.f32 %v1452_v39, %v1319_v32 }
 0x1a0   : > { %1494 = vst.msk [vmem:[%s2541_s21 + $0x4b] sm:$0xff] %vm243_vm1, %v1481_v52  ;;  %v1482_v37 = vadd.f32 %v2572_v43, %v1465_v42 }
 0x1a2   : > { %1496 = vst.msk [vmem:[%s2541_s21 + $0x53] sm:$0x3f] %vm1495_vm3, %v1482_v37 }
 0x1a3 PF: > { %s13_s12 = sadd.s32 1, %s2103_s12  }
 0x1a4   : > { %p10_p4 = scmp.ge.s32.totalorder %s13_s12, 4  }
 0x1a6   :  { %12 = sbr.rel (!%p10_p4) target bundleno = 1 (0x1), region = 70 }

// kernel: down_block_forward.17
= control target key start
LH: loop header
LB: loop body
LE: loop exit
PB: predicated region body
PF: predicated region fallthrough
CT: control target
= control target key end

     0   :  { %s2212_s15 = smov 0   ;;  %s2716_s0 = inlined_call_operand.vmem [shape: f32[2,100,64], index: 0, kind: input, shape index: {}]   ;;  %s2717_s1 = inlined_call_operand.vmem [shape: bf16[9,64,64], index: 1, kind: input, shape index: {}]   ;;  %s2718_s2 = inlined_call_operand.vmem [shape: f32[1,64], index: 2, kind: input, shape index: {}]   ;;  %s2719_s3 = inlined_call_operand.vmem [shape: f32[2,100,64], index: 3, kind: input, shape index: {}]   ;;  %s2720_s4 = inlined_call_operand.vmem [shape: f32[2,100,64], index: 4, kind: output, shape index: {}]  }
   0x1 LB: > { %s1633_s16 = sadd.s32 4294967295, %s2183_s15   ;;  %p1637_p0 = scmp.ge.s32.totalorder %s2183_s15, 1  ;;  %s2183_s15 = sphi %s2212_s15, %s14_s15  }
   0x2   : > { %p172_p1 = scmp.lt.s32.totalorder %s2183_s15, 3 }
   0x4   : > { %p173_p2 = pnand %p1637_p0, %p172_p1 }
   0x5   : > { %v2141_v0 = vld [vmem:[%s2717_s1 + $0x20] sm:$0xff] (!%p173_p2)   ;;  %v2185_v1 = vmov (!%p173_p2), 0.0   ;;  %v2142_v2 = vld [vmem:[%s2717_s1 + $0x28] sm:$0xff] (!%p173_p2)   ;;  %p203_p3 = scmp.lt.s32.totalorder (!%p173_p2), %s1633_s16, 1  ;;  %vm2186_vm0 = vmmov (!%p173_p2), 0   ;;  %v2143_v3 = vld [vmem:[%s2717_s1 + $0x30] sm:$0xff] (!%p173_p2)  }
   0x6   : > { %176 = sbr.rel (%p173_p2) target bundleno = 421 (0x1a5), region = 36  ;;  %2122 = vmatprep.subr.bf16.mxu1 (!%p173_p2), %v2185_v1  ;;  %1870 = vmatprep.subr.bf16.mxu0 (!%p173_p2), %v2185_v1  ;;  %v2144_v4 = vld [vmem:[%s2717_s1 + $0x38] sm:$0xff] (!%p173_p2)   ;;  %vm290_vm1 = vcmask (!%p173_p2), 523264   ;;  %v2145_v11 = vld [vmem:[%s2717_s1] sm:$0xff] (!%p173_p2)   ;;  %v2146_v13 = vld [vmem:[%s2717_s1 + $0x8] sm:$0xff] (!%p173_p2)   ;;  %vm1551_vm2 = vcmask (!%p173_p2), 518144  }
   0x7   : > { %2126 = vmatpush3.bf16.msra.mxu1 (!%p173_p2), %v2141_v0  ;;  %1871 = vmatpush3.bf16.msra.mxu0 (!%p173_p2), %v2141_v0  ;;  %v2147_v12 = vld [vmem:[%s2717_s1 + $0x40] sm:$0xff] (!%p173_p2)   ;;  %v2149_v18 = vld [vmem:[%s2717_s1 + $0x48] sm:$0xff] (!%p173_p2)   ;;  %v2148_v21 = vld [vmem:[%s2717_s1 + $0x10] sm:$0xff] (!%p173_p2)   ;;  %vm1562_vm3 = vcmask (!%p173_p2), 521216  }
   0x8   : > { %2123 = vmatprep.subr.bf16.mxu1 (!%p173_p2), %v2185_v1  ;;  %1872 = vmatprep.subr.bf16.mxu0 (!%p173_p2), %v2185_v1  ;;  %v2150_v22 = vld [vmem:[%s2717_s1 + $0x50] sm:$0xff] (!%p173_p2)   ;;  %v2151_v25 = vld [vmem:[%s2717_s1 + $0x18] sm:$0xff] (!%p173_p2)   ;;  %v2154_v31 = vld [vmem:[%s2717_s1 + $0x80] sm:$0xff] (!%p173_p2)  }
   0x9   : > { %1886 = vmatprep.mubr.msk.bf16.mxu1 (!%p173_p2), %vm2186_vm0, %v2185_v1  ;;  %1878 = vmatprep.mubr.msk.bf16.mxu0 (!%p173_p2), %vm2186_vm0, %v2185_v1  ;;  %v2152_v26 = vld [vmem:[%s2717_s1 + $0x58] sm:$0xff] (!%p173_p2)   ;;  %v2156_v35 = vld [vmem:[%s2717_s1 + $0x88] sm:$0xff] (!%p173_p2)   ;;  %v2153_v38 = vld [vmem:[%s2717_s1 + $0x60] sm:$0xff] (!%p173_p2)  }
   0xa   : > { %v2158_v40 = vld [vmem:[%s2717_s1 + $0x90] sm:$0xff] (!%p173_p2)   ;;  %v2155_v43 = vld [vmem:[%s2717_s1 + $0x68] sm:$0xff] (!%p173_p2)   ;;  %v2160_v46 = vld [vmem:[%s2717_s1 + $0x98] sm:$0xff] (!%p173_p2)  }
   0xb   : > { %2127 = vmatpush3.bf16.msra.mxu1 (!%p173_p2), %v2142_v2  ;;  %1873 = vmatpush3.bf16.msra.mxu0 (!%p173_p2), %v2142_v2  ;;  %v2157_v48 = vld [vmem:[%s2717_s1 + $0x70] sm:$0xff] (!%p173_p2)   ;;  %v2159_v52 = vld [vmem:[%s2717_s1 + $0x78] sm:$0xff] (!%p173_p2)  }
   0xc   : > { %2124 = vmatprep.subr.bf16.mxu1 (!%p173_p2), %v2185_v1  ;;  %1874 = vmatprep.subr.bf16.mxu0 (!%p173_p2), %v2185_v1 }
   0xd   : > { %s2722_s16 = smov (!%p203_p3, %s1633_s16), 1 }
   0xe   : > { %s2237_s23 = smul.u32 104, %s2722_s16 }
   0xf   : > { %2128 = vmatpush3.bf16.msra.mxu1 %v2143_v3  ;;  %1875 = vmatpush3.bf16.msra.mxu0 %v2143_v3 }
  0x10   : > { %s2245_s26 = scalar_lea.vmem %s2716_s0, %s2237_s23  ;;  %2125 = vmatprep.subr.bf16.mxu1 %v2185_v1  ;;  %1876 = vmatprep.subr.bf16.mxu0 %v2185_v1  ;;  %s2623_s24 = scalar_lea.vmem %s2720_s4, %s2237_s23 }
  0x11   : > { %v246_v5 = vld [vmem:[%s2245_s26 + $0x21] sm:$0xff]  ;;  %v247_v6 = vld [vmem:[%s2245_s26 + $0x29] sm:$0xff]  ;;  %v248_v14 = vld [vmem:[%s2245_s26 + $0x31] sm:$0xff]  ;;  %1550 = vst.msk [vmem:[%s2623_s24] sm:$0xff] %vm290_vm1, %v2185_v1  ;;  %s2659_s28 = scalar_lea.vmem %s2719_s3, %s2237_s23 }
  0x12   : > { %v242_v7 = vld [vmem:[%s2245_s26 + $0x1] sm:$0xff]  ;;  %v243_v8 = vld [vmem:[%s2245_s26 + $0x9] sm:$0xff]  ;;  %v254_v9 = vpack.c.bf16 %v247_v6, %v246_v5  ;;  %v249_v15 = vld [vmem:[%s2245_s26 + $0x39] sm:$0xff]  ;;  %1564 = vst.msk [vmem:[%s2623_s24 + $0x59] sm:$0xff] %vm290_vm1, %v2185_v1 }
  0x13   : > { %v252_v10 = vpack.c.bf16 %v243_v8, %v242_v7  ;;  %2129 = vmatpush3.bf16.msra.mxu1 %v2144_v4  ;;  %1877 = vmatpush3.bf16.msra.mxu0 %v2144_v4  ;;  %v244_v16 = vld [vmem:[%s2245_s26 + $0x11] sm:$0xff]  ;;  %v245_v17 = vld [vmem:[%s2245_s26 + $0x19] sm:$0xff]  ;;  %v255_v19 = vpack.c.bf16 %v249_v15, %v248_v14  ;;  %v250_v23 = vld [vmem:[%s2245_s26 + $0x41] sm:$0xff]  ;;  %1552 = vst.msk [vmem:[%s2623_s24 + $0x8] sm:$0x7] %vm1551_vm2, %v2185_v1 }
  0x14   : > { %1898 = vmatprep.subr.bf16.mxu1 %v2185_v1  ;;  %1926 = vmatprep.subr.bf16.mxu0 %v2185_v1  ;;  %v253_v20 = vpack.c.bf16 %v245_v17, %v244_v16  ;;  %v251_v24 = vld [vmem:[%s2245_s26 + $0x49] sm:$0x3f]  ;;  %v219_v32 = vld [vmem:[%s2245_s26] sm:$0xff]  ;;  %v2325_v34 = vld [vmem:[%s2245_s26 + $0x12] sm:$0xff]  ;;  %1565 = vst.msk [vmem:[%s2623_s24 + $0x61] sm:$0x7] %vm1551_vm2, %v2185_v1 }
  0x15   : > { %v491_v27 = vld [vmem:[%s2245_s26 + $0x2] sm:$0xff]  ;;  %v2305_v28 = vld [vmem:[%s2245_s26 + $0xa] sm:$0xff]  ;;  %v256_v29 = vpack.c.bf16 %v251_v24, %v250_v23  ;;  %v2331_v36 = vld [vmem:[%s2245_s26 + $0x1a] sm:$0xff] }
  0x16   : > { %1887 = vmatmul.mubr.msk.bf16.vlgmr.msra.gmra.mrb[0].mxu1 %vm290_vm1, %v254_v9  ;;  %1879 = vmatmul.mubr.msk.bf16.vlgmr.msra.gmra.mrb[0].mxu0 %vm290_vm1, %v252_v10  ;;  %v501_v30 = vpack.c.bf16 %v2305_v28, %v491_v27  ;;  %v220_v33 = vld [vmem:[%s2245_s26 + $0x8] sm:$0xff]  ;;  %v502_v39 = vpack.c.bf16 %v2331_v36, %v2325_v34  ;;  %v221_v41 = vld [vmem:[%s2245_s26 + $0x10] sm:$0xff]  ;;  %v222_v42 = vld [vmem:[%s2245_s26 + $0x18] sm:$0xff]  ;;  %v647_v10 = vpack.c.bf16 %v2325_v34, %v2305_v28 }
  0x17   : > { %1899 = vmatpush3.bf16.msra.mxu1 %v2145_v11  ;;  %1890 = vmatprep.mubr.msk.bf16.mxu1 %vm2186_vm0, %v2185_v1  ;;  %v229_v37 = vpack.c.bf16 %v220_v33, %v219_v32  ;;  %v2352_v44 = vld [vmem:[%s2245_s26 + $0x22] sm:$0xff]  ;;  %v2357_v45 = vld [vmem:[%s2245_s26 + $0x2a] sm:$0xff]  ;;  %v230_v47 = vpack.c.bf16 %v222_v42, %v221_v41  ;;  %v2385_v53 = vld [vmem:[%s2245_s26 + $0x32] sm:$0xff] }
  0x18   : > { %1900 = vmatprep.subr.bf16.mxu1 %v2185_v1  ;;  %1927 = vmatpush3.bf16.msra.mxu0 %v2147_v12  ;;  %v503_v49 = vpack.c.bf16 %v2357_v45, %v2352_v44  ;;  %v223_v50 = vld [vmem:[%s2245_s26 + $0x20] sm:$0xff]  ;;  %v224_v51 = vld [vmem:[%s2245_s26 + $0x28] sm:$0xff]  ;;  %v225_v57 = vld [vmem:[%s2245_s26 + $0x30] sm:$0xff]  ;;  %v649_v24 = vpack.c.bf16 %v2385_v53, %v2357_v45 }
  0x19   : > { %1928 = vmatprep.subr.bf16.mxu0 %v2185_v1  ;;  %1882 = vmatprep.mubr.msk.bf16.mxu0 %vm2186_vm0, %v2185_v1  ;;  %v2388_v54 = vld [vmem:[%s2245_s26 + $0x3a] sm:$0xff]  ;;  %v231_v55 = vpack.c.bf16 %v224_v51, %v223_v50  ;;  %v2402_v59 = vld [vmem:[%s2245_s26 + $0x42] sm:$0xff]  ;;  %v500_v60 = vld [vmem:[%s2245_s26 + $0x4a] sm:$0x3f] }
  0x1a   : > { %v504_v56 = vpack.c.bf16 %v2388_v54, %v2385_v53  ;;  %v226_v58 = vld [vmem:[%s2245_s26 + $0x38] sm:$0xff]  ;;  %v505_v62 = vpack.c.bf16 %v500_v60, %v2402_v59  ;;  %v227_v63 = vld [vmem:[%s2245_s26 + $0x40] sm:$0xff]  ;;  %v228_v0 = vld [vmem:[%s2245_s26 + $0x48] sm:$0x3f]  ;;  %v650_v28 = vpack.c.bf16 %v2402_v59, %v2388_v54 }
  0x1b   : > { %1901 = vmatpush3.bf16.msra.mxu1 %v2146_v13  ;;  %v232_v61 = vpack.c.bf16 %v226_v58, %v225_v57  ;;  %v783_v2 = vld [vmem:[%s2245_s26 + $0xb] sm:$0xff]  ;;  %v784_v3 = vld [vmem:[%s2245_s26 + $0x13] sm:$0xff]  ;;  %v233_v4 = vpack.c.bf16 %v228_v0, %v227_v63  ;;  %v2162_v6 = vld [vmem:[%s2717_s1 + $0xc0] sm:$0xff]  }
  0x1c   : > { %1902 = vmatprep.subr.bf16.mxu1 %v2185_v1  ;;  %1929 = vmatpush3.bf16.msra.mxu0 %v2149_v18  ;;  %v793_v5 = vpack.c.bf16 %v784_v3, %v783_v2  ;;  %v785_v7 = vld [vmem:[%s2245_s26 + $0x1b] sm:$0xff]  ;;  %v786_v8 = vld [vmem:[%s2245_s26 + $0x23] sm:$0xff]  ;;  %v2166_v13 = vld [vmem:[%s2717_s1 + $0xd0] sm:$0xff]   ;;  %v648_v18 = vpack.c.bf16 %v2352_v44, %v2331_v36 }
  0x1d   : > { %1930 = vmatprep.subr.bf16.mxu0 %v2185_v1  ;;  %v2164_v9 = vld [vmem:[%s2717_s1 + $0xc8] sm:$0xff]   ;;  %v2161_v11 = vld [vmem:[%s2717_s1 + $0xa0] sm:$0xff]   ;;  %v794_v12 = vpack.c.bf16 %v786_v8, %v785_v7  ;;  %v788_v16 = vld [vmem:[%s2245_s26 + $0x33] sm:$0xff] }
  0x1e   : > { %1891 = vmatmul.mubr.msk.bf16.gmra.mrb[4].mxu1 %vm290_vm1, %v255_v19  ;;  %1883 = vmatmul.mubr.msk.bf16.gmra.mrb[4].mxu0 %vm290_vm1, %v253_v20  ;;  %v2163_v14 = vld [vmem:[%s2717_s1 + $0xa8] sm:$0xff]   ;;  %v2168_v17 = vld [vmem:[%s2717_s1 + $0xd8] sm:$0xff]   ;;  %v2165_v19 = vld [vmem:[%s2717_s1 + $0xb0] sm:$0xff]  }
  0x1f   : > { %1903 = vmatpush3.bf16.msra.mxu1 %v2148_v21  ;;  %1894 = vmatprep.mubr.msk.bf16.mxu1 %vm2186_vm0, %v2185_v1  ;;  %v787_v15 = vld [vmem:[%s2245_s26 + $0x2b] sm:$0xff]  ;;  %v2167_v21 = vld [vmem:[%s2717_s1 + $0xb8] sm:$0xff]   ;;  %v790_v23 = vld [vmem:[%s2245_s26 + $0x43] sm:$0xff] }
  0x20   : > { %1931 = vmatpush3.bf16.msra.mxu0 %v2150_v22  ;;  %1904 = vmatprep.subr.bf16.mxu1 %v2185_v1  ;;  %v795_v20 = vpack.c.bf16 %v788_v16, %v787_v15  ;;  %v789_v22 = vld [vmem:[%s2245_s26 + $0x3b] sm:$0xff]  ;;  %v792_v27 = vld [vmem:[%s2245_s26 + $0x53] sm:$0x3f]  ;;  %v2171_v45 = vld [vmem:[%s2717_s1 + $0xe8] sm:$0xff]  }
  0x21   : > { %1932 = vmatprep.subr.bf16.mxu0 %v2185_v1  ;;  %1934 = vmatprep.mubr.msk.bf16.mxu0 %vm2186_vm0, %v2185_v1  ;;  %v930_v32 = vld [vmem:[%s2245_s26 + $0x14] sm:$0xff]  ;;  %v1076_v33 = vld [vmem:[%s2245_s26 + $0x1c] sm:$0xff]  ;;  %v936_v53 = vld [vmem:[%s2245_s26 + $0x44] sm:$0xff] }
  0x22   : > { %v2170_v36 = vld [vmem:[%s2717_s1 + $0x100] sm:$0xff]   ;;  %v2174_v44 = vld [vmem:[%s2717_s1 + $0x110] sm:$0xff]  }
  0x23   : > { %1905 = vmatpush3.bf16.msra.mxu1 %v2151_v25  ;;  %v796_v25 = vpack.c.bf16 %v790_v23, %v789_v22  ;;  %v2169_v42 = vld [vmem:[%s2717_s1 + $0xe0] sm:$0xff]   ;;  %v2173_v50 = vld [vmem:[%s2717_s1 + $0xf0] sm:$0xff]  }
  0x24   : > { %1933 = vmatpush3.bf16.msra.mxu0 %v2152_v26  ;;  %1954 = vmatprep.subr.bf16.mxu1 %v2185_v1  ;;  %v791_v26 = vld [vmem:[%s2245_s26 + $0x4b] sm:$0xff]  ;;  %v1083_v57 = vld [vmem:[%s2245_s26 + $0x54] sm:$0xff]  ;;  %v1084_v58 = vld [vmem:[%s2245_s26 + $0x5c] sm:$0x3f] }
  0x25   : > { %1982 = vmatprep.subr.bf16.mxu0 %v2185_v1  ;;  %v1082_v54 = vld [vmem:[%s2245_s26 + $0x4c] sm:$0xff]  ;;  %v1089_v60 = vpack.c.bf16 %v1084_v58, %v1083_v57  ;;  %v1368_v63 = vld [vmem:[%s2245_s26 + $0x1e] sm:$0xff]  ;;  %v1221_v3 = vld [vmem:[%s2245_s26 + $0x15] sm:$0xff] }
  0x26   : > { %1895 = vmatmul.mubr.msk.bf16.gmra.mrb[8].mxu1 %vm290_vm1, %v256_v29  ;;  %v797_v29 = vpack.c.bf16 %v792_v27, %v791_v26  ;;  %v1225_v15 = vld [vmem:[%s2245_s26 + $0x35] sm:$0xff]  ;;  %v1226_v16 = vld [vmem:[%s2245_s26 + $0x3d] sm:$0xff]  ;;  %v1228_v22 = vld [vmem:[%s2245_s26 + $0x4d] sm:$0xff] }
  0x27   : > { %1906 = vmatprep.mubr.msk.bf16.mxu1 %vm2186_vm0, %v2185_v1  ;;  %1935 = vmatmul.mubr.msk.bf16.vlgmr.msra.gmra.mrb[8].mxu0 %vm290_vm1, %v501_v30  ;;  %v645_v30 = vld [vmem:[%s2245_s26 + $0x4a] sm:$0xff]  ;;  %v1375_v23 = vld [vmem:[%s2245_s26 + $0x56] sm:$0xff] }
  0x28   : > { %1983 = vmatpush3.bf16.msra.mxu0 %v2154_v31  ;;  %1938 = vmatprep.mubr.msk.bf16.mxu0 %vm2186_vm0, %v2185_v1  ;;  %v646_v31 = vld [vmem:[%s2245_s26 + $0x52] sm:$0x3f] }
  0x29   : > { %1984 = vmatprep.subr.bf16.mxu0 %v2185_v1  ;;  %v651_v34 = vpack.c.bf16 %v646_v31, %v645_v30  ;;  %v1229_v27 = vld [vmem:[%s2245_s26 + $0x55] sm:$0xff] }
  0x2c   : > { %1985 = vmatpush3.bf16.msra.mxu0 %v2156_v35  ;;  %v1085_v35 = vpack.c.bf16 %v1076_v33, %v930_v32 }
  0x2d   : > { %1986 = vmatprep.subr.bf16.mxu0 %v2185_v1 }
  0x2e   : > { %1907 = vmatmul.mubr.msk.bf16.vlgmr.msra.gmra.mrb[12].mxu1 %vm290_vm1, %v229_v37  ;;  %v929_v37 = vld [vmem:[%s2245_s26 + $0xc] sm:$0xff] }
  0x2f   : > { %1955 = vmatpush3.bf16.msra.mxu1 %v2153_v38  ;;  %1910 = vmatprep.mubr.msk.bf16.mxu1 %vm2186_vm0, %v2185_v1  ;;  %v932_v38 = vld [vmem:[%s2245_s26 + $0x24] sm:$0xff]  ;;  %v939_v41 = vpack.c.bf16 %v930_v32, %v929_v37 }
  0x30   : > { %1939 = vmatmul.mubr.msk.bf16.gmra.mrb[12].mxu0 %vm290_vm1, %v502_v39  ;;  %1956 = vmatprep.subr.bf16.mxu1 %v2185_v1  ;;  %v1078_v39 = vld [vmem:[%s2245_s26 + $0x2c] sm:$0xff] }
  0x31   : > { %1942 = vmatprep.mubr.msk.bf16.mxu0 %vm2186_vm0, %v2185_v1  ;;  %1987 = vmatpush3.bf16.msra.mxu0 %v2158_v40  ;;  %v2172_v40 = vld [vmem:[%s2717_s1 + $0x108] sm:$0xff]  }
  0x32   : > { %1988 = vmatprep.subr.bf16.mxu0 %v2185_v1 }
  0x33   : > { %1957 = vmatpush3.bf16.msra.mxu1 %v2155_v43  ;;  %v1086_v43 = vpack.c.bf16 %v1078_v39, %v932_v38 }
  0x34   : > { %1958 = vmatprep.subr.bf16.mxu1 %v2185_v1 }
  0x35   : > { %1989 = vmatpush3.bf16.msra.mxu0 %v2160_v46  ;;  %v934_v46 = vld [vmem:[%s2245_s26 + $0x34] sm:$0xff] }
  0x36   : > { %1911 = vmatmul.mubr.msk.bf16.gmra.mrb[16].mxu1 %vm290_vm1, %v230_v47  ;;  %2038 = vmatprep.subr.bf16.mxu0 %v2185_v1  ;;  %v1080_v47 = vld [vmem:[%s2245_s26 + $0x3c] sm:$0xff] }
  0x37   : > { %1914 = vmatprep.mubr.msk.bf16.mxu1 %vm2186_vm0, %v2185_v1  ;;  %1959 = vmatpush3.bf16.msra.mxu1 %v2157_v48  ;;  %v2176_v48 = vld [vmem:[%s2717_s1 + $0x118] sm:$0xff]   ;;  %v1087_v51 = vpack.c.bf16 %v1080_v47, %v934_v46  ;;  %v942_v59 = vpack.c.bf16 %v936_v53, %v1080_v47 }
  0x38   : > { %1943 = vmatmul.mubr.msk.bf16.gmra.mrb[16].mxu0 %vm290_vm1, %v503_v49  ;;  %1960 = vmatprep.subr.bf16.mxu1 %v2185_v1  ;;  %v940_v49 = vpack.c.bf16 %v932_v38, %v1076_v33 }
  0x39   : > { %1946 = vmatprep.mubr.msk.bf16.mxu0 %vm2186_vm0, %v2185_v1 }
  0x3b   : > { %1961 = vmatpush3.bf16.msra.mxu1 %v2159_v52  ;;  %v2175_v52 = vld [vmem:[%s2717_s1 + $0xf8] sm:$0xff]  }
  0x3c   : > { %2010 = vmatprep.subr.bf16.mxu1 %v2185_v1 }
  0x3e   : > { %1915 = vmatmul.mubr.msk.bf16.gmra.mrb[20].mxu1 %vm290_vm1, %v231_v55  ;;  %v941_v55 = vpack.c.bf16 %v934_v46, %v1078_v39 }
  0x3f   : > { %1918 = vmatprep.mubr.msk.bf16.mxu1 %vm2186_vm0, %v2185_v1 }
  0x40   : > { %1947 = vmatmul.mubr.msk.bf16.gmra.mrb[20].mxu0 %vm290_vm1, %v504_v56  ;;  %v1088_v56 = vpack.c.bf16 %v1082_v54, %v936_v53 }
  0x41   : > { %1950 = vmatprep.mubr.msk.bf16.mxu0 %vm2186_vm0, %v2185_v1 }
  0x46   : > { %1919 = vmatmul.mubr.msk.bf16.gmra.mrb[24].mxu1 %vm290_vm1, %v232_v61  ;;  %v938_v61 = vld [vmem:[%s2245_s26 + $0x54] sm:$0x3f] }
  0x47   : > { %1922 = vmatprep.mubr.msk.bf16.mxu1 %vm2186_vm0, %v2185_v1  ;;  %v943_v0 = vpack.c.bf16 %v938_v61, %v1082_v54 }
  0x48   : > { %1951 = vmatmul.mubr.msk.bf16.gmra.mrb[24].mxu0 %vm290_vm1, %v505_v62  ;;  %v1367_v62 = vld [vmem:[%s2245_s26 + $0x16] sm:$0xff] }
  0x49   : > { %1990 = vmatprep.mubr.msk.bf16.mxu0 %vm2186_vm0, %v2185_v1  ;;  %v1377_v2 = vpack.c.bf16 %v1368_v63, %v1367_v62 }
  0x4e   : > { %1923 = vmatmul.mubr.msk.bf16.gmra.mrb[28].mxu1 %vm290_vm1, %v233_v4  ;;  %v1222_v4 = vld [vmem:[%s2245_s26 + $0x1d] sm:$0xff] }
  0x4f   : > { %1962 = vmatprep.mubr.msk.bf16.mxu1 %vm2186_vm0, %v2185_v1  ;;  %v1231_v7 = vpack.c.bf16 %v1222_v4, %v1221_v3 }
  0x50   : > { %1991 = vmatmul.mubr.msk.bf16.vlgmr.msra.gmra.mrb[28].mxu0 %vm290_vm1, %v793_v5  ;;  %v1369_v5 = vld [vmem:[%s2245_s26 + $0x26] sm:$0xff] }
  0x51   : > { %2039 = vmatpush3.bf16.msra.mxu0 %v2162_v6  ;;  %1994 = vmatprep.mubr.msk.bf16.mxu0 %vm2186_vm0, %v2185_v1  ;;  %v1370_v6 = vld [vmem:[%s2245_s26 + $0x2e] sm:$0xff] }
  0x52   : > { %2040 = vmatprep.subr.bf16.mxu0 %v2185_v1  ;;  %v1378_v8 = vpack.c.bf16 %v1370_v6, %v1369_v5 }
  0x55   : > { %2041 = vmatpush3.bf16.msra.mxu0 %v2164_v9  ;;  %v1223_v9 = vld [vmem:[%s2245_s26 + $0x25] sm:$0xff] }
  0x56   : > { %1963 = vmatmul.mubr.msk.bf16.vlgmr.msra.gmra.mrb[32].mxu1 %vm290_vm1, %v647_v10  ;;  %2042 = vmatprep.subr.bf16.mxu0 %v2185_v1  ;;  %v1224_v10 = vld [vmem:[%s2245_s26 + $0x2d] sm:$0xff] }
  0x57   : > { %2011 = vmatpush3.bf16.msra.mxu1 %v2161_v11  ;;  %1966 = vmatprep.mubr.msk.bf16.mxu1 %vm2186_vm0, %v2185_v1  ;;  %v1371_v11 = vld [vmem:[%s2245_s26 + $0x36] sm:$0xff] }
  0x58   : > { %1995 = vmatmul.mubr.msk.bf16.gmra.mrb[32].mxu0 %vm290_vm1, %v794_v12  ;;  %2012 = vmatprep.subr.bf16.mxu1 %v2185_v1  ;;  %v1372_v12 = vld [vmem:[%s2245_s26 + $0x3e] sm:$0xff] }
  0x59   : > { %1998 = vmatprep.mubr.msk.bf16.mxu0 %vm2186_vm0, %v2185_v1  ;;  %2043 = vmatpush3.bf16.msra.mxu0 %v2166_v13  ;;  %v1232_v13 = vpack.c.bf16 %v1224_v10, %v1223_v9 }
  0x5a   : > { %2044 = vmatprep.subr.bf16.mxu0 %v2185_v1 }
  0x5b   : > { %2013 = vmatpush3.bf16.msra.mxu1 %v2163_v14  ;;  %v1379_v14 = vpack.c.bf16 %v1372_v12, %v1371_v11 }
  0x5c   : > { %2014 = vmatprep.subr.bf16.mxu1 %v2185_v1 }
  0x5d   : > { %2045 = vmatpush3.bf16.msra.mxu0 %v2168_v17  ;;  %v1373_v17 = vld [vmem:[%s2245_s26 + $0x46] sm:$0xff] }
  0x5e   : > { %1967 = vmatmul.mubr.msk.bf16.gmra.mrb[36].mxu1 %vm290_vm1, %v648_v18  ;;  %2094 = vmatprep.subr.bf16.mxu0 %v2185_v1  ;;  %v1374_v18 = vld [vmem:[%s2245_s26 + $0x4e] sm:$0xff] }
  0x5f   : > { %1970 = vmatprep.mubr.msk.bf16.mxu1 %vm2186_vm0, %v2185_v1  ;;  %2015 = vmatpush3.bf16.msra.mxu1 %v2165_v19  ;;  %v1233_v19 = vpack.c.bf16 %v1226_v16, %v1225_v15 }
  0x60   : > { %1999 = vmatmul.mubr.msk.bf16.gmra.mrb[36].mxu0 %vm290_vm1, %v795_v20  ;;  %2016 = vmatprep.subr.bf16.mxu1 %v2185_v1  ;;  %v1380_v20 = vpack.c.bf16 %v1374_v18, %v1373_v17 }
  0x61   : > { %2002 = vmatprep.mubr.msk.bf16.mxu0 %vm2186_vm0, %v2185_v1 }
  0x63   : > { %2017 = vmatpush3.bf16.msra.mxu1 %v2167_v21  ;;  %v1227_v21 = vld [vmem:[%s2245_s26 + $0x45] sm:$0xff] }
  0x64   : > { %2066 = vmatprep.subr.bf16.mxu1 %v2185_v1 }
  0x66   : > { %1971 = vmatmul.mubr.msk.bf16.gmra.mrb[40].mxu1 %vm290_vm1, %v649_v24  ;;  %v1376_v24 = vld [vmem:[%s2245_s26 + $0x5e] sm:$0x3f] }
  0x67   : > { %1974 = vmatprep.mubr.msk.bf16.mxu1 %vm2186_vm0, %v2185_v1  ;;  %v1381_v26 = vpack.c.bf16 %v1376_v24, %v1375_v23 }
  0x68   : > { %2003 = vmatmul.mubr.msk.bf16.gmra.mrb[40].mxu0 %vm290_vm1, %v796_v25  ;;  %v1234_v25 = vpack.c.bf16 %v1228_v22, %v1227_v21 }
  0x69   : > { %2006 = vmatprep.mubr.msk.bf16.mxu0 %vm2186_vm0, %v2185_v1 }
  0x6e   : > { %1975 = vmatmul.mubr.msk.bf16.gmra.mrb[44].mxu1 %vm290_vm1, %v650_v28  ;;  %v1230_v28 = vld [vmem:[%s2245_s26 + $0x5d] sm:$0x3f] }
  0x6f   : > { %1978 = vmatprep.mubr.msk.bf16.mxu1 %vm2186_vm0, %v2185_v1 }
  0x70   : > { %2007 = vmatmul.mubr.msk.bf16.gmra.mrb[44].mxu0 %vm290_vm1, %v797_v29  ;;  %v1235_v29 = vpack.c.bf16 %v1230_v28, %v1229_v27 }
  0x71   : > { %2046 = vmatprep.mubr.msk.bf16.mxu0 %vm2186_vm0, %v2185_v1 }
  0x76   : > { %1979 = vmatmul.mubr.msk.bf16.gmra.mrb[48].mxu1 %vm290_vm1, %v651_v34 }
  0x77   : > { %2018 = vmatprep.mubr.msk.bf16.mxu1 %vm2186_vm0, %v2185_v1 }
  0x78   : > { %2047 = vmatmul.mubr.msk.bf16.vlgmr.msra.gmra.mrb[48].mxu0 %vm290_vm1, %v1085_v35 }
  0x79   : > { %2095 = vmatpush3.bf16.msra.mxu0 %v2170_v36  ;;  %2050 = vmatprep.mubr.msk.bf16.mxu0 %vm2186_vm0, %v2185_v1 }
  0x7a   : > { %2096 = vmatprep.subr.bf16.mxu0 %v2185_v1 }
  0x7d   : > { %2097 = vmatpush3.bf16.msra.mxu0 %v2172_v40 }
  0x7e   : > { %2019 = vmatmul.mubr.msk.bf16.vlgmr.msra.gmra.mrb[52].mxu1 %vm290_vm1, %v939_v41  ;;  %2098 = vmatprep.subr.bf16.mxu0 %v2185_v1 }
  0x7f   : > { %2067 = vmatpush3.bf16.msra.mxu1 %v2169_v42  ;;  %2022 = vmatprep.mubr.msk.bf16.mxu1 %vm2186_vm0, %v2185_v1 }
  0x80   : > { %2051 = vmatmul.mubr.msk.bf16.gmra.mrb[52].mxu0 %vm290_vm1, %v1086_v43  ;;  %2068 = vmatprep.subr.bf16.mxu1 %v2185_v1 }
  0x81   : > { %2054 = vmatprep.mubr.msk.bf16.mxu0 %vm2186_vm0, %v2185_v1  ;;  %2099 = vmatpush3.bf16.msra.mxu0 %v2174_v44 }
  0x82   : > { %2100 = vmatprep.subr.bf16.mxu0 %v2185_v1 }
  0x83   : > { %2069 = vmatpush3.bf16.msra.mxu1 %v2171_v45 }
  0x84   : > { %2070 = vmatprep.subr.bf16.mxu1 %v2185_v1 }
  0x85   : > { %2101 = vmatpush3.bf16.msra.mxu0 %v2176_v48 }
  0x86   : > { %2023 = vmatmul.mubr.msk.bf16.gmra.mrb[56].mxu1 %vm290_vm1, %v940_v49 }
  0x87   : > { %2026 = vmatprep.mubr.msk.bf16.mxu1 %vm2186_vm0, %v2185_v1  ;;  %2071 = vmatpush3.bf16.msra.mxu1 %v2173_v50 }
  0x88   : > { %2055 = vmatmul.mubr.msk.bf16.gmra.mrb[56].mxu0 %vm290_vm1, %v1087_v51  ;;  %2072 = vmatprep.subr.bf16.mxu1 %v2185_v1 }
  0x89   : > { %2058 = vmatprep.mubr.msk.bf16.mxu0 %vm2186_vm0, %v2185_v1 }
  0x8b   : > { %2073 = vmatpush3.bf16.msra.mxu1 %v2175_v52 }
  0x8e   : > { %2027 = vmatmul.mubr.msk.bf16.gmra.mrb[60].mxu1 %vm290_vm1, %v941_v55 }
  0x8f   : > { %2030 = vmatprep.mubr.msk.bf16.mxu1 %vm2186_vm0, %v2185_v1 }
  0x90   : > { %2059 = vmatmul.mubr.msk.bf16.gmra.mrb[60].mxu0 %vm290_vm1, %v1088_v56 }
  0x91   : > { %2062 = vmatprep.mubr.msk.bf16.mxu0 %vm2186_vm0, %v2185_v1 }
  0x96   : > { %2031 = vmatmul.mubr.msk.bf16.gmra.mrb[64].mxu1 %vm290_vm1, %v942_v59 }
  0x97   : > { %2034 = vmatprep.mubr.msk.bf16.mxu1 %vm2186_vm0, %v2185_v1 }
  0x98   : > { %2063 = vmatmul.mubr.msk.bf16.gmra.mrb[64].mxu0 %vm290_vm1, %v1089_v60 }
  0x99   : > { %2102 = vmatprep.mubr.msk.bf16.mxu0 %vm2186_vm0, %v2185_v1 }
  0x9e   : > { %2035 = vmatmul.mubr.msk.bf16.gmra.mrb[68].mxu1 %vm290_vm1, %v943_v0 }
  0x9f   : > { %2074 = vmatprep.mubr.msk.bf16.mxu1 %vm2186_vm0, %v2185_v1 }
  0xa0   : > { %2103 = vmatmul.mubr.msk.bf16.vlgmr.msra.gmra.mrb[68].mxu0 %vm290_vm1, %v1377_v2 }
  0xa1   : > { %2106 = vmatprep.mubr.msk.bf16.mxu0 %vm2186_vm0, %v2185_v1 }
  0xa6   : > { %2075 = vmatmul.mubr.msk.bf16.vlgmr.msra.gmra.mrb[72].mxu1 %vm290_vm1, %v1231_v7 }
  0xa7   : > { %2078 = vmatprep.mubr.msk.bf16.mxu1 %vm2186_vm0, %v2185_v1 }
  0xa8   : > { %2107 = vmatmul.mubr.msk.bf16.gmra.mrb[72].mxu0 %vm290_vm1, %v1378_v8 }
  0xa9   : > { %2110 = vmatprep.mubr.msk.bf16.mxu0 %vm2186_vm0, %v2185_v1 }
  0xae   : > { %2079 = vmatmul.mubr.msk.bf16.gmra.mrb[76].mxu1 %vm290_vm1, %v1232_v13 }
  0xaf   : > { %2082 = vmatprep.mubr.msk.bf16.mxu1 %vm2186_vm0, %v2185_v1 }
  0xb0   : > { %2111 = vmatmul.mubr.msk.bf16.gmra.mrb[76].mxu0 %vm290_vm1, %v1379_v14 }
  0xb1   : > { %2114 = vmatprep.mubr.msk.bf16.mxu0 %vm2186_vm0, %v2185_v1 }
  0xb6   : > { %2083 = vmatmul.mubr.msk.bf16.gmra.mrb[80].mxu1 %vm290_vm1, %v1233_v19 }
  0xb7   : > { %2086 = vmatprep.mubr.msk.bf16.mxu1 %vm2186_vm0, %v2185_v1 }
  0xb8   : > { %2115 = vmatmul.mubr.msk.bf16.gmra.mrb[80].mxu0 %vm290_vm1, %v1380_v20 }
  0xb9   : > { %2118 = vmatprep.mubr.msk.bf16.mxu0 %vm2186_vm0, %v2185_v1 }
  0xbe   : > { %2087 = vmatmul.mubr.msk.bf16.gmra.mrb[84].mxu1 %vm290_vm1, %v1234_v25 }
  0xbf   : > { %2090 = vmatprep.mubr.msk.bf16.mxu1 %vm2186_vm0, %v2185_v1 }
  0xc0   : > { %2119 = vmatmul.mubr.msk.bf16.gmra.mrb[84].mxu0 %vm290_vm1, %v1381_v26 }
  0xc6   : > { %2091 = vmatmul.mubr.msk.bf16.gmra.mrb[88].mxu1 %vm290_vm1, %v1235_v29 }
  0xe9   : > { %v356_v30 = vpop.f32.mrb[0].mxu1  ;;  %v340_v31 = vpop.f32.mrb[0].mxu0 }
  0xea   : > { %v1888_v32 = vpop.f32.mrb[1].mxu1  ;;  %v1880_v33 = vpop.f32.mrb[1].mxu0 }
  0xeb   : > { %v359_v34 = vpop.f32.mrb[2].mxu1  ;;  %v343_v35 = vpop.f32.mrb[2].mxu0 }
  0xec   : > { %v1889_v36 = vpop.f32.mrb[3].mxu1  ;;  %v1881_v37 = vpop.f32.mrb[3].mxu0 }
  0xf1   : > { %v364_v38 = vpop.f32.mrb[4].mxu1  ;;  %v348_v39 = vpop.f32.mrb[4].mxu0 }
  0xf2   : > { %v1892_v40 = vpop.f32.mrb[5].mxu1  ;;  %v1884_v41 = vpop.f32.mrb[5].mxu0 }
  0xf3   : > { %v367_v42 = vpop.f32.mrb[6].mxu1  ;;  %v351_v43 = vpop.f32.mrb[6].mxu0 }
  0xf4   : > { %v1893_v44 = vpop.f32.mrb[7].mxu1  ;;  %v1885_v45 = vpop.f32.mrb[7].mxu0 }
  0xf9   : > { %v2617_v46 = vpop.f32.mrb[8].mxu1 }
  0xfa   : > { %v1896_v47 = vpop.f32.mrb[9].mxu1  ;;  %v588_v48 = vpop.f32.mrb[8].mxu0 }
  0xfb   : > { %v2625_v49 = vpop.f32.mrb[10].mxu1  ;;  %v1936_v50 = vpop.f32.mrb[9].mxu0 }
  0xfc   : > { %v1897_v51 = vpop.f32.mrb[11].mxu1  ;;  %v591_v52 = vpop.f32.mrb[10].mxu0 }
  0xfd   : > { %v1937_v53 = vpop.f32.mrb[11].mxu0 }
 0x101   : > { %v452_v54 = vpop.f32.mrb[12].mxu1 }
 0x102   : > { %v453_v55 = vadd.f32 %v452_v54, %v340_v31  ;;  %v1908_v56 = vpop.f32.mrb[13].mxu1 }
 0x103   : > { %v455_v57 = vpop.f32.mrb[14].mxu1  ;;  %v596_v58 = vpop.f32.mrb[12].mxu0 }
 0x104   : > { %v627_v59 = vadd.f32 %v588_v48, %v453_v55  ;;  %v456_v60 = vadd.f32 %v455_v57, %v343_v35  ;;  %v1909_v61 = vpop.f32.mrb[15].mxu1  ;;  %v1940_v62 = vpop.f32.mrb[13].mxu0 }
 0x105   : > { %v599_v63 = vpop.f32.mrb[14].mxu0 }
 0x106   : > { %v628_v0 = vadd.f32 %v591_v52, %v456_v60  ;;  %v1941_v2 = vpop.f32.mrb[15].mxu0 }
 0x109   : > { %v460_v3 = vpop.f32.mrb[16].mxu1 }
 0x10a   : > { %v461_v4 = vadd.f32 %v460_v3, %v348_v39  ;;  %v1912_v5 = vpop.f32.mrb[17].mxu1 }
 0x10b   : > { %v463_v6 = vpop.f32.mrb[18].mxu1  ;;  %v604_v7 = vpop.f32.mrb[16].mxu0 }
 0x10c   : > { %v629_v8 = vadd.f32 %v596_v58, %v461_v4  ;;  %v464_v9 = vadd.f32 %v463_v6, %v351_v43  ;;  %v1913_v10 = vpop.f32.mrb[19].mxu1  ;;  %v1944_v1 = vpop.f32.mrb[17].mxu0 }
 0x10d   : > { %v607_v11 = vpop.f32.mrb[18].mxu0 }
 0x10e   : > { %v630_v12 = vadd.f32 %v599_v63, %v464_v9  ;;  %v1945_v13 = vpop.f32.mrb[19].mxu0 }
 0x111   : > { %v468_v14 = vpop.f32.mrb[20].mxu1 }
 0x112   : > { %v469_v15 = vadd.f32 %v468_v14, %v356_v30  ;;  %v1916_v16 = vpop.f32.mrb[21].mxu1 }
 0x113   : > { %v471_v17 = vpop.f32.mrb[22].mxu1  ;;  %v612_v18 = vpop.f32.mrb[20].mxu0 }
 0x114   : > { %v631_v19 = vadd.f32 %v604_v7, %v469_v15  ;;  %v472_v20 = vadd.f32 %v471_v17, %v359_v34  ;;  %v1917_v21 = vpop.f32.mrb[23].mxu1  ;;  %v1948_v22 = vpop.f32.mrb[21].mxu0 }
 0x115   : > { %v615_v23 = vpop.f32.mrb[22].mxu0 }
 0x116   : > { %v632_v24 = vadd.f32 %v607_v11, %v472_v20  ;;  %v1949_v25 = vpop.f32.mrb[23].mxu0 }
 0x119   : > { %v476_v26 = vpop.f32.mrb[24].mxu1 }
 0x11a   : > { %v477_v27 = vadd.f32 %v476_v26, %v364_v38  ;;  %v1920_v28 = vpop.f32.mrb[25].mxu1 }
 0x11b   : > { %v479_v29 = vpop.f32.mrb[26].mxu1  ;;  %v620_v31 = vpop.f32.mrb[24].mxu0 }
 0x11c   : > { %v633_v32 = vadd.f32 %v612_v18, %v477_v27  ;;  %v480_v33 = vadd.f32 %v479_v29, %v367_v42  ;;  %v1921_v35 = vpop.f32.mrb[27].mxu1  ;;  %v1952_v36 = vpop.f32.mrb[25].mxu0 }
 0x11d   : > { %v623_v30 = vpop.f32.mrb[26].mxu0 }
 0x11e   : > { %v634_v37 = vadd.f32 %v615_v23, %v480_v33  ;;  %v1953_v39 = vpop.f32.mrb[27].mxu0 }
 0x121   : > { %v484_v40 = vpop.f32.mrb[28].mxu1 }
 0x122   : > { %v485_v34 = vadd.f32 %v484_v40, %v2617_v46  ;;  %v1924_v41 = vpop.f32.mrb[29].mxu1 }
 0x123   : > { %v487_v43 = vpop.f32.mrb[30].mxu1  ;;  %v880_v44 = vpop.f32.mrb[28].mxu0 }
 0x124   : > { %v635_v45 = vadd.f32 %v620_v31, %v485_v34  ;;  %v488_v47 = vadd.f32 %v487_v43, %v2625_v49  ;;  %v1925_v38 = vpop.f32.mrb[31].mxu1  ;;  %v1992_v48 = vpop.f32.mrb[29].mxu0 }
 0x125   : > { %v883_v50 = vpop.f32.mrb[30].mxu0 }
 0x126   : > { %v636_v51 = vadd.f32 %v623_v30, %v488_v47  ;;  %v1993_v52 = vpop.f32.mrb[31].mxu0 }
 0x129   : > { %v734_v42 = vpop.f32.mrb[32].mxu1 }
 0x12a   : > { %v773_v53 = vadd.f32 %v734_v42, %v627_v59  ;;  %v1964_v54 = vpop.f32.mrb[33].mxu1 }
 0x12b   : > { %v737_v55 = vpop.f32.mrb[34].mxu1  ;;  %v888_v56 = vpop.f32.mrb[32].mxu0 }
 0x12c   : > { %v919_v57 = vadd.f32 %v880_v44, %v773_v53  ;;  %v774_v58 = vadd.f32 %v737_v55, %v628_v0  ;;  %v1965_v60 = vpop.f32.mrb[35].mxu1  ;;  %v1996_v46 = vpop.f32.mrb[33].mxu0 }
 0x12d   : > { %v891_v61 = vpop.f32.mrb[34].mxu0 }
 0x12e   : > { %v920_v62 = vadd.f32 %v883_v50, %v774_v58  ;;  %v1997_v63 = vpop.f32.mrb[35].mxu0 }
 0x131   : > { %v742_v2 = vpop.f32.mrb[36].mxu1 }
 0x132   : > { %v775_v3 = vadd.f32 %v742_v2, %v629_v8  ;;  %v1968_v49 = vpop.f32.mrb[37].mxu1 }
 0x133   : > { %v745_v4 = vpop.f32.mrb[38].mxu1  ;;  %v896_v5 = vpop.f32.mrb[36].mxu0 }
 0x134   : > { %v921_v6 = vadd.f32 %v888_v56, %v775_v3  ;;  %v776_v7 = vadd.f32 %v745_v4, %v630_v12  ;;  %v1969_v9 = vpop.f32.mrb[39].mxu1  ;;  %v2000_v10 = vpop.f32.mrb[37].mxu0 }
 0x135   : > { %v899_v59 = vpop.f32.mrb[38].mxu0 }
 0x136   : > { %v922_v1 = vadd.f32 %v891_v61, %v776_v7  ;;  %v2001_v11 = vpop.f32.mrb[39].mxu0 }
 0x139   : > { %v750_v13 = vpop.f32.mrb[40].mxu1 }
 0x13a   : > { %v777_v14 = vadd.f32 %v750_v13, %v631_v19  ;;  %v1972_v0 = vpop.f32.mrb[41].mxu1 }
 0x13b   : > { %v753_v15 = vpop.f32.mrb[42].mxu1  ;;  %v904_v16 = vpop.f32.mrb[40].mxu0 }
 0x13c   : > { %v923_v17 = vadd.f32 %v896_v5, %v777_v14  ;;  %v778_v18 = vadd.f32 %v753_v15, %v632_v24  ;;  %v1973_v20 = vpop.f32.mrb[43].mxu1  ;;  %v2004_v21 = vpop.f32.mrb[41].mxu0 }
 0x13d   : > { %v907_v8 = vpop.f32.mrb[42].mxu0 }
 0x13e   : > { %v924_v22 = vadd.f32 %v899_v59, %v778_v18  ;;  %v2005_v23 = vpop.f32.mrb[43].mxu0 }
 0x141   : > { %v758_v25 = vpop.f32.mrb[44].mxu1 }
 0x142   : > { %v779_v26 = vadd.f32 %v758_v25, %v633_v32  ;;  %v1976_v12 = vpop.f32.mrb[45].mxu1 }
 0x143   : > { %v761_v27 = vpop.f32.mrb[46].mxu1  ;;  %v912_v28 = vpop.f32.mrb[44].mxu0 }
 0x144   : > { %v925_v29 = vadd.f32 %v904_v16, %v779_v26  ;;  %v780_v31 = vadd.f32 %v761_v27, %v634_v37  ;;  %v1977_v33 = vpop.f32.mrb[47].mxu1  ;;  %v2008_v35 = vpop.f32.mrb[45].mxu0 }
 0x145   : > { %v915_v19 = vpop.f32.mrb[46].mxu0 }
 0x146   : > { %v926_v36 = vadd.f32 %v907_v8, %v780_v31  ;;  %v2009_v30 = vpop.f32.mrb[47].mxu0 }
 0x149   : > { %v766_v39 = vpop.f32.mrb[48].mxu1 }
 0x14a   : > { %v781_v40 = vadd.f32 %v766_v39, %v635_v45  ;;  %v1980_v24 = vpop.f32.mrb[49].mxu1 }
 0x14b   : > { %v769_v34 = vpop.f32.mrb[50].mxu1  ;;  %v1172_v41 = vpop.f32.mrb[48].mxu0 }
 0x14c   : > { %v927_v43 = vadd.f32 %v912_v28, %v781_v40  ;;  %v782_v44 = vadd.f32 %v769_v34, %v636_v51  ;;  %v1981_v47 = vpop.f32.mrb[51].mxu1  ;;  %v2048_v38 = vpop.f32.mrb[49].mxu0 }
 0x14d   : > { %v1175_v32 = vpop.f32.mrb[50].mxu0 }
 0x14e   : > { %v928_v48 = vadd.f32 %v915_v19, %v782_v44  ;;  %v2049_v50 = vpop.f32.mrb[51].mxu0 }
 0x151   : > { %v1026_v52 = vpop.f32.mrb[52].mxu1 }
 0x152   : > { %v1065_v42 = vadd.f32 %v1026_v52, %v919_v57  ;;  %v2020_v37 = vpop.f32.mrb[53].mxu1  ;;  %v1513_v52 = vld [vmem:[%s2659_s28 + $0xb] sm:$0xff] }
 0x153   : > { %v1029_v53 = vpop.f32.mrb[54].mxu1  ;;  %v1180_v54 = vpop.f32.mrb[52].mxu0 }
 0x154   : > { %v1211_v55 = vadd.f32 %v1172_v41, %v1065_v42  ;;  %v1066_v56 = vadd.f32 %v1029_v53, %v920_v62  ;;  %v2021_v58 = vpop.f32.mrb[55].mxu1  ;;  %v2052_v60 = vpop.f32.mrb[53].mxu0 }
 0x155   : > { %v1183_v45 = vpop.f32.mrb[54].mxu0  ;;  %v2665_v58 = vld [vmem:[%s2718_s2] ss:$0 sm:$0xff]  ;;  %v1514_v60 = vld [vmem:[%s2659_s28 + $0x13] sm:$0xff] }
 0x156   : > { %v1212_v46 = vadd.f32 %v1175_v32, %v1066_v56  ;;  %v2053_v61 = vpop.f32.mrb[55].mxu0 }
 0x159   : > { %v1034_v63 = vpop.f32.mrb[56].mxu1 }
 0x15a   : > { %v1067_v2 = vadd.f32 %v1034_v63, %v921_v6  ;;  %v2024_v51 = vpop.f32.mrb[57].mxu1 }
 0x15b   : > { %v1037_v3 = vpop.f32.mrb[58].mxu1  ;;  %v1188_v49 = vpop.f32.mrb[56].mxu0 }
 0x15c   : > { %v2639_v4 = vadd.f32 %v1180_v54, %v1067_v2  ;;  %v1068_v5 = vadd.f32 %v1037_v3, %v922_v1  ;;  %v2025_v7 = vpop.f32.mrb[59].mxu1  ;;  %v2056_v57 = vpop.f32.mrb[57].mxu0 }
 0x15d   : > { %v1191_v9 = vpop.f32.mrb[58].mxu0  ;;  %v1515_v7 = vld [vmem:[%s2659_s28 + $0x1b] sm:$0xff] }
 0x15e   : > { %v2641_v10 = vadd.f32 %v1183_v45, %v1068_v5  ;;  %v2057_v59 = vpop.f32.mrb[59].mxu0 }
 0x161   : > { %v1042_v62 = vpop.f32.mrb[60].mxu1 }
 0x162   : > { %v1069_v11 = vadd.f32 %v1042_v62, %v923_v17  ;;  %v2028_v13 = vpop.f32.mrb[61].mxu1 }
 0x163   : > { %v1045_v14 = vpop.f32.mrb[62].mxu1  ;;  %v1196_v0 = vpop.f32.mrb[60].mxu0 }
 0x164   : > { %v2643_v15 = vadd.f32 %v1188_v49, %v1069_v11  ;;  %v1070_v6 = vadd.f32 %v1045_v14, %v924_v22  ;;  %v2029_v16 = vpop.f32.mrb[63].mxu1  ;;  %v2060_v18 = vpop.f32.mrb[61].mxu0  ;;  %v1516_v14 = vld [vmem:[%s2659_s28 + $0x23] sm:$0xff] }
 0x165   : > { %v1199_v20 = vpop.f32.mrb[62].mxu0 }
 0x166   : > { %v2645_v21 = vadd.f32 %v1191_v9, %v1070_v6  ;;  %v2061_v1 = vpop.f32.mrb[63].mxu0 }
 0x169   : > { %v1050_v8 = vpop.f32.mrb[64].mxu1 }
 0x16a   : > { %v1071_v23 = vadd.f32 %v1050_v8, %v925_v29  ;;  %v2032_v25 = vpop.f32.mrb[65].mxu1 }
 0x16b   : > { %v1053_v26 = vpop.f32.mrb[66].mxu1  ;;  %v1204_v12 = vpop.f32.mrb[64].mxu0  ;;  %v1517_v25 = vld [vmem:[%s2659_s28 + $0x2b] sm:$0xff] }
 0x16c   : > { %v2647_v27 = vadd.f32 %v1196_v0, %v1071_v23  ;;  %v1072_v17 = vadd.f32 %v1053_v26, %v926_v36  ;;  %v2033_v28 = vpop.f32.mrb[67].mxu1  ;;  %v2064_v31 = vpop.f32.mrb[65].mxu0 }
 0x16d   : > { %v1207_v33 = vpop.f32.mrb[66].mxu0 }
 0x16e   : > { %v2649_v35 = vadd.f32 %v1199_v20, %v1072_v17  ;;  %v2065_v22 = vpop.f32.mrb[67].mxu0 }
 0x16f   : > { %v1518_v22 = vld [vmem:[%s2659_s28 + $0x33] sm:$0xff] }
 0x171   : > { %v1058_v19 = vpop.f32.mrb[68].mxu1 }
 0x172   : > { %v1073_v30 = vadd.f32 %v1058_v19, %v927_v43  ;;  %v2036_v39 = vpop.f32.mrb[69].mxu1 }
 0x173   : > { %v1061_v40 = vpop.f32.mrb[70].mxu1  ;;  %v1464_v24 = vpop.f32.mrb[68].mxu0 }
 0x174   : > { %v2651_v34 = vadd.f32 %v1204_v12, %v1073_v30  ;;  %v1074_v29 = vadd.f32 %v1061_v40, %v928_v48  ;;  %v2037_v41 = vpop.f32.mrb[71].mxu1  ;;  %v2104_v44 = vpop.f32.mrb[69].mxu0 }
 0x175   : > { %v1467_v47 = vpop.f32.mrb[70].mxu0 }
 0x176   : > { %v2653_v38 = vadd.f32 %v1207_v33, %v1074_v29  ;;  %v2105_v36 = vpop.f32.mrb[71].mxu0 }
 0x179   : > { %v1318_v43 = vpop.f32.mrb[72].mxu1 }
 0x17a   : > { %v1357_v32 = vadd.f32 %v1318_v43, %v1211_v55  ;;  %v2076_v50 = vpop.f32.mrb[73].mxu1 }
 0x17b   : > { %v1321_v42 = vpop.f32.mrb[74].mxu1  ;;  %v1472_v48 = vpop.f32.mrb[72].mxu0 }
 0x17c   : > { %v1503_v37 = vadd.f32 %v1464_v24, %v1357_v32  ;;  %v1358_v53 = vadd.f32 %v1321_v42, %v1212_v46  ;;  %v2077_v54 = vpop.f32.mrb[75].mxu1  ;;  %v2108_v56 = vpop.f32.mrb[73].mxu0 }
 0x17d   : > { %v1475_v45 = vpop.f32.mrb[74].mxu0 }
 0x17e   : > { %v1523_v61 = vadd.f32 %v1513_v52, %v1503_v37  ;;  %v1504_v55 = vadd.f32 %v1467_v47, %v1358_v53  ;;  %v2109_v63 = vpop.f32.mrb[75].mxu0  ;;  %v1519_v47 = vld [vmem:[%s2659_s28 + $0x3b] sm:$0xff] }
 0x17f   : > { %v1521_v63 = vld [vmem:[%s2659_s28 + $0x4b] sm:$0xff] }
 0x180   : > { %v1540_v2 = vadd.f32 %v2665_v58, %v1523_v61  ;;  %v1524_v51 = vadd.f32 %v1514_v60, %v1504_v55 }
 0x181   : > { %v1326_v3 = vpop.f32.mrb[76].mxu1 }
 0x182   : > { %1553 = vst.msk [vmem:[%s2623_s24 + $0xb] sm:$0xff] %vm290_vm1, %v1540_v2  ;;  %v1541_v46 = vadd.f32 %v2665_v58, %v1524_v51  ;;  %v1359_v49 = vadd.f32 %v1326_v3, %v2639_v4  ;;  %v2080_v5 = vpop.f32.mrb[77].mxu1 }
 0x183   : > { %v1329_v57 = vpop.f32.mrb[78].mxu1  ;;  %v1480_v9 = vpop.f32.mrb[76].mxu0 }
 0x184   : > { %1554 = vst.msk [vmem:[%s2623_s24 + $0x13] sm:$0xff] %vm290_vm1, %v1541_v46  ;;  %v1505_v59 = vadd.f32 %v1472_v48, %v1359_v49  ;;  %v1360_v62 = vadd.f32 %v1329_v57, %v2641_v10  ;;  %v2081_v11 = vpop.f32.mrb[79].mxu1  ;;  %v2112_v13 = vpop.f32.mrb[77].mxu0  ;;  %v1520_v48 = vld [vmem:[%s2659_s28 + $0x43] sm:$0xff]  ;;  %v1522_v49 = vld [vmem:[%s2659_s28 + $0x53] sm:$0x3f] }
 0x185   : > { %v1483_v0 = vpop.f32.mrb[78].mxu0 }
 0x186   : > { %v1525_v6 = vadd.f32 %v1515_v7, %v1505_v59  ;;  %v1506_v16 = vadd.f32 %v1475_v45, %v1360_v62  ;;  %v2113_v18 = vpop.f32.mrb[79].mxu0 }
 0x188   : > { %v1542_v4 = vadd.f32 %v2665_v58, %v1525_v6  ;;  %v1526_v20 = vadd.f32 %v1516_v14, %v1506_v16 }
 0x189   : > { %v1334_v1 = vpop.f32.mrb[80].mxu1 }
 0x18a   : > { %1555 = vst.msk [vmem:[%s2623_s24 + $0x1b] sm:$0xff] %vm290_vm1, %v1542_v4  ;;  %v1543_v8 = vadd.f32 %v2665_v58, %v1526_v20  ;;  %v1361_v23 = vadd.f32 %v1334_v1, %v2643_v15  ;;  %v2084_v10 = vpop.f32.mrb[81].mxu1 }
 0x18b   : > { %v1337_v26 = vpop.f32.mrb[82].mxu1  ;;  %v1488_v12 = vpop.f32.mrb[80].mxu0 }
 0x18c   : > { %1556 = vst.msk [vmem:[%s2623_s24 + $0x23] sm:$0xff] %vm290_vm1, %v1543_v8  ;;  %v1507_v17 = vadd.f32 %v1480_v9, %v1361_v23  ;;  %v1362_v28 = vadd.f32 %v1337_v26, %v2645_v21  ;;  %v2085_v31 = vpop.f32.mrb[83].mxu1  ;;  %v2116_v33 = vpop.f32.mrb[81].mxu0 }
 0x18d   : > { %v1491_v19 = vpop.f32.mrb[82].mxu0 }
 0x18e   : > { %v1527_v30 = vadd.f32 %v1517_v25, %v1507_v17  ;;  %v1508_v39 = vadd.f32 %v1483_v0, %v1362_v28  ;;  %v2117_v40 = vpop.f32.mrb[83].mxu0 }
 0x190   : > { %v1544_v15 = vadd.f32 %v2665_v58, %v1527_v30  ;;  %v1528_v24 = vadd.f32 %v1518_v22, %v1508_v39 }
 0x191   : > { %v1342_v29 = vpop.f32.mrb[84].mxu1 }
 0x192   : > { %1557 = vst.msk [vmem:[%s2623_s24 + $0x2b] sm:$0xff] %vm290_vm1, %v1544_v15  ;;  %v1545_v41 = vadd.f32 %v2665_v58, %v1528_v24  ;;  %v1363_v44 = vadd.f32 %v1342_v29, %v2647_v27  ;;  %v2088_v21 = vpop.f32.mrb[85].mxu1 }
 0x193   : > { %v1345_v36 = vpop.f32.mrb[86].mxu1  ;;  %v1496_v43 = vpop.f32.mrb[84].mxu0 }
 0x194   : > { %1558 = vst.msk [vmem:[%s2623_s24 + $0x33] sm:$0xff] %vm290_vm1, %v1545_v41  ;;  %v1509_v32 = vadd.f32 %v1488_v12, %v1363_v44  ;;  %v1364_v50 = vadd.f32 %v1345_v36, %v2649_v35  ;;  %v2089_v52 = vpop.f32.mrb[87].mxu1  ;;  %v2120_v42 = vpop.f32.mrb[85].mxu0 }
 0x195   : > { %v1499_v37 = vpop.f32.mrb[86].mxu0 }
 0x196   : > { %v1529_v53 = vadd.f32 %v1519_v47, %v1509_v32  ;;  %v1510_v54 = vadd.f32 %v1491_v19, %v1364_v50  ;;  %v2121_v27 = vpop.f32.mrb[87].mxu0 }
 0x198   : > { %v1546_v56 = vadd.f32 %v2665_v58, %v1529_v53  ;;  %v1530_v60 = vadd.f32 %v1520_v48, %v1510_v54 }
 0x199   : > { %v1350_v45 = vpop.f32.mrb[88].mxu1 }
 0x19a   : > { %1559 = vst.msk [vmem:[%s2623_s24 + $0x3b] sm:$0xff] %vm290_vm1, %v1546_v56  ;;  %v1547_v61 = vadd.f32 %v2665_v58, %v1530_v60  ;;  %v1365_v35 = vadd.f32 %v1350_v45, %v2651_v34  ;;  %v2092_v55 = vpop.f32.mrb[89].mxu1 }
 0x19b   : > { %v1353_v2 = vpop.f32.mrb[90].mxu1 }
 0x19c   : > { %1560 = vst.msk [vmem:[%s2623_s24 + $0x43] sm:$0xff] %vm290_vm1, %v1547_v61  ;;  %v1511_v51 = vadd.f32 %v1496_v43, %v1365_v35  ;;  %v1366_v3 = vadd.f32 %v1353_v2, %v2653_v38  ;;  %v2093_v46 = vpop.f32.mrb[91].mxu1 }
 0x19e   : > { %v1531_v5 = vadd.f32 %v1521_v63, %v1511_v51  ;;  %v1512_v7 = vadd.f32 %v1499_v37, %v1366_v3 }
 0x1a0   : > { %v1548_v57 = vadd.f32 %v2665_v58, %v1531_v5  ;;  %v1532_v9 = vadd.f32 %v1522_v49, %v1512_v7 }
 0x1a2   : > { %1561 = vst.msk [vmem:[%s2623_s24 + $0x4b] sm:$0xff] %vm290_vm1, %v1548_v57  ;;  %v1549_v34 = vadd.f32 %v2665_v58, %v1532_v9 }
 0x1a4   : > { %1563 = vst.msk [vmem:[%s2623_s24 + $0x53] sm:$0x3f] %vm1562_vm3, %v1549_v34 }
 0x1a5 PF: > { %s14_s15 = sadd.s32 1, %s2183_s15  }
 0x1a6   : > { %p11_p4 = scmp.ge.s32.totalorder %s14_s15, 4  }
 0x1a8   :  { %13 = sbr.rel (!%p11_p4) target bundleno = 1 (0x1), region = 77 }

// kernel: down_block_forward.13
= control target key start
LH: loop header
LB: loop body
LE: loop exit
PB: predicated region body
PF: predicated region fallthrough
CT: control target
= control target key end

     0   :  { %s2564_s24 = smov 0   ;;  %s3051_s0 = inlined_call_operand.vmem [shape: f32[2,100,64], index: 0, kind: input, shape index: {}]   ;;  %s3052_s1 = inlined_call_operand.vmem [shape: bf16[9,64,64], index: 1, kind: input, shape index: {}]   ;;  %s3053_s2 = inlined_call_operand.vmem [shape: f32[1,64], index: 2, kind: input, shape index: {}]   ;;  %s3054_s3 = inlined_call_operand.vmem [shape: f32[2,100,32], index: 3, kind: input, shape index: {}]   ;;  %s3055_s4 = inlined_call_operand.vmem [shape: bf16[32,64], index: 4, kind: input, shape index: {}]   ;;  %s3056_s5 = inlined_call_operand.vmem [shape: f32[2,1,16], index: 5, kind: input, shape index: {}]   ;;  %s3057_s6 = inlined_call_operand.vmem [shape: bf16[16,64], index: 6, kind: input, shape index: {}]   ;;  %s3058_s7 = inlined_call_operand.vmem [shape: f32[2,100,64], index: 7, kind: output, shape index: {}]  }
   0x1 LB: > { %s1922_s25 = sadd.s32 4294967295, %s2520_s24   ;;  %p1926_p0 = scmp.ge.s32.totalorder %s2520_s24, 1  ;;  %s2520_s24 = sphi %s2564_s24, %s17_s24  }
   0x2   : > { %p255_p1 = scmp.lt.s32.totalorder %s2520_s24, 3 }
   0x4   : > { %p256_p2 = pnand %p1926_p0, %p255_p1 }
   0x5   : > { %v2471_v0 = vld [vmem:[%s3052_s1 + $0x20] sm:$0xff] (!%p256_p2)   ;;  %v2522_v1 = vmov (!%p256_p2), 0.0   ;;  %v2473_v3 = vld [vmem:[%s3052_s1 + $0x28] sm:$0xff] (!%p256_p2)   ;;  %vm2523_vm0 = vmmov (!%p256_p2), 0   ;;  %p295_p3 = scmp.lt.s32.totalorder (!%p256_p2), %s1922_s25, 1  ;;  %v2475_v5 = vld [vmem:[%s3052_s1 + $0x30] sm:$0xff] (!%p256_p2)  }
   0x6   : > { %259 = sbr.rel (%p256_p2) target bundleno = 446 (0x1be), region = 48  ;;  %2178 = vmatprep.subr.bf16.mxu0 (!%p256_p2), %v2522_v1  ;;  %2206 = vmatprep.subr.bf16.mxu1 (!%p256_p2), %v2522_v1  ;;  %v2472_v2 = vld [vmem:[%s3052_s1] sm:$0xff] (!%p256_p2)   ;;  %v2474_v4 = vld [vmem:[%s3052_s1 + $0x8] sm:$0xff] (!%p256_p2)   ;;  %v2476_v6 = vld [vmem:[%s3052_s1 + $0x10] sm:$0xff] (!%p256_p2)   ;;  %vm385_vm1 = vcmask (!%p256_p2), 523264   ;;  %vm1639_vm2 = vcmask (!%p256_p2), 261120  }
   0x7   : > { %2179 = vmatpush3.bf16.msra.mxu0 (!%p256_p2), %v2471_v0  ;;  %2186 = vmatprep.mubr.msk.bf16.mxu0 (!%p256_p2), %vm2523_vm0, %v2522_v1  ;;  %v2477_v7 = vld [vmem:[%s3052_s1 + $0x38] sm:$0xff] (!%p256_p2)   ;;  %v2479_v15 = vld [vmem:[%s3052_s1 + $0x40] sm:$0xff] (!%p256_p2)   ;;  %v2481_v20 = vld [vmem:[%s3052_s1 + $0x48] sm:$0xff] (!%p256_p2)   ;;  %vm1755_vm3 = vcmask (!%p256_p2), 130048   ;;  %vm1831_vm4 = vcmask (!%p256_p2), 518144   ;;  %vm1842_vm5 = vcmask (!%p256_p2), 521216  }
   0x8   : > { %2207 = vmatpush3.bf16.msra.mxu1 (!%p256_p2), %v2472_v2  ;;  %2180 = vmatprep.subr.bf16.mxu0 (!%p256_p2), %v2522_v1  ;;  %v2478_v10 = vld [vmem:[%s3052_s1 + $0x18] sm:$0xff] (!%p256_p2)   ;;  %v2480_v16 = vld [vmem:[%s3052_s1 + $0x60] sm:$0xff] (!%p256_p2)   ;;  %v2482_v22 = vld [vmem:[%s3052_s1 + $0x68] sm:$0xff] (!%p256_p2)  }
   0x9   : > { %2208 = vmatprep.subr.bf16.mxu1 (!%p256_p2), %v2522_v1  ;;  %2214 = vmatprep.mubr.msk.bf16.mxu1 (!%p256_p2), %vm2523_vm0, %v2522_v1  ;;  %v2483_v25 = vld [vmem:[%s3052_s1 + $0x50] sm:$0xff] (!%p256_p2)   ;;  %v2485_v31 = vld [vmem:[%s3052_s1 + $0x58] sm:$0xff] (!%p256_p2)   ;;  %v2487_v51 = vld [vmem:[%s3052_s1 + $0x80] sm:$0xff] (!%p256_p2)  }
   0xa   : > { %v2484_v26 = vld [vmem:[%s3052_s1 + $0x70] sm:$0xff] (!%p256_p2)   ;;  %v2486_v32 = vld [vmem:[%s3052_s1 + $0x78] sm:$0xff] (!%p256_p2)   ;;  %v2488_v53 = vld [vmem:[%s3052_s1 + $0xa0] sm:$0xff] (!%p256_p2)  }
   0xb   : > { %2181 = vmatpush3.bf16.msra.mxu0 (!%p256_p2), %v2473_v3  ;;  %v2489_v55 = vld [vmem:[%s3052_s1 + $0x88] sm:$0xff] (!%p256_p2)   ;;  %v2491_v60 = vld [vmem:[%s3052_s1 + $0x90] sm:$0xff] (!%p256_p2)   ;;  %v2493_v0 = vld [vmem:[%s3052_s1 + $0x98] sm:$0xff] (!%p256_p2)  }
   0xc   : > { %2209 = vmatpush3.bf16.msra.mxu1 (!%p256_p2), %v2474_v4  ;;  %2182 = vmatprep.subr.bf16.mxu0 (!%p256_p2), %v2522_v1  ;;  %v2490_v57 = vld [vmem:[%s3052_s1 + $0xa8] sm:$0xff] (!%p256_p2)   ;;  %v2492_v61 = vld [vmem:[%s3052_s1 + $0xb0] sm:$0xff] (!%p256_p2)   ;;  %v2494_v2 = vld [vmem:[%s3052_s1 + $0xb8] sm:$0xff] (!%p256_p2)  }
   0xd   : > { %s3060_s25 = smov (!%p295_p3, %s1922_s25), 1  ;;  %2210 = vmatprep.subr.bf16.mxu1 %v2522_v1 }
   0xe   : > { %s2598_s13 = smul.u32 104, %s3060_s25  ;;  %s307_s10 = scalar_lea.vmem %s3056_s5, %s3060_s25 }
   0xf   : > { %2183 = vmatpush3.bf16.msra.mxu0 %v2475_v5 }
  0x10   : > { %s2609_s18 = scalar_lea.vmem %s3051_s0, %s2598_s13  ;;  %2211 = vmatpush3.bf16.msra.mxu1 %v2476_v6  ;;  %2184 = vmatprep.subr.bf16.mxu0 %v2522_v1  ;;  %s2946_s30 = scalar_lea.vmem %s3054_s3, %s2598_s13 }
  0x11   : > { %v337_v8 = vld [vmem:[%s2609_s18 + $0x1] sm:$0xff]  ;;  %v338_v9 = vld [vmem:[%s2609_s18 + $0x9] sm:$0xff]  ;;  %2212 = vmatprep.subr.bf16.mxu1 %v2522_v1  ;;  %v339_v17 = vld [vmem:[%s2609_s18 + $0x11] sm:$0xff]  ;;  %s3013_s14 = scalar_lea.vmem %s3058_s7, %s2598_s13 }
  0x12   : > { %v314_v11 = vld [vmem:[%s2609_s18] sm:$0xff]  ;;  %v315_v12 = vld [vmem:[%s2609_s18 + $0x8] sm:$0xff]  ;;  %v347_v13 = vpack.c.bf16 %v338_v9, %v337_v8  ;;  %v316_v19 = vld [vmem:[%s2609_s18 + $0x10] sm:$0xff]  ;;  %1830 = vst.msk [vmem:[%s3013_s14] sm:$0xff] %vm385_vm1, %v2522_v1 }
  0x13   : > { %2185 = vmatpush3.bf16.msra.mxu0 %v2477_v7  ;;  %v324_v14 = vpack.c.bf16 %v315_v12, %v314_v11  ;;  %v340_v18 = vld [vmem:[%s2609_s18 + $0x19] sm:$0xff]  ;;  %v341_v27 = vld [vmem:[%s2609_s18 + $0x21] sm:$0xff]  ;;  %v342_v28 = vld [vmem:[%s2609_s18 + $0x29] sm:$0xff]  ;;  %1844 = vst.msk [vmem:[%s3013_s14 + $0x59] sm:$0xff] %vm385_vm1, %v2522_v1 }
  0x14   : > { %2213 = vmatpush3.bf16.msra.mxu1 %v2478_v10  ;;  %2234 = vmatprep.subr.bf16.mxu0 %v2522_v1  ;;  %v317_v21 = vld [vmem:[%s2609_s18 + $0x18] sm:$0xff]  ;;  %v348_v23 = vpack.c.bf16 %v340_v18, %v339_v17  ;;  %v318_v29 = vld [vmem:[%s2609_s18 + $0x20] sm:$0xff]  ;;  %v319_v30 = vld [vmem:[%s2609_s18 + $0x28] sm:$0xff]  ;;  %v349_v33 = vpack.c.bf16 %v342_v28, %v341_v27  ;;  %1832 = vst.msk [vmem:[%s3013_s14 + $0x8] sm:$0x7] %vm1831_vm4, %v2522_v1 }
  0x15   : > { %2262 = vmatprep.subr.bf16.mxu1 %v2522_v1  ;;  %v325_v24 = vpack.c.bf16 %v317_v21, %v316_v19  ;;  %v326_v34 = vpack.c.bf16 %v319_v30, %v318_v29  ;;  %v343_v35 = vld [vmem:[%s2609_s18 + $0x31] sm:$0xff]  ;;  %v344_v36 = vld [vmem:[%s2609_s18 + $0x39] sm:$0xff]  ;;  %v345_v41 = vld [vmem:[%s2609_s18 + $0x41] sm:$0xff]  ;;  %1845 = vst.msk [vmem:[%s3013_s14 + $0x61] sm:$0x7] %vm1831_vm4, %v2522_v1 }
  0x16   : > { %2187 = vmatmul.mubr.msk.bf16.vlgmr.msra.gmra.mrb[0].mxu0 %vm385_vm1, %v347_v13  ;;  %v320_v37 = vld [vmem:[%s2609_s18 + $0x30] sm:$0xff]  ;;  %v321_v38 = vld [vmem:[%s2609_s18 + $0x38] sm:$0xff]  ;;  %v350_v39 = vpack.c.bf16 %v344_v36, %v343_v35  ;;  %v346_v42 = vld [vmem:[%s2609_s18 + $0x49] sm:$0x3f] }
  0x17   : > { %2215 = vmatmul.mubr.msk.bf16.vlgmr.msra.gmra.mrb[0].mxu1 %vm385_vm1, %v324_v14  ;;  %2235 = vmatpush3.bf16.msra.mxu0 %v2479_v15  ;;  %v327_v40 = vpack.c.bf16 %v321_v38, %v320_v37  ;;  %v322_v43 = vld [vmem:[%s2609_s18 + $0x40] sm:$0xff]  ;;  %v323_v44 = vld [vmem:[%s2609_s18 + $0x48] sm:$0x3f]  ;;  %v351_v45 = vpack.c.bf16 %v346_v42, %v345_v41  ;;  %v733_v49 = vld [vmem:[%s2609_s18 + $0x12] sm:$0xff] }
  0x18   : > { %2190 = vmatprep.mubr.msk.bf16.mxu0 %vm2523_vm0, %v2522_v1  ;;  %2218 = vmatprep.mubr.msk.bf16.mxu1 %vm2523_vm0, %v2522_v1  ;;  %v328_v46 = vpack.c.bf16 %v323_v44, %v322_v43  ;;  %v586_v47 = vld [vmem:[%s2609_s18 + $0x2] sm:$0xff]  ;;  %v587_v48 = vld [vmem:[%s2609_s18 + $0xa] sm:$0xff]  ;;  %v589_v54 = vld [vmem:[%s2609_s18 + $0x1a] sm:$0xff] }
  0x19   : > { %2263 = vmatpush3.bf16.msra.mxu1 %v2480_v16  ;;  %2236 = vmatprep.subr.bf16.mxu0 %v2522_v1  ;;  %v596_v50 = vpack.c.bf16 %v587_v48, %v586_v47  ;;  %v742_v52 = vpack.c.bf16 %v733_v49, %v587_v48  ;;  %v735_v56 = vld [vmem:[%s2609_s18 + $0x22] sm:$0xff]  ;;  %v597_v58 = vpack.c.bf16 %v589_v54, %v733_v49  ;;  %v591_v62 = vld [vmem:[%s2609_s18 + $0x2a] sm:$0xff]  ;;  %v737_v63 = vld [vmem:[%s2609_s18 + $0x32] sm:$0xff] }
  0x1a   : > { %2264 = vmatprep.subr.bf16.mxu1 %v2522_v1  ;;  %v743_v59 = vpack.c.bf16 %v735_v56, %v589_v54  ;;  %v598_v3 = vpack.c.bf16 %v591_v62, %v735_v56  ;;  %v744_v4 = vpack.c.bf16 %v737_v63, %v591_v62  ;;  %v593_v5 = vld [vmem:[%s2609_s18 + $0x3a] sm:$0xff]  ;;  %v739_v6 = vld [vmem:[%s2609_s18 + $0x42] sm:$0xff]  ;;  %v595_v9 = vld [vmem:[%s2609_s18 + $0x4a] sm:$0x3f] }
  0x1b   : > { %2237 = vmatpush3.bf16.msra.mxu0 %v2481_v20  ;;  %v599_v7 = vpack.c.bf16 %v593_v5, %v737_v63  ;;  %v745_v8 = vpack.c.bf16 %v739_v6, %v593_v5  ;;  %v740_v10 = vld [vmem:[%s2609_s18 + $0x4a] sm:$0xff]  ;;  %v741_v11 = vld [vmem:[%s2609_s18 + $0x52] sm:$0x3f]  ;;  %v600_v12 = vpack.c.bf16 %v595_v9, %v739_v6  ;;  %v2495_v19 = vld [vmem:[%s3052_s1 + $0xc0] sm:$0xff]  }
  0x1c   : > { %2238 = vmatprep.subr.bf16.mxu0 %v2522_v1  ;;  %v746_v13 = vpack.c.bf16 %v741_v11, %v740_v10  ;;  %v878_v14 = vld [vmem:[%s2609_s18 + $0xb] sm:$0xff]  ;;  %v879_v15 = vld [vmem:[%s2609_s18 + $0x13] sm:$0xff]  ;;  %v2496_v21 = vld [vmem:[%s3052_s1 + $0xe0] sm:$0xff]  }
  0x1d   : > { %2265 = vmatpush3.bf16.msra.mxu1 %v2482_v22  ;;  %v1024_v16 = vld [vmem:[%s2609_s18 + $0xc] sm:$0xff]  ;;  %v2781_v17 = vld [vmem:[%s2609_s18 + $0x14] sm:$0xff]  ;;  %v888_v18 = vpack.c.bf16 %v879_v15, %v878_v14  ;;  %v885_v41 = vld [vmem:[%s2609_s18 + $0x43] sm:$0xff] }
  0x1e   : > { %2191 = vmatmul.mubr.msk.bf16.gmra.mrb[4].mxu0 %vm385_vm1, %v348_v23  ;;  %2266 = vmatprep.subr.bf16.mxu1 %v2522_v1  ;;  %v1034_v20 = vpack.c.bf16 %v2781_v17, %v1024_v16  ;;  %v880_v22 = vld [vmem:[%s2609_s18 + $0x1b] sm:$0xff]  ;;  %v881_v23 = vld [vmem:[%s2609_s18 + $0x23] sm:$0xff]  ;;  %v2499_v30 = vld [vmem:[%s3052_s1 + $0xd0] sm:$0xff]  }
  0x1f   : > { %2219 = vmatmul.mubr.msk.bf16.gmra.mrb[4].mxu1 %vm385_vm1, %v325_v24  ;;  %2194 = vmatprep.mubr.msk.bf16.mxu0 %vm2523_vm0, %v2522_v1  ;;  %v2497_v24 = vld [vmem:[%s3052_s1 + $0xc8] sm:$0xff]   ;;  %v889_v28 = vpack.c.bf16 %v881_v23, %v880_v22  ;;  %v2834_v35 = vld [vmem:[%s2609_s18 + $0x34] sm:$0xff]  ;;  %v1030_v42 = vld [vmem:[%s2609_s18 + $0x3c] sm:$0xff] }
  0x20   : > { %2222 = vmatprep.mubr.msk.bf16.mxu1 %vm2523_vm0, %v2522_v1  ;;  %2239 = vmatpush3.bf16.msra.mxu0 %v2483_v25  ;;  %v2800_v25 = vld [vmem:[%s2609_s18 + $0x1c] sm:$0xff]  ;;  %v2498_v27 = vld [vmem:[%s3052_s1 + $0xe8] sm:$0xff]   ;;  %v887_v47 = vld [vmem:[%s2609_s18 + $0x53] sm:$0x3f]  ;;  %v1182_v5 = vpack.c.bf16 %v1030_v42, %v2834_v35 }
  0x21   : > { %2267 = vmatpush3.bf16.msra.mxu1 %v2484_v26  ;;  %2240 = vmatprep.subr.bf16.mxu0 %v2522_v1  ;;  %v2803_v26 = vld [vmem:[%s2609_s18 + $0x24] sm:$0xff]  ;;  %v2501_v36 = vld [vmem:[%s3052_s1 + $0xd8] sm:$0xff]   ;;  %v1032_v48 = vld [vmem:[%s2609_s18 + $0x4c] sm:$0xff]  ;;  %v1180_v54 = vpack.c.bf16 %v2800_v25, %v2781_v17 }
  0x22   : > { %2268 = vmatprep.subr.bf16.mxu1 %v2522_v1  ;;  %v1035_v29 = vpack.c.bf16 %v2803_v26, %v2800_v25  ;;  %v2502_v37 = vld [vmem:[%s3052_s1 + $0xf8] sm:$0xff]   ;;  %v2858_v43 = vld [vmem:[%s2609_s18 + $0x44] sm:$0xff] }
  0x23   : > { %v1033_v49 = vld [vmem:[%s2609_s18 + $0x54] sm:$0x3f]  ;;  %v1183_v9 = vpack.c.bf16 %v1032_v48, %v2858_v43  ;;  %v1325_v14 = vld [vmem:[%s2609_s18 + $0x5d] sm:$0x3f] }
  0x24   : > { %2241 = vmatpush3.bf16.msra.mxu0 %v2485_v31  ;;  %v2500_v31 = vld [vmem:[%s3052_s1 + $0xf0] sm:$0xff]   ;;  %v2509_v23 = vld [vmem:[%s3057_s6] sm:$0xff]  }
  0x25   : > { %2269 = vmatpush3.bf16.msra.mxu1 %v2486_v32  ;;  %2290 = vmatprep.subr.bf16.mxu0 %v2522_v1  ;;  %v882_v32 = vld [vmem:[%s2609_s18 + $0x2b] sm:$0xff]  ;;  %v1178_v11 = vld [vmem:[%s2609_s18 + $0x54] sm:$0xff] }
  0x26   : > { %2195 = vmatmul.mubr.msk.bf16.gmra.mrb[8].mxu0 %vm385_vm1, %v349_v33  ;;  %2318 = vmatprep.subr.bf16.mxu1 %v2522_v1  ;;  %v883_v33 = vld [vmem:[%s2609_s18 + $0x33] sm:$0xff] }
  0x27   : > { %2223 = vmatmul.mubr.msk.bf16.gmra.mrb[8].mxu1 %vm385_vm1, %v326_v34  ;;  %2198 = vmatprep.mubr.msk.bf16.mxu0 %vm2523_vm0, %v2522_v1  ;;  %v2831_v34 = vld [vmem:[%s2609_s18 + $0x2c] sm:$0xff]  ;;  %v890_v38 = vpack.c.bf16 %v883_v33, %v882_v32  ;;  %v1462_v17 = vld [vmem:[%s2609_s18 + $0x16] sm:$0xff]  ;;  %v1467_v33 = vld [vmem:[%s2609_s18 + $0x3e] sm:$0xff] }
  0x28   : > { %2226 = vmatprep.mubr.msk.bf16.mxu1 %vm2523_vm0, %v2522_v1  ;;  %v1181_v62 = vpack.c.bf16 %v2831_v34, %v2803_v26  ;;  %v1464_v26 = vld [vmem:[%s2609_s18 + $0x26] sm:$0xff]  ;;  %v1466_v32 = vld [vmem:[%s2609_s18 + $0x36] sm:$0xff] }
  0x2e   : > { %2199 = vmatmul.mubr.msk.bf16.gmra.mrb[12].mxu0 %vm385_vm1, %v350_v39  ;;  %v1036_v39 = vpack.c.bf16 %v2834_v35, %v2831_v34  ;;  %v1612_v34 = vld [vmem:[%s2946_s30 + $0x2b] sm:$0xff]  ;;  %v1613_v35 = vld [vmem:[%s2946_s30 + $0x33] sm:$0xff] }
  0x2f   : > { %2227 = vmatmul.mubr.msk.bf16.gmra.mrb[12].mxu1 %vm385_vm1, %v327_v40  ;;  %2202 = vmatprep.mubr.msk.bf16.mxu0 %vm2523_vm0, %v2522_v1  ;;  %v884_v40 = vld [vmem:[%s2609_s18 + $0x3b] sm:$0xff] }
  0x30   : > { %2230 = vmatprep.mubr.msk.bf16.mxu1 %vm2523_vm0, %v2522_v1  ;;  %v891_v44 = vpack.c.bf16 %v885_v41, %v884_v40  ;;  %v1468_v40 = vld [vmem:[%s2609_s18 + $0x46] sm:$0xff]  ;;  %v1469_v41 = vld [vmem:[%s2609_s18 + $0x4e] sm:$0xff] }
  0x36   : > { %2203 = vmatmul.mubr.msk.bf16.gmra.mrb[16].mxu0 %vm385_vm1, %v351_v45  ;;  %v1037_v45 = vpack.c.bf16 %v2858_v43, %v1030_v42  ;;  %v1614_v42 = vld [vmem:[%s2946_s30 + $0x3b] sm:$0xff]  ;;  %v1615_v43 = vld [vmem:[%s2946_s30 + $0x43] sm:$0xff] }
  0x37   : > { %2231 = vmatmul.mubr.msk.bf16.gmra.mrb[16].mxu1 %vm385_vm1, %v328_v46  ;;  %2242 = vmatprep.mubr.msk.bf16.mxu0 %vm2523_vm0, %v2522_v1  ;;  %v886_v46 = vld [vmem:[%s2609_s18 + $0x4b] sm:$0xff] }
  0x38   : > { %2270 = vmatprep.mubr.msk.bf16.mxu1 %vm2523_vm0, %v2522_v1 }
  0x3e   : > { %2243 = vmatmul.mubr.msk.bf16.vlgmr.msra.gmra.mrb[20].mxu0 %vm385_vm1, %v596_v50  ;;  %v892_v50 = vpack.c.bf16 %v887_v47, %v886_v46  ;;  %v1470_v46 = vld [vmem:[%s2609_s18 + $0x56] sm:$0xff]  ;;  %v1471_v47 = vld [vmem:[%s2609_s18 + $0x5e] sm:$0x3f] }
  0x3f   : > { %2291 = vmatpush3.bf16.msra.mxu0 %v2487_v51  ;;  %2271 = vmatmul.mubr.msk.bf16.vlgmr.msra.gmra.mrb[20].mxu1 %vm385_vm1, %v742_v52  ;;  %v1038_v51 = vpack.c.bf16 %v1033_v49, %v1032_v48  ;;  %v1316_v52 = vld [vmem:[%s2609_s18 + $0x15] sm:$0xff]  ;;  %v1616_v48 = vld [vmem:[%s2946_s30 + $0x4b] sm:$0xff] }
  0x40   : > { %2246 = vmatprep.mubr.msk.bf16.mxu0 %vm2523_vm0, %v2522_v1  ;;  %2319 = vmatpush3.bf16.msra.mxu1 %v2488_v53  ;;  %v1317_v53 = vld [vmem:[%s2609_s18 + $0x1d] sm:$0xff]  ;;  %v1617_v49 = vld [vmem:[%s2946_s30 + $0x53] sm:$0x3f] }
  0x41   : > { %2274 = vmatprep.mubr.msk.bf16.mxu1 %vm2523_vm0, %v2522_v1  ;;  %2292 = vmatprep.subr.bf16.mxu0 %v2522_v1  ;;  %v1326_v56 = vpack.c.bf16 %v1317_v53, %v1316_v52  ;;  %v1622_v52 = vpack.c.bf16 %v1617_v49, %v1616_v48 }
  0x42   : > { %2320 = vmatprep.subr.bf16.mxu1 %v2522_v1 }
  0x43   : > { %2293 = vmatpush3.bf16.msra.mxu0 %v2489_v55  ;;  %v2503_v55 = vld [vmem:[%s3052_s1 + $0x100] sm:$0xff]  }
  0x44   : > { %2321 = vmatpush3.bf16.msra.mxu1 %v2490_v57  ;;  %2294 = vmatprep.subr.bf16.mxu0 %v2522_v1  ;;  %v2504_v57 = vld [vmem:[%s3055_s4] sm:$0xff]  }
  0x45   : > { %2322 = vmatprep.subr.bf16.mxu1 %v2522_v1 }
  0x46   : > { %2247 = vmatmul.mubr.msk.bf16.gmra.mrb[24].mxu0 %vm385_vm1, %v597_v58  ;;  %v2505_v58 = vld [vmem:[%s3052_s1 + $0x108] sm:$0xff]  }
  0x47   : > { %2275 = vmatmul.mubr.msk.bf16.gmra.mrb[24].mxu1 %vm385_vm1, %v743_v59  ;;  %2250 = vmatprep.mubr.msk.bf16.mxu0 %vm2523_vm0, %v2522_v1  ;;  %v1318_v59 = vld [vmem:[%s2609_s18 + $0x25] sm:$0xff] }
  0x48   : > { %2278 = vmatprep.mubr.msk.bf16.mxu1 %vm2523_vm0, %v2522_v1  ;;  %2295 = vmatpush3.bf16.msra.mxu0 %v2491_v60  ;;  %v1319_v60 = vld [vmem:[%s2609_s18 + $0x2d] sm:$0xff] }
  0x49   : > { %2323 = vmatpush3.bf16.msra.mxu1 %v2492_v61  ;;  %2296 = vmatprep.subr.bf16.mxu0 %v2522_v1  ;;  %v2507_v61 = vld [vmem:[%s3055_s4 + $0x8] sm:$0xff]   ;;  %v1327_v63 = vpack.c.bf16 %v1319_v60, %v1318_v59 }
  0x4a   : > { %2324 = vmatprep.subr.bf16.mxu1 %v2522_v1 }
  0x4c   : > { %2297 = vmatpush3.bf16.msra.mxu0 %v2493_v0  ;;  %v2506_v0 = vld [vmem:[%s3052_s1 + $0x110] sm:$0xff]  }
  0x4d   : > { %2325 = vmatpush3.bf16.msra.mxu1 %v2494_v2  ;;  %2346 = vmatprep.subr.bf16.mxu0 %v2522_v1  ;;  %v1320_v2 = vld [vmem:[%s2609_s18 + $0x35] sm:$0xff] }
  0x4e   : > { %2251 = vmatmul.mubr.msk.bf16.gmra.mrb[28].mxu0 %vm385_vm1, %v598_v3  ;;  %2374 = vmatprep.subr.bf16.mxu1 %v2522_v1  ;;  %v1321_v3 = vld [vmem:[%s2609_s18 + $0x3d] sm:$0xff] }
  0x4f   : > { %2279 = vmatmul.mubr.msk.bf16.gmra.mrb[28].mxu1 %vm385_vm1, %v744_v4  ;;  %2254 = vmatprep.mubr.msk.bf16.mxu0 %vm2523_vm0, %v2522_v1  ;;  %v2508_v4 = vld [vmem:[%s3052_s1 + $0x118] sm:$0xff]   ;;  %v1328_v6 = vpack.c.bf16 %v1321_v3, %v1320_v2 }
  0x50   : > { %2282 = vmatprep.mubr.msk.bf16.mxu1 %vm2523_vm0, %v2522_v1 }
  0x56   : > { %2255 = vmatmul.mubr.msk.bf16.gmra.mrb[32].mxu0 %vm385_vm1, %v599_v7  ;;  %v1322_v7 = vld [vmem:[%s2609_s18 + $0x45] sm:$0xff] }
  0x57   : > { %2283 = vmatmul.mubr.msk.bf16.gmra.mrb[32].mxu1 %vm385_vm1, %v745_v8  ;;  %2258 = vmatprep.mubr.msk.bf16.mxu0 %vm2523_vm0, %v2522_v1  ;;  %v1323_v8 = vld [vmem:[%s2609_s18 + $0x4d] sm:$0xff] }
  0x58   : > { %2286 = vmatprep.mubr.msk.bf16.mxu1 %vm2523_vm0, %v2522_v1  ;;  %v1329_v10 = vpack.c.bf16 %v1323_v8, %v1322_v7 }
  0x5e   : > { %2259 = vmatmul.mubr.msk.bf16.gmra.mrb[36].mxu0 %vm385_vm1, %v600_v12  ;;  %v1179_v12 = vld [vmem:[%s2609_s18 + $0x5c] sm:$0x3f] }
  0x5f   : > { %2287 = vmatmul.mubr.msk.bf16.gmra.mrb[36].mxu1 %vm385_vm1, %v746_v13  ;;  %2298 = vmatprep.mubr.msk.bf16.mxu0 %vm2523_vm0, %v2522_v1  ;;  %v1324_v13 = vld [vmem:[%s2609_s18 + $0x55] sm:$0xff]  ;;  %v1184_v15 = vpack.c.bf16 %v1179_v12, %v1178_v11 }
  0x60   : > { %2326 = vmatprep.mubr.msk.bf16.mxu1 %vm2523_vm0, %v2522_v1  ;;  %v1330_v16 = vpack.c.bf16 %v1325_v14, %v1324_v13 }
  0x66   : > { %2299 = vmatmul.mubr.msk.bf16.vlgmr.msra.gmra.mrb[40].mxu0 %vm385_vm1, %v888_v18  ;;  %v1463_v18 = vld [vmem:[%s2609_s18 + $0x1e] sm:$0xff] }
  0x67   : > { %2347 = vmatpush3.bf16.msra.mxu0 %v2495_v19  ;;  %2327 = vmatmul.mubr.msk.bf16.vlgmr.msra.gmra.mrb[40].mxu1 %vm385_vm1, %v1034_v20  ;;  %v1608_v19 = vld [vmem:[%s2946_s30 + $0xb] sm:$0xff]  ;;  %v1609_v20 = vld [vmem:[%s2946_s30 + $0x13] sm:$0xff]  ;;  %v1472_v22 = vpack.c.bf16 %v1463_v18, %v1462_v17 }
  0x68   : > { %2302 = vmatprep.mubr.msk.bf16.mxu0 %vm2523_vm0, %v2522_v1  ;;  %2375 = vmatpush3.bf16.msra.mxu1 %v2496_v21  ;;  %v1738_v21 = vld [vmem:[%s307_s10] sm:$0x1] }
  0x69   : > { %2330 = vmatprep.mubr.msk.bf16.mxu1 %vm2523_vm0, %v2522_v1  ;;  %2348 = vmatprep.subr.bf16.mxu0 %v2522_v1  ;;  %v2082_v25 = vmul.f32 -1.442695, %v1738_v21 }
  0x6a   : > { %2376 = vmatprep.subr.bf16.mxu1 %v2522_v1 }
  0x6b   : > { %2349 = vmatpush3.bf16.msra.mxu0 %v2497_v24  ;;  %v1618_v24 = vpack.c.bf16 %v1609_v20, %v1608_v19  ;;  %2510 = vpow2.f32 %v2082_v25 }
  0x6c   : > { %2377 = vmatpush3.bf16.msra.mxu1 %v2498_v27  ;;  %2350 = vmatprep.subr.bf16.mxu0 %v2522_v1  ;;  %v1465_v27 = vld [vmem:[%s2609_s18 + $0x2e] sm:$0xff] }
  0x6d   : > { %2378 = vmatprep.subr.bf16.mxu1 %v2522_v1 }
  0x6e   : > { %2303 = vmatmul.mubr.msk.bf16.gmra.mrb[44].mxu0 %vm385_vm1, %v889_v28  ;;  %v1610_v28 = vld [vmem:[%s2946_s30 + $0x1b] sm:$0xff] }
  0x6f   : > { %2331 = vmatmul.mubr.msk.bf16.gmra.mrb[44].mxu1 %vm385_vm1, %v1035_v29  ;;  %2306 = vmatprep.mubr.msk.bf16.mxu0 %vm2523_vm0, %v2522_v1  ;;  %v1611_v29 = vld [vmem:[%s2946_s30 + $0x23] sm:$0xff] }
  0x70   : > { %2334 = vmatprep.mubr.msk.bf16.mxu1 %vm2523_vm0, %v2522_v1  ;;  %2351 = vmatpush3.bf16.msra.mxu0 %v2499_v30  ;;  %v1473_v30 = vpack.c.bf16 %v1465_v27, %v1464_v26 }
  0x71   : > { %2379 = vmatpush3.bf16.msra.mxu1 %v2500_v31  ;;  %2352 = vmatprep.subr.bf16.mxu0 %v2522_v1  ;;  %v1619_v31 = vpack.c.bf16 %v1611_v29, %v1610_v28 }
  0x72   : > { %2380 = vmatprep.subr.bf16.mxu1 %v2522_v1 }
  0x74   : > { %2353 = vmatpush3.bf16.msra.mxu0 %v2501_v36 }
  0x75   : > { %2381 = vmatpush3.bf16.msra.mxu1 %v2502_v37  ;;  %2402 = vmatprep.subr.bf16.mxu0 %v2522_v1  ;;  %v2511_v36 = vpop.eup %2510  ;;  %v1474_v37 = vpack.c.bf16 %v1467_v33, %v1466_v32 }
  0x76   : > { %2307 = vmatmul.mubr.msk.bf16.gmra.mrb[48].mxu0 %vm385_vm1, %v890_v38  ;;  %2430 = vmatprep.subr.bf16.mxu1 %v2522_v1  ;;  %v1620_v38 = vpack.c.bf16 %v1613_v35, %v1612_v34 }
  0x77   : > { %2335 = vmatmul.mubr.msk.bf16.gmra.mrb[48].mxu1 %vm385_vm1, %v1036_v39  ;;  %2310 = vmatprep.mubr.msk.bf16.mxu0 %vm2523_vm0, %v2522_v1  ;;  %v1742_v39 = vadd.f32 1.0, %v2511_v36 }
  0x78   : > { %2338 = vmatprep.mubr.msk.bf16.mxu1 %vm2523_vm0, %v2522_v1 }
  0x79   : > { %2512 = vrcp.f32 %v1742_v39 }
  0x7e   : > { %2311 = vmatmul.mubr.msk.bf16.gmra.mrb[52].mxu0 %vm385_vm1, %v891_v44  ;;  %v1475_v44 = vpack.c.bf16 %v1469_v41, %v1468_v40 }
  0x7f   : > { %2339 = vmatmul.mubr.msk.bf16.gmra.mrb[52].mxu1 %vm385_vm1, %v1037_v45  ;;  %2314 = vmatprep.mubr.msk.bf16.mxu0 %vm2523_vm0, %v2522_v1  ;;  %v1621_v45 = vpack.c.bf16 %v1615_v43, %v1614_v42 }
  0x80   : > { %2342 = vmatprep.mubr.msk.bf16.mxu1 %vm2523_vm0, %v2522_v1 }
  0x86   : > { %2315 = vmatmul.mubr.msk.bf16.gmra.mrb[56].mxu0 %vm385_vm1, %v892_v50  ;;  %v1476_v50 = vpack.c.bf16 %v1471_v47, %v1470_v46 }
  0x87   : > { %2343 = vmatmul.mubr.msk.bf16.gmra.mrb[56].mxu1 %vm385_vm1, %v1038_v51  ;;  %2354 = vmatprep.mubr.msk.bf16.mxu0 %vm2523_vm0, %v2522_v1  ;;  %v2513_v51 = vpop.eup %2512 }
  0x88   : > { %2382 = vmatprep.mubr.msk.bf16.mxu1 %vm2523_vm0, %v2522_v1  ;;  %v1745_v53 = vmul.f32 %v2513_v51, %v1738_v21 }
  0x8e   : > { %2355 = vmatmul.mubr.msk.bf16.vlgmr.msra.gmra.mrb[60].mxu0 %vm385_vm1, %v1180_v54  ;;  %v1746_v54 = vpack.c.bf16 %v1745_v53, %v1745_v53 }
  0x8f   : > { %2403 = vmatpush3.bf16.msra.mxu0 %v2503_v55  ;;  %2383 = vmatmul.mubr.msk.bf16.vlgmr.msra.gmra.mrb[60].mxu1 %vm385_vm1, %v1326_v56 }
  0x90   : > { %2358 = vmatprep.mubr.msk.bf16.mxu0 %vm2523_vm0, %v2522_v1  ;;  %2431 = vmatpush3.bf16.msra.mxu1 %v2504_v57 }
  0x91   : > { %2386 = vmatprep.mubr.msk.bf16.mxu1 %vm2523_vm0, %v2522_v1  ;;  %2404 = vmatprep.subr.bf16.mxu0 %v2522_v1 }
  0x92   : > { %2432 = vmatprep.subr.bf16.mxu1 %v2522_v1 }
  0x93   : > { %2405 = vmatpush3.bf16.msra.mxu0 %v2505_v58 }
  0x94   : > { %2406 = vmatprep.subr.bf16.mxu0 %v2522_v1  ;;  %2433 = vmatpush3.bf16.msra.mxu1 %v2507_v61 }
  0x96   : > { %2359 = vmatmul.mubr.msk.bf16.gmra.mrb[64].mxu0 %vm385_vm1, %v1181_v62 }
  0x97   : > { %2387 = vmatmul.mubr.msk.bf16.gmra.mrb[64].mxu1 %vm385_vm1, %v1327_v63  ;;  %2362 = vmatprep.mubr.msk.bf16.mxu0 %vm2523_vm0, %v2522_v1 }
  0x98   : > { %2390 = vmatprep.mubr.msk.bf16.mxu1 %vm2523_vm0, %v2522_v1  ;;  %2407 = vmatpush3.bf16.msra.mxu0 %v2506_v0 }
  0x99   : > { %2408 = vmatprep.subr.bf16.mxu0 %v2522_v1 }
  0x9c   : > { %2409 = vmatpush3.bf16.msra.mxu0 %v2508_v4 }
  0x9d   : > { %2454 = vmatprep.subr.bf16.mxu0 %v2522_v1 }
  0x9e   : > { %2363 = vmatmul.mubr.msk.bf16.gmra.mrb[68].mxu0 %vm385_vm1, %v1182_v5 }
  0x9f   : > { %2391 = vmatmul.mubr.msk.bf16.gmra.mrb[68].mxu1 %vm385_vm1, %v1328_v6  ;;  %2366 = vmatprep.mubr.msk.bf16.mxu0 %vm2523_vm0, %v2522_v1 }
  0xa0   : > { %2394 = vmatprep.mubr.msk.bf16.mxu1 %vm2523_vm0, %v2522_v1 }
  0xa6   : > { %2367 = vmatmul.mubr.msk.bf16.gmra.mrb[72].mxu0 %vm385_vm1, %v1183_v9 }
  0xa7   : > { %2395 = vmatmul.mubr.msk.bf16.gmra.mrb[72].mxu1 %vm385_vm1, %v1329_v10  ;;  %2370 = vmatprep.mubr.msk.bf16.mxu0 %vm2523_vm0, %v2522_v1 }
  0xa8   : > { %2398 = vmatprep.mubr.msk.bf16.mxu1 %vm2523_vm0, %v2522_v1 }
  0xae   : > { %2371 = vmatmul.mubr.msk.bf16.gmra.mrb[76].mxu0 %vm385_vm1, %v1184_v15 }
  0xaf   : > { %2399 = vmatmul.mubr.msk.bf16.gmra.mrb[76].mxu1 %vm385_vm1, %v1330_v16  ;;  %2410 = vmatprep.mubr.msk.bf16.mxu0 %vm2523_vm0, %v2522_v1 }
  0xb0   : > { %2434 = vmatprep.mubr.msk.bf16.mxu1 %vm2523_vm0, %v2522_v1 }
  0xb6   : > { %2411 = vmatmul.mubr.msk.bf16.vlgmr.msra.gmra.mrb[80].mxu0 %vm385_vm1, %v1472_v22 }
  0xb7   : > { %2455 = vmatpush3.bf16.msra.mxu0 %v2509_v23  ;;  %2435 = vmatmul.mubr.msk.bf16.vlgmr.msra.gmra.mrb[80].mxu1 %vm1639_vm2, %v1618_v24 }
  0xb8   : > { %2414 = vmatprep.mubr.msk.bf16.mxu0 %vm2523_vm0, %v2522_v1  ;;  %2438 = vmatprep.mubr.msk.bf16.mxu1 %vm2523_vm0, %v2522_v1 }
  0xbe   : > { %2415 = vmatmul.mubr.msk.bf16.gmra.mrb[84].mxu0 %vm385_vm1, %v1473_v30 }
  0xbf   : > { %2439 = vmatmul.mubr.msk.bf16.gmra.mrb[84].mxu1 %vm1639_vm2, %v1619_v31  ;;  %2418 = vmatprep.mubr.msk.bf16.mxu0 %vm2523_vm0, %v2522_v1 }
  0xc0   : > { %2442 = vmatprep.mubr.msk.bf16.mxu1 %vm2523_vm0, %v2522_v1 }
  0xc6   : > { %2419 = vmatmul.mubr.msk.bf16.gmra.mrb[88].mxu0 %vm385_vm1, %v1474_v37 }
  0xc7   : > { %2443 = vmatmul.mubr.msk.bf16.gmra.mrb[88].mxu1 %vm1639_vm2, %v1620_v38  ;;  %2422 = vmatprep.mubr.msk.bf16.mxu0 %vm2523_vm0, %v2522_v1 }
  0xc8   : > { %2446 = vmatprep.mubr.msk.bf16.mxu1 %vm2523_vm0, %v2522_v1 }
  0xce   : > { %2423 = vmatmul.mubr.msk.bf16.gmra.mrb[92].mxu0 %vm385_vm1, %v1475_v44 }
  0xcf   : > { %2447 = vmatmul.mubr.msk.bf16.gmra.mrb[92].mxu1 %vm1639_vm2, %v1621_v45  ;;  %2426 = vmatprep.mubr.msk.bf16.mxu0 %vm2523_vm0, %v2522_v1 }
  0xd0   : > { %2450 = vmatprep.mubr.msk.bf16.mxu1 %vm2523_vm0, %v2522_v1 }
  0xd6   : > { %2427 = vmatmul.mubr.msk.bf16.gmra.mrb[96].mxu0 %vm385_vm1, %v1476_v50 }
  0xd7   : > { %2451 = vmatmul.mubr.msk.bf16.gmra.mrb[96].mxu1 %vm1639_vm2, %v1622_v52  ;;  %2456 = vmatprep.mubr.msk.bf16.mxu0 %vm2523_vm0, %v2522_v1 }
  0xde   : > { %2457 = vmatmul.mubr.msk.bf16.vlgmr.msra.gmra.mrb[100].mxu0 %vm1755_vm3, %v1746_v54 }
  0xe9   : > { %v435_v55 = vpop.f32.mrb[0].mxu0 }
  0xea   : > { %v547_v56 = vpop.f32.mrb[0].mxu1  ;;  %v2188_v57 = vpop.f32.mrb[1].mxu0 }
  0xeb   : > { %v548_v58 = vadd.f32 %v547_v56, %v435_v55  ;;  %v2216_v59 = vpop.f32.mrb[1].mxu1  ;;  %v438_v60 = vpop.f32.mrb[2].mxu0 }
  0xec   : > { %v550_v61 = vpop.f32.mrb[2].mxu1  ;;  %v2189_v62 = vpop.f32.mrb[3].mxu0 }
  0xed   : > { %v551_v63 = vadd.f32 %v550_v61, %v438_v60  ;;  %v2217_v0 = vpop.f32.mrb[3].mxu1 }
  0xf1   : > { %v443_v2 = vpop.f32.mrb[4].mxu0 }
  0xf2   : > { %v555_v3 = vpop.f32.mrb[4].mxu1  ;;  %v2192_v4 = vpop.f32.mrb[5].mxu0 }
  0xf3   : > { %v556_v5 = vadd.f32 %v555_v3, %v443_v2  ;;  %v2220_v6 = vpop.f32.mrb[5].mxu1  ;;  %v446_v7 = vpop.f32.mrb[6].mxu0 }
  0xf4   : > { %v558_v8 = vpop.f32.mrb[6].mxu1  ;;  %v2193_v9 = vpop.f32.mrb[7].mxu0 }
  0xf5   : > { %v559_v10 = vadd.f32 %v558_v8, %v446_v7  ;;  %v2221_v11 = vpop.f32.mrb[7].mxu1 }
  0xf9   : > { %v451_v12 = vpop.f32.mrb[8].mxu0 }
  0xfa   : > { %v563_v13 = vpop.f32.mrb[8].mxu1  ;;  %v2196_v14 = vpop.f32.mrb[9].mxu0 }
  0xfb   : > { %v564_v15 = vadd.f32 %v563_v13, %v451_v12  ;;  %v2224_v16 = vpop.f32.mrb[9].mxu1  ;;  %v454_v17 = vpop.f32.mrb[10].mxu0 }
  0xfc   : > { %v566_v18 = vpop.f32.mrb[10].mxu1  ;;  %v2197_v19 = vpop.f32.mrb[11].mxu0 }
  0xfd   : > { %v567_v20 = vadd.f32 %v566_v18, %v454_v17  ;;  %v2225_v21 = vpop.f32.mrb[11].mxu1 }
 0x101   : > { %v459_v22 = vpop.f32.mrb[12].mxu0 }
 0x102   : > { %v571_v23 = vpop.f32.mrb[12].mxu1  ;;  %v2200_v24 = vpop.f32.mrb[13].mxu0 }
 0x103   : > { %v572_v25 = vadd.f32 %v571_v23, %v459_v22  ;;  %v2228_v26 = vpop.f32.mrb[13].mxu1  ;;  %v462_v27 = vpop.f32.mrb[14].mxu0 }
 0x104   : > { %v574_v28 = vpop.f32.mrb[14].mxu1  ;;  %v2201_v29 = vpop.f32.mrb[15].mxu0 }
 0x105   : > { %v575_v30 = vadd.f32 %v574_v28, %v462_v27  ;;  %v2229_v31 = vpop.f32.mrb[15].mxu1 }
 0x109   : > { %v467_v32 = vpop.f32.mrb[16].mxu0 }
 0x10a   : > { %v579_v33 = vpop.f32.mrb[16].mxu1  ;;  %v2204_v34 = vpop.f32.mrb[17].mxu0 }
 0x10b   : > { %v580_v35 = vadd.f32 %v579_v33, %v467_v32  ;;  %v2232_v36 = vpop.f32.mrb[17].mxu1  ;;  %v470_v37 = vpop.f32.mrb[18].mxu0 }
 0x10c   : > { %v582_v38 = vpop.f32.mrb[18].mxu1  ;;  %v2205_v39 = vpop.f32.mrb[19].mxu0 }
 0x10d   : > { %v583_v40 = vadd.f32 %v582_v38, %v470_v37  ;;  %v2233_v41 = vpop.f32.mrb[19].mxu1 }
 0x111   : > { %v683_v42 = vpop.f32.mrb[20].mxu0 }
 0x112   : > { %v722_v43 = vadd.f32 %v683_v42, %v548_v58  ;;  %v2244_v44 = vpop.f32.mrb[21].mxu0  ;;  %v829_v45 = vpop.f32.mrb[20].mxu1 }
 0x113   : > { %v686_v46 = vpop.f32.mrb[22].mxu0  ;;  %v2272_v47 = vpop.f32.mrb[21].mxu1 }
 0x114   : > { %v723_v48 = vadd.f32 %v686_v46, %v551_v63  ;;  %v868_v49 = vadd.f32 %v829_v45, %v722_v43  ;;  %v2245_v50 = vpop.f32.mrb[23].mxu0  ;;  %v832_v51 = vpop.f32.mrb[22].mxu1 }
 0x115   : > { %v2273_v52 = vpop.f32.mrb[23].mxu1 }
 0x116   : > { %v869_v53 = vadd.f32 %v832_v51, %v723_v48 }
 0x119   : > { %v691_v54 = vpop.f32.mrb[24].mxu0 }
 0x11a   : > { %v724_v55 = vadd.f32 %v691_v54, %v556_v5  ;;  %v2248_v56 = vpop.f32.mrb[25].mxu0  ;;  %v837_v57 = vpop.f32.mrb[24].mxu1 }
 0x11b   : > { %v694_v59 = vpop.f32.mrb[26].mxu0  ;;  %v2276_v60 = vpop.f32.mrb[25].mxu1 }
 0x11c   : > { %v725_v61 = vadd.f32 %v694_v59, %v559_v10  ;;  %v870_v62 = vadd.f32 %v837_v57, %v724_v55  ;;  %v2249_v0 = vpop.f32.mrb[27].mxu0  ;;  %v840_v58 = vpop.f32.mrb[26].mxu1 }
 0x11d   : > { %v2277_v2 = vpop.f32.mrb[27].mxu1 }
 0x11e   : > { %v871_v3 = vadd.f32 %v840_v58, %v725_v61 }
 0x121   : > { %v699_v4 = vpop.f32.mrb[28].mxu0 }
 0x122   : > { %v726_v6 = vadd.f32 %v699_v4, %v564_v15  ;;  %v2252_v63 = vpop.f32.mrb[29].mxu0  ;;  %v845_v7 = vpop.f32.mrb[28].mxu1 }
 0x123   : > { %v702_v8 = vpop.f32.mrb[30].mxu0  ;;  %v2280_v9 = vpop.f32.mrb[29].mxu1 }
 0x124   : > { %v727_v11 = vadd.f32 %v702_v8, %v567_v20  ;;  %v872_v12 = vadd.f32 %v845_v7, %v726_v6  ;;  %v2253_v13 = vpop.f32.mrb[31].mxu0  ;;  %v848_v5 = vpop.f32.mrb[30].mxu1 }
 0x125   : > { %v2281_v14 = vpop.f32.mrb[31].mxu1 }
 0x126   : > { %v873_v16 = vadd.f32 %v848_v5, %v727_v11 }
 0x129   : > { %v707_v17 = vpop.f32.mrb[32].mxu0 }
 0x12a   : > { %v728_v10 = vadd.f32 %v707_v17, %v572_v25  ;;  %v2256_v18 = vpop.f32.mrb[33].mxu0  ;;  %v853_v19 = vpop.f32.mrb[32].mxu1 }
 0x12b   : > { %v710_v21 = vpop.f32.mrb[34].mxu0  ;;  %v2284_v22 = vpop.f32.mrb[33].mxu1 }
 0x12c   : > { %v729_v23 = vadd.f32 %v710_v21, %v575_v30  ;;  %v874_v24 = vadd.f32 %v853_v19, %v728_v10  ;;  %v2257_v15 = vpop.f32.mrb[35].mxu0  ;;  %v856_v26 = vpop.f32.mrb[34].mxu1 }
 0x12d   : > { %v2285_v27 = vpop.f32.mrb[35].mxu1 }
 0x12e   : > { %v875_v28 = vadd.f32 %v856_v26, %v729_v23 }
 0x131   : > { %v715_v20 = vpop.f32.mrb[36].mxu0 }
 0x132   : > { %v730_v25 = vadd.f32 %v715_v20, %v580_v35  ;;  %v2260_v29 = vpop.f32.mrb[37].mxu0  ;;  %v861_v30 = vpop.f32.mrb[36].mxu1 }
 0x133   : > { %v718_v31 = vpop.f32.mrb[38].mxu0  ;;  %v2288_v32 = vpop.f32.mrb[37].mxu1 }
 0x134   : > { %v731_v33 = vadd.f32 %v718_v31, %v583_v40  ;;  %v876_v34 = vadd.f32 %v861_v30, %v730_v25  ;;  %v2261_v36 = vpop.f32.mrb[39].mxu0  ;;  %v864_v37 = vpop.f32.mrb[38].mxu1 }
 0x135   : > { %v2289_v38 = vpop.f32.mrb[39].mxu1 }
 0x136   : > { %v877_v39 = vadd.f32 %v864_v37, %v731_v33 }
 0x139   : > { %v975_v41 = vpop.f32.mrb[40].mxu0 }
 0x13a   : > { %v1014_v42 = vadd.f32 %v975_v41, %v868_v49  ;;  %v2300_v43 = vpop.f32.mrb[41].mxu0  ;;  %v1121_v44 = vpop.f32.mrb[40].mxu1 }
 0x13b   : > { %v978_v35 = vpop.f32.mrb[42].mxu0  ;;  %v2328_v45 = vpop.f32.mrb[41].mxu1 }
 0x13c   : > { %v1015_v46 = vadd.f32 %v978_v35, %v869_v53  ;;  %v1160_v47 = vadd.f32 %v1121_v44, %v1014_v42  ;;  %v2301_v48 = vpop.f32.mrb[43].mxu0  ;;  %v1124_v40 = vpop.f32.mrb[42].mxu1 }
 0x13d   : > { %v2329_v50 = vpop.f32.mrb[43].mxu1 }
 0x13e   : > { %v1161_v51 = vadd.f32 %v1124_v40, %v1015_v46 }
 0x141   : > { %v983_v52 = vpop.f32.mrb[44].mxu0 }
 0x142   : > { %v1016_v54 = vadd.f32 %v983_v52, %v870_v62  ;;  %v2304_v55 = vpop.f32.mrb[45].mxu0  ;;  %v1129_v56 = vpop.f32.mrb[44].mxu1 }
 0x143   : > { %v986_v57 = vpop.f32.mrb[46].mxu0  ;;  %v2332_v59 = vpop.f32.mrb[45].mxu1 }
 0x144   : > { %v1017_v60 = vadd.f32 %v986_v57, %v871_v3  ;;  %v1162_v61 = vadd.f32 %v1129_v56, %v1016_v54  ;;  %v2305_v1 = vpop.f32.mrb[47].mxu0  ;;  %v1132_v49 = vpop.f32.mrb[46].mxu1 }
 0x145   : > { %v2333_v0 = vpop.f32.mrb[47].mxu1 }
 0x146   : > { %v1163_v58 = vadd.f32 %v1132_v49, %v1017_v60 }
 0x149   : > { %v991_v2 = vpop.f32.mrb[48].mxu0 }
 0x14a   : > { %v1018_v4 = vadd.f32 %v991_v2, %v872_v12  ;;  %v2308_v53 = vpop.f32.mrb[49].mxu0  ;;  %v1137_v6 = vpop.f32.mrb[48].mxu1 }
 0x14b   : > { %v994_v63 = vpop.f32.mrb[50].mxu0  ;;  %v2336_v7 = vpop.f32.mrb[49].mxu1 }
 0x14c   : > { %v1019_v8 = vadd.f32 %v994_v63, %v873_v16  ;;  %v1164_v9 = vadd.f32 %v1137_v6, %v1018_v4  ;;  %v2309_v11 = vpop.f32.mrb[51].mxu0  ;;  %v1140_v62 = vpop.f32.mrb[50].mxu1 }
 0x14d   : > { %v2337_v13 = vpop.f32.mrb[51].mxu1 }
 0x14e   : > { %v1165_v5 = vadd.f32 %v1140_v62, %v1019_v8 }
 0x151   : > { %v999_v14 = vpop.f32.mrb[52].mxu0 }
 0x152   : > { %v1020_v17 = vadd.f32 %v999_v14, %v874_v24  ;;  %v2312_v3 = vpop.f32.mrb[53].mxu0  ;;  %v1145_v10 = vpop.f32.mrb[52].mxu1 }
 0x153   : > { %v1002_v18 = vpop.f32.mrb[54].mxu0  ;;  %v2340_v19 = vpop.f32.mrb[53].mxu1 }
 0x154   : > { %v1021_v21 = vadd.f32 %v1002_v18, %v875_v28  ;;  %v1166_v22 = vadd.f32 %v1145_v10, %v1020_v17  ;;  %v2313_v23 = vpop.f32.mrb[55].mxu0  ;;  %v1148_v12 = vpop.f32.mrb[54].mxu1 }
 0x155   : > { %v2341_v15 = vpop.f32.mrb[55].mxu1 }
 0x156   : > { %v1167_v26 = vadd.f32 %v1148_v12, %v1021_v21 }
 0x159   : > { %v1007_v27 = vpop.f32.mrb[56].mxu0 }
 0x15a   : > { %v1022_v20 = vadd.f32 %v1007_v27, %v876_v34  ;;  %v2316_v16 = vpop.f32.mrb[57].mxu0  ;;  %v1153_v25 = vpop.f32.mrb[56].mxu1 }
 0x15b   : > { %v1010_v29 = vpop.f32.mrb[58].mxu0  ;;  %v2344_v30 = vpop.f32.mrb[57].mxu1 }
 0x15c   : > { %v1023_v31 = vadd.f32 %v1010_v29, %v877_v39  ;;  %v1168_v32 = vadd.f32 %v1153_v25, %v1022_v20  ;;  %v2317_v33 = vpop.f32.mrb[59].mxu0  ;;  %v1156_v24 = vpop.f32.mrb[58].mxu1 }
 0x15d   : > { %v2345_v36 = vpop.f32.mrb[59].mxu1 }
 0x15e   : > { %v1169_v37 = vadd.f32 %v1156_v24, %v1023_v31 }
 0x161   : > { %v1267_v38 = vpop.f32.mrb[60].mxu0 }
 0x162   : > { %v1306_v41 = vadd.f32 %v1267_v38, %v1160_v47  ;;  %v2356_v28 = vpop.f32.mrb[61].mxu0  ;;  %v1413_v42 = vpop.f32.mrb[60].mxu1 }
 0x163   : > { %v1270_v43 = vpop.f32.mrb[62].mxu0  ;;  %v2384_v44 = vpop.f32.mrb[61].mxu1 }
 0x164   : > { %v1307_v35 = vadd.f32 %v1270_v43, %v1161_v51  ;;  %v1452_v45 = vadd.f32 %v1413_v42, %v1306_v41  ;;  %v2357_v46 = vpop.f32.mrb[63].mxu0  ;;  %v1416_v34 = vpop.f32.mrb[62].mxu1 }
 0x165   : > { %v2385_v48 = vpop.f32.mrb[63].mxu1 }
 0x166   : > { %v1453_v40 = vadd.f32 %v1416_v34, %v1307_v35 }
 0x169   : > { %v1275_v50 = vpop.f32.mrb[64].mxu0 }
 0x16a   : > { %v1308_v52 = vadd.f32 %v1275_v50, %v1162_v61  ;;  %v2360_v39 = vpop.f32.mrb[65].mxu0  ;;  %v1421_v54 = vpop.f32.mrb[64].mxu1 }
 0x16b   : > { %v1278_v55 = vpop.f32.mrb[66].mxu0  ;;  %v2388_v56 = vpop.f32.mrb[65].mxu1 }
 0x16c   : > { %v1309_v57 = vadd.f32 %v1278_v55, %v1163_v58  ;;  %v1454_v59 = vadd.f32 %v1421_v54, %v1308_v52  ;;  %v2361_v60 = vpop.f32.mrb[67].mxu0  ;;  %v1424_v47 = vpop.f32.mrb[66].mxu1 }
 0x16d   : > { %v2389_v1 = vpop.f32.mrb[67].mxu1 }
 0x16e   : > { %v1455_v49 = vadd.f32 %v1424_v47, %v1309_v57 }
 0x171   : > { %v1283_v0 = vpop.f32.mrb[68].mxu0 }
 0x172   : > { %v1310_v2 = vadd.f32 %v1283_v0, %v1164_v9  ;;  %v2364_v51 = vpop.f32.mrb[69].mxu0  ;;  %v1429_v4 = vpop.f32.mrb[68].mxu1 }
 0x173   : > { %v1286_v53 = vpop.f32.mrb[70].mxu0  ;;  %v2392_v6 = vpop.f32.mrb[69].mxu1 }
 0x174   : > { %v1311_v63 = vadd.f32 %v1286_v53, %v1165_v5  ;;  %v1456_v7 = vadd.f32 %v1429_v4, %v1310_v2  ;;  %v2365_v8 = vpop.f32.mrb[71].mxu0  ;;  %v1432_v61 = vpop.f32.mrb[70].mxu1 }
 0x175   : > { %v2393_v11 = vpop.f32.mrb[71].mxu1 }
 0x176   : > { %v1457_v62 = vadd.f32 %v1432_v61, %v1311_v63 }
 0x179   : > { %v1291_v13 = vpop.f32.mrb[72].mxu0 }
 0x17a   : > { %v1312_v14 = vadd.f32 %v1291_v13, %v1166_v22  ;;  %v2368_v58 = vpop.f32.mrb[73].mxu0  ;;  %v1437_v17 = vpop.f32.mrb[72].mxu1 }
 0x17b   : > { %v1294_v3 = vpop.f32.mrb[74].mxu0  ;;  %v2396_v10 = vpop.f32.mrb[73].mxu1 }
 0x17c   : > { %v1313_v18 = vadd.f32 %v1294_v3, %v1167_v26  ;;  %v1458_v19 = vadd.f32 %v1437_v17, %v1312_v14  ;;  %v2369_v21 = vpop.f32.mrb[75].mxu0  ;;  %v1440_v9 = vpop.f32.mrb[74].mxu1 }
 0x17d   : > { %v2397_v23 = vpop.f32.mrb[75].mxu1 }
 0x17e   : > { %v1459_v12 = vadd.f32 %v1440_v9, %v1313_v18  ;;  %v1799_v23 = vlaneseq }
 0x181   : > { %v1299_v15 = vpop.f32.mrb[76].mxu0 }
 0x182   : > { %v1314_v27 = vadd.f32 %v1299_v15, %v1168_v32  ;;  %v2372_v5 = vpop.f32.mrb[77].mxu0  ;;  %v1445_v20 = vpop.f32.mrb[76].mxu1 }
 0x183   : > { %v1302_v16 = vpop.f32.mrb[78].mxu0  ;;  %v2400_v25 = vpop.f32.mrb[77].mxu1 }
 0x184   : > { %v1315_v29 = vadd.f32 %v1302_v16, %v1169_v37  ;;  %v1460_v30 = vadd.f32 %v1445_v20, %v1314_v27  ;;  %v2373_v31 = vpop.f32.mrb[79].mxu0  ;;  %v1448_v22 = vpop.f32.mrb[78].mxu1  ;;  %v1800_v20 = vshrl.u32 %v1799_v23, 7 }
 0x185   : > { %v2401_v33 = vpop.f32.mrb[79].mxu1 }
 0x186   : > { %v1461_v24 = vadd.f32 %v1448_v22, %v1315_v29 }
 0x189   : > { %v1559_v36 = vpop.f32.mrb[80].mxu0 }
 0x18a   : > { %v1598_v38 = vadd.f32 %v1559_v36, %v1452_v45  ;;  %v2412_v26 = vpop.f32.mrb[81].mxu0  ;;  %v1689_v41 = vpop.f32.mrb[80].mxu1 }
 0x18b   : > { %v1562_v28 = vpop.f32.mrb[82].mxu0  ;;  %v2436_v42 = vpop.f32.mrb[81].mxu1 }
 0x18c   : > { %v1599_v43 = vadd.f32 %v1562_v28, %v1453_v40  ;;  %v1728_v44 = vadd.f32 %v1689_v41, %v1598_v38  ;;  %v2413_v35 = vpop.f32.mrb[83].mxu0  ;;  %v1692_v32 = vpop.f32.mrb[82].mxu1  ;;  %v2085_v28 = vld [vmem:[%s3053_s2] ss:$0 sm:$0xff] }
 0x18d   : > { %v2437_v46 = vpop.f32.mrb[83].mxu1 }
 0x18e   : > { %v1729_v34 = vadd.f32 %v1692_v32, %v1599_v43 }
 0x191   : > { %v1567_v48 = vpop.f32.mrb[84].mxu0 }
 0x192   : > { %v1600_v50 = vadd.f32 %v1567_v48, %v1454_v59  ;;  %v2416_v37 = vpop.f32.mrb[85].mxu0  ;;  %v1697_v52 = vpop.f32.mrb[84].mxu1 }
 0x193   : > { %v1570_v39 = vpop.f32.mrb[86].mxu0  ;;  %v2440_v54 = vpop.f32.mrb[85].mxu1 }
 0x194   : > { %v1601_v55 = vadd.f32 %v1570_v39, %v1455_v49  ;;  %v1730_v56 = vadd.f32 %v1697_v52, %v1600_v50  ;;  %v2417_v57 = vpop.f32.mrb[87].mxu0  ;;  %v1700_v45 = vpop.f32.mrb[86].mxu1 }
 0x195   : > { %v2441_v60 = vpop.f32.mrb[87].mxu1 }
 0x196   : > { %v1731_v47 = vadd.f32 %v1700_v45, %v1601_v55 }
 0x199   : > { %v1575_v1 = vpop.f32.mrb[88].mxu0 }
 0x19a   : > { %v1602_v0 = vadd.f32 %v1575_v1, %v1456_v7  ;;  %v2420_v40 = vpop.f32.mrb[89].mxu0  ;;  %v1705_v2 = vpop.f32.mrb[88].mxu1 }
 0x19b   : > { %v1578_v51 = vpop.f32.mrb[90].mxu0  ;;  %v2444_v4 = vpop.f32.mrb[89].mxu1 }
 0x19c   : > { %v1603_v53 = vadd.f32 %v1578_v51, %v1457_v62  ;;  %v1732_v6 = vadd.f32 %v1705_v2, %v1602_v0  ;;  %v2421_v63 = vpop.f32.mrb[91].mxu0  ;;  %v1708_v59 = vpop.f32.mrb[90].mxu1 }
 0x19d   : > { %v2445_v8 = vpop.f32.mrb[91].mxu1 }
 0x19e   : > { %v1733_v61 = vadd.f32 %v1708_v59, %v1603_v53 }
 0x1a1   : > { %v1583_v11 = vpop.f32.mrb[92].mxu0 }
 0x1a2   : > { %v1604_v13 = vadd.f32 %v1583_v11, %v1458_v19  ;;  %v2424_v49 = vpop.f32.mrb[93].mxu0  ;;  %v1713_v14 = vpop.f32.mrb[92].mxu1 }
 0x1a3   : > { %v1586_v58 = vpop.f32.mrb[94].mxu0  ;;  %v2448_v17 = vpop.f32.mrb[93].mxu1 }
 0x1a4   : > { %v1605_v3 = vadd.f32 %v1586_v58, %v1459_v12  ;;  %v1734_v10 = vadd.f32 %v1713_v14, %v1604_v13  ;;  %v2425_v18 = vpop.f32.mrb[95].mxu0  ;;  %v1716_v7 = vpop.f32.mrb[94].mxu1  ;;  %v1801_v12 = vsub.s32 0, %v1800_v20 }
 0x1a5   : > { %v2449_v21 = vpop.f32.mrb[95].mxu1 }
 0x1a6   : > { %v1735_v9 = vadd.f32 %v1716_v7, %v1605_v3 }
 0x1a9   : > { %v1591_v15 = vpop.f32.mrb[96].mxu0 }
 0x1aa   : > { %v1606_v62 = vadd.f32 %v1591_v15, %v1460_v30  ;;  %v2428_v27 = vpop.f32.mrb[97].mxu0  ;;  %v1721_v5 = vpop.f32.mrb[96].mxu1 }
 0x1ab   : > { %v1594_v16 = vpop.f32.mrb[98].mxu0  ;;  %v2452_v25 = vpop.f32.mrb[97].mxu1 }
 0x1ac   : > { %v1607_v29 = vadd.f32 %v1594_v16, %v1461_v24  ;;  %v1736_v19 = vadd.f32 %v1721_v5, %v1606_v62  ;;  %v2429_v31 = vpop.f32.mrb[99].mxu0  ;;  %v1724_v22 = vpop.f32.mrb[98].mxu1 }
 0x1ad   : > { %v2453_v33 = vpop.f32.mrb[99].mxu1 }
 0x1ae   : > { %v1737_v36 = vadd.f32 %v1724_v22, %v1607_v29 }
 0x1b1   : > { %v1793_v38 = vpop.f32.mrb[100].mxu0 }
 0x1b2   : > { %v1802_v26 = vrot.slane %v1793_v38, %v1801_v12  ;;  %v2458_v41 = vpop.f32.mrb[101].mxu0 }
 0x1b3   : > { %v1796_v30 = vpop.f32.mrb[102].mxu0 }
 0x1b4   : > { %v1803_v42 = vadd.f32 %v1802_v26, %v1728_v44  ;;  %v1804_v43 = vadd.f32 %v1802_v26, %v1729_v34  ;;  %v1805_v35 = vadd.f32 %v1802_v26, %v1730_v56  ;;  %v1806_v32 = vadd.f32 %v1802_v26, %v1731_v47  ;;  %v2459_v24 = vpop.f32.mrb[103].mxu0 }
 0x1b5   : > { %v1807_v46 = vadd.f32 %v1802_v26, %v1732_v6  ;;  %v1808_v48 = vadd.f32 %v1802_v26, %v1733_v61  ;;  %v1809_v50 = vadd.f32 %v1802_v26, %v1734_v10  ;;  %v1810_v37 = vadd.f32 %v1802_v26, %v1735_v9 }
 0x1b6   : > { %v1811_v52 = vadd.f32 %v1802_v26, %v1736_v19  ;;  %v1812_v39 = vadd.f32 %v1802_v26, %v1737_v36  ;;  %v1820_v54 = vadd.f32 %v2085_v28, %v1803_v42  ;;  %v1821_v55 = vadd.f32 %v2085_v28, %v1804_v43 }
 0x1b7   : > { %v1822_v44 = vadd.f32 %v2085_v28, %v1805_v35  ;;  %v1823_v34 = vadd.f32 %v2085_v28, %v1806_v32  ;;  %v1824_v56 = vadd.f32 %v2085_v28, %v1807_v46  ;;  %v1825_v57 = vadd.f32 %v2085_v28, %v1808_v48 }
 0x1b8   : > { %v1826_v45 = vadd.f32 %v2085_v28, %v1809_v50  ;;  %v1827_v60 = vadd.f32 %v2085_v28, %v1810_v37  ;;  %v1828_v47 = vadd.f32 %v2085_v28, %v1811_v52  ;;  %v1829_v1 = vadd.f32 %v2085_v28, %v1812_v39  ;;  %1833 = vst.msk [vmem:[%s3013_s14 + $0xb] sm:$0xff] %vm385_vm1, %v1820_v54 }
 0x1b9   : > { %1834 = vst.msk [vmem:[%s3013_s14 + $0x13] sm:$0xff] %vm385_vm1, %v1821_v55  ;;  %1835 = vst.msk [vmem:[%s3013_s14 + $0x1b] sm:$0xff] %vm385_vm1, %v1822_v44 }
 0x1ba   : > { %1836 = vst.msk [vmem:[%s3013_s14 + $0x23] sm:$0xff] %vm385_vm1, %v1823_v34  ;;  %1837 = vst.msk [vmem:[%s3013_s14 + $0x2b] sm:$0xff] %vm385_vm1, %v1824_v56 }
 0x1bb   : > { %1838 = vst.msk [vmem:[%s3013_s14 + $0x33] sm:$0xff] %vm385_vm1, %v1825_v57  ;;  %1839 = vst.msk [vmem:[%s3013_s14 + $0x3b] sm:$0xff] %vm385_vm1, %v1826_v45 }
 0x1bc   : > { %1840 = vst.msk [vmem:[%s3013_s14 + $0x43] sm:$0xff] %vm385_vm1, %v1827_v60  ;;  %1841 = vst.msk [vmem:[%s3013_s14 + $0x4b] sm:$0xff] %vm385_vm1, %v1828_v47 }
 0x1bd   : > { %1843 = vst.msk [vmem:[%s3013_s14 + $0x53] sm:$0x3f] %vm1842_vm5, %v1829_v1 }
 0x1be PF: > { %s17_s24 = sadd.s32 1, %s2520_s24  }
 0x1bf   : > { %p14_p4 = scmp.ge.s32.totalorder %s17_s24, 4  }
 0x1c1   :  { %16 = sbr.rel (!%p14_p4) target bundleno = 1 (0x1), region = 92 }

</bundles_post_ra>
